<compile_context>
chip_gen: v5e
topology: v5e:2x2
jax: 0.10.0
libtpu: 0.0.40
codegen_flags: <defaults>
</compile_context>

<pallas_src>
import jax
import jax.numpy as jnp
from jax.experimental import pallas as pl
from jax.experimental.pallas import tpu as pltpu

# ----------------------------- model config ---------------------------------
INPUT_SIZE = 4
HIDDEN_SIZE = 32
NUM_LAYERS = 3
OUTPUT_SIZE = 1
BATCH = 2
SEQ = 8
DIRECTIONS = 2
D_FULL = HIDDEN_SIZE * DIRECTIONS          # 64
FC1_OUT = D_FULL // 2                      # 32
FC2_OUT = D_FULL // 4                      # 16
BN_EPS = 1e-5

VMEM_SPEC = pl.BlockSpec(memory_space=pltpu.MemorySpace.VMEM)


# --------------------------- fused forward kernel -----------------------------
def make_fused_kernel(T, B, H, num_layers):
    """Builds the single fused kernel for the whole forward pass."""
    D = 2 * H

    def kernel(*refs):
        i = 0
        x_ref = refs[i]; i += 1                       # (T*B, INPUT_SIZE), time-major flat
        lstm_refs = []
        for _ in range(num_layers):
            dirs = []
            for _ in range(DIRECTIONS):
                dirs.append((refs[i], refs[i + 1], refs[i + 2]))   # (wih, whh, b)
                i += 3
            lstm_refs.append(dirs)
        (wa1_ref, ba1_ref, wa2_ref, ba2_ref,
         w1_ref, b1_ref, w2_ref, b2_ref, w3_ref, b3_ref) = refs[i:i + 10]
        i += 10
        out_ref, attn_ref = refs[i], refs[i + 1]       # (B, 1), (B, T)
        layer_bufs = list(refs[i + 2:])                # num_layers x VMEM (T*B, 2H)

        # ---------------- one LSTM direction, recurrence fully unrolled ----------------
        def run_direction(inp_flat, wih_ref, whh_ref, b_ref, reverse, dst_ref, lane_off):
            whh = whh_ref[...]                                              # loop-invariant
            # Hoisted input projection for ALL timesteps + bias (one MXU matmul).
            xproj = jnp.dot(inp_flat, wih_ref[...],
                            preferred_element_type=jnp.float32) + b_ref[...]   # (T*B, 4H)
            h = jnp.zeros((B, H), jnp.float32)
            c = jnp.zeros((B, H), jnp.float32)
            for s in range(T):                                              # unrolled
                t = (T - 1 - s) if reverse else s
                gates = xproj[t * B:(t + 1) * B, :] + jnp.dot(
                    h, whh, preferred_element_type=jnp.float32)             # (B, 4H)
                # Whole-vreg activation passes, then static lane slices (PyTorch order i,f,g,o).
                sig = jax.nn.sigmoid(gates)
                tnh = jnp.tanh(gates)
                i_g = sig[:, 0 * H:1 * H]
                f_g = sig[:, 1 * H:2 * H]
                g_g = tnh[:, 2 * H:3 * H]
                o_g = sig[:, 3 * H:4 * H]
                c = f_g * c + i_g * g_g
                h = o_g * jnp.tanh(c)
                # fwd -> lanes [0:H), bwd -> lanes [H:2H) of the shared layer buffer.
                dst_ref[t * B:(t + 1) * B, lane_off:lane_off + H] = h

        # ---------------- stacked bidirectional layers ----------------
        layer_in = x_ref[...]                                               # (T*B, I0)
        for l in range(num_layers):
            dst = layer_bufs[l]
            (wih_f, whh_f, b_f), (wih_b, whh_b, b_b) = lstm_refs[l]
            run_direction(layer_in, wih_f, whh_f, b_f, False, dst, 0)
            run_direction(layer_in, wih_b, whh_b, b_b, True, dst, H)
            layer_in = dst[...]                                             # (T*B, 2H)

        lstm_flat = layer_in                                                # (T*B, D)

        # ---------------- attention: Linear(D,D) -> tanh -> Linear(D,1) -> softmax over T ----
        a1 = jnp.tanh(jnp.dot(lstm_flat, wa1_ref[...],
                              preferred_element_type=jnp.float32) + ba1_ref[...])   # (T*B, D)
        s_flat = jnp.sum(a1 * wa2_ref[...], axis=1, keepdims=True) + ba2_ref[...]   # (T*B, 1)
        # Gather per-time scores into (B, T) layout via the attention output ref.
        for t in range(T):
            attn_ref[:, t:t + 1] = s_flat[t * B:(t + 1) * B, :]
        scores = attn_ref[...]                                              # (B, T)
        scores = scores - jnp.max(scores, axis=1, keepdims=True)
        e = jnp.exp(scores)
        w = e / jnp.sum(e, axis=1, keepdims=True)                           # (B, T)
        attn_ref[...] = w

        # context vector: sum over time of weights * lstm_output
        ctx = jnp.zeros((B, D), jnp.float32)
        for t in range(T):
            ctx = ctx + w[:, t:t + 1] * lstm_flat[t * B:(t + 1) * B, :]     # (B, D)

        # fc1 (+BN1 folded) + relu, fc2 (+BN2 folded) + relu, fc3
        h1 = jnp.maximum(jnp.dot(ctx, w1_ref[...],
                                 preferred_element_type=jnp.float32) + b1_ref[...], 0.0)
        h2 = jnp.maximum(jnp.dot(h1, w2_ref[...],
                                 preferred_element_type=jnp.float32) + b2_ref[...], 0.0)
        out_ref[...] = jnp.dot(h2, w3_ref[...],
                               preferred_element_type=jnp.float32) + b3_ref[...]

    return kernel


def forward(x, params):
    """x: (B, T, input_size) batch-first, like the PyTorch module. Returns (out, attn)."""
    B, T, I = x.shape
    # time-major flat layout: row t*B + b == x[b, t, :]
    x_flat = jnp.transpose(x, (1, 0, 2)).reshape(T * B, I).astype(jnp.float32)
    flat_params = params['lstm'] + params['head']
    kernel = make_fused_kernel(T, B, HIDDEN_SIZE, NUM_LAYERS)
    out, attn_bt = pl.pallas_call(
        kernel,
        out_shape=(jax.ShapeDtypeStruct((B, OUTPUT_SIZE), jnp.float32),
                   jax.ShapeDtypeStruct((B, T), jnp.float32)),
        in_specs=[VMEM_SPEC] * (1 + len(flat_params)),
        out_specs=(VMEM_SPEC, VMEM_SPEC),
        scratch_shapes=[pltpu.VMEM((T * B, D_FULL), jnp.float32)
                        for _ in range(NUM_LAYERS)],
    )(x_flat, *flat_params)
    return out, attn_bt[..., None]           # attention weights as (B, T, 1), like PyTorch


# ------------------------------ parameters -----------------------------------
def init_params(key):
    keys = iter(jax.random.split(key, 64))

    def rnd(shape, scale=0.1):
        return scale * jax.random.normal(next(keys), shape, dtype=jnp.float32)

    # LSTM: num_layers x {fwd, bwd}; layer 0 input = INPUT_SIZE, later layers = 2H.
    # Weights pre-transposed to (in_features, 4H); biases combined (b_ih + b_hh).
    lstm = []
    in_sz = INPUT_SIZE
    for _ in range(NUM_LAYERS):
        for _ in range(DIRECTIONS):
            wih = rnd((4 * HIDDEN_SIZE, in_sz))
            whh = rnd((4 * HIDDEN_SIZE, HIDDEN_SIZE))
            bih = rnd((4 * HIDDEN_SIZE,))
            bhh = rnd((4 * HIDDEN_SIZE,))
            lstm += [wih.T, whh.T, (bih + bhh).reshape(1, -1)]
        in_sz = DIRECTIONS * HIDDEN_SIZE

    D = D_FULL
    # attention
    wa1 = rnd((D, D)).T                    # (D, D) pre-transposed
    ba1 = rnd((D,)).reshape(1, D)
    wa2 = rnd((1, D)).reshape(1, D)        # row vector, used via elementwise + lane reduce
    ba2 = rnd((1,)).reshape(1, 1)

    # fc1 + batch_norm1 folded (eval mode, running stats)
    w1 = rnd((FC1_OUT, D)); b1 = rnd((FC1_OUT,))
    g1 = 1.0 + rnd((FC1_OUT,)); be1 = rnd((FC1_OUT,)); m1 = rnd((FC1_OUT,))
    v1 = 0.5 + jax.random.uniform(next(keys), (FC1_OUT,), dtype=jnp.float32)
    s1 = g1 / jnp.sqrt(v1 + BN_EPS)
    w1f = (w1 * s1[:, None]).T                              # (D, FC1_OUT)
    b1f = ((b1 - m1) * s1 + be1).reshape(1, -1)

    # fc2 + batch_norm2 folded
    w2 = rnd((FC2_OUT, FC1_OUT)); b2 = rnd((FC2_OUT,))
    g2 = 1.0 + rnd((FC2_OUT,)); be2 = rnd((FC2_OUT,)); m2 = rnd((FC2_OUT,))
    v2 = 0.5 + jax.random.uniform(next(keys), (FC2_OUT,), dtype=jnp.float32)
    s2 = g2 / jnp.sqrt(v2 + BN_EPS)
    w2f = (w2 * s2[:, None]).T                              # (FC1_OUT, FC2_OUT)
    b2f = ((b2 - m2) * s2 + be2).reshape(1, -1)

    # fc3
    w3 = rnd((OUTPUT_SIZE, FC2_OUT)).T
    b3 = rnd((OUTPUT_SIZE,)).reshape(1, -1)

    head = (wa1, ba1, wa2, ba2, w1f, b1f, w2f, b2f, w3, b3)
    return {'lstm': tuple(lstm), 'head': head}


# --------------------------------- main ---------------------------------------
if __name__ == "__main__":
    key = jax.random.PRNGKey(0)
    k_param, k_x = jax.random.split(key)
    params = init_params(k_param)
    x = jax.random.normal(k_x, (BATCH, SEQ, INPUT_SIZE), dtype=jnp.float32)

    out, attn = jax.jit(forward)(x, params)
    jax.block_until_ready((out, attn))

    assert out.shape == (BATCH, OUTPUT_SIZE)
    assert attn.shape == (BATCH, SEQ, 1)
    print("KERNEL_OK")
</pallas_src>

<mosaic_0001>
module attributes {stable_mosaic.version = 11 : i64} {
  func.func @kernel(%arg0: memref<16x4xf32, #tpu.memory_space<vmem>>, %arg1: memref<4x128xf32, #tpu.memory_space<vmem>>, %arg2: memref<32x128xf32, #tpu.memory_space<vmem>>, %arg3: memref<1x128xf32, #tpu.memory_space<vmem>>, %arg4: memref<4x128xf32, #tpu.memory_space<vmem>>, %arg5: memref<32x128xf32, #tpu.memory_space<vmem>>, %arg6: memref<1x128xf32, #tpu.memory_space<vmem>>, %arg7: memref<64x128xf32, #tpu.memory_space<vmem>>, %arg8: memref<32x128xf32, #tpu.memory_space<vmem>>, %arg9: memref<1x128xf32, #tpu.memory_space<vmem>>, %arg10: memref<64x128xf32, #tpu.memory_space<vmem>>, %arg11: memref<32x128xf32, #tpu.memory_space<vmem>>, %arg12: memref<1x128xf32, #tpu.memory_space<vmem>>, %arg13: memref<64x128xf32, #tpu.memory_space<vmem>>, %arg14: memref<32x128xf32, #tpu.memory_space<vmem>>, %arg15: memref<1x128xf32, #tpu.memory_space<vmem>>, %arg16: memref<64x128xf32, #tpu.memory_space<vmem>>, %arg17: memref<32x128xf32, #tpu.memory_space<vmem>>, %arg18: memref<1x128xf32, #tpu.memory_space<vmem>>, %arg19: memref<64x64xf32, #tpu.memory_space<vmem>>, %arg20: memref<1x64xf32, #tpu.memory_space<vmem>>, %arg21: memref<1x64xf32, #tpu.memory_space<vmem>>, %arg22: memref<1x1xf32, #tpu.memory_space<vmem>>, %arg23: memref<64x32xf32, #tpu.memory_space<vmem>>, %arg24: memref<1x32xf32, #tpu.memory_space<vmem>>, %arg25: memref<32x16xf32, #tpu.memory_space<vmem>>, %arg26: memref<1x16xf32, #tpu.memory_space<vmem>>, %arg27: memref<16x1xf32, #tpu.memory_space<vmem>>, %arg28: memref<1x1xf32, #tpu.memory_space<vmem>>, %arg29: memref<2x1xf32, #tpu.memory_space<vmem>>, %arg30: memref<2x8xf32, #tpu.memory_space<vmem>>, %arg31: memref<16x64xf32, #tpu.memory_space<vmem>>, %arg32: memref<16x64xf32, #tpu.memory_space<vmem>>, %arg33: memref<16x64xf32, #tpu.memory_space<vmem>>) attributes {dimension_semantics = [], scalar_prefetch = 0 : i64, scratch_operands = 3 : i64, tpu.core_type = #tpu.core_type<tc>} {
    %c0 = arith.constant 0 : index
    %c0_0 = arith.constant 0 : index
    %0 = vector.load %arg0[%c0, %c0_0] : memref<16x4xf32, #tpu.memory_space<vmem>>, vector<16x4xf32>
    %c0_1 = arith.constant 0 : index
    %c0_2 = arith.constant 0 : index
    %1 = vector.load %arg2[%c0_1, %c0_2] : memref<32x128xf32, #tpu.memory_space<vmem>>, vector<32x128xf32>
    %c0_3 = arith.constant 0 : index
    %c0_4 = arith.constant 0 : index
    %2 = vector.load %arg1[%c0_3, %c0_4] : memref<4x128xf32, #tpu.memory_space<vmem>>, vector<4x128xf32>
    %cst = arith.constant dense<0.000000e+00> : vector<16x128xf32>
    %3 = tpu.matmul %0, %2, %cst {dimension_numbers = #tpu.dot_dimension_numbers<[1], [0], [0], [1], [0, 0, 1, 1], [], []>} : vector<16x4xf32>, vector<4x128xf32>, vector<16x128xf32> -> vector<16x128xf32>
    %c0_5 = arith.constant 0 : index
    %c0_6 = arith.constant 0 : index
    %4 = vector.load %arg3[%c0_5, %c0_6] : memref<1x128xf32, #tpu.memory_space<vmem>>, vector<1x128xf32>
    %5 = vector.broadcast %4 : vector<1x128xf32> to vector<16x128xf32>
    %6 = arith.addf %3, %5 : vector<16x128xf32>
    %cst_7 = arith.constant 0.000000e+00 : f32
    %7 = vector.broadcast %cst_7 : f32 to vector<2x32xf32>
    %cst_8 = arith.constant 0.000000e+00 : f32
    %8 = vector.broadcast %cst_8 : f32 to vector<2x32xf32>
    %9 = vector.extract_strided_slice %6 {offsets = [0, 0], sizes = [2, 128], strides = [1, 1]} : vector<16x128xf32> to vector<2x128xf32>
    %cst_9 = arith.constant dense<0.000000e+00> : vector<2x128xf32>
    %10 = tpu.matmul %7, %1, %cst_9 {dimension_numbers = #tpu.dot_dimension_numbers<[1], [0], [0], [1], [0, 0, 1, 1], [], []>} : vector<2x32xf32>, vector<32x128xf32>, vector<2x128xf32> -> vector<2x128xf32>
    %11 = arith.addf %9, %10 : vector<2x128xf32>
    %12 = arith.negf %11 : vector<2x128xf32>
    %13 = math.exp %12 : vector<2x128xf32>
    %cst_10 = arith.constant 1.000000e+00 : f32
    %14 = vector.broadcast %cst_10 : f32 to vector<2x128xf32>
    %15 = arith.addf %14, %13 : vector<2x128xf32>
    %16 = arith.divf %14, %15 : vector<2x128xf32>
    %17 = math.tanh %11 : vector<2x128xf32>
    %18 = vector.extract_strided_slice %16 {offsets = [0, 0], sizes = [2, 32], strides = [1, 1]} : vector<2x128xf32> to vector<2x32xf32>
    %19 = vector.extract_strided_slice %16 {offsets = [0, 32], sizes = [2, 32], strides = [1, 1]} : vector<2x128xf32> to vector<2x32xf32>
    %20 = vector.extract_strided_slice %17 {offsets = [0, 64], sizes = [2, 32], strides = [1, 1]} : vector<2x128xf32> to vector<2x32xf32>
    %21 = vector.extract_strided_slice %16 {offsets = [0, 96], sizes = [2, 32], strides = [1, 1]} : vector<2x128xf32> to vector<2x32xf32>
    %22 = arith.mulf %19, %8 : vector<2x32xf32>
    %23 = arith.mulf %18, %20 : vector<2x32xf32>
    %24 = arith.addf %22, %23 : vector<2x32xf32>
    %25 = math.tanh %24 : vector<2x32xf32>
    %26 = arith.mulf %21, %25 : vector<2x32xf32>
    %c0_11 = arith.constant 0 : index
    %c0_12 = arith.constant 0 : index
    %27 = vector.load %arg31[%c0_11, %c0_12] : memref<16x64xf32, #tpu.memory_space<vmem>>, vector<2x32xf32>
    tpu.vector_store %arg31[%c0_11, %c0_12], %26 {strides = array<i32>} : memref<16x64xf32, #tpu.memory_space<vmem>>, vector<2x32xf32>,
    %28 = vector.extract_strided_slice %6 {offsets = [2, 0], sizes = [2, 128], strides = [1, 1]} : vector<16x128xf32> to vector<2x128xf32>
    %cst_13 = arith.constant dense<0.000000e+00> : vector<2x128xf32>
    %29 = tpu.matmul %26, %1, %cst_13 {dimension_numbers = #tpu.dot_dimension_numbers<[1], [0], [0], [1], [0, 0, 1, 1], [], []>} : vector<2x32xf32>, vector<32x128xf32>, vector<2x128xf32> -> vector<2x128xf32>
    %30 = arith.addf %28, %29 : vector<2x128xf32>
    %31 = arith.negf %30 : vector<2x128xf32>
    %32 = math.exp %31 : vector<2x128xf32>
    %cst_14 = arith.constant 1.000000e+00 : f32
    %33 = vector.broadcast %cst_14 : f32 to vector<2x128xf32>
    %34 = arith.addf %33, %32 : vector<2x128xf32>
    %35 = arith.divf %33, %34 : vector<2x128xf32>
    %36 = math.tanh %30 : vector<2x128xf32>
    %37 = vector.extract_strided_slice %35 {offsets = [0, 0], sizes = [2, 32], strides = [1, 1]} : vector<2x128xf32> to vector<2x32xf32>
    %38 = vector.extract_strided_slice %35 {offsets = [0, 32], sizes = [2, 32], strides = [1, 1]} : vector<2x128xf32> to vector<2x32xf32>
    %39 = vector.extract_strided_slice %36 {offsets = [0, 64], sizes = [2, 32], strides = [1, 1]} : vector<2x128xf32> to vector<2x32xf32>
    %40 = vector.extract_strided_slice %35 {offsets = [0, 96], sizes = [2, 32], strides = [1, 1]} : vector<2x128xf32> to vector<2x32xf32>
    %41 = arith.mulf %38, %24 : vector<2x32xf32>
    %42 = arith.mulf %37, %39 : vector<2x32xf32>
    %43 = arith.addf %41, %42 : vector<2x32xf32>
    %44 = math.tanh %43 : vector<2x32xf32>
    %45 = arith.mulf %40, %44 : vector<2x32xf32>
    %c2 = arith.constant 2 : index
    %c0_15 = arith.constant 0 : index
    %46 = vector.load %arg31[%c2, %c0_15] : memref<16x64xf32, #tpu.memory_space<vmem>>, vector<2x32xf32>
    tpu.vector_store %arg31[%c2, %c0_15], %45 {strides = array<i32>} : memref<16x64xf32, #tpu.memory_space<vmem>>, vector<2x32xf32>,
    %47 = vector.extract_strided_slice %6 {offsets = [4, 0], sizes = [2, 128], strides = [1, 1]} : vector<16x128xf32> to vector<2x128xf32>
    %cst_16 = arith.constant dense<0.000000e+00> : vector<2x128xf32>
    %48 = tpu.matmul %45, %1, %cst_16 {dimension_numbers = #tpu.dot_dimension_numbers<[1], [0], [0], [1], [0, 0, 1, 1], [], []>} : vector<2x32xf32>, vector<32x128xf32>, vector<2x128xf32> -> vector<2x128xf32>
    %49 = arith.addf %47, %48 : vector<2x128xf32>
    %50 = arith.negf %49 : vector<2x128xf32>
    %51 = math.exp %50 : vector<2x128xf32>
    %cst_17 = arith.constant 1.000000e+00 : f32
    %52 = vector.broadcast %cst_17 : f32 to vector<2x128xf32>
    %53 = arith.addf %52, %51 : vector<2x128xf32>
    %54 = arith.divf %52, %53 : vector<2x128xf32>
    %55 = math.tanh %49 : vector<2x128xf32>
    %56 = vector.extract_strided_slice %54 {offsets = [0, 0], sizes = [2, 32], strides = [1, 1]} : vector<2x128xf32> to vector<2x32xf32>
    %57 = vector.extract_strided_slice %54 {offsets = [0, 32], sizes = [2, 32], strides = [1, 1]} : vector<2x128xf32> to vector<2x32xf32>
    %58 = vector.extract_strided_slice %55 {offsets = [0, 64], sizes = [2, 32], strides = [1, 1]} : vector<2x128xf32> to vector<2x32xf32>
    %59 = vector.extract_strided_slice %54 {offsets = [0, 96], sizes = [2, 32], strides = [1, 1]} : vector<2x128xf32> to vector<2x32xf32>
    %60 = arith.mulf %57, %43 : vector<2x32xf32>
    %61 = arith.mulf %56, %58 : vector<2x32xf32>
    %62 = arith.addf %60, %61 : vector<2x32xf32>
    %63 = math.tanh %62 : vector<2x32xf32>
    %64 = arith.mulf %59, %63 : vector<2x32xf32>
    %c4 = arith.constant 4 : index
    %c0_18 = arith.constant 0 : index
    %65 = vector.load %arg31[%c4, %c0_18] : memref<16x64xf32, #tpu.memory_space<vmem>>, vector<2x32xf32>
    tpu.vector_store %arg31[%c4, %c0_18], %64 {strides = array<i32>} : memref<16x64xf32, #tpu.memory_space<vmem>>, vector<2x32xf32>,
    %66 = vector.extract_strided_slice %6 {offsets = [6, 0], sizes = [2, 128], strides = [1, 1]} : vector<16x128xf32> to vector<2x128xf32>
    %cst_19 = arith.constant dense<0.000000e+00> : vector<2x128xf32>
    %67 = tpu.matmul %64, %1, %cst_19 {dimension_numbers = #tpu.dot_dimension_numbers<[1], [0], [0], [1], [0, 0, 1, 1], [], []>} : vector<2x32xf32>, vector<32x128xf32>, vector<2x128xf32> -> vector<2x128xf32>
    %68 = arith.addf %66, %67 : vector<2x128xf32>
    %69 = arith.negf %68 : vector<2x128xf32>
    %70 = math.exp %69 : vector<2x128xf32>
    %cst_20 = arith.constant 1.000000e+00 : f32
    %71 = vector.broadcast %cst_20 : f32 to vector<2x128xf32>
    %72 = arith.addf %71, %70 : vector<2x128xf32>
    %73 = arith.divf %71, %72 : vector<2x128xf32>
    %74 = math.tanh %68 : vector<2x128xf32>
    %75 = vector.extract_strided_slice %73 {offsets = [0, 0], sizes = [2, 32], strides = [1, 1]} : vector<2x128xf32> to vector<2x32xf32>
    %76 = vector.extract_strided_slice %73 {offsets = [0, 32], sizes = [2, 32], strides = [1, 1]} : vector<2x128xf32> to vector<2x32xf32>
    %77 = vector.extract_strided_slice %74 {offsets = [0, 64], sizes = [2, 32], strides = [1, 1]} : vector<2x128xf32> to vector<2x32xf32>
    %78 = vector.extract_strided_slice %73 {offsets = [0, 96], sizes = [2, 32], strides = [1, 1]} : vector<2x128xf32> to vector<2x32xf32>
    %79 = arith.mulf %76, %62 : vector<2x32xf32>
    %80 = arith.mulf %75, %77 : vector<2x32xf32>
    %81 = arith.addf %79, %80 : vector<2x32xf32>
    %82 = math.tanh %81 : vector<2x32xf32>
    %83 = arith.mulf %78, %82 : vector<2x32xf32>
    %c6 = arith.constant 6 : index
    %c0_21 = arith.constant 0 : index
    %84 = vector.load %arg31[%c6, %c0_21] : memref<16x64xf32, #tpu.memory_space<vmem>>, vector<2x32xf32>
    tpu.vector_store %arg31[%c6, %c0_21], %83 {strides = array<i32>} : memref<16x64xf32, #tpu.memory_space<vmem>>, vector<2x32xf32>,
    %85 = vector.extract_strided_slice %6 {offsets = [8, 0], sizes = [2, 128], strides = [1, 1]} : vector<16x128xf32> to vector<2x128xf32>
    %cst_22 = arith.constant dense<0.000000e+00> : vector<2x128xf32>
    %86 = tpu.matmul %83, %1, %cst_22 {dimension_numbers = #tpu.dot_dimension_numbers<[1], [0], [0], [1], [0, 0, 1, 1], [], []>} : vector<2x32xf32>, vector<32x128xf32>, vector<2x128xf32> -> vector<2x128xf32>
    %87 = arith.addf %85, %86 : vector<2x128xf32>
    %88 = arith.negf %87 : vector<2x128xf32>
    %89 = math.exp %88 : vector<2x128xf32>
    %cst_23 = arith.constant 1.000000e+00 : f32
    %90 = vector.broadcast %cst_23 : f32 to vector<2x128xf32>
    %91 = arith.addf %90, %89 : vector<2x128xf32>
    %92 = arith.divf %90, %91 : vector<2x128xf32>
    %93 = math.tanh %87 : vector<2x128xf32>
    %94 = vector.extract_strided_slice %92 {offsets = [0, 0], sizes = [2, 32], strides = [1, 1]} : vector<2x128xf32> to vector<2x32xf32>
    %95 = vector.extract_strided_slice %92 {offsets = [0, 32], sizes = [2, 32], strides = [1, 1]} : vector<2x128xf32> to vector<2x32xf32>
    %96 = vector.extract_strided_slice %93 {offsets = [0, 64], sizes = [2, 32], strides = [1, 1]} : vector<2x128xf32> to vector<2x32xf32>
    %97 = vector.extract_strided_slice %92 {offsets = [0, 96], sizes = [2, 32], strides = [1, 1]} : vector<2x128xf32> to vector<2x32xf32>
    %98 = arith.mulf %95, %81 : vector<2x32xf32>
    %99 = arith.mulf %94, %96 : vector<2x32xf32>
    %100 = arith.addf %98, %99 : vector<2x32xf32>
    %101 = math.tanh %100 : vector<2x32xf32>
    %102 = arith.mulf %97, %101 : vector<2x32xf32>
    %c8 = arith.constant 8 : index
    %c0_24 = arith.constant 0 : index
    %103 = vector.load %arg31[%c8, %c0_24] : memref<16x64xf32, #tpu.memory_space<vmem>>, vector<2x32xf32>
    tpu.vector_store %arg31[%c8, %c0_24], %102 {strides = array<i32>} : memref<16x64xf32, #tpu.memory_space<vmem>>, vector<2x32xf32>,
    %104 = vector.extract_strided_slice %6 {offsets = [10, 0], sizes = [2, 128], strides = [1, 1]} : vector<16x128xf32> to vector<2x128xf32>
    %cst_25 = arith.constant dense<0.000000e+00> : vector<2x128xf32>
    %105 = tpu.matmul %102, %1, %cst_25 {dimension_numbers = #tpu.dot_dimension_numbers<[1], [0], [0], [1], [0, 0, 1, 1], [], []>} : vector<2x32xf32>, vector<32x128xf32>, vector<2x128xf32> -> vector<2x128xf32>
    %106 = arith.addf %104, %105 : vector<2x128xf32>
    %107 = arith.negf %106 : vector<2x128xf32>
    %108 = math.exp %107 : vector<2x128xf32>
    %cst_26 = arith.constant 1.000000e+00 : f32
    %109 = vector.broadcast %cst_26 : f32 to vector<2x128xf32>
    %110 = arith.addf %109, %108 : vector<2x128xf32>
    %111 = arith.divf %109, %110 : vector<2x128xf32>
    %112 = math.tanh %106 : vector<2x128xf32>
    %113 = vector.extract_strided_slice %111 {offsets = [0, 0], sizes = [2, 32], strides = [1, 1]} : vector<2x128xf32> to vector<2x32xf32>
    %114 = vector.extract_strided_slice %111 {offsets = [0, 32], sizes = [2, 32], strides = [1, 1]} : vector<2x128xf32> to vector<2x32xf32>
    %115 = vector.extract_strided_slice %112 {offsets = [0, 64], sizes = [2, 32], strides = [1, 1]} : vector<2x128xf32> to vector<2x32xf32>
    %116 = vector.extract_strided_slice %111 {offsets = [0, 96], sizes = [2, 32], strides = [1, 1]} : vector<2x128xf32> to vector<2x32xf32>
    %117 = arith.mulf %114, %100 : vector<2x32xf32>
    %118 = arith.mulf %113, %115 : vector<2x32xf32>
    %119 = arith.addf %117, %118 : vector<2x32xf32>
    %120 = math.tanh %119 : vector<2x32xf32>
    %121 = arith.mulf %116, %120 : vector<2x32xf32>
    %c10 = arith.constant 10 : index
    %c0_27 = arith.constant 0 : index
    %122 = vector.load %arg31[%c10, %c0_27] : memref<16x64xf32, #tpu.memory_space<vmem>>, vector<2x32xf32>
    tpu.vector_store %arg31[%c10, %c0_27], %121 {strides = array<i32>} : memref<16x64xf32, #tpu.memory_space<vmem>>, vector<2x32xf32>,
    %123 = vector.extract_strided_slice %6 {offsets = [12, 0], sizes = [2, 128], strides = [1, 1]} : vector<16x128xf32> to vector<2x128xf32>
    %cst_28 = arith.constant dense<0.000000e+00> : vector<2x128xf32>
    %124 = tpu.matmul %121, %1, %cst_28 {dimension_numbers = #tpu.dot_dimension_numbers<[1], [0], [0], [1], [0, 0, 1, 1], [], []>} : vector<2x32xf32>, vector<32x128xf32>, vector<2x128xf32> -> vector<2x128xf32>
    %125 = arith.addf %123, %124 : vector<2x128xf32>
    %126 = arith.negf %125 : vector<2x128xf32>
    %127 = math.exp %126 : vector<2x128xf32>
    %cst_29 = arith.constant 1.000000e+00 : f32
    %128 = vector.broadcast %cst_29 : f32 to vector<2x128xf32>
    %129 = arith.addf %128, %127 : vector<2x128xf32>
    %130 = arith.divf %128, %129 : vector<2x128xf32>
    %131 = math.tanh %125 : vector<2x128xf32>
    %132 = vector.extract_strided_slice %130 {offsets = [0, 0], sizes = [2, 32], strides = [1, 1]} : vector<2x128xf32> to vector<2x32xf32>
    %133 = vector.extract_strided_slice %130 {offsets = [0, 32], sizes = [2, 32], strides = [1, 1]} : vector<2x128xf32> to vector<2x32xf32>
    %134 = vector.extract_strided_slice %131 {offsets = [0, 64], sizes = [2, 32], strides = [1, 1]} : vector<2x128xf32> to vector<2x32xf32>
    %135 = vector.extract_strided_slice %130 {offsets = [0, 96], sizes = [2, 32], strides = [1, 1]} : vector<2x128xf32> to vector<2x32xf32>
    %136 = arith.mulf %133, %119 : vector<2x32xf32>
    %137 = arith.mulf %132, %134 : vector<2x32xf32>
    %138 = arith.addf %136, %137 : vector<2x32xf32>
    %139 = math.tanh %138 : vector<2x32xf32>
    %140 = arith.mulf %135, %139 : vector<2x32xf32>
    %c12 = arith.constant 12 : index
    %c0_30 = arith.constant 0 : index
    %141 = vector.load %arg31[%c12, %c0_30] : memref<16x64xf32, #tpu.memory_space<vmem>>, vector<2x32xf32>
    tpu.vector_store %arg31[%c12, %c0_30], %140 {strides = array<i32>} : memref<16x64xf32, #tpu.memory_space<vmem>>, vector<2x32xf32>,
    %142 = vector.extract_strided_slice %6 {offsets = [14, 0], sizes = [2, 128], strides = [1, 1]} : vector<16x128xf32> to vector<2x128xf32>
    %cst_31 = arith.constant dense<0.000000e+00> : vector<2x128xf32>
    %143 = tpu.matmul %140, %1, %cst_31 {dimension_numbers = #tpu.dot_dimension_numbers<[1], [0], [0], [1], [0, 0, 1, 1], [], []>} : vector<2x32xf32>, vector<32x128xf32>, vector<2x128xf32> -> vector<2x128xf32>
    %144 = arith.addf %142, %143 : vector<2x128xf32>
    %145 = arith.negf %144 : vector<2x128xf32>
    %146 = math.exp %145 : vector<2x128xf32>
    %cst_32 = arith.constant 1.000000e+00 : f32
    %147 = vector.broadcast %cst_32 : f32 to vector<2x128xf32>
    %148 = arith.addf %147, %146 : vector<2x128xf32>
    %149 = arith.divf %147, %148 : vector<2x128xf32>
    %150 = math.tanh %144 : vector<2x128xf32>
    %151 = vector.extract_strided_slice %149 {offsets = [0, 0], sizes = [2, 32], strides = [1, 1]} : vector<2x128xf32> to vector<2x32xf32>
    %152 = vector.extract_strided_slice %149 {offsets = [0, 32], sizes = [2, 32], strides = [1, 1]} : vector<2x128xf32> to vector<2x32xf32>
    %153 = vector.extract_strided_slice %150 {offsets = [0, 64], sizes = [2, 32], strides = [1, 1]} : vector<2x128xf32> to vector<2x32xf32>
    %154 = vector.extract_strided_slice %149 {offsets = [0, 96], sizes = [2, 32], strides = [1, 1]} : vector<2x128xf32> to vector<2x32xf32>
    %155 = arith.mulf %152, %138 : vector<2x32xf32>
    %156 = arith.mulf %151, %153 : vector<2x32xf32>
    %157 = arith.addf %155, %156 : vector<2x32xf32>
    %158 = math.tanh %157 : vector<2x32xf32>
    %159 = arith.mulf %154, %158 : vector<2x32xf32>
    %c14 = arith.constant 14 : index
    %c0_33 = arith.constant 0 : index
    %160 = vector.load %arg31[%c14, %c0_33] : memref<16x64xf32, #tpu.memory_space<vmem>>, vector<2x32xf32>
    tpu.vector_store %arg31[%c14, %c0_33], %159 {strides = array<i32>} : memref<16x64xf32, #tpu.memory_space<vmem>>, vector<2x32xf32>,
    %c0_34 = arith.constant 0 : index
    %c0_35 = arith.constant 0 : index
    %161 = vector.load %arg5[%c0_34, %c0_35] : memref<32x128xf32, #tpu.memory_space<vmem>>, vector<32x128xf32>
    %c0_36 = arith.constant 0 : index
    %c0_37 = arith.constant 0 : index
    %162 = vector.load %arg4[%c0_36, %c0_37] : memref<4x128xf32, #tpu.memory_space<vmem>>, vector<4x128xf32>
    %cst_38 = arith.constant dense<0.000000e+00> : vector<16x128xf32>
    %163 = tpu.matmul %0, %162, %cst_38 {dimension_numbers = #tpu.dot_dimension_numbers<[1], [0], [0], [1], [0, 0, 1, 1], [], []>} : vector<16x4xf32>, vector<4x128xf32>, vector<16x128xf32> -> vector<16x128xf32>
    %c0_39 = arith.constant 0 : index
    %c0_40 = arith.constant 0 : index
    %164 = vector.load %arg6[%c0_39, %c0_40] : memref<1x128xf32, #tpu.memory_space<vmem>>, vector<1x128xf32>
    %165 = vector.broadcast %164 : vector<1x128xf32> to vector<16x128xf32>
    %166 = arith.addf %163, %165 : vector<16x128xf32>
    %cst_41 = arith.constant 0.000000e+00 : f32
    %167 = vector.broadcast %cst_41 : f32 to vector<2x32xf32>
    %cst_42 = arith.constant 0.000000e+00 : f32
    %168 = vector.broadcast %cst_42 : f32 to vector<2x32xf32>
    %169 = vector.extract_strided_slice %166 {offsets = [14, 0], sizes = [2, 128], strides = [1, 1]} : vector<16x128xf32> to vector<2x128xf32>
    %cst_43 = arith.constant dense<0.000000e+00> : vector<2x128xf32>
    %170 = tpu.matmul %167, %161, %cst_43 {dimension_numbers = #tpu.dot_dimension_numbers<[1], [0], [0], [1], [0, 0, 1, 1], [], []>} : vector<2x32xf32>, vector<32x128xf32>, vector<2x128xf32> -> vector<2x128xf32>
    %171 = arith.addf %169, %170 : vector<2x128xf32>
    %172 = arith.negf %171 : vector<2x128xf32>
    %173 = math.exp %172 : vector<2x128xf32>
    %cst_44 = arith.constant 1.000000e+00 : f32
    %174 = vector.broadcast %cst_44 : f32 to vector<2x128xf32>
    %175 = arith.addf %174, %173 : vector<2x128xf32>
    %176 = arith.divf %174, %175 : vector<2x128xf32>
    %177 = math.tanh %171 : vector<2x128xf32>
    %178 = vector.extract_strided_slice %176 {offsets = [0, 0], sizes = [2, 32], strides = [1, 1]} : vector<2x128xf32> to vector<2x32xf32>
    %179 = vector.extract_strided_slice %176 {offsets = [0, 32], sizes = [2, 32], strides = [1, 1]} : vector<2x128xf32> to vector<2x32xf32>
    %180 = vector.extract_strided_slice %177 {offsets = [0, 64], sizes = [2, 32], strides = [1, 1]} : vector<2x128xf32> to vector<2x32xf32>
    %181 = vector.extract_strided_slice %176 {offsets = [0, 96], sizes = [2, 32], strides = [1, 1]} : vector<2x128xf32> to vector<2x32xf32>
    %182 = arith.mulf %179, %168 : vector<2x32xf32>
    %183 = arith.mulf %178, %180 : vector<2x32xf32>
    %184 = arith.addf %182, %183 : vector<2x32xf32>
    %185 = math.tanh %184 : vector<2x32xf32>
    %186 = arith.mulf %181, %185 : vector<2x32xf32>
    %c14_45 = arith.constant 14 : index
    %c32 = arith.constant 32 : index
    %187 = vector.load %arg31[%c14_45, %c32] : memref<16x64xf32, #tpu.memory_space<vmem>>, vector<2x32xf32>
    tpu.vector_store %arg31[%c14_45, %c32], %186 {strides = array<i32>} : memref<16x64xf32, #tpu.memory_space<vmem>>, vector<2x32xf32>,
    %188 = vector.extract_strided_slice %166 {offsets = [12, 0], sizes = [2, 128], strides = [1, 1]} : vector<16x128xf32> to vector<2x128xf32>
    %cst_46 = arith.constant dense<0.000000e+00> : vector<2x128xf32>
    %189 = tpu.matmul %186, %161, %cst_46 {dimension_numbers = #tpu.dot_dimension_numbers<[1], [0], [0], [1], [0, 0, 1, 1], [], []>} : vector<2x32xf32>, vector<32x128xf32>, vector<2x128xf32> -> vector<2x128xf32>
    %190 = arith.addf %188, %189 : vector<2x128xf32>
    %191 = arith.negf %190 : vector<2x128xf32>
    %192 = math.exp %191 : vector<2x128xf32>
    %cst_47 = arith.constant 1.000000e+00 : f32
    %193 = vector.broadcast %cst_47 : f32 to vector<2x128xf32>
    %194 = arith.addf %193, %192 : vector<2x128xf32>
    %195 = arith.divf %193, %194 : vector<2x128xf32>
    %196 = math.tanh %190 : vector<2x128xf32>
    %197 = vector.extract_strided_slice %195 {offsets = [0, 0], sizes = [2, 32], strides = [1, 1]} : vector<2x128xf32> to vector<2x32xf32>
    %198 = vector.extract_strided_slice %195 {offsets = [0, 32], sizes = [2, 32], strides = [1, 1]} : vector<2x128xf32> to vector<2x32xf32>
    %199 = vector.extract_strided_slice %196 {offsets = [0, 64], sizes = [2, 32], strides = [1, 1]} : vector<2x128xf32> to vector<2x32xf32>
    %200 = vector.extract_strided_slice %195 {offsets = [0, 96], sizes = [2, 32], strides = [1, 1]} : vector<2x128xf32> to vector<2x32xf32>
    %201 = arith.mulf %198, %184 : vector<2x32xf32>
    %202 = arith.mulf %197, %199 : vector<2x32xf32>
    %203 = arith.addf %201, %202 : vector<2x32xf32>
    %204 = math.tanh %203 : vector<2x32xf32>
    %205 = arith.mulf %200, %204 : vector<2x32xf32>
    %c12_48 = arith.constant 12 : index
    %c32_49 = arith.constant 32 : index
    %206 = vector.load %arg31[%c12_48, %c32_49] : memref<16x64xf32, #tpu.memory_space<vmem>>, vector<2x32xf32>
    tpu.vector_store %arg31[%c12_48, %c32_49], %205 {strides = array<i32>} : memref<16x64xf32, #tpu.memory_space<vmem>>, vector<2x32xf32>,
    %207 = vector.extract_strided_slice %166 {offsets = [10, 0], sizes = [2, 128], strides = [1, 1]} : vector<16x128xf32> to vector<2x128xf32>
    %cst_50 = arith.constant dense<0.000000e+00> : vector<2x128xf32>
    %208 = tpu.matmul %205, %161, %cst_50 {dimension_numbers = #tpu.dot_dimension_numbers<[1], [0], [0], [1], [0, 0, 1, 1], [], []>} : vector<2x32xf32>, vector<32x128xf32>, vector<2x128xf32> -> vector<2x128xf32>
    %209 = arith.addf %207, %208 : vector<2x128xf32>
    %210 = arith.negf %209 : vector<2x128xf32>
    %211 = math.exp %210 : vector<2x128xf32>
    %cst_51 = arith.constant 1.000000e+00 : f32
    %212 = vector.broadcast %cst_51 : f32 to vector<2x128xf32>
    %213 = arith.addf %212, %211 : vector<2x128xf32>
    %214 = arith.divf %212, %213 : vector<2x128xf32>
    %215 = math.tanh %209 : vector<2x128xf32>
    %216 = vector.extract_strided_slice %214 {offsets = [0, 0], sizes = [2, 32], strides = [1, 1]} : vector<2x128xf32> to vector<2x32xf32>
    %217 = vector.extract_strided_slice %214 {offsets = [0, 32], sizes = [2, 32], strides = [1, 1]} : vector<2x128xf32> to vector<2x32xf32>
    %218 = vector.extract_strided_slice %215 {offsets = [0, 64], sizes = [2, 32], strides = [1, 1]} : vector<2x128xf32> to vector<2x32xf32>
    %219 = vector.extract_strided_slice %214 {offsets = [0, 96], sizes = [2, 32], strides = [1, 1]} : vector<2x128xf32> to vector<2x32xf32>
    %220 = arith.mulf %217, %203 : vector<2x32xf32>
    %221 = arith.mulf %216, %218 : vector<2x32xf32>
    %222 = arith.addf %220, %221 : vector<2x32xf32>
    %223 = math.tanh %222 : vector<2x32xf32>
    %224 = arith.mulf %219, %223 : vector<2x32xf32>
    %c10_52 = arith.constant 10 : index
    %c32_53 = arith.constant 32 : index
    %225 = vector.load %arg31[%c10_52, %c32_53] : memref<16x64xf32, #tpu.memory_space<vmem>>, vector<2x32xf32>
    tpu.vector_store %arg31[%c10_52, %c32_53], %224 {strides = array<i32>} : memref<16x64xf32, #tpu.memory_space<vmem>>, vector<2x32xf32>,
    %226 = vector.extract_strided_slice %166 {offsets = [8, 0], sizes = [2, 128], strides = [1, 1]} : vector<16x128xf32> to vector<2x128xf32>
    %cst_54 = arith.constant dense<0.000000e+00> : vector<2x128xf32>
    %227 = tpu.matmul %224, %161, %cst_54 {dimension_numbers = #tpu.dot_dimension_numbers<[1], [0], [0], [1], [0, 0, 1, 1], [], []>} : vector<2x32xf32>, vector<32x128xf32>, vector<2x128xf32> -> vector<2x128xf32>
    %228 = arith.addf %226, %227 : vector<2x128xf32>
    %229 = arith.negf %228 : vector<2x128xf32>
    %230 = math.exp %229 : vector<2x128xf32>
    %cst_55 = arith.constant 1.000000e+00 : f32
    %231 = vector.broadcast %cst_55 : f32 to vector<2x128xf32>
    %232 = arith.addf %231, %230 : vector<2x128xf32>
    %233 = arith.divf %231, %232 : vector<2x128xf32>
    %234 = math.tanh %228 : vector<2x128xf32>
    %235 = vector.extract_strided_slice %233 {offsets = [0, 0], sizes = [2, 32], strides = [1, 1]} : vector<2x128xf32> to vector<2x32xf32>
    %236 = vector.extract_strided_slice %233 {offsets = [0, 32], sizes = [2, 32], strides = [1, 1]} : vector<2x128xf32> to vector<2x32xf32>
    %237 = vector.extract_strided_slice %234 {offsets = [0, 64], sizes = [2, 32], strides = [1, 1]} : vector<2x128xf32> to vector<2x32xf32>
    %238 = vector.extract_strided_slice %233 {offsets = [0, 96], sizes = [2, 32], strides = [1, 1]} : vector<2x128xf32> to vector<2x32xf32>
    %239 = arith.mulf %236, %222 : vector<2x32xf32>
    %240 = arith.mulf %235, %237 : vector<2x32xf32>
    %241 = arith.addf %239, %240 : vector<2x32xf32>
    %242 = math.tanh %241 : vector<2x32xf32>
    %243 = arith.mulf %238, %242 : vector<2x32xf32>
    %c8_56 = arith.constant 8 : index
    %c32_57 = arith.constant 32 : index
    %244 = vector.load %arg31[%c8_56, %c32_57] : memref<16x64xf32, #tpu.memory_space<vmem>>, vector<2x32xf32>
    tpu.vector_store %arg31[%c8_56, %c32_57], %243 {strides = array<i32>} : memref<16x64xf32, #tpu.memory_space<vmem>>, vector<2x32xf32>,
    %245 = vector.extract_strided_slice %166 {offsets = [6, 0], sizes = [2, 128], strides = [1, 1]} : vector<16x128xf32> to vector<2x128xf32>
    %cst_58 = arith.constant dense<0.000000e+00> : vector<2x128xf32>
    %246 = tpu.matmul %243, %161, %cst_58 {dimension_numbers = #tpu.dot_dimension_numbers<[1], [0], [0], [1], [0, 0, 1, 1], [], []>} : vector<2x32xf32>, vector<32x128xf32>, vector<2x128xf32> -> vector<2x128xf32>
    %247 = arith.addf %245, %246 : vector<2x128xf32>
    %248 = arith.negf %247 : vector<2x128xf32>
    %249 = math.exp %248 : vector<2x128xf32>
    %cst_59 = arith.constant 1.000000e+00 : f32
    %250 = vector.broadcast %cst_59 : f32 to vector<2x128xf32>
    %251 = arith.addf %250, %249 : vector<2x128xf32>
    %252 = arith.divf %250, %251 : vector<2x128xf32>
    %253 = math.tanh %247 : vector<2x128xf32>
    %254 = vector.extract_strided_slice %252 {offsets = [0, 0], sizes = [2, 32], strides = [1, 1]} : vector<2x128xf32> to vector<2x32xf32>
    %255 = vector.extract_strided_slice %252 {offsets = [0, 32], sizes = [2, 32], strides = [1, 1]} : vector<2x128xf32> to vector<2x32xf32>
    %256 = vector.extract_strided_slice %253 {offsets = [0, 64], sizes = [2, 32], strides = [1, 1]} : vector<2x128xf32> to vector<2x32xf32>
    %257 = vector.extract_strided_slice %252 {offsets = [0, 96], sizes = [2, 32], strides = [1, 1]} : vector<2x128xf32> to vector<2x32xf32>
    %258 = arith.mulf %255, %241 : vector<2x32xf32>
    %259 = arith.mulf %254, %256 : vector<2x32xf32>
    %260 = arith.addf %258, %259 : vector<2x32xf32>
    %261 = math.tanh %260 : vector<2x32xf32>
    %262 = arith.mulf %257, %261 : vector<2x32xf32>
    %c6_60 = arith.constant 6 : index
    %c32_61 = arith.constant 32 : index
    %263 = vector.load %arg31[%c6_60, %c32_61] : memref<16x64xf32, #tpu.memory_space<vmem>>, vector<2x32xf32>
    tpu.vector_store %arg31[%c6_60, %c32_61], %262 {strides = array<i32>} : memref<16x64xf32, #tpu.memory_space<vmem>>, vector<2x32xf32>,
    %264 = vector.extract_strided_slice %166 {offsets = [4, 0], sizes = [2, 128], strides = [1, 1]} : vector<16x128xf32> to vector<2x128xf32>
    %cst_62 = arith.constant dense<0.000000e+00> : vector<2x128xf32>
    %265 = tpu.matmul %262, %161, %cst_62 {dimension_numbers = #tpu.dot_dimension_numbers<[1], [0], [0], [1], [0, 0, 1, 1], [], []>} : vector<2x32xf32>, vector<32x128xf32>, vector<2x128xf32> -> vector<2x128xf32>
    %266 = arith.addf %264, %265 : vector<2x128xf32>
    %267 = arith.negf %266 : vector<2x128xf32>
    %268 = math.exp %267 : vector<2x128xf32>
    %cst_63 = arith.constant 1.000000e+00 : f32
    %269 = vector.broadcast %cst_63 : f32 to vector<2x128xf32>
    %270 = arith.addf %269, %268 : vector<2x128xf32>
    %271 = arith.divf %269, %270 : vector<2x128xf32>
    %272 = math.tanh %266 : vector<2x128xf32>
    %273 = vector.extract_strided_slice %271 {offsets = [0, 0], sizes = [2, 32], strides = [1, 1]} : vector<2x128xf32> to vector<2x32xf32>
    %274 = vector.extract_strided_slice %271 {offsets = [0, 32], sizes = [2, 32], strides = [1, 1]} : vector<2x128xf32> to vector<2x32xf32>
    %275 = vector.extract_strided_slice %272 {offsets = [0, 64], sizes = [2, 32], strides = [1, 1]} : vector<2x128xf32> to vector<2x32xf32>
    %276 = vector.extract_strided_slice %271 {offsets = [0, 96], sizes = [2, 32], strides = [1, 1]} : vector<2x128xf32> to vector<2x32xf32>
    %277 = arith.mulf %274, %260 : vector<2x32xf32>
    %278 = arith.mulf %273, %275 : vector<2x32xf32>
    %279 = arith.addf %277, %278 : vector<2x32xf32>
    %280 = math.tanh %279 : vector<2x32xf32>
    %281 = arith.mulf %276, %280 : vector<2x32xf32>
    %c4_64 = arith.constant 4 : index
    %c32_65 = arith.constant 32 : index
    %282 = vector.load %arg31[%c4_64, %c32_65] : memref<16x64xf32, #tpu.memory_space<vmem>>, vector<2x32xf32>
    tpu.vector_store %arg31[%c4_64, %c32_65], %281 {strides = array<i32>} : memref<16x64xf32, #tpu.memory_space<vmem>>, vector<2x32xf32>,
    %283 = vector.extract_strided_slice %166 {offsets = [2, 0], sizes = [2, 128], strides = [1, 1]} : vector<16x128xf32> to vector<2x128xf32>
    %cst_66 = arith.constant dense<0.000000e+00> : vector<2x128xf32>
    %284 = tpu.matmul %281, %161, %cst_66 {dimension_numbers = #tpu.dot_dimension_numbers<[1], [0], [0], [1], [0, 0, 1, 1], [], []>} : vector<2x32xf32>, vector<32x128xf32>, vector<2x128xf32> -> vector<2x128xf32>
    %285 = arith.addf %283, %284 : vector<2x128xf32>
    %286 = arith.negf %285 : vector<2x128xf32>
    %287 = math.exp %286 : vector<2x128xf32>
    %cst_67 = arith.constant 1.000000e+00 : f32
    %288 = vector.broadcast %cst_67 : f32 to vector<2x128xf32>
    %289 = arith.addf %288, %287 : vector<2x128xf32>
    %290 = arith.divf %288, %289 : vector<2x128xf32>
    %291 = math.tanh %285 : vector<2x128xf32>
    %292 = vector.extract_strided_slice %290 {offsets = [0, 0], sizes = [2, 32], strides = [1, 1]} : vector<2x128xf32> to vector<2x32xf32>
    %293 = vector.extract_strided_slice %290 {offsets = [0, 32], sizes = [2, 32], strides = [1, 1]} : vector<2x128xf32> to vector<2x32xf32>
    %294 = vector.extract_strided_slice %291 {offsets = [0, 64], sizes = [2, 32], strides = [1, 1]} : vector<2x128xf32> to vector<2x32xf32>
    %295 = vector.extract_strided_slice %290 {offsets = [0, 96], sizes = [2, 32], strides = [1, 1]} : vector<2x128xf32> to vector<2x32xf32>
    %296 = arith.mulf %293, %279 : vector<2x32xf32>
    %297 = arith.mulf %292, %294 : vector<2x32xf32>
    %298 = arith.addf %296, %297 : vector<2x32xf32>
    %299 = math.tanh %298 : vector<2x32xf32>
    %300 = arith.mulf %295, %299 : vector<2x32xf32>
    %c2_68 = arith.constant 2 : index
    %c32_69 = arith.constant 32 : index
    %301 = vector.load %arg31[%c2_68, %c32_69] : memref<16x64xf32, #tpu.memory_space<vmem>>, vector<2x32xf32>
    tpu.vector_store %arg31[%c2_68, %c32_69], %300 {strides = array<i32>} : memref<16x64xf32, #tpu.memory_space<vmem>>, vector<2x32xf32>,
    %302 = vector.extract_strided_slice %166 {offsets = [0, 0], sizes = [2, 128], strides = [1, 1]} : vector<16x128xf32> to vector<2x128xf32>
    %cst_70 = arith.constant dense<0.000000e+00> : vector<2x128xf32>
    %303 = tpu.matmul %300, %161, %cst_70 {dimension_numbers = #tpu.dot_dimension_numbers<[1], [0], [0], [1], [0, 0, 1, 1], [], []>} : vector<2x32xf32>, vector<32x128xf32>, vector<2x128xf32> -> vector<2x128xf32>
    %304 = arith.addf %302, %303 : vector<2x128xf32>
    %305 = arith.negf %304 : vector<2x128xf32>
    %306 = math.exp %305 : vector<2x128xf32>
    %cst_71 = arith.constant 1.000000e+00 : f32
    %307 = vector.broadcast %cst_71 : f32 to vector<2x128xf32>
    %308 = arith.addf %307, %306 : vector<2x128xf32>
    %309 = arith.divf %307, %308 : vector<2x128xf32>
    %310 = math.tanh %304 : vector<2x128xf32>
    %311 = vector.extract_strided_slice %309 {offsets = [0, 0], sizes = [2, 32], strides = [1, 1]} : vector<2x128xf32> to vector<2x32xf32>
    %312 = vector.extract_strided_slice %309 {offsets = [0, 32], sizes = [2, 32], strides = [1, 1]} : vector<2x128xf32> to vector<2x32xf32>
    %313 = vector.extract_strided_slice %310 {offsets = [0, 64], sizes = [2, 32], strides = [1, 1]} : vector<2x128xf32> to vector<2x32xf32>
    %314 = vector.extract_strided_slice %309 {offsets = [0, 96], sizes = [2, 32], strides = [1, 1]} : vector<2x128xf32> to vector<2x32xf32>
    %315 = arith.mulf %312, %298 : vector<2x32xf32>
    %316 = arith.mulf %311, %313 : vector<2x32xf32>
    %317 = arith.addf %315, %316 : vector<2x32xf32>
    %318 = math.tanh %317 : vector<2x32xf32>
    %319 = arith.mulf %314, %318 : vector<2x32xf32>
    %c0_72 = arith.constant 0 : index
    %c32_73 = arith.constant 32 : index
    %320 = vector.load %arg31[%c0_72, %c32_73] : memref<16x64xf32, #tpu.memory_space<vmem>>, vector<2x32xf32>
    tpu.vector_store %arg31[%c0_72, %c32_73], %319 {strides = array<i32>} : memref<16x64xf32, #tpu.memory_space<vmem>>, vector<2x32xf32>,
    %c0_74 = arith.constant 0 : index
    %c0_75 = arith.constant 0 : index
    %321 = vector.load %arg31[%c0_74, %c0_75] : memref<16x64xf32, #tpu.memory_space<vmem>>, vector<16x64xf32>
    %c0_76 = arith.constant 0 : index
    %c0_77 = arith.constant 0 : index
    %322 = vector.load %arg8[%c0_76, %c0_77] : memref<32x128xf32, #tpu.memory_space<vmem>>, vector<32x128xf32>
    %c0_78 = arith.constant 0 : index
    %c0_79 = arith.constant 0 : index
    %323 = vector.load %arg7[%c0_78, %c0_79] : memref<64x128xf32, #tpu.memory_space<vmem>>, vector<64x128xf32>
    %cst_80 = arith.constant dense<0.000000e+00> : vector<16x128xf32>
    %324 = tpu.matmul %321, %323, %cst_80 {dimension_numbers = #tpu.dot_dimension_numbers<[1], [0], [0], [1], [0, 0, 1, 1], [], []>} : vector<16x64xf32>, vector<64x128xf32>, vector<16x128xf32> -> vector<16x128xf32>
    %c0_81 = arith.constant 0 : index
    %c0_82 = arith.constant 0 : index
    %325 = vector.load %arg9[%c0_81, %c0_82] : memref<1x128xf32, #tpu.memory_space<vmem>>, vector<1x128xf32>
    %326 = vector.broadcast %325 : vector<1x128xf32> to vector<16x128xf32>
    %327 = arith.addf %324, %326 : vector<16x128xf32>
    %cst_83 = arith.constant 0.000000e+00 : f32
    %328 = vector.broadcast %cst_83 : f32 to vector<2x32xf32>
    %cst_84 = arith.constant 0.000000e+00 : f32
    %329 = vector.broadcast %cst_84 : f32 to vector<2x32xf32>
    %330 = vector.extract_strided_slice %327 {offsets = [0, 0], sizes = [2, 128], strides = [1, 1]} : vector<16x128xf32> to vector<2x128xf32>
    %cst_85 = arith.constant dense<0.000000e+00> : vector<2x128xf32>
    %331 = tpu.matmul %328, %322, %cst_85 {dimension_numbers = #tpu.dot_dimension_numbers<[1], [0], [0], [1], [0, 0, 1, 1], [], []>} : vector<2x32xf32>, vector<32x128xf32>, vector<2x128xf32> -> vector<2x128xf32>
    %332 = arith.addf %330, %331 : vector<2x128xf32>
    %333 = arith.negf %332 : vector<2x128xf32>
    %334 = math.exp %333 : vector<2x128xf32>
    %cst_86 = arith.constant 1.000000e+00 : f32
    %335 = vector.broadcast %cst_86 : f32 to vector<2x128xf32>
    %336 = arith.addf %335, %334 : vector<2x128xf32>
    %337 = arith.divf %335, %336 : vector<2x128xf32>
    %338 = math.tanh %332 : vector<2x128xf32>
    %339 = vector.extract_strided_slice %337 {offsets = [0, 0], sizes = [2, 32], strides = [1, 1]} : vector<2x128xf32> to vector<2x32xf32>
    %340 = vector.extract_strided_slice %337 {offsets = [0, 32], sizes = [2, 32], strides = [1, 1]} : vector<2x128xf32> to vector<2x32xf32>
    %341 = vector.extract_strided_slice %338 {offsets = [0, 64], sizes = [2, 32], strides = [1, 1]} : vector<2x128xf32> to vector<2x32xf32>
    %342 = vector.extract_strided_slice %337 {offsets = [0, 96], sizes = [2, 32], strides = [1, 1]} : vector<2x128xf32> to vector<2x32xf32>
    %343 = arith.mulf %340, %329 : vector<2x32xf32>
    %344 = arith.mulf %339, %341 : vector<2x32xf32>
    %345 = arith.addf %343, %344 : vector<2x32xf32>
    %346 = math.tanh %345 : vector<2x32xf32>
    %347 = arith.mulf %342, %346 : vector<2x32xf32>
    %c0_87 = arith.constant 0 : index
    %c0_88 = arith.constant 0 : index
    %348 = vector.load %arg32[%c0_87, %c0_88] : memref<16x64xf32, #tpu.memory_space<vmem>>, vector<2x32xf32>
    tpu.vector_store %arg32[%c0_87, %c0_88], %347 {strides = array<i32>} : memref<16x64xf32, #tpu.memory_space<vmem>>, vector<2x32xf32>,
    %349 = vector.extract_strided_slice %327 {offsets = [2, 0], sizes = [2, 128], strides = [1, 1]} : vector<16x128xf32> to vector<2x128xf32>
    %cst_89 = arith.constant dense<0.000000e+00> : vector<2x128xf32>
    %350 = tpu.matmul %347, %322, %cst_89 {dimension_numbers = #tpu.dot_dimension_numbers<[1], [0], [0], [1], [0, 0, 1, 1], [], []>} : vector<2x32xf32>, vector<32x128xf32>, vector<2x128xf32> -> vector<2x128xf32>
    %351 = arith.addf %349, %350 : vector<2x128xf32>
    %352 = arith.negf %351 : vector<2x128xf32>
    %353 = math.exp %352 : vector<2x128xf32>
    %cst_90 = arith.constant 1.000000e+00 : f32
    %354 = vector.broadcast %cst_90 : f32 to vector<2x128xf32>
    %355 = arith.addf %354, %353 : vector<2x128xf32>
    %356 = arith.divf %354, %355 : vector<2x128xf32>
    %357 = math.tanh %351 : vector<2x128xf32>
    %358 = vector.extract_strided_slice %356 {offsets = [0, 0], sizes = [2, 32], strides = [1, 1]} : vector<2x128xf32> to vector<2x32xf32>
    %359 = vector.extract_strided_slice %356 {offsets = [0, 32], sizes = [2, 32], strides = [1, 1]} : vector<2x128xf32> to vector<2x32xf32>
    %360 = vector.extract_strided_slice %357 {offsets = [0, 64], sizes = [2, 32], strides = [1, 1]} : vector<2x128xf32> to vector<2x32xf32>
    %361 = vector.extract_strided_slice %356 {offsets = [0, 96], sizes = [2, 32], strides = [1, 1]} : vector<2x128xf32> to vector<2x32xf32>
    %362 = arith.mulf %359, %345 : vector<2x32xf32>
    %363 = arith.mulf %358, %360 : vector<2x32xf32>
    %364 = arith.addf %362, %363 : vector<2x32xf32>
    %365 = math.tanh %364 : vector<2x32xf32>
    %366 = arith.mulf %361, %365 : vector<2x32xf32>
    %c2_91 = arith.constant 2 : index
    %c0_92 = arith.constant 0 : index
    %367 = vector.load %arg32[%c2_91, %c0_92] : memref<16x64xf32, #tpu.memory_space<vmem>>, vector<2x32xf32>
    tpu.vector_store %arg32[%c2_91, %c0_92], %366 {strides = array<i32>} : memref<16x64xf32, #tpu.memory_space<vmem>>, vector<2x32xf32>,
    %368 = vector.extract_strided_slice %327 {offsets = [4, 0], sizes = [2, 128], strides = [1, 1]} : vector<16x128xf32> to vector<2x128xf32>
    %cst_93 = arith.constant dense<0.000000e+00> : vector<2x128xf32>
    %369 = tpu.matmul %366, %322, %cst_93 {dimension_numbers = #tpu.dot_dimension_numbers<[1], [0], [0], [1], [0, 0, 1, 1], [], []>} : vector<2x32xf32>, vector<32x128xf32>, vector<2x128xf32> -> vector<2x128xf32>
    %370 = arith.addf %368, %369 : vector<2x128xf32>
    %371 = arith.negf %370 : vector<2x128xf32>
    %372 = math.exp %371 : vector<2x128xf32>
    %cst_94 = arith.constant 1.000000e+00 : f32
    %373 = vector.broadcast %cst_94 : f32 to vector<2x128xf32>
    %374 = arith.addf %373, %372 : vector<2x128xf32>
    %375 = arith.divf %373, %374 : vector<2x128xf32>
    %376 = math.tanh %370 : vector<2x128xf32>
    %377 = vector.extract_strided_slice %375 {offsets = [0, 0], sizes = [2, 32], strides = [1, 1]} : vector<2x128xf32> to vector<2x32xf32>
    %378 = vector.extract_strided_slice %375 {offsets = [0, 32], sizes = [2, 32], strides = [1, 1]} : vector<2x128xf32> to vector<2x32xf32>
    %379 = vector.extract_strided_slice %376 {offsets = [0, 64], sizes = [2, 32], strides = [1, 1]} : vector<2x128xf32> to vector<2x32xf32>
    %380 = vector.extract_strided_slice %375 {offsets = [0, 96], sizes = [2, 32], strides = [1, 1]} : vector<2x128xf32> to vector<2x32xf32>
    %381 = arith.mulf %378, %364 : vector<2x32xf32>
    %382 = arith.mulf %377, %379 : vector<2x32xf32>
    %383 = arith.addf %381, %382 : vector<2x32xf32>
    %384 = math.tanh %383 : vector<2x32xf32>
    %385 = arith.mulf %380, %384 : vector<2x32xf32>
    %c4_95 = arith.constant 4 : index
    %c0_96 = arith.constant 0 : index
    %386 = vector.load %arg32[%c4_95, %c0_96] : memref<16x64xf32, #tpu.memory_space<vmem>>, vector<2x32xf32>
    tpu.vector_store %arg32[%c4_95, %c0_96], %385 {strides = array<i32>} : memref<16x64xf32, #tpu.memory_space<vmem>>, vector<2x32xf32>,
    %387 = vector.extract_strided_slice %327 {offsets = [6, 0], sizes = [2, 128], strides = [1, 1]} : vector<16x128xf32> to vector<2x128xf32>
    %cst_97 = arith.constant dense<0.000000e+00> : vector<2x128xf32>
    %388 = tpu.matmul %385, %322, %cst_97 {dimension_numbers = #tpu.dot_dimension_numbers<[1], [0], [0], [1], [0, 0, 1, 1], [], []>} : vector<2x32xf32>, vector<32x128xf32>, vector<2x128xf32> -> vector<2x128xf32>
    %389 = arith.addf %387, %388 : vector<2x128xf32>
    %390 = arith.negf %389 : vector<2x128xf32>
    %391 = math.exp %390 : vector<2x128xf32>
    %cst_98 = arith.constant 1.000000e+00 : f32
    %392 = vector.broadcast %cst_98 : f32 to vector<2x128xf32>
    %393 = arith.addf %392, %391 : vector<2x128xf32>
    %394 = arith.divf %392, %393 : vector<2x128xf32>
    %395 = math.tanh %389 : vector<2x128xf32>
    %396 = vector.extract_strided_slice %394 {offsets = [0, 0], sizes = [2, 32], strides = [1, 1]} : vector<2x128xf32> to vector<2x32xf32>
    %397 = vector.extract_strided_slice %394 {offsets = [0, 32], sizes = [2, 32], strides = [1, 1]} : vector<2x128xf32> to vector<2x32xf32>
    %398 = vector.extract_strided_slice %395 {offsets = [0, 64], sizes = [2, 32], strides = [1, 1]} : vector<2x128xf32> to vector<2x32xf32>
    %399 = vector.extract_strided_slice %394 {offsets = [0, 96], sizes = [2, 32], strides = [1, 1]} : vector<2x128xf32> to vector<2x32xf32>
    %400 = arith.mulf %397, %383 : vector<2x32xf32>
    %401 = arith.mulf %396, %398 : vector<2x32xf32>
    %402 = arith.addf %400, %401 : vector<2x32xf32>
    %403 = math.tanh %402 : vector<2x32xf32>
    %404 = arith.mulf %399, %403 : vector<2x32xf32>
    %c6_99 = arith.constant 6 : index
    %c0_100 = arith.constant 0 : index
    %405 = vector.load %arg32[%c6_99, %c0_100] : memref<16x64xf32, #tpu.memory_space<vmem>>, vector<2x32xf32>
    tpu.vector_store %arg32[%c6_99, %c0_100], %404 {strides = array<i32>} : memref<16x64xf32, #tpu.memory_space<vmem>>, vector<2x32xf32>,
    %406 = vector.extract_strided_slice %327 {offsets = [8, 0], sizes = [2, 128], strides = [1, 1]} : vector<16x128xf32> to vector<2x128xf32>
    %cst_101 = arith.constant dense<0.000000e+00> : vector<2x128xf32>
    %407 = tpu.matmul %404, %322, %cst_101 {dimension_numbers = #tpu.dot_dimension_numbers<[1], [0], [0], [1], [0, 0, 1, 1], [], []>} : vector<2x32xf32>, vector<32x128xf32>, vector<2x128xf32> -> vector<2x128xf32>
    %408 = arith.addf %406, %407 : vector<2x128xf32>
    %409 = arith.negf %408 : vector<2x128xf32>
    %410 = math.exp %409 : vector<2x128xf32>
    %cst_102 = arith.constant 1.000000e+00 : f32
    %411 = vector.broadcast %cst_102 : f32 to vector<2x128xf32>
    %412 = arith.addf %411, %410 : vector<2x128xf32>
    %413 = arith.divf %411, %412 : vector<2x128xf32>
    %414 = math.tanh %408 : vector<2x128xf32>
    %415 = vector.extract_strided_slice %413 {offsets = [0, 0], sizes = [2, 32], strides = [1, 1]} : vector<2x128xf32> to vector<2x32xf32>
    %416 = vector.extract_strided_slice %413 {offsets = [0, 32], sizes = [2, 32], strides = [1, 1]} : vector<2x128xf32> to vector<2x32xf32>
    %417 = vector.extract_strided_slice %414 {offsets = [0, 64], sizes = [2, 32], strides = [1, 1]} : vector<2x128xf32> to vector<2x32xf32>
    %418 = vector.extract_strided_slice %413 {offsets = [0, 96], sizes = [2, 32], strides = [1, 1]} : vector<2x128xf32> to vector<2x32xf32>
    %419 = arith.mulf %416, %402 : vector<2x32xf32>
    %420 = arith.mulf %415, %417 : vector<2x32xf32>
    %421 = arith.addf %419, %420 : vector<2x32xf32>
    %422 = math.tanh %421 : vector<2x32xf32>
    %423 = arith.mulf %418, %422 : vector<2x32xf32>
    %c8_103 = arith.constant 8 : index
    %c0_104 = arith.constant 0 : index
    %424 = vector.load %arg32[%c8_103, %c0_104] : memref<16x64xf32, #tpu.memory_space<vmem>>, vector<2x32xf32>
    tpu.vector_store %arg32[%c8_103, %c0_104], %423 {strides = array<i32>} : memref<16x64xf32, #tpu.memory_space<vmem>>, vector<2x32xf32>,
    %425 = vector.extract_strided_slice %327 {offsets = [10, 0], sizes = [2, 128], strides = [1, 1]} : vector<16x128xf32> to vector<2x128xf32>
    %cst_105 = arith.constant dense<0.000000e+00> : vector<2x128xf32>
    %426 = tpu.matmul %423, %322, %cst_105 {dimension_numbers = #tpu.dot_dimension_numbers<[1], [0], [0], [1], [0, 0, 1, 1], [], []>} : vector<2x32xf32>, vector<32x128xf32>, vector<2x128xf32> -> vector<2x128xf32>
    %427 = arith.addf %425, %426 : vector<2x128xf32>
    %428 = arith.negf %427 : vector<2x128xf32>
    %429 = math.exp %428 : vector<2x128xf32>
    %cst_106 = arith.constant 1.000000e+00 : f32
    %430 = vector.broadcast %cst_106 : f32 to vector<2x128xf32>
    %431 = arith.addf %430, %429 : vector<2x128xf32>
    %432 = arith.divf %430, %431 : vector<2x128xf32>
    %433 = math.tanh %427 : vector<2x128xf32>
    %434 = vector.extract_strided_slice %432 {offsets = [0, 0], sizes = [2, 32], strides = [1, 1]} : vector<2x128xf32> to vector<2x32xf32>
    %435 = vector.extract_strided_slice %432 {offsets = [0, 32], sizes = [2, 32], strides = [1, 1]} : vector<2x128xf32> to vector<2x32xf32>
    %436 = vector.extract_strided_slice %433 {offsets = [0, 64], sizes = [2, 32], strides = [1, 1]} : vector<2x128xf32> to vector<2x32xf32>
    %437 = vector.extract_strided_slice %432 {offsets = [0, 96], sizes = [2, 32], strides = [1, 1]} : vector<2x128xf32> to vector<2x32xf32>
    %438 = arith.mulf %435, %421 : vector<2x32xf32>
    %439 = arith.mulf %434, %436 : vector<2x32xf32>
    %440 = arith.addf %438, %439 : vector<2x32xf32>
    %441 = math.tanh %440 : vector<2x32xf32>
    %442 = arith.mulf %437, %441 : vector<2x32xf32>
    %c10_107 = arith.constant 10 : index
    %c0_108 = arith.constant 0 : index
    %443 = vector.load %arg32[%c10_107, %c0_108] : memref<16x64xf32, #tpu.memory_space<vmem>>, vector<2x32xf32>
    tpu.vector_store %arg32[%c10_107, %c0_108], %442 {strides = array<i32>} : memref<16x64xf32, #tpu.memory_space<vmem>>, vector<2x32xf32>,
    %444 = vector.extract_strided_slice %327 {offsets = [12, 0], sizes = [2, 128], strides = [1, 1]} : vector<16x128xf32> to vector<2x128xf32>
    %cst_109 = arith.constant dense<0.000000e+00> : vector<2x128xf32>
    %445 = tpu.matmul %442, %322, %cst_109 {dimension_numbers = #tpu.dot_dimension_numbers<[1], [0], [0], [1], [0, 0, 1, 1], [], []>} : vector<2x32xf32>, vector<32x128xf32>, vector<2x128xf32> -> vector<2x128xf32>
    %446 = arith.addf %444, %445 : vector<2x128xf32>
    %447 = arith.negf %446 : vector<2x128xf32>
    %448 = math.exp %447 : vector<2x128xf32>
    %cst_110 = arith.constant 1.000000e+00 : f32
    %449 = vector.broadcast %cst_110 : f32 to vector<2x128xf32>
    %450 = arith.addf %449, %448 : vector<2x128xf32>
    %451 = arith.divf %449, %450 : vector<2x128xf32>
    %452 = math.tanh %446 : vector<2x128xf32>
    %453 = vector.extract_strided_slice %451 {offsets = [0, 0], sizes = [2, 32], strides = [1, 1]} : vector<2x128xf32> to vector<2x32xf32>
    %454 = vector.extract_strided_slice %451 {offsets = [0, 32], sizes = [2, 32], strides = [1, 1]} : vector<2x128xf32> to vector<2x32xf32>
    %455 = vector.extract_strided_slice %452 {offsets = [0, 64], sizes = [2, 32], strides = [1, 1]} : vector<2x128xf32> to vector<2x32xf32>
    %456 = vector.extract_strided_slice %451 {offsets = [0, 96], sizes = [2, 32], strides = [1, 1]} : vector<2x128xf32> to vector<2x32xf32>
    %457 = arith.mulf %454, %440 : vector<2x32xf32>
    %458 = arith.mulf %453, %455 : vector<2x32xf32>
    %459 = arith.addf %457, %458 : vector<2x32xf32>
    %460 = math.tanh %459 : vector<2x32xf32>
    %461 = arith.mulf %456, %460 : vector<2x32xf32>
    %c12_111 = arith.constant 12 : index
    %c0_112 = arith.constant 0 : index
    %462 = vector.load %arg32[%c12_111, %c0_112] : memref<16x64xf32, #tpu.memory_space<vmem>>, vector<2x32xf32>
    tpu.vector_store %arg32[%c12_111, %c0_112], %461 {strides = array<i32>} : memref<16x64xf32, #tpu.memory_space<vmem>>, vector<2x32xf32>,
    %463 = vector.extract_strided_slice %327 {offsets = [14, 0], sizes = [2, 128], strides = [1, 1]} : vector<16x128xf32> to vector<2x128xf32>
    %cst_113 = arith.constant dense<0.000000e+00> : vector<2x128xf32>
    %464 = tpu.matmul %461, %322, %cst_113 {dimension_numbers = #tpu.dot_dimension_numbers<[1], [0], [0], [1], [0, 0, 1, 1], [], []>} : vector<2x32xf32>, vector<32x128xf32>, vector<2x128xf32> -> vector<2x128xf32>
    %465 = arith.addf %463, %464 : vector<2x128xf32>
    %466 = arith.negf %465 : vector<2x128xf32>
    %467 = math.exp %466 : vector<2x128xf32>
    %cst_114 = arith.constant 1.000000e+00 : f32
    %468 = vector.broadcast %cst_114 : f32 to vector<2x128xf32>
    %469 = arith.addf %468, %467 : vector<2x128xf32>
    %470 = arith.divf %468, %469 : vector<2x128xf32>
    %471 = math.tanh %465 : vector<2x128xf32>
    %472 = vector.extract_strided_slice %470 {offsets = [0, 0], sizes = [2, 32], strides = [1, 1]} : vector<2x128xf32> to vector<2x32xf32>
    %473 = vector.extract_strided_slice %470 {offsets = [0, 32], sizes = [2, 32], strides = [1, 1]} : vector<2x128xf32> to vector<2x32xf32>
    %474 = vector.extract_strided_slice %471 {offsets = [0, 64], sizes = [2, 32], strides = [1, 1]} : vector<2x128xf32> to vector<2x32xf32>
    %475 = vector.extract_strided_slice %470 {offsets = [0, 96], sizes = [2, 32], strides = [1, 1]} : vector<2x128xf32> to vector<2x32xf32>
    %476 = arith.mulf %473, %459 : vector<2x32xf32>
    %477 = arith.mulf %472, %474 : vector<2x32xf32>
    %478 = arith.addf %476, %477 : vector<2x32xf32>
    %479 = math.tanh %478 : vector<2x32xf32>
    %480 = arith.mulf %475, %479 : vector<2x32xf32>
    %c14_115 = arith.constant 14 : index
    %c0_116 = arith.constant 0 : index
    %481 = vector.load %arg32[%c14_115, %c0_116] : memref<16x64xf32, #tpu.memory_space<vmem>>, vector<2x32xf32>
    tpu.vector_store %arg32[%c14_115, %c0_116], %480 {strides = array<i32>} : memref<16x64xf32, #tpu.memory_space<vmem>>, vector<2x32xf32>,
    %c0_117 = arith.constant 0 : index
    %c0_118 = arith.constant 0 : index
    %482 = vector.load %arg11[%c0_117, %c0_118] : memref<32x128xf32, #tpu.memory_space<vmem>>, vector<32x128xf32>
    %c0_119 = arith.constant 0 : index
    %c0_120 = arith.constant 0 : index
    %483 = vector.load %arg10[%c0_119, %c0_120] : memref<64x128xf32, #tpu.memory_space<vmem>>, vector<64x128xf32>
    %cst_121 = arith.constant dense<0.000000e+00> : vector<16x128xf32>
    %484 = tpu.matmul %321, %483, %cst_121 {dimension_numbers = #tpu.dot_dimension_numbers<[1], [0], [0], [1], [0, 0, 1, 1], [], []>} : vector<16x64xf32>, vector<64x128xf32>, vector<16x128xf32> -> vector<16x128xf32>
    %c0_122 = arith.constant 0 : index
    %c0_123 = arith.constant 0 : index
    %485 = vector.load %arg12[%c0_122, %c0_123] : memref<1x128xf32, #tpu.memory_space<vmem>>, vector<1x128xf32>
    %486 = vector.broadcast %485 : vector<1x128xf32> to vector<16x128xf32>
    %487 = arith.addf %484, %486 : vector<16x128xf32>
    %cst_124 = arith.constant 0.000000e+00 : f32
    %488 = vector.broadcast %cst_124 : f32 to vector<2x32xf32>
    %cst_125 = arith.constant 0.000000e+00 : f32
    %489 = vector.broadcast %cst_125 : f32 to vector<2x32xf32>
    %490 = vector.extract_strided_slice %487 {offsets = [14, 0], sizes = [2, 128], strides = [1, 1]} : vector<16x128xf32> to vector<2x128xf32>
    %cst_126 = arith.constant dense<0.000000e+00> : vector<2x128xf32>
    %491 = tpu.matmul %488, %482, %cst_126 {dimension_numbers = #tpu.dot_dimension_numbers<[1], [0], [0], [1], [0, 0, 1, 1], [], []>} : vector<2x32xf32>, vector<32x128xf32>, vector<2x128xf32> -> vector<2x128xf32>
    %492 = arith.addf %490, %491 : vector<2x128xf32>
    %493 = arith.negf %492 : vector<2x128xf32>
    %494 = math.exp %493 : vector<2x128xf32>
    %cst_127 = arith.constant 1.000000e+00 : f32
    %495 = vector.broadcast %cst_127 : f32 to vector<2x128xf32>
    %496 = arith.addf %495, %494 : vector<2x128xf32>
    %497 = arith.divf %495, %496 : vector<2x128xf32>
    %498 = math.tanh %492 : vector<2x128xf32>
    %499 = vector.extract_strided_slice %497 {offsets = [0, 0], sizes = [2, 32], strides = [1, 1]} : vector<2x128xf32> to vector<2x32xf32>
    %500 = vector.extract_strided_slice %497 {offsets = [0, 32], sizes = [2, 32], strides = [1, 1]} : vector<2x128xf32> to vector<2x32xf32>
    %501 = vector.extract_strided_slice %498 {offsets = [0, 64], sizes = [2, 32], strides = [1, 1]} : vector<2x128xf32> to vector<2x32xf32>
    %502 = vector.extract_strided_slice %497 {offsets = [0, 96], sizes = [2, 32], strides = [1, 1]} : vector<2x128xf32> to vector<2x32xf32>
    %503 = arith.mulf %500, %489 : vector<2x32xf32>
    %504 = arith.mulf %499, %501 : vector<2x32xf32>
    %505 = arith.addf %503, %504 : vector<2x32xf32>
    %506 = math.tanh %505 : vector<2x32xf32>
    %507 = arith.mulf %502, %506 : vector<2x32xf32>
    %c14_128 = arith.constant 14 : index
    %c32_129 = arith.constant 32 : index
    %508 = vector.load %arg32[%c14_128, %c32_129] : memref<16x64xf32, #tpu.memory_space<vmem>>, vector<2x32xf32>
    tpu.vector_store %arg32[%c14_128, %c32_129], %507 {strides = array<i32>} : memref<16x64xf32, #tpu.memory_space<vmem>>, vector<2x32xf32>,
    %509 = vector.extract_strided_slice %487 {offsets = [12, 0], sizes = [2, 128], strides = [1, 1]} : vector<16x128xf32> to vector<2x128xf32>
    %cst_130 = arith.constant dense<0.000000e+00> : vector<2x128xf32>
    %510 = tpu.matmul %507, %482, %cst_130 {dimension_numbers = #tpu.dot_dimension_numbers<[1], [0], [0], [1], [0, 0, 1, 1], [], []>} : vector<2x32xf32>, vector<32x128xf32>, vector<2x128xf32> -> vector<2x128xf32>
    %511 = arith.addf %509, %510 : vector<2x128xf32>
    %512 = arith.negf %511 : vector<2x128xf32>
    %513 = math.exp %512 : vector<2x128xf32>
    %cst_131 = arith.constant 1.000000e+00 : f32
    %514 = vector.broadcast %cst_131 : f32 to vector<2x128xf32>
    %515 = arith.addf %514, %513 : vector<2x128xf32>
    %516 = arith.divf %514, %515 : vector<2x128xf32>
    %517 = math.tanh %511 : vector<2x128xf32>
    %518 = vector.extract_strided_slice %516 {offsets = [0, 0], sizes = [2, 32], strides = [1, 1]} : vector<2x128xf32> to vector<2x32xf32>
    %519 = vector.extract_strided_slice %516 {offsets = [0, 32], sizes = [2, 32], strides = [1, 1]} : vector<2x128xf32> to vector<2x32xf32>
    %520 = vector.extract_strided_slice %517 {offsets = [0, 64], sizes = [2, 32], strides = [1, 1]} : vector<2x128xf32> to vector<2x32xf32>
    %521 = vector.extract_strided_slice %516 {offsets = [0, 96], sizes = [2, 32], strides = [1, 1]} : vector<2x128xf32> to vector<2x32xf32>
    %522 = arith.mulf %519, %505 : vector<2x32xf32>
    %523 = arith.mulf %518, %520 : vector<2x32xf32>
    %524 = arith.addf %522, %523 : vector<2x32xf32>
    %525 = math.tanh %524 : vector<2x32xf32>
    %526 = arith.mulf %521, %525 : vector<2x32xf32>
    %c12_132 = arith.constant 12 : index
    %c32_133 = arith.constant 32 : index
    %527 = vector.load %arg32[%c12_132, %c32_133] : memref<16x64xf32, #tpu.memory_space<vmem>>, vector<2x32xf32>
    tpu.vector_store %arg32[%c12_132, %c32_133], %526 {strides = array<i32>} : memref<16x64xf32, #tpu.memory_space<vmem>>, vector<2x32xf32>,
    %528 = vector.extract_strided_slice %487 {offsets = [10, 0], sizes = [2, 128], strides = [1, 1]} : vector<16x128xf32> to vector<2x128xf32>
    %cst_134 = arith.constant dense<0.000000e+00> : vector<2x128xf32>
    %529 = tpu.matmul %526, %482, %cst_134 {dimension_numbers = #tpu.dot_dimension_numbers<[1], [0], [0], [1], [0, 0, 1, 1], [], []>} : vector<2x32xf32>, vector<32x128xf32>, vector<2x128xf32> -> vector<2x128xf32>
    %530 = arith.addf %528, %529 : vector<2x128xf32>
    %531 = arith.negf %530 : vector<2x128xf32>
    %532 = math.exp %531 : vector<2x128xf32>
    %cst_135 = arith.constant 1.000000e+00 : f32
    %533 = vector.broadcast %cst_135 : f32 to vector<2x128xf32>
    %534 = arith.addf %533, %532 : vector<2x128xf32>
    %535 = arith.divf %533, %534 : vector<2x128xf32>
    %536 = math.tanh %530 : vector<2x128xf32>
    %537 = vector.extract_strided_slice %535 {offsets = [0, 0], sizes = [2, 32], strides = [1, 1]} : vector<2x128xf32> to vector<2x32xf32>
    %538 = vector.extract_strided_slice %535 {offsets = [0, 32], sizes = [2, 32], strides = [1, 1]} : vector<2x128xf32> to vector<2x32xf32>
    %539 = vector.extract_strided_slice %536 {offsets = [0, 64], sizes = [2, 32], strides = [1, 1]} : vector<2x128xf32> to vector<2x32xf32>
    %540 = vector.extract_strided_slice %535 {offsets = [0, 96], sizes = [2, 32], strides = [1, 1]} : vector<2x128xf32> to vector<2x32xf32>
    %541 = arith.mulf %538, %524 : vector<2x32xf32>
    %542 = arith.mulf %537, %539 : vector<2x32xf32>
    %543 = arith.addf %541, %542 : vector<2x32xf32>
    %544 = math.tanh %543 : vector<2x32xf32>
    %545 = arith.mulf %540, %544 : vector<2x32xf32>
    %c10_136 = arith.constant 10 : index
    %c32_137 = arith.constant 32 : index
    %546 = vector.load %arg32[%c10_136, %c32_137] : memref<16x64xf32, #tpu.memory_space<vmem>>, vector<2x32xf32>
    tpu.vector_store %arg32[%c10_136, %c32_137], %545 {strides = array<i32>} : memref<16x64xf32, #tpu.memory_space<vmem>>, vector<2x32xf32>,
    %547 = vector.extract_strided_slice %487 {offsets = [8, 0], sizes = [2, 128], strides = [1, 1]} : vector<16x128xf32> to vector<2x128xf32>
    %cst_138 = arith.constant dense<0.000000e+00> : vector<2x128xf32>
    %548 = tpu.matmul %545, %482, %cst_138 {dimension_numbers = #tpu.dot_dimension_numbers<[1], [0], [0], [1], [0, 0, 1, 1], [], []>} : vector<2x32xf32>, vector<32x128xf32>, vector<2x128xf32> -> vector<2x128xf32>
    %549 = arith.addf %547, %548 : vector<2x128xf32>
    %550 = arith.negf %549 : vector<2x128xf32>
    %551 = math.exp %550 : vector<2x128xf32>
    %cst_139 = arith.constant 1.000000e+00 : f32
    %552 = vector.broadcast %cst_139 : f32 to vector<2x128xf32>
    %553 = arith.addf %552, %551 : vector<2x128xf32>
    %554 = arith.divf %552, %553 : vector<2x128xf32>
    %555 = math.tanh %549 : vector<2x128xf32>
    %556 = vector.extract_strided_slice %554 {offsets = [0, 0], sizes = [2, 32], strides = [1, 1]} : vector<2x128xf32> to vector<2x32xf32>
    %557 = vector.extract_strided_slice %554 {offsets = [0, 32], sizes = [2, 32], strides = [1, 1]} : vector<2x128xf32> to vector<2x32xf32>
    %558 = vector.extract_strided_slice %555 {offsets = [0, 64], sizes = [2, 32], strides = [1, 1]} : vector<2x128xf32> to vector<2x32xf32>
    %559 = vector.extract_strided_slice %554 {offsets = [0, 96], sizes = [2, 32], strides = [1, 1]} : vector<2x128xf32> to vector<2x32xf32>
    %560 = arith.mulf %557, %543 : vector<2x32xf32>
    %561 = arith.mulf %556, %558 : vector<2x32xf32>
    %562 = arith.addf %560, %561 : vector<2x32xf32>
    %563 = math.tanh %562 : vector<2x32xf32>
    %564 = arith.mulf %559, %563 : vector<2x32xf32>
    %c8_140 = arith.constant 8 : index
    %c32_141 = arith.constant 32 : index
    %565 = vector.load %arg32[%c8_140, %c32_141] : memref<16x64xf32, #tpu.memory_space<vmem>>, vector<2x32xf32>
    tpu.vector_store %arg32[%c8_140, %c32_141], %564 {strides = array<i32>} : memref<16x64xf32, #tpu.memory_space<vmem>>, vector<2x32xf32>,
    %566 = vector.extract_strided_slice %487 {offsets = [6, 0], sizes = [2, 128], strides = [1, 1]} : vector<16x128xf32> to vector<2x128xf32>
    %cst_142 = arith.constant dense<0.000000e+00> : vector<2x128xf32>
    %567 = tpu.matmul %564, %482, %cst_142 {dimension_numbers = #tpu.dot_dimension_numbers<[1], [0], [0], [1], [0, 0, 1, 1], [], []>} : vector<2x32xf32>, vector<32x128xf32>, vector<2x128xf32> -> vector<2x128xf32>
    %568 = arith.addf %566, %567 : vector<2x128xf32>
    %569 = arith.negf %568 : vector<2x128xf32>
    %570 = math.exp %569 : vector<2x128xf32>
    %cst_143 = arith.constant 1.000000e+00 : f32
    %571 = vector.broadcast %cst_143 : f32 to vector<2x128xf32>
    %572 = arith.addf %571, %570 : vector<2x128xf32>
    %573 = arith.divf %571, %572 : vector<2x128xf32>
    %574 = math.tanh %568 : vector<2x128xf32>
    %575 = vector.extract_strided_slice %573 {offsets = [0, 0], sizes = [2, 32], strides = [1, 1]} : vector<2x128xf32> to vector<2x32xf32>
    %576 = vector.extract_strided_slice %573 {offsets = [0, 32], sizes = [2, 32], strides = [1, 1]} : vector<2x128xf32> to vector<2x32xf32>
    %577 = vector.extract_strided_slice %574 {offsets = [0, 64], sizes = [2, 32], strides = [1, 1]} : vector<2x128xf32> to vector<2x32xf32>
    %578 = vector.extract_strided_slice %573 {offsets = [0, 96], sizes = [2, 32], strides = [1, 1]} : vector<2x128xf32> to vector<2x32xf32>
    %579 = arith.mulf %576, %562 : vector<2x32xf32>
    %580 = arith.mulf %575, %577 : vector<2x32xf32>
    %581 = arith.addf %579, %580 : vector<2x32xf32>
    %582 = math.tanh %581 : vector<2x32xf32>
    %583 = arith.mulf %578, %582 : vector<2x32xf32>
    %c6_144 = arith.constant 6 : index
    %c32_145 = arith.constant 32 : index
    %584 = vector.load %arg32[%c6_144, %c32_145] : memref<16x64xf32, #tpu.memory_space<vmem>>, vector<2x32xf32>
    tpu.vector_store %arg32[%c6_144, %c32_145], %583 {strides = array<i32>} : memref<16x64xf32, #tpu.memory_space<vmem>>, vector<2x32xf32>,
    %585 = vector.extract_strided_slice %487 {offsets = [4, 0], sizes = [2, 128], strides = [1, 1]} : vector<16x128xf32> to vector<2x128xf32>
    %cst_146 = arith.constant dense<0.000000e+00> : vector<2x128xf32>
    %586 = tpu.matmul %583, %482, %cst_146 {dimension_numbers = #tpu.dot_dimension_numbers<[1], [0], [0], [1], [0, 0, 1, 1], [], []>} : vector<2x32xf32>, vector<32x128xf32>, vector<2x128xf32> -> vector<2x128xf32>
    %587 = arith.addf %585, %586 : vector<2x128xf32>
    %588 = arith.negf %587 : vector<2x128xf32>
    %589 = math.exp %588 : vector<2x128xf32>
    %cst_147 = arith.constant 1.000000e+00 : f32
    %590 = vector.broadcast %cst_147 : f32 to vector<2x128xf32>
    %591 = arith.addf %590, %589 : vector<2x128xf32>
    %592 = arith.divf %590, %591 : vector<2x128xf32>
    %593 = math.tanh %587 : vector<2x128xf32>
    %594 = vector.extract_strided_slice %592 {offsets = [0, 0], sizes = [2, 32], strides = [1, 1]} : vector<2x128xf32> to vector<2x32xf32>
    %595 = vector.extract_strided_slice %592 {offsets = [0, 32], sizes = [2, 32], strides = [1, 1]} : vector<2x128xf32> to vector<2x32xf32>
    %596 = vector.extract_strided_slice %593 {offsets = [0, 64], sizes = [2, 32], strides = [1, 1]} : vector<2x128xf32> to vector<2x32xf32>
    %597 = vector.extract_strided_slice %592 {offsets = [0, 96], sizes = [2, 32], strides = [1, 1]} : vector<2x128xf32> to vector<2x32xf32>
    %598 = arith.mulf %595, %581 : vector<2x32xf32>
    %599 = arith.mulf %594, %596 : vector<2x32xf32>
    %600 = arith.addf %598, %599 : vector<2x32xf32>
    %601 = math.tanh %600 : vector<2x32xf32>
    %602 = arith.mulf %597, %601 : vector<2x32xf32>
    %c4_148 = arith.constant 4 : index
    %c32_149 = arith.constant 32 : index
    %603 = vector.load %arg32[%c4_148, %c32_149] : memref<16x64xf32, #tpu.memory_space<vmem>>, vector<2x32xf32>
    tpu.vector_store %arg32[%c4_148, %c32_149], %602 {strides = array<i32>} : memref<16x64xf32, #tpu.memory_space<vmem>>, vector<2x32xf32>,
    %604 = vector.extract_strided_slice %487 {offsets = [2, 0], sizes = [2, 128], strides = [1, 1]} : vector<16x128xf32> to vector<2x128xf32>
    %cst_150 = arith.constant dense<0.000000e+00> : vector<2x128xf32>
    %605 = tpu.matmul %602, %482, %cst_150 {dimension_numbers = #tpu.dot_dimension_numbers<[1], [0], [0], [1], [0, 0, 1, 1], [], []>} : vector<2x32xf32>, vector<32x128xf32>, vector<2x128xf32> -> vector<2x128xf32>
    %606 = arith.addf %604, %605 : vector<2x128xf32>
    %607 = arith.negf %606 : vector<2x128xf32>
    %608 = math.exp %607 : vector<2x128xf32>
    %cst_151 = arith.constant 1.000000e+00 : f32
    %609 = vector.broadcast %cst_151 : f32 to vector<2x128xf32>
    %610 = arith.addf %609, %608 : vector<2x128xf32>
    %611 = arith.divf %609, %610 : vector<2x128xf32>
    %612 = math.tanh %606 : vector<2x128xf32>
    %613 = vector.extract_strided_slice %611 {offsets = [0, 0], sizes = [2, 32], strides = [1, 1]} : vector<2x128xf32> to vector<2x32xf32>
    %614 = vector.extract_strided_slice %611 {offsets = [0, 32], sizes = [2, 32], strides = [1, 1]} : vector<2x128xf32> to vector<2x32xf32>
    %615 = vector.extract_strided_slice %612 {offsets = [0, 64], sizes = [2, 32], strides = [1, 1]} : vector<2x128xf32> to vector<2x32xf32>
    %616 = vector.extract_strided_slice %611 {offsets = [0, 96], sizes = [2, 32], strides = [1, 1]} : vector<2x128xf32> to vector<2x32xf32>
    %617 = arith.mulf %614, %600 : vector<2x32xf32>
    %618 = arith.mulf %613, %615 : vector<2x32xf32>
    %619 = arith.addf %617, %618 : vector<2x32xf32>
    %620 = math.tanh %619 : vector<2x32xf32>
    %621 = arith.mulf %616, %620 : vector<2x32xf32>
    %c2_152 = arith.constant 2 : index
    %c32_153 = arith.constant 32 : index
    %622 = vector.load %arg32[%c2_152, %c32_153] : memref<16x64xf32, #tpu.memory_space<vmem>>, vector<2x32xf32>
    tpu.vector_store %arg32[%c2_152, %c32_153], %621 {strides = array<i32>} : memref<16x64xf32, #tpu.memory_space<vmem>>, vector<2x32xf32>,
    %623 = vector.extract_strided_slice %487 {offsets = [0, 0], sizes = [2, 128], strides = [1, 1]} : vector<16x128xf32> to vector<2x128xf32>
    %cst_154 = arith.constant dense<0.000000e+00> : vector<2x128xf32>
    %624 = tpu.matmul %621, %482, %cst_154 {dimension_numbers = #tpu.dot_dimension_numbers<[1], [0], [0], [1], [0, 0, 1, 1], [], []>} : vector<2x32xf32>, vector<32x128xf32>, vector<2x128xf32> -> vector<2x128xf32>
    %625 = arith.addf %623, %624 : vector<2x128xf32>
    %626 = arith.negf %625 : vector<2x128xf32>
    %627 = math.exp %626 : vector<2x128xf32>
    %cst_155 = arith.constant 1.000000e+00 : f32
    %628 = vector.broadcast %cst_155 : f32 to vector<2x128xf32>
    %629 = arith.addf %628, %627 : vector<2x128xf32>
    %630 = arith.divf %628, %629 : vector<2x128xf32>
    %631 = math.tanh %625 : vector<2x128xf32>
    %632 = vector.extract_strided_slice %630 {offsets = [0, 0], sizes = [2, 32], strides = [1, 1]} : vector<2x128xf32> to vector<2x32xf32>
    %633 = vector.extract_strided_slice %630 {offsets = [0, 32], sizes = [2, 32], strides = [1, 1]} : vector<2x128xf32> to vector<2x32xf32>
    %634 = vector.extract_strided_slice %631 {offsets = [0, 64], sizes = [2, 32], strides = [1, 1]} : vector<2x128xf32> to vector<2x32xf32>
    %635 = vector.extract_strided_slice %630 {offsets = [0, 96], sizes = [2, 32], strides = [1, 1]} : vector<2x128xf32> to vector<2x32xf32>
    %636 = arith.mulf %633, %619 : vector<2x32xf32>
    %637 = arith.mulf %632, %634 : vector<2x32xf32>
    %638 = arith.addf %636, %637 : vector<2x32xf32>
    %639 = math.tanh %638 : vector<2x32xf32>
    %640 = arith.mulf %635, %639 : vector<2x32xf32>
    %c0_156 = arith.constant 0 : index
    %c32_157 = arith.constant 32 : index
    %641 = vector.load %arg32[%c0_156, %c32_157] : memref<16x64xf32, #tpu.memory_space<vmem>>, vector<2x32xf32>
    tpu.vector_store %arg32[%c0_156, %c32_157], %640 {strides = array<i32>} : memref<16x64xf32, #tpu.memory_space<vmem>>, vector<2x32xf32>,
    %c0_158 = arith.constant 0 : index
    %c0_159 = arith.constant 0 : index
    %642 = vector.load %arg32[%c0_158, %c0_159] : memref<16x64xf32, #tpu.memory_space<vmem>>, vector<16x64xf32>
    %c0_160 = arith.constant 0 : index
    %c0_161 = arith.constant 0 : index
    %643 = vector.load %arg14[%c0_160, %c0_161] : memref<32x128xf32, #tpu.memory_space<vmem>>, vector<32x128xf32>
    %c0_162 = arith.constant 0 : index
    %c0_163 = arith.constant 0 : index
    %644 = vector.load %arg13[%c0_162, %c0_163] : memref<64x128xf32, #tpu.memory_space<vmem>>, vector<64x128xf32>
    %cst_164 = arith.constant dense<0.000000e+00> : vector<16x128xf32>
    %645 = tpu.matmul %642, %644, %cst_164 {dimension_numbers = #tpu.dot_dimension_numbers<[1], [0], [0], [1], [0, 0, 1, 1], [], []>} : vector<16x64xf32>, vector<64x128xf32>, vector<16x128xf32> -> vector<16x128xf32>
    %c0_165 = arith.constant 0 : index
    %c0_166 = arith.constant 0 : index
    %646 = vector.load %arg15[%c0_165, %c0_166] : memref<1x128xf32, #tpu.memory_space<vmem>>, vector<1x128xf32>
    %647 = vector.broadcast %646 : vector<1x128xf32> to vector<16x128xf32>
    %648 = arith.addf %645, %647 : vector<16x128xf32>
    %cst_167 = arith.constant 0.000000e+00 : f32
    %649 = vector.broadcast %cst_167 : f32 to vector<2x32xf32>
    %cst_168 = arith.constant 0.000000e+00 : f32
    %650 = vector.broadcast %cst_168 : f32 to vector<2x32xf32>
    %651 = vector.extract_strided_slice %648 {offsets = [0, 0], sizes = [2, 128], strides = [1, 1]} : vector<16x128xf32> to vector<2x128xf32>
    %cst_169 = arith.constant dense<0.000000e+00> : vector<2x128xf32>
    %652 = tpu.matmul %649, %643, %cst_169 {dimension_numbers = #tpu.dot_dimension_numbers<[1], [0], [0], [1], [0, 0, 1, 1], [], []>} : vector<2x32xf32>, vector<32x128xf32>, vector<2x128xf32> -> vector<2x128xf32>
    %653 = arith.addf %651, %652 : vector<2x128xf32>
    %654 = arith.negf %653 : vector<2x128xf32>
    %655 = math.exp %654 : vector<2x128xf32>
    %cst_170 = arith.constant 1.000000e+00 : f32
    %656 = vector.broadcast %cst_170 : f32 to vector<2x128xf32>
    %657 = arith.addf %656, %655 : vector<2x128xf32>
    %658 = arith.divf %656, %657 : vector<2x128xf32>
    %659 = math.tanh %653 : vector<2x128xf32>
    %660 = vector.extract_strided_slice %658 {offsets = [0, 0], sizes = [2, 32], strides = [1, 1]} : vector<2x128xf32> to vector<2x32xf32>
    %661 = vector.extract_strided_slice %658 {offsets = [0, 32], sizes = [2, 32], strides = [1, 1]} : vector<2x128xf32> to vector<2x32xf32>
    %662 = vector.extract_strided_slice %659 {offsets = [0, 64], sizes = [2, 32], strides = [1, 1]} : vector<2x128xf32> to vector<2x32xf32>
    %663 = vector.extract_strided_slice %658 {offsets = [0, 96], sizes = [2, 32], strides = [1, 1]} : vector<2x128xf32> to vector<2x32xf32>
    %664 = arith.mulf %661, %650 : vector<2x32xf32>
    %665 = arith.mulf %660, %662 : vector<2x32xf32>
    %666 = arith.addf %664, %665 : vector<2x32xf32>
    %667 = math.tanh %666 : vector<2x32xf32>
    %668 = arith.mulf %663, %667 : vector<2x32xf32>
    %c0_171 = arith.constant 0 : index
    %c0_172 = arith.constant 0 : index
    %669 = vector.load %arg33[%c0_171, %c0_172] : memref<16x64xf32, #tpu.memory_space<vmem>>, vector<2x32xf32>
    tpu.vector_store %arg33[%c0_171, %c0_172], %668 {strides = array<i32>} : memref<16x64xf32, #tpu.memory_space<vmem>>, vector<2x32xf32>,
    %670 = vector.extract_strided_slice %648 {offsets = [2, 0], sizes = [2, 128], strides = [1, 1]} : vector<16x128xf32> to vector<2x128xf32>
    %cst_173 = arith.constant dense<0.000000e+00> : vector<2x128xf32>
    %671 = tpu.matmul %668, %643, %cst_173 {dimension_numbers = #tpu.dot_dimension_numbers<[1], [0], [0], [1], [0, 0, 1, 1], [], []>} : vector<2x32xf32>, vector<32x128xf32>, vector<2x128xf32> -> vector<2x128xf32>
    %672 = arith.addf %670, %671 : vector<2x128xf32>
    %673 = arith.negf %672 : vector<2x128xf32>
    %674 = math.exp %673 : vector<2x128xf32>
    %cst_174 = arith.constant 1.000000e+00 : f32
    %675 = vector.broadcast %cst_174 : f32 to vector<2x128xf32>
    %676 = arith.addf %675, %674 : vector<2x128xf32>
    %677 = arith.divf %675, %676 : vector<2x128xf32>
    %678 = math.tanh %672 : vector<2x128xf32>
    %679 = vector.extract_strided_slice %677 {offsets = [0, 0], sizes = [2, 32], strides = [1, 1]} : vector<2x128xf32> to vector<2x32xf32>
    %680 = vector.extract_strided_slice %677 {offsets = [0, 32], sizes = [2, 32], strides = [1, 1]} : vector<2x128xf32> to vector<2x32xf32>
    %681 = vector.extract_strided_slice %678 {offsets = [0, 64], sizes = [2, 32], strides = [1, 1]} : vector<2x128xf32> to vector<2x32xf32>
    %682 = vector.extract_strided_slice %677 {offsets = [0, 96], sizes = [2, 32], strides = [1, 1]} : vector<2x128xf32> to vector<2x32xf32>
    %683 = arith.mulf %680, %666 : vector<2x32xf32>
    %684 = arith.mulf %679, %681 : vector<2x32xf32>
    %685 = arith.addf %683, %684 : vector<2x32xf32>
    %686 = math.tanh %685 : vector<2x32xf32>
    %687 = arith.mulf %682, %686 : vector<2x32xf32>
    %c2_175 = arith.constant 2 : index
    %c0_176 = arith.constant 0 : index
    %688 = vector.load %arg33[%c2_175, %c0_176] : memref<16x64xf32, #tpu.memory_space<vmem>>, vector<2x32xf32>
    tpu.vector_store %arg33[%c2_175, %c0_176], %687 {strides = array<i32>} : memref<16x64xf32, #tpu.memory_space<vmem>>, vector<2x32xf32>,
    %689 = vector.extract_strided_slice %648 {offsets = [4, 0], sizes = [2, 128], strides = [1, 1]} : vector<16x128xf32> to vector<2x128xf32>
    %cst_177 = arith.constant dense<0.000000e+00> : vector<2x128xf32>
    %690 = tpu.matmul %687, %643, %cst_177 {dimension_numbers = #tpu.dot_dimension_numbers<[1], [0], [0], [1], [0, 0, 1, 1], [], []>} : vector<2x32xf32>, vector<32x128xf32>, vector<2x128xf32> -> vector<2x128xf32>
    %691 = arith.addf %689, %690 : vector<2x128xf32>
    %692 = arith.negf %691 : vector<2x128xf32>
    %693 = math.exp %692 : vector<2x128xf32>
    %cst_178 = arith.constant 1.000000e+00 : f32
    %694 = vector.broadcast %cst_178 : f32 to vector<2x128xf32>
    %695 = arith.addf %694, %693 : vector<2x128xf32>
    %696 = arith.divf %694, %695 : vector<2x128xf32>
    %697 = math.tanh %691 : vector<2x128xf32>
    %698 = vector.extract_strided_slice %696 {offsets = [0, 0], sizes = [2, 32], strides = [1, 1]} : vector<2x128xf32> to vector<2x32xf32>
    %699 = vector.extract_strided_slice %696 {offsets = [0, 32], sizes = [2, 32], strides = [1, 1]} : vector<2x128xf32> to vector<2x32xf32>
    %700 = vector.extract_strided_slice %697 {offsets = [0, 64], sizes = [2, 32], strides = [1, 1]} : vector<2x128xf32> to vector<2x32xf32>
    %701 = vector.extract_strided_slice %696 {offsets = [0, 96], sizes = [2, 32], strides = [1, 1]} : vector<2x128xf32> to vector<2x32xf32>
    %702 = arith.mulf %699, %685 : vector<2x32xf32>
    %703 = arith.mulf %698, %700 : vector<2x32xf32>
    %704 = arith.addf %702, %703 : vector<2x32xf32>
    %705 = math.tanh %704 : vector<2x32xf32>
    %706 = arith.mulf %701, %705 : vector<2x32xf32>
    %c4_179 = arith.constant 4 : index
    %c0_180 = arith.constant 0 : index
    %707 = vector.load %arg33[%c4_179, %c0_180] : memref<16x64xf32, #tpu.memory_space<vmem>>, vector<2x32xf32>
    tpu.vector_store %arg33[%c4_179, %c0_180], %706 {strides = array<i32>} : memref<16x64xf32, #tpu.memory_space<vmem>>, vector<2x32xf32>,
    %708 = vector.extract_strided_slice %648 {offsets = [6, 0], sizes = [2, 128], strides = [1, 1]} : vector<16x128xf32> to vector<2x128xf32>
    %cst_181 = arith.constant dense<0.000000e+00> : vector<2x128xf32>
    %709 = tpu.matmul %706, %643, %cst_181 {dimension_numbers = #tpu.dot_dimension_numbers<[1], [0], [0], [1], [0, 0, 1, 1], [], []>} : vector<2x32xf32>, vector<32x128xf32>, vector<2x128xf32> -> vector<2x128xf32>
    %710 = arith.addf %708, %709 : vector<2x128xf32>
    %711 = arith.negf %710 : vector<2x128xf32>
    %712 = math.exp %711 : vector<2x128xf32>
    %cst_182 = arith.constant 1.000000e+00 : f32
    %713 = vector.broadcast %cst_182 : f32 to vector<2x128xf32>
    %714 = arith.addf %713, %712 : vector<2x128xf32>
    %715 = arith.divf %713, %714 : vector<2x128xf32>
    %716 = math.tanh %710 : vector<2x128xf32>
    %717 = vector.extract_strided_slice %715 {offsets = [0, 0], sizes = [2, 32], strides = [1, 1]} : vector<2x128xf32> to vector<2x32xf32>
    %718 = vector.extract_strided_slice %715 {offsets = [0, 32], sizes = [2, 32], strides = [1, 1]} : vector<2x128xf32> to vector<2x32xf32>
    %719 = vector.extract_strided_slice %716 {offsets = [0, 64], sizes = [2, 32], strides = [1, 1]} : vector<2x128xf32> to vector<2x32xf32>
    %720 = vector.extract_strided_slice %715 {offsets = [0, 96], sizes = [2, 32], strides = [1, 1]} : vector<2x128xf32> to vector<2x32xf32>
    %721 = arith.mulf %718, %704 : vector<2x32xf32>
    %722 = arith.mulf %717, %719 : vector<2x32xf32>
    %723 = arith.addf %721, %722 : vector<2x32xf32>
    %724 = math.tanh %723 : vector<2x32xf32>
    %725 = arith.mulf %720, %724 : vector<2x32xf32>
    %c6_183 = arith.constant 6 : index
    %c0_184 = arith.constant 0 : index
    %726 = vector.load %arg33[%c6_183, %c0_184] : memref<16x64xf32, #tpu.memory_space<vmem>>, vector<2x32xf32>
    tpu.vector_store %arg33[%c6_183, %c0_184], %725 {strides = array<i32>} : memref<16x64xf32, #tpu.memory_space<vmem>>, vector<2x32xf32>,
    %727 = vector.extract_strided_slice %648 {offsets = [8, 0], sizes = [2, 128], strides = [1, 1]} : vector<16x128xf32> to vector<2x128xf32>
    %cst_185 = arith.constant dense<0.000000e+00> : vector<2x128xf32>
    %728 = tpu.matmul %725, %643, %cst_185 {dimension_numbers = #tpu.dot_dimension_numbers<[1], [0], [0], [1], [0, 0, 1, 1], [], []>} : vector<2x32xf32>, vector<32x128xf32>, vector<2x128xf32> -> vector<2x128xf32>
    %729 = arith.addf %727, %728 : vector<2x128xf32>
    %730 = arith.negf %729 : vector<2x128xf32>
    %731 = math.exp %730 : vector<2x128xf32>
    %cst_186 = arith.constant 1.000000e+00 : f32
    %732 = vector.broadcast %cst_186 : f32 to vector<2x128xf32>
    %733 = arith.addf %732, %731 : vector<2x128xf32>
    %734 = arith.divf %732, %733 : vector<2x128xf32>
    %735 = math.tanh %729 : vector<2x128xf32>
    %736 = vector.extract_strided_slice %734 {offsets = [0, 0], sizes = [2, 32], strides = [1, 1]} : vector<2x128xf32> to vector<2x32xf32>
    %737 = vector.extract_strided_slice %734 {offsets = [0, 32], sizes = [2, 32], strides = [1, 1]} : vector<2x128xf32> to vector<2x32xf32>
    %738 = vector.extract_strided_slice %735 {offsets = [0, 64], sizes = [2, 32], strides = [1, 1]} : vector<2x128xf32> to vector<2x32xf32>
    %739 = vector.extract_strided_slice %734 {offsets = [0, 96], sizes = [2, 32], strides = [1, 1]} : vector<2x128xf32> to vector<2x32xf32>
    %740 = arith.mulf %737, %723 : vector<2x32xf32>
    %741 = arith.mulf %736, %738 : vector<2x32xf32>
    %742 = arith.addf %740, %741 : vector<2x32xf32>
    %743 = math.tanh %742 : vector<2x32xf32>
    %744 = arith.mulf %739, %743 : vector<2x32xf32>
    %c8_187 = arith.constant 8 : index
    %c0_188 = arith.constant 0 : index
    %745 = vector.load %arg33[%c8_187, %c0_188] : memref<16x64xf32, #tpu.memory_space<vmem>>, vector<2x32xf32>
    tpu.vector_store %arg33[%c8_187, %c0_188], %744 {strides = array<i32>} : memref<16x64xf32, #tpu.memory_space<vmem>>, vector<2x32xf32>,
    %746 = vector.extract_strided_slice %648 {offsets = [10, 0], sizes = [2, 128], strides = [1, 1]} : vector<16x128xf32> to vector<2x128xf32>
    %cst_189 = arith.constant dense<0.000000e+00> : vector<2x128xf32>
    %747 = tpu.matmul %744, %643, %cst_189 {dimension_numbers = #tpu.dot_dimension_numbers<[1], [0], [0], [1], [0, 0, 1, 1], [], []>} : vector<2x32xf32>, vector<32x128xf32>, vector<2x128xf32> -> vector<2x128xf32>
    %748 = arith.addf %746, %747 : vector<2x128xf32>
    %749 = arith.negf %748 : vector<2x128xf32>
    %750 = math.exp %749 : vector<2x128xf32>
    %cst_190 = arith.constant 1.000000e+00 : f32
    %751 = vector.broadcast %cst_190 : f32 to vector<2x128xf32>
    %752 = arith.addf %751, %750 : vector<2x128xf32>
    %753 = arith.divf %751, %752 : vector<2x128xf32>
    %754 = math.tanh %748 : vector<2x128xf32>
    %755 = vector.extract_strided_slice %753 {offsets = [0, 0], sizes = [2, 32], strides = [1, 1]} : vector<2x128xf32> to vector<2x32xf32>
    %756 = vector.extract_strided_slice %753 {offsets = [0, 32], sizes = [2, 32], strides = [1, 1]} : vector<2x128xf32> to vector<2x32xf32>
    %757 = vector.extract_strided_slice %754 {offsets = [0, 64], sizes = [2, 32], strides = [1, 1]} : vector<2x128xf32> to vector<2x32xf32>
    %758 = vector.extract_strided_slice %753 {offsets = [0, 96], sizes = [2, 32], strides = [1, 1]} : vector<2x128xf32> to vector<2x32xf32>
    %759 = arith.mulf %756, %742 : vector<2x32xf32>
    %760 = arith.mulf %755, %757 : vector<2x32xf32>
    %761 = arith.addf %759, %760 : vector<2x32xf32>
    %762 = math.tanh %761 : vector<2x32xf32>
    %763 = arith.mulf %758, %762 : vector<2x32xf32>
    %c10_191 = arith.constant 10 : index
    %c0_192 = arith.constant 0 : index
    %764 = vector.load %arg33[%c10_191, %c0_192] : memref<16x64xf32, #tpu.memory_space<vmem>>, vector<2x32xf32>
    tpu.vector_store %arg33[%c10_191, %c0_192], %763 {strides = array<i32>} : memref<16x64xf32, #tpu.memory_space<vmem>>, vector<2x32xf32>,
    %765 = vector.extract_strided_slice %648 {offsets = [12, 0], sizes = [2, 128], strides = [1, 1]} : vector<16x128xf32> to vector<2x128xf32>
    %cst_193 = arith.constant dense<0.000000e+00> : vector<2x128xf32>
    %766 = tpu.matmul %763, %643, %cst_193 {dimension_numbers = #tpu.dot_dimension_numbers<[1], [0], [0], [1], [0, 0, 1, 1], [], []>} : vector<2x32xf32>, vector<32x128xf32>, vector<2x128xf32> -> vector<2x128xf32>
    %767 = arith.addf %765, %766 : vector<2x128xf32>
    %768 = arith.negf %767 : vector<2x128xf32>
    %769 = math.exp %768 : vector<2x128xf32>
    %cst_194 = arith.constant 1.000000e+00 : f32
    %770 = vector.broadcast %cst_194 : f32 to vector<2x128xf32>
    %771 = arith.addf %770, %769 : vector<2x128xf32>
    %772 = arith.divf %770, %771 : vector<2x128xf32>
    %773 = math.tanh %767 : vector<2x128xf32>
    %774 = vector.extract_strided_slice %772 {offsets = [0, 0], sizes = [2, 32], strides = [1, 1]} : vector<2x128xf32> to vector<2x32xf32>
    %775 = vector.extract_strided_slice %772 {offsets = [0, 32], sizes = [2, 32], strides = [1, 1]} : vector<2x128xf32> to vector<2x32xf32>
    %776 = vector.extract_strided_slice %773 {offsets = [0, 64], sizes = [2, 32], strides = [1, 1]} : vector<2x128xf32> to vector<2x32xf32>
    %777 = vector.extract_strided_slice %772 {offsets = [0, 96], sizes = [2, 32], strides = [1, 1]} : vector<2x128xf32> to vector<2x32xf32>
    %778 = arith.mulf %775, %761 : vector<2x32xf32>
    %779 = arith.mulf %774, %776 : vector<2x32xf32>
    %780 = arith.addf %778, %779 : vector<2x32xf32>
    %781 = math.tanh %780 : vector<2x32xf32>
    %782 = arith.mulf %777, %781 : vector<2x32xf32>
    %c12_195 = arith.constant 12 : index
    %c0_196 = arith.constant 0 : index
    %783 = vector.load %arg33[%c12_195, %c0_196] : memref<16x64xf32, #tpu.memory_space<vmem>>, vector<2x32xf32>
    tpu.vector_store %arg33[%c12_195, %c0_196], %782 {strides = array<i32>} : memref<16x64xf32, #tpu.memory_space<vmem>>, vector<2x32xf32>,
    %784 = vector.extract_strided_slice %648 {offsets = [14, 0], sizes = [2, 128], strides = [1, 1]} : vector<16x128xf32> to vector<2x128xf32>
    %cst_197 = arith.constant dense<0.000000e+00> : vector<2x128xf32>
    %785 = tpu.matmul %782, %643, %cst_197 {dimension_numbers = #tpu.dot_dimension_numbers<[1], [0], [0], [1], [0, 0, 1, 1], [], []>} : vector<2x32xf32>, vector<32x128xf32>, vector<2x128xf32> -> vector<2x128xf32>
    %786 = arith.addf %784, %785 : vector<2x128xf32>
    %787 = arith.negf %786 : vector<2x128xf32>
    %788 = math.exp %787 : vector<2x128xf32>
    %cst_198 = arith.constant 1.000000e+00 : f32
    %789 = vector.broadcast %cst_198 : f32 to vector<2x128xf32>
    %790 = arith.addf %789, %788 : vector<2x128xf32>
    %791 = arith.divf %789, %790 : vector<2x128xf32>
    %792 = math.tanh %786 : vector<2x128xf32>
    %793 = vector.extract_strided_slice %791 {offsets = [0, 0], sizes = [2, 32], strides = [1, 1]} : vector<2x128xf32> to vector<2x32xf32>
    %794 = vector.extract_strided_slice %791 {offsets = [0, 32], sizes = [2, 32], strides = [1, 1]} : vector<2x128xf32> to vector<2x32xf32>
    %795 = vector.extract_strided_slice %792 {offsets = [0, 64], sizes = [2, 32], strides = [1, 1]} : vector<2x128xf32> to vector<2x32xf32>
    %796 = vector.extract_strided_slice %791 {offsets = [0, 96], sizes = [2, 32], strides = [1, 1]} : vector<2x128xf32> to vector<2x32xf32>
    %797 = arith.mulf %794, %780 : vector<2x32xf32>
    %798 = arith.mulf %793, %795 : vector<2x32xf32>
    %799 = arith.addf %797, %798 : vector<2x32xf32>
    %800 = math.tanh %799 : vector<2x32xf32>
    %801 = arith.mulf %796, %800 : vector<2x32xf32>
    %c14_199 = arith.constant 14 : index
    %c0_200 = arith.constant 0 : index
    %802 = vector.load %arg33[%c14_199, %c0_200] : memref<16x64xf32, #tpu.memory_space<vmem>>, vector<2x32xf32>
    tpu.vector_store %arg33[%c14_199, %c0_200], %801 {strides = array<i32>} : memref<16x64xf32, #tpu.memory_space<vmem>>, vector<2x32xf32>,
    %c0_201 = arith.constant 0 : index
    %c0_202 = arith.constant 0 : index
    %803 = vector.load %arg17[%c0_201, %c0_202] : memref<32x128xf32, #tpu.memory_space<vmem>>, vector<32x128xf32>
    %c0_203 = arith.constant 0 : index
    %c0_204 = arith.constant 0 : index
    %804 = vector.load %arg16[%c0_203, %c0_204] : memref<64x128xf32, #tpu.memory_space<vmem>>, vector<64x128xf32>
    %cst_205 = arith.constant dense<0.000000e+00> : vector<16x128xf32>
    %805 = tpu.matmul %642, %804, %cst_205 {dimension_numbers = #tpu.dot_dimension_numbers<[1], [0], [0], [1], [0, 0, 1, 1], [], []>} : vector<16x64xf32>, vector<64x128xf32>, vector<16x128xf32> -> vector<16x128xf32>
    %c0_206 = arith.constant 0 : index
    %c0_207 = arith.constant 0 : index
    %806 = vector.load %arg18[%c0_206, %c0_207] : memref<1x128xf32, #tpu.memory_space<vmem>>, vector<1x128xf32>
    %807 = vector.broadcast %806 : vector<1x128xf32> to vector<16x128xf32>
    %808 = arith.addf %805, %807 : vector<16x128xf32>
    %cst_208 = arith.constant 0.000000e+00 : f32
    %809 = vector.broadcast %cst_208 : f32 to vector<2x32xf32>
    %cst_209 = arith.constant 0.000000e+00 : f32
    %810 = vector.broadcast %cst_209 : f32 to vector<2x32xf32>
    %811 = vector.extract_strided_slice %808 {offsets = [14, 0], sizes = [2, 128], strides = [1, 1]} : vector<16x128xf32> to vector<2x128xf32>
    %cst_210 = arith.constant dense<0.000000e+00> : vector<2x128xf32>
    %812 = tpu.matmul %809, %803, %cst_210 {dimension_numbers = #tpu.dot_dimension_numbers<[1], [0], [0], [1], [0, 0, 1, 1], [], []>} : vector<2x32xf32>, vector<32x128xf32>, vector<2x128xf32> -> vector<2x128xf32>
    %813 = arith.addf %811, %812 : vector<2x128xf32>
    %814 = arith.negf %813 : vector<2x128xf32>
    %815 = math.exp %814 : vector<2x128xf32>
    %cst_211 = arith.constant 1.000000e+00 : f32
    %816 = vector.broadcast %cst_211 : f32 to vector<2x128xf32>
    %817 = arith.addf %816, %815 : vector<2x128xf32>
    %818 = arith.divf %816, %817 : vector<2x128xf32>
    %819 = math.tanh %813 : vector<2x128xf32>
    %820 = vector.extract_strided_slice %818 {offsets = [0, 0], sizes = [2, 32], strides = [1, 1]} : vector<2x128xf32> to vector<2x32xf32>
    %821 = vector.extract_strided_slice %818 {offsets = [0, 32], sizes = [2, 32], strides = [1, 1]} : vector<2x128xf32> to vector<2x32xf32>
    %822 = vector.extract_strided_slice %819 {offsets = [0, 64], sizes = [2, 32], strides = [1, 1]} : vector<2x128xf32> to vector<2x32xf32>
    %823 = vector.extract_strided_slice %818 {offsets = [0, 96], sizes = [2, 32], strides = [1, 1]} : vector<2x128xf32> to vector<2x32xf32>
    %824 = arith.mulf %821, %810 : vector<2x32xf32>
    %825 = arith.mulf %820, %822 : vector<2x32xf32>
    %826 = arith.addf %824, %825 : vector<2x32xf32>
    %827 = math.tanh %826 : vector<2x32xf32>
    %828 = arith.mulf %823, %827 : vector<2x32xf32>
    %c14_212 = arith.constant 14 : index
    %c32_213 = arith.constant 32 : index
    %829 = vector.load %arg33[%c14_212, %c32_213] : memref<16x64xf32, #tpu.memory_space<vmem>>, vector<2x32xf32>
    tpu.vector_store %arg33[%c14_212, %c32_213], %828 {strides = array<i32>} : memref<16x64xf32, #tpu.memory_space<vmem>>, vector<2x32xf32>,
    %830 = vector.extract_strided_slice %808 {offsets = [12, 0], sizes = [2, 128], strides = [1, 1]} : vector<16x128xf32> to vector<2x128xf32>
    %cst_214 = arith.constant dense<0.000000e+00> : vector<2x128xf32>
    %831 = tpu.matmul %828, %803, %cst_214 {dimension_numbers = #tpu.dot_dimension_numbers<[1], [0], [0], [1], [0, 0, 1, 1], [], []>} : vector<2x32xf32>, vector<32x128xf32>, vector<2x128xf32> -> vector<2x128xf32>
    %832 = arith.addf %830, %831 : vector<2x128xf32>
    %833 = arith.negf %832 : vector<2x128xf32>
    %834 = math.exp %833 : vector<2x128xf32>
    %cst_215 = arith.constant 1.000000e+00 : f32
    %835 = vector.broadcast %cst_215 : f32 to vector<2x128xf32>
    %836 = arith.addf %835, %834 : vector<2x128xf32>
    %837 = arith.divf %835, %836 : vector<2x128xf32>
    %838 = math.tanh %832 : vector<2x128xf32>
    %839 = vector.extract_strided_slice %837 {offsets = [0, 0], sizes = [2, 32], strides = [1, 1]} : vector<2x128xf32> to vector<2x32xf32>
    %840 = vector.extract_strided_slice %837 {offsets = [0, 32], sizes = [2, 32], strides = [1, 1]} : vector<2x128xf32> to vector<2x32xf32>
    %841 = vector.extract_strided_slice %838 {offsets = [0, 64], sizes = [2, 32], strides = [1, 1]} : vector<2x128xf32> to vector<2x32xf32>
    %842 = vector.extract_strided_slice %837 {offsets = [0, 96], sizes = [2, 32], strides = [1, 1]} : vector<2x128xf32> to vector<2x32xf32>
    %843 = arith.mulf %840, %826 : vector<2x32xf32>
    %844 = arith.mulf %839, %841 : vector<2x32xf32>
    %845 = arith.addf %843, %844 : vector<2x32xf32>
    %846 = math.tanh %845 : vector<2x32xf32>
    %847 = arith.mulf %842, %846 : vector<2x32xf32>
    %c12_216 = arith.constant 12 : index
    %c32_217 = arith.constant 32 : index
    %848 = vector.load %arg33[%c12_216, %c32_217] : memref<16x64xf32, #tpu.memory_space<vmem>>, vector<2x32xf32>
    tpu.vector_store %arg33[%c12_216, %c32_217], %847 {strides = array<i32>} : memref<16x64xf32, #tpu.memory_space<vmem>>, vector<2x32xf32>,
    %849 = vector.extract_strided_slice %808 {offsets = [10, 0], sizes = [2, 128], strides = [1, 1]} : vector<16x128xf32> to vector<2x128xf32>
    %cst_218 = arith.constant dense<0.000000e+00> : vector<2x128xf32>
    %850 = tpu.matmul %847, %803, %cst_218 {dimension_numbers = #tpu.dot_dimension_numbers<[1], [0], [0], [1], [0, 0, 1, 1], [], []>} : vector<2x32xf32>, vector<32x128xf32>, vector<2x128xf32> -> vector<2x128xf32>
    %851 = arith.addf %849, %850 : vector<2x128xf32>
    %852 = arith.negf %851 : vector<2x128xf32>
    %853 = math.exp %852 : vector<2x128xf32>
    %cst_219 = arith.constant 1.000000e+00 : f32
    %854 = vector.broadcast %cst_219 : f32 to vector<2x128xf32>
    %855 = arith.addf %854, %853 : vector<2x128xf32>
    %856 = arith.divf %854, %855 : vector<2x128xf32>
    %857 = math.tanh %851 : vector<2x128xf32>
    %858 = vector.extract_strided_slice %856 {offsets = [0, 0], sizes = [2, 32], strides = [1, 1]} : vector<2x128xf32> to vector<2x32xf32>
    %859 = vector.extract_strided_slice %856 {offsets = [0, 32], sizes = [2, 32], strides = [1, 1]} : vector<2x128xf32> to vector<2x32xf32>
    %860 = vector.extract_strided_slice %857 {offsets = [0, 64], sizes = [2, 32], strides = [1, 1]} : vector<2x128xf32> to vector<2x32xf32>
    %861 = vector.extract_strided_slice %856 {offsets = [0, 96], sizes = [2, 32], strides = [1, 1]} : vector<2x128xf32> to vector<2x32xf32>
    %862 = arith.mulf %859, %845 : vector<2x32xf32>
    %863 = arith.mulf %858, %860 : vector<2x32xf32>
    %864 = arith.addf %862, %863 : vector<2x32xf32>
    %865 = math.tanh %864 : vector<2x32xf32>
    %866 = arith.mulf %861, %865 : vector<2x32xf32>
    %c10_220 = arith.constant 10 : index
    %c32_221 = arith.constant 32 : index
    %867 = vector.load %arg33[%c10_220, %c32_221] : memref<16x64xf32, #tpu.memory_space<vmem>>, vector<2x32xf32>
    tpu.vector_store %arg33[%c10_220, %c32_221], %866 {strides = array<i32>} : memref<16x64xf32, #tpu.memory_space<vmem>>, vector<2x32xf32>,
    %868 = vector.extract_strided_slice %808 {offsets = [8, 0], sizes = [2, 128], strides = [1, 1]} : vector<16x128xf32> to vector<2x128xf32>
    %cst_222 = arith.constant dense<0.000000e+00> : vector<2x128xf32>
    %869 = tpu.matmul %866, %803, %cst_222 {dimension_numbers = #tpu.dot_dimension_numbers<[1], [0], [0], [1], [0, 0, 1, 1], [], []>} : vector<2x32xf32>, vector<32x128xf32>, vector<2x128xf32> -> vector<2x128xf32>
    %870 = arith.addf %868, %869 : vector<2x128xf32>
    %871 = arith.negf %870 : vector<2x128xf32>
    %872 = math.exp %871 : vector<2x128xf32>
    %cst_223 = arith.constant 1.000000e+00 : f32
    %873 = vector.broadcast %cst_223 : f32 to vector<2x128xf32>
    %874 = arith.addf %873, %872 : vector<2x128xf32>
    %875 = arith.divf %873, %874 : vector<2x128xf32>
    %876 = math.tanh %870 : vector<2x128xf32>
    %877 = vector.extract_strided_slice %875 {offsets = [0, 0], sizes = [2, 32], strides = [1, 1]} : vector<2x128xf32> to vector<2x32xf32>
    %878 = vector.extract_strided_slice %875 {offsets = [0, 32], sizes = [2, 32], strides = [1, 1]} : vector<2x128xf32> to vector<2x32xf32>
    %879 = vector.extract_strided_slice %876 {offsets = [0, 64], sizes = [2, 32], strides = [1, 1]} : vector<2x128xf32> to vector<2x32xf32>
    %880 = vector.extract_strided_slice %875 {offsets = [0, 96], sizes = [2, 32], strides = [1, 1]} : vector<2x128xf32> to vector<2x32xf32>
    %881 = arith.mulf %878, %864 : vector<2x32xf32>
    %882 = arith.mulf %877, %879 : vector<2x32xf32>
    %883 = arith.addf %881, %882 : vector<2x32xf32>
    %884 = math.tanh %883 : vector<2x32xf32>
    %885 = arith.mulf %880, %884 : vector<2x32xf32>
    %c8_224 = arith.constant 8 : index
    %c32_225 = arith.constant 32 : index
    %886 = vector.load %arg33[%c8_224, %c32_225] : memref<16x64xf32, #tpu.memory_space<vmem>>, vector<2x32xf32>
    tpu.vector_store %arg33[%c8_224, %c32_225], %885 {strides = array<i32>} : memref<16x64xf32, #tpu.memory_space<vmem>>, vector<2x32xf32>,
    %887 = vector.extract_strided_slice %808 {offsets = [6, 0], sizes = [2, 128], strides = [1, 1]} : vector<16x128xf32> to vector<2x128xf32>
    %cst_226 = arith.constant dense<0.000000e+00> : vector<2x128xf32>
    %888 = tpu.matmul %885, %803, %cst_226 {dimension_numbers = #tpu.dot_dimension_numbers<[1], [0], [0], [1], [0, 0, 1, 1], [], []>} : vector<2x32xf32>, vector<32x128xf32>, vector<2x128xf32> -> vector<2x128xf32>
    %889 = arith.addf %887, %888 : vector<2x128xf32>
    %890 = arith.negf %889 : vector<2x128xf32>
    %891 = math.exp %890 : vector<2x128xf32>
    %cst_227 = arith.constant 1.000000e+00 : f32
    %892 = vector.broadcast %cst_227 : f32 to vector<2x128xf32>
    %893 = arith.addf %892, %891 : vector<2x128xf32>
    %894 = arith.divf %892, %893 : vector<2x128xf32>
    %895 = math.tanh %889 : vector<2x128xf32>
    %896 = vector.extract_strided_slice %894 {offsets = [0, 0], sizes = [2, 32], strides = [1, 1]} : vector<2x128xf32> to vector<2x32xf32>
    %897 = vector.extract_strided_slice %894 {offsets = [0, 32], sizes = [2, 32], strides = [1, 1]} : vector<2x128xf32> to vector<2x32xf32>
    %898 = vector.extract_strided_slice %895 {offsets = [0, 64], sizes = [2, 32], strides = [1, 1]} : vector<2x128xf32> to vector<2x32xf32>
    %899 = vector.extract_strided_slice %894 {offsets = [0, 96], sizes = [2, 32], strides = [1, 1]} : vector<2x128xf32> to vector<2x32xf32>
    %900 = arith.mulf %897, %883 : vector<2x32xf32>
    %901 = arith.mulf %896, %898 : vector<2x32xf32>
    %902 = arith.addf %900, %901 : vector<2x32xf32>
    %903 = math.tanh %902 : vector<2x32xf32>
    %904 = arith.mulf %899, %903 : vector<2x32xf32>
    %c6_228 = arith.constant 6 : index
    %c32_229 = arith.constant 32 : index
    %905 = vector.load %arg33[%c6_228, %c32_229] : memref<16x64xf32, #tpu.memory_space<vmem>>, vector<2x32xf32>
    tpu.vector_store %arg33[%c6_228, %c32_229], %904 {strides = array<i32>} : memref<16x64xf32, #tpu.memory_space<vmem>>, vector<2x32xf32>,
    %906 = vector.extract_strided_slice %808 {offsets = [4, 0], sizes = [2, 128], strides = [1, 1]} : vector<16x128xf32> to vector<2x128xf32>
    %cst_230 = arith.constant dense<0.000000e+00> : vector<2x128xf32>
    %907 = tpu.matmul %904, %803, %cst_230 {dimension_numbers = #tpu.dot_dimension_numbers<[1], [0], [0], [1], [0, 0, 1, 1], [], []>} : vector<2x32xf32>, vector<32x128xf32>, vector<2x128xf32> -> vector<2x128xf32>
    %908 = arith.addf %906, %907 : vector<2x128xf32>
    %909 = arith.negf %908 : vector<2x128xf32>
    %910 = math.exp %909 : vector<2x128xf32>
    %cst_231 = arith.constant 1.000000e+00 : f32
    %911 = vector.broadcast %cst_231 : f32 to vector<2x128xf32>
    %912 = arith.addf %911, %910 : vector<2x128xf32>
    %913 = arith.divf %911, %912 : vector<2x128xf32>
    %914 = math.tanh %908 : vector<2x128xf32>
    %915 = vector.extract_strided_slice %913 {offsets = [0, 0], sizes = [2, 32], strides = [1, 1]} : vector<2x128xf32> to vector<2x32xf32>
    %916 = vector.extract_strided_slice %913 {offsets = [0, 32], sizes = [2, 32], strides = [1, 1]} : vector<2x128xf32> to vector<2x32xf32>
    %917 = vector.extract_strided_slice %914 {offsets = [0, 64], sizes = [2, 32], strides = [1, 1]} : vector<2x128xf32> to vector<2x32xf32>
    %918 = vector.extract_strided_slice %913 {offsets = [0, 96], sizes = [2, 32], strides = [1, 1]} : vector<2x128xf32> to vector<2x32xf32>
    %919 = arith.mulf %916, %902 : vector<2x32xf32>
    %920 = arith.mulf %915, %917 : vector<2x32xf32>
    %921 = arith.addf %919, %920 : vector<2x32xf32>
    %922 = math.tanh %921 : vector<2x32xf32>
    %923 = arith.mulf %918, %922 : vector<2x32xf32>
    %c4_232 = arith.constant 4 : index
    %c32_233 = arith.constant 32 : index
    %924 = vector.load %arg33[%c4_232, %c32_233] : memref<16x64xf32, #tpu.memory_space<vmem>>, vector<2x32xf32>
    tpu.vector_store %arg33[%c4_232, %c32_233], %923 {strides = array<i32>} : memref<16x64xf32, #tpu.memory_space<vmem>>, vector<2x32xf32>,
    %925 = vector.extract_strided_slice %808 {offsets = [2, 0], sizes = [2, 128], strides = [1, 1]} : vector<16x128xf32> to vector<2x128xf32>
    %cst_234 = arith.constant dense<0.000000e+00> : vector<2x128xf32>
    %926 = tpu.matmul %923, %803, %cst_234 {dimension_numbers = #tpu.dot_dimension_numbers<[1], [0], [0], [1], [0, 0, 1, 1], [], []>} : vector<2x32xf32>, vector<32x128xf32>, vector<2x128xf32> -> vector<2x128xf32>
    %927 = arith.addf %925, %926 : vector<2x128xf32>
    %928 = arith.negf %927 : vector<2x128xf32>
    %929 = math.exp %928 : vector<2x128xf32>
    %cst_235 = arith.constant 1.000000e+00 : f32
    %930 = vector.broadcast %cst_235 : f32 to vector<2x128xf32>
    %931 = arith.addf %930, %929 : vector<2x128xf32>
    %932 = arith.divf %930, %931 : vector<2x128xf32>
    %933 = math.tanh %927 : vector<2x128xf32>
    %934 = vector.extract_strided_slice %932 {offsets = [0, 0], sizes = [2, 32], strides = [1, 1]} : vector<2x128xf32> to vector<2x32xf32>
    %935 = vector.extract_strided_slice %932 {offsets = [0, 32], sizes = [2, 32], strides = [1, 1]} : vector<2x128xf32> to vector<2x32xf32>
    %936 = vector.extract_strided_slice %933 {offsets = [0, 64], sizes = [2, 32], strides = [1, 1]} : vector<2x128xf32> to vector<2x32xf32>
    %937 = vector.extract_strided_slice %932 {offsets = [0, 96], sizes = [2, 32], strides = [1, 1]} : vector<2x128xf32> to vector<2x32xf32>
    %938 = arith.mulf %935, %921 : vector<2x32xf32>
    %939 = arith.mulf %934, %936 : vector<2x32xf32>
    %940 = arith.addf %938, %939 : vector<2x32xf32>
    %941 = math.tanh %940 : vector<2x32xf32>
    %942 = arith.mulf %937, %941 : vector<2x32xf32>
    %c2_236 = arith.constant 2 : index
    %c32_237 = arith.constant 32 : index
    %943 = vector.load %arg33[%c2_236, %c32_237] : memref<16x64xf32, #tpu.memory_space<vmem>>, vector<2x32xf32>
    tpu.vector_store %arg33[%c2_236, %c32_237], %942 {strides = array<i32>} : memref<16x64xf32, #tpu.memory_space<vmem>>, vector<2x32xf32>,
    %944 = vector.extract_strided_slice %808 {offsets = [0, 0], sizes = [2, 128], strides = [1, 1]} : vector<16x128xf32> to vector<2x128xf32>
    %cst_238 = arith.constant dense<0.000000e+00> : vector<2x128xf32>
    %945 = tpu.matmul %942, %803, %cst_238 {dimension_numbers = #tpu.dot_dimension_numbers<[1], [0], [0], [1], [0, 0, 1, 1], [], []>} : vector<2x32xf32>, vector<32x128xf32>, vector<2x128xf32> -> vector<2x128xf32>
    %946 = arith.addf %944, %945 : vector<2x128xf32>
    %947 = arith.negf %946 : vector<2x128xf32>
    %948 = math.exp %947 : vector<2x128xf32>
    %cst_239 = arith.constant 1.000000e+00 : f32
    %949 = vector.broadcast %cst_239 : f32 to vector<2x128xf32>
    %950 = arith.addf %949, %948 : vector<2x128xf32>
    %951 = arith.divf %949, %950 : vector<2x128xf32>
    %952 = math.tanh %946 : vector<2x128xf32>
    %953 = vector.extract_strided_slice %951 {offsets = [0, 0], sizes = [2, 32], strides = [1, 1]} : vector<2x128xf32> to vector<2x32xf32>
    %954 = vector.extract_strided_slice %951 {offsets = [0, 32], sizes = [2, 32], strides = [1, 1]} : vector<2x128xf32> to vector<2x32xf32>
    %955 = vector.extract_strided_slice %952 {offsets = [0, 64], sizes = [2, 32], strides = [1, 1]} : vector<2x128xf32> to vector<2x32xf32>
    %956 = vector.extract_strided_slice %951 {offsets = [0, 96], sizes = [2, 32], strides = [1, 1]} : vector<2x128xf32> to vector<2x32xf32>
    %957 = arith.mulf %954, %940 : vector<2x32xf32>
    %958 = arith.mulf %953, %955 : vector<2x32xf32>
    %959 = arith.addf %957, %958 : vector<2x32xf32>
    %960 = math.tanh %959 : vector<2x32xf32>
    %961 = arith.mulf %956, %960 : vector<2x32xf32>
    %c0_240 = arith.constant 0 : index
    %c32_241 = arith.constant 32 : index
    %962 = vector.load %arg33[%c0_240, %c32_241] : memref<16x64xf32, #tpu.memory_space<vmem>>, vector<2x32xf32>
    tpu.vector_store %arg33[%c0_240, %c32_241], %961 {strides = array<i32>} : memref<16x64xf32, #tpu.memory_space<vmem>>, vector<2x32xf32>,
    %c0_242 = arith.constant 0 : index
    %c0_243 = arith.constant 0 : index
    %963 = vector.load %arg33[%c0_242, %c0_243] : memref<16x64xf32, #tpu.memory_space<vmem>>, vector<16x64xf32>
    %c0_244 = arith.constant 0 : index
    %c0_245 = arith.constant 0 : index
    %964 = vector.load %arg19[%c0_244, %c0_245] : memref<64x64xf32, #tpu.memory_space<vmem>>, vector<64x64xf32>
    %cst_246 = arith.constant dense<0.000000e+00> : vector<16x64xf32>
    %965 = tpu.matmul %963, %964, %cst_246 {dimension_numbers = #tpu.dot_dimension_numbers<[1], [0], [0], [1], [0, 0, 1, 1], [], []>} : vector<16x64xf32>, vector<64x64xf32>, vector<16x64xf32> -> vector<16x64xf32>
    %c0_247 = arith.constant 0 : index
    %c0_248 = arith.constant 0 : index
    %966 = vector.load %arg20[%c0_247, %c0_248] : memref<1x64xf32, #tpu.memory_space<vmem>>, vector<1x64xf32>
    %967 = vector.broadcast %966 : vector<1x64xf32> to vector<16x64xf32>
    %968 = arith.addf %965, %967 : vector<16x64xf32>
    %969 = math.tanh %968 : vector<16x64xf32>
    %c0_249 = arith.constant 0 : index
    %c0_250 = arith.constant 0 : index
    %970 = vector.load %arg21[%c0_249, %c0_250] : memref<1x64xf32, #tpu.memory_space<vmem>>, vector<1x64xf32>
    %971 = vector.broadcast %970 : vector<1x64xf32> to vector<16x64xf32>
    %972 = arith.mulf %969, %971 : vector<16x64xf32>
    %cst_251 = arith.constant dense<0.000000e+00> : vector<16xf32>
    %973 = vector.multi_reduction <add>, %972, %cst_251 [1] : vector<16x64xf32> to vector<16xf32>
    %974 = vector.shape_cast %973 : vector<16xf32> to vector<16x1xf32>
    %c0_252 = arith.constant 0 : index
    %c0_253 = arith.constant 0 : index
    %975 = vector.load %arg22[%c0_252, %c0_253] : memref<1x1xf32, #tpu.memory_space<vmem>>, vector<1x1xf32>
    %976 = vector.broadcast %975 : vector<1x1xf32> to vector<16x1xf32>
    %977 = arith.addf %974, %976 : vector<16x1xf32>
    %978 = vector.extract_strided_slice %977 {offsets = [0, 0], sizes = [2, 1], strides = [1, 1]} : vector<16x1xf32> to vector<2x1xf32>
    %c0_254 = arith.constant 0 : index
    %c0_255 = arith.constant 0 : index
    %979 = vector.load %arg30[%c0_254, %c0_255] : memref<2x8xf32, #tpu.memory_space<vmem>>, vector<2x1xf32>
    tpu.vector_store %arg30[%c0_254, %c0_255], %978 {strides = array<i32>} : memref<2x8xf32, #tpu.memory_space<vmem>>, vector<2x1xf32>,
    %980 = vector.extract_strided_slice %977 {offsets = [2, 0], sizes = [2, 1], strides = [1, 1]} : vector<16x1xf32> to vector<2x1xf32>
    %c0_256 = arith.constant 0 : index
    %c1 = arith.constant 1 : index
    %981 = vector.load %arg30[%c0_256, %c1] : memref<2x8xf32, #tpu.memory_space<vmem>>, vector<2x1xf32>
    tpu.vector_store %arg30[%c0_256, %c1], %980 {strides = array<i32>} : memref<2x8xf32, #tpu.memory_space<vmem>>, vector<2x1xf32>,
    %982 = vector.extract_strided_slice %977 {offsets = [4, 0], sizes = [2, 1], strides = [1, 1]} : vector<16x1xf32> to vector<2x1xf32>
    %c0_257 = arith.constant 0 : index
    %c2_258 = arith.constant 2 : index
    %983 = vector.load %arg30[%c0_257, %c2_258] : memref<2x8xf32, #tpu.memory_space<vmem>>, vector<2x1xf32>
    tpu.vector_store %arg30[%c0_257, %c2_258], %982 {strides = array<i32>} : memref<2x8xf32, #tpu.memory_space<vmem>>, vector<2x1xf32>,
    %984 = vector.extract_strided_slice %977 {offsets = [6, 0], sizes = [2, 1], strides = [1, 1]} : vector<16x1xf32> to vector<2x1xf32>
    %c0_259 = arith.constant 0 : index
    %c3 = arith.constant 3 : index
    %985 = vector.load %arg30[%c0_259, %c3] : memref<2x8xf32, #tpu.memory_space<vmem>>, vector<2x1xf32>
    tpu.vector_store %arg30[%c0_259, %c3], %984 {strides = array<i32>} : memref<2x8xf32, #tpu.memory_space<vmem>>, vector<2x1xf32>,
    %986 = vector.extract_strided_slice %977 {offsets = [8, 0], sizes = [2, 1], strides = [1, 1]} : vector<16x1xf32> to vector<2x1xf32>
    %c0_260 = arith.constant 0 : index
    %c4_261 = arith.constant 4 : index
    %987 = vector.load %arg30[%c0_260, %c4_261] : memref<2x8xf32, #tpu.memory_space<vmem>>, vector<2x1xf32>
    tpu.vector_store %arg30[%c0_260, %c4_261], %986 {strides = array<i32>} : memref<2x8xf32, #tpu.memory_space<vmem>>, vector<2x1xf32>,
    %988 = vector.extract_strided_slice %977 {offsets = [10, 0], sizes = [2, 1], strides = [1, 1]} : vector<16x1xf32> to vector<2x1xf32>
    %c0_262 = arith.constant 0 : index
    %c5 = arith.constant 5 : index
    %989 = vector.load %arg30[%c0_262, %c5] : memref<2x8xf32, #tpu.memory_space<vmem>>, vector<2x1xf32>
    tpu.vector_store %arg30[%c0_262, %c5], %988 {strides = array<i32>} : memref<2x8xf32, #tpu.memory_space<vmem>>, vector<2x1xf32>,
    %990 = vector.extract_strided_slice %977 {offsets = [12, 0], sizes = [2, 1], strides = [1, 1]} : vector<16x1xf32> to vector<2x1xf32>
    %c0_263 = arith.constant 0 : index
    %c6_264 = arith.constant 6 : index
    %991 = vector.load %arg30[%c0_263, %c6_264] : memref<2x8xf32, #tpu.memory_space<vmem>>, vector<2x1xf32>
    tpu.vector_store %arg30[%c0_263, %c6_264], %990 {strides = array<i32>} : memref<2x8xf32, #tpu.memory_space<vmem>>, vector<2x1xf32>,
    %992 = vector.extract_strided_slice %977 {offsets = [14, 0], sizes = [2, 1], strides = [1, 1]} : vector<16x1xf32> to vector<2x1xf32>
    %c0_265 = arith.constant 0 : index
    %c7 = arith.constant 7 : index
    %993 = vector.load %arg30[%c0_265, %c7] : memref<2x8xf32, #tpu.memory_space<vmem>>, vector<2x1xf32>
    tpu.vector_store %arg30[%c0_265, %c7], %992 {strides = array<i32>} : memref<2x8xf32, #tpu.memory_space<vmem>>, vector<2x1xf32>,
    %c0_266 = arith.constant 0 : index
    %c0_267 = arith.constant 0 : index
    %994 = vector.load %arg30[%c0_266, %c0_267] : memref<2x8xf32, #tpu.memory_space<vmem>>, vector<2x8xf32>
    %cst_268 = arith.constant dense<0xFF800000> : vector<2xf32>
    %995 = vector.multi_reduction <maximumf>, %994, %cst_268 [1] : vector<2x8xf32> to vector<2xf32>
    %996 = vector.shape_cast %995 : vector<2xf32> to vector<2x1xf32>
    %997 = vector.broadcast %996 : vector<2x1xf32> to vector<2x8xf32>
    %998 = arith.subf %994, %997 : vector<2x8xf32>
    %999 = math.exp %998 : vector<2x8xf32>
    %cst_269 = arith.constant dense<0.000000e+00> : vector<2xf32>
    %1000 = vector.multi_reduction <add>, %999, %cst_269 [1] : vector<2x8xf32> to vector<2xf32>
    %1001 = vector.shape_cast %1000 : vector<2xf32> to vector<2x1xf32>
    %1002 = vector.broadcast %1001 : vector<2x1xf32> to vector<2x8xf32>
    %1003 = arith.divf %999, %1002 : vector<2x8xf32>
    %c0_270 = arith.constant 0 : index
    %c0_271 = arith.constant 0 : index
    %1004 = vector.load %arg30[%c0_270, %c0_271] : memref<2x8xf32, #tpu.memory_space<vmem>>, vector<2x8xf32>
    tpu.vector_store %arg30[%c0_270, %c0_271], %1003 {strides = array<i32>} : memref<2x8xf32, #tpu.memory_space<vmem>>, vector<2x8xf32>,
    %cst_272 = arith.constant 0.000000e+00 : f32
    %1005 = vector.broadcast %cst_272 : f32 to vector<2x64xf32>
    %1006 = vector.extract_strided_slice %1003 {offsets = [0, 0], sizes = [2, 1], strides = [1, 1]} : vector<2x8xf32> to vector<2x1xf32>
    %1007 = vector.extract_strided_slice %963 {offsets = [0, 0], sizes = [2, 64], strides = [1, 1]} : vector<16x64xf32> to vector<2x64xf32>
    %1008 = vector.broadcast %1006 : vector<2x1xf32> to vector<2x64xf32>
    %1009 = arith.mulf %1008, %1007 : vector<2x64xf32>
    %1010 = arith.addf %1005, %1009 : vector<2x64xf32>
    %1011 = vector.extract_strided_slice %1003 {offsets = [0, 1], sizes = [2, 1], strides = [1, 1]} : vector<2x8xf32> to vector<2x1xf32>
    %1012 = vector.extract_strided_slice %963 {offsets = [2, 0], sizes = [2, 64], strides = [1, 1]} : vector<16x64xf32> to vector<2x64xf32>
    %1013 = vector.broadcast %1011 : vector<2x1xf32> to vector<2x64xf32>
    %1014 = arith.mulf %1013, %1012 : vector<2x64xf32>
    %1015 = arith.addf %1010, %1014 : vector<2x64xf32>
    %1016 = vector.extract_strided_slice %1003 {offsets = [0, 2], sizes = [2, 1], strides = [1, 1]} : vector<2x8xf32> to vector<2x1xf32>
    %1017 = vector.extract_strided_slice %963 {offsets = [4, 0], sizes = [2, 64], strides = [1, 1]} : vector<16x64xf32> to vector<2x64xf32>
    %1018 = vector.broadcast %1016 : vector<2x1xf32> to vector<2x64xf32>
    %1019 = arith.mulf %1018, %1017 : vector<2x64xf32>
    %1020 = arith.addf %1015, %1019 : vector<2x64xf32>
    %1021 = vector.extract_strided_slice %1003 {offsets = [0, 3], sizes = [2, 1], strides = [1, 1]} : vector<2x8xf32> to vector<2x1xf32>
    %1022 = vector.extract_strided_slice %963 {offsets = [6, 0], sizes = [2, 64], strides = [1, 1]} : vector<16x64xf32> to vector<2x64xf32>
    %1023 = vector.broadcast %1021 : vector<2x1xf32> to vector<2x64xf32>
    %1024 = arith.mulf %1023, %1022 : vector<2x64xf32>
    %1025 = arith.addf %1020, %1024 : vector<2x64xf32>
    %1026 = vector.extract_strided_slice %1003 {offsets = [0, 4], sizes = [2, 1], strides = [1, 1]} : vector<2x8xf32> to vector<2x1xf32>
    %1027 = vector.extract_strided_slice %963 {offsets = [8, 0], sizes = [2, 64], strides = [1, 1]} : vector<16x64xf32> to vector<2x64xf32>
    %1028 = vector.broadcast %1026 : vector<2x1xf32> to vector<2x64xf32>
    %1029 = arith.mulf %1028, %1027 : vector<2x64xf32>
    %1030 = arith.addf %1025, %1029 : vector<2x64xf32>
    %1031 = vector.extract_strided_slice %1003 {offsets = [0, 5], sizes = [2, 1], strides = [1, 1]} : vector<2x8xf32> to vector<2x1xf32>
    %1032 = vector.extract_strided_slice %963 {offsets = [10, 0], sizes = [2, 64], strides = [1, 1]} : vector<16x64xf32> to vector<2x64xf32>
    %1033 = vector.broadcast %1031 : vector<2x1xf32> to vector<2x64xf32>
    %1034 = arith.mulf %1033, %1032 : vector<2x64xf32>
    %1035 = arith.addf %1030, %1034 : vector<2x64xf32>
    %1036 = vector.extract_strided_slice %1003 {offsets = [0, 6], sizes = [2, 1], strides = [1, 1]} : vector<2x8xf32> to vector<2x1xf32>
    %1037 = vector.extract_strided_slice %963 {offsets = [12, 0], sizes = [2, 64], strides = [1, 1]} : vector<16x64xf32> to vector<2x64xf32>
    %1038 = vector.broadcast %1036 : vector<2x1xf32> to vector<2x64xf32>
    %1039 = arith.mulf %1038, %1037 : vector<2x64xf32>
    %1040 = arith.addf %1035, %1039 : vector<2x64xf32>
    %1041 = vector.extract_strided_slice %1003 {offsets = [0, 7], sizes = [2, 1], strides = [1, 1]} : vector<2x8xf32> to vector<2x1xf32>
    %1042 = vector.extract_strided_slice %963 {offsets = [14, 0], sizes = [2, 64], strides = [1, 1]} : vector<16x64xf32> to vector<2x64xf32>
    %1043 = vector.broadcast %1041 : vector<2x1xf32> to vector<2x64xf32>
    %1044 = arith.mulf %1043, %1042 : vector<2x64xf32>
    %1045 = arith.addf %1040, %1044 : vector<2x64xf32>
    %c0_273 = arith.constant 0 : index
    %c0_274 = arith.constant 0 : index
    %1046 = vector.load %arg23[%c0_273, %c0_274] : memref<64x32xf32, #tpu.memory_space<vmem>>, vector<64x32xf32>
    %cst_275 = arith.constant dense<0.000000e+00> : vector<2x32xf32>
    %1047 = tpu.matmul %1045, %1046, %cst_275 {dimension_numbers = #tpu.dot_dimension_numbers<[1], [0], [0], [1], [0, 0, 1, 1], [], []>} : vector<2x64xf32>, vector<64x32xf32>, vector<2x32xf32> -> vector<2x32xf32>
    %c0_276 = arith.constant 0 : index
    %c0_277 = arith.constant 0 : index
    %1048 = vector.load %arg24[%c0_276, %c0_277] : memref<1x32xf32, #tpu.memory_space<vmem>>, vector<1x32xf32>
    %1049 = vector.broadcast %1048 : vector<1x32xf32> to vector<2x32xf32>
    %1050 = arith.addf %1047, %1049 : vector<2x32xf32>
    %cst_278 = arith.constant 0.000000e+00 : f32
    %1051 = vector.broadcast %cst_278 : f32 to vector<2x32xf32>
    %1052 = arith.maximumf %1050, %1051 : vector<2x32xf32>
    %c0_279 = arith.constant 0 : index
    %c0_280 = arith.constant 0 : index
    %1053 = vector.load %arg25[%c0_279, %c0_280] : memref<32x16xf32, #tpu.memory_space<vmem>>, vector<32x16xf32>
    %cst_281 = arith.constant dense<0.000000e+00> : vector<2x16xf32>
    %1054 = tpu.matmul %1052, %1053, %cst_281 {dimension_numbers = #tpu.dot_dimension_numbers<[1], [0], [0], [1], [0, 0, 1, 1], [], []>} : vector<2x32xf32>, vector<32x16xf32>, vector<2x16xf32> -> vector<2x16xf32>
    %c0_282 = arith.constant 0 : index
    %c0_283 = arith.constant 0 : index
    %1055 = vector.load %arg26[%c0_282, %c0_283] : memref<1x16xf32, #tpu.memory_space<vmem>>, vector<1x16xf32>
    %1056 = vector.broadcast %1055 : vector<1x16xf32> to vector<2x16xf32>
    %1057 = arith.addf %1054, %1056 : vector<2x16xf32>
    %cst_284 = arith.constant 0.000000e+00 : f32
    %1058 = vector.broadcast %cst_284 : f32 to vector<2x16xf32>
    %1059 = arith.maximumf %1057, %1058 : vector<2x16xf32>
    %c0_285 = arith.constant 0 : index
    %c0_286 = arith.constant 0 : index
    %1060 = vector.load %arg27[%c0_285, %c0_286] : memref<16x1xf32, #tpu.memory_space<vmem>>, vector<16x1xf32>
    %cst_287 = arith.constant dense<0.000000e+00> : vector<2x1xf32>
    %1061 = tpu.matmul %1059, %1060, %cst_287 {dimension_numbers = #tpu.dot_dimension_numbers<[1], [0], [0], [1], [0, 0, 1, 1], [], []>} : vector<2x16xf32>, vector<16x1xf32>, vector<2x1xf32> -> vector<2x1xf32>
    %c0_288 = arith.constant 0 : index
    %c0_289 = arith.constant 0 : index
    %1062 = vector.load %arg28[%c0_288, %c0_289] : memref<1x1xf32, #tpu.memory_space<vmem>>, vector<1x1xf32>
    %1063 = vector.broadcast %1062 : vector<1x1xf32> to vector<2x1xf32>
    %1064 = arith.addf %1061, %1063 : vector<2x1xf32>
    %c0_290 = arith.constant 0 : index
    %c0_291 = arith.constant 0 : index
    %1065 = vector.load %arg29[%c0_290, %c0_291] : memref<2x1xf32, #tpu.memory_space<vmem>>, vector<2x1xf32>
    tpu.vector_store %arg29[%c0_290, %c0_291], %1064 {strides = array<i32>} : memref<2x1xf32, #tpu.memory_space<vmem>>, vector<2x1xf32>,
    return
  }
}

</mosaic_0001>

<bundles_post_ra>
// kernel: forward.1
= control target key start
LH: loop header
LB: loop body
LE: loop exit
PB: predicated region body
PF: predicated region fallthrough
CT: control target
= control target key end

     0   :  { %s5439_s6 = smov 1   ;;  %s5440_s10 = smov 2   ;;  %s6689_s0 = inlined_call_operand.smem [shape: u32[31], index: -1, kind: input, shape index: {}] }
   0x1   :  { %s5514_s5 = sld [smem:[%s6689_s0]]   ;;  %s5441_s14 = smov 3  }
   0x2   :  { %s5519_s9 = sld [smem:[%s6689_s0 + %s5439_s6]]   ;;  %s5442_s18 = smov 4  }
   0x3   :  { %s5524_s13 = sld [smem:[%s6689_s0 + %s5440_s10]]   ;;  %s5443_s22 = smov 5  }
   0x4   :  { %s5529_s17 = sld [smem:[%s6689_s0 + %s5441_s14]]   ;;  %s5444_s26 = smov 6  }
   0x5   :  { %s5534_s21 = sld [smem:[%s6689_s0 + %s5442_s18]]   ;;  %s5445_s30 = smov 7  }
   0x6   :  { %s5539_s25 = sld [smem:[%s6689_s0 + %s5443_s22]]   ;;  %s5446_s4 = smov 8  }
   0x7   :  { %6700 = sst [smem:[#allocation44_spill]] %s5514_s5  ;;  %s5447_s10 = smov 9  }
   0x8   :  { %s5544_s29 = sld [smem:[%s6689_s0 + %s5444_s26]]   ;;  %s5448_s15 = smov 10  }
   0x9   :  { %s5549_s3 = sld [smem:[%s6689_s0 + %s5445_s30]]   ;;  %s5449_s20 = smov 11  }
   0xa   :  { %6701 = sst [smem:[#allocation45_spill]] %s5529_s17  ;;  %s5450_s26 = smov 12  }
   0xb   :  { %s5554_s8 = sld [smem:[%s6689_s0 + %s5446_s4]]   ;;  %s5451_s1 = smov 13  }
   0xc   :  { %s5559_s14 = sld [smem:[%s6689_s0 + %s5447_s10]]   ;;  %s5452_s7 = smov 14  }
   0xd   :  { %s5564_s19 = sld [smem:[%s6689_s0 + %s5448_s15]]   ;;  %s5453_s15 = smov 15  }
   0xe   :  { %6702 = sst [smem:[#allocation46_spill]] %s5544_s29  ;;  %s5454_s22 = smov 16  }
   0xf   :  { %6703 = sst [smem:[#allocation47_spill]] %s5549_s3  ;;  %s5455_s28 = smov 17  }
  0x10   :  { %s5569_s24 = sld [smem:[%s6689_s0 + %s5449_s20]]   ;;  %s5461_s16 = smov 23  }
  0x11   :  { %s5574_s30 = sld [smem:[%s6689_s0 + %s5450_s26]]   ;;  %s5462_s23 = smov 24  }
  0x12   :  { %6704 = sst [smem:[#allocation48_spill]] %s5559_s14  ;;  %s5464_s10 = smov 26  }
  0x13   :  { %6705 = sst [smem:[#allocation49_spill]] %s5564_s19 }
  0x14   :  { %s5579_s6 = sld [smem:[%s6689_s0 + %s5451_s1]]   ;;  %s5463_s1 = smov 25  }
  0x15   :  { %s5584_s12 = sld [smem:[%s6689_s0 + %s5452_s7]]   ;;  %s5456_s7 = smov 18  }
  0x16   :  { %s5589_s20 = sld [smem:[%s6689_s0 + %s5453_s15]]   ;;  %s5457_s15 = smov 19  }
  0x17   :  { %s5594_s27 = sld [smem:[%s6689_s0 + %s5454_s22]]   ;;  %s5458_s22 = smov 20  }
  0x18   :  { %s5599_s4 = sld [smem:[%s6689_s0 + %s5455_s28]]   ;;  %s5459_s28 = smov 21  }
  0x19   :  { %s5609_s19 = sld [smem:[%s6689_s0 + %s5457_s15]]  }
  0x1a   :  { %s5614_s14 = sld [smem:[%s6689_s0 + %s5458_s22]]  }
  0x1b   :  { %6706 = sst [smem:[#allocation50_spill]] %s5584_s12 }
  0x1c   :  { %s5604_s12 = sld [smem:[%s6689_s0 + %s5456_s7]]   ;;  %s5460_s7 = smov 22  }
  0x1d   :  { %s5619_s3 = sld [smem:[%s6689_s0 + %s5459_s28]]  }
  0x1e   :  { %s5627_s29 = sld [smem:[%s6689_s0 + %s5461_s16]]   ;;  %s5465_s16 = smov 27  }
  0x1f   :  { %s5632_s17 = sld [smem:[%s6689_s0 + %s5462_s23]]   ;;  %s5466_s23 = smov 29  }
  0x20   :  { %6708 = sst [smem:[#allocation52_spill]] %s5614_s14 }
  0x21   :  { %s5637_s5 = sld [smem:[%s6689_s0 + %s5463_s1]]   ;;  %s5467_s1 = smov 30  }
  0x22   :  { %6707 = sst [smem:[#allocation51_spill]] %s5604_s12 }
  0x23   :  { %s4414_s12 = sld [smem:[%s6689_s0 + %s5460_s7]]  }
  0x24   :  { %6709 = sst [smem:[#allocation53_spill]] %s5627_s29 }
  0x25   :  { %6710 = sst [smem:[#allocation54_spill]] %s5632_s17 }
  0x26   :  { %s5642_s14 = sld [smem:[%s6689_s0 + %s5464_s10]]   ;;  %s5468_s10 = smov 28  }
  0x27   :  { %6711 = sst [smem:[#allocation55_spill]] %s5637_s5 }
  0x28   :  { %s5647_s29 = sld [smem:[%s6689_s0 + %s5465_s16]]  }
  0x29   :  { %s5652_s17 = sld [smem:[%s6689_s0 + %s5466_s23]]   ;;  %v67_v0 = vstv %s4414_s12 }
  0x2a   :  { %s5657_s7 = sld [smem:[%s6689_s0 + %s5467_s1]]   ;;  %68 = vst [vmem:[#allocation5] sm:$0x1] %v67_v0 }
  0x2b   :  { %s4420_s16 = sld [smem:[%s6689_s0 + %s5468_s10]]  }
  0x31   :  { %v69_v1 = vstv %s4420_s16 }
  0x32   :  { %70 = vst [vmem:[#allocation6] sm:$0x1] %v69_v1 }
  0x33   :  { %71 = vsyncpa [#allocation8], 0 }
  0x34   :  { %72 = vsyncpa [#allocation11], 0 }
  0x35   :  { %73 = vsyncpa [#allocation14], 0 }
  0x36   :  { %74 = vsyncpa [#allocation17], 0 }
  0x37   :  { %75 = vsyncpa [#allocation20], 0 }
  0x38   :  { %76 = vsyncpa [#allocation23], 0 }
  0x39   :  { %77 = vsyncpa [#allocation26], 0 }
  0x3a   :  { %78 = vsyncpa [#allocation29], 0 }
  0x3b   :  { %79 = vsyncpa [#allocation32], 0  ;;  %s98_s12 = sshll.u32 %s5524_s13, 4  ;;  %s99_s12 = int_to_ptr.hbm [resolvable:$true] %s98_s12 }
  0x3c   :  { %80 = vsyncpa [#allocation9], 0  ;;  %s5469_s5 = smov [#allocation10]   ;;  %s124_s15 = sshll.u32 %s5539_s25, 4  ;;  %s125_s15 = int_to_ptr.hbm [resolvable:$true] %s124_s15 }
  0x3d   :  { %s100_s0 = sshll.u32 %s5469_s5, 4  ;;  %s5011_s18 = sshra.s32 %s99_s12, 4  ;;  %s101_s0 = int_to_ptr.vmem [resolvable:$true] %s100_s0  ;;  %s5012_s18 = int_to_ptr.hbm [resolvable:$true] %s5011_s18 }
  0x3e   :  { %s5013_s23 = scalar_lea.hbm %s5012_s18, 32  ;;  %s5015_s22 = scalar_lea.hbm %s5524_s13, 32 }
  0x3f   :  { %p5014_p0 = scmp.ne.s32.totalorder %s5012_s18, %s5013_s23  ;;  %p5016_p1 = scmp.lt.s32.totalorder %s5012_s18, %s5524_s13 }
  0x40   :  { %p5017_p2 = scmp.lt.s32.totalorder %s5015_s22, %s5013_s23 }
  0x42   :  { %p5018_p3 = por %p5017_p2, %p5016_p1 }
  0x44   :  { %p5019_p4 = pnand %p5018_p3, %p5014_p0 }
  0x46   :  { %5022 = shalt.err (!%p5019_p4)
}
  0x47   :  { %s5470_s26 = smov 128   ;;  %s5471_s1 = smov 8  }
  0x48   :  { %106 = dma.hbm_to_vmem [thread:$0]  %s99_s12, 512, %s101_s0, [#allocation11], %s5470_s26, %s5470_s26, %s5471_s1  }
  0x49   :  { %s5472_s28 = smov [#allocation13]   ;;  %s158_s10 = sshll.u32 %s5569_s24, 4  ;;  %s5670_s10 = int_to_ptr.hbm [resolvable:$true] %s158_s10 }
  0x4a   :  { %s126_s2 = sshll.u32 %s5472_s28, 4  ;;  %s5035_s13 = sshra.s32 %s125_s15, 4  ;;  %s127_s2 = int_to_ptr.vmem [resolvable:$true] %s126_s2  ;;  %s5036_s13 = int_to_ptr.hbm [resolvable:$true] %s5035_s13 }
  0x4b   :  { %s5037_s11 = scalar_lea.hbm %s5036_s13, 32  ;;  %s5039_s16 = scalar_lea.hbm %s5539_s25, 32 }
  0x4c   :  { %p5038_p5 = scmp.ne.s32.totalorder %s5036_s13, %s5037_s11  ;;  %p5040_p6 = scmp.lt.s32.totalorder %s5036_s13, %s5539_s25 }
  0x4d   :  { %p5041_p7 = scmp.lt.s32.totalorder %s5039_s16, %s5037_s11 }
  0x4f   :  { %p5042_p8 = por %p5041_p7, %p5040_p6 }
  0x51   :  { %p5043_p9 = pnand %p5042_p8, %p5038_p5 }
  0x53   :  { %5046 = shalt.err (!%p5043_p9)
}
  0x54   :  { %132 = dma.hbm_to_vmem [thread:$0]  %s125_s15, 512, %s127_s2, [#allocation14], %s5470_s26, %s5470_s26, %s5471_s1  }
  0x55   :  { %s182_s12 = sshll.u32 %s5579_s6, 4  ;;  %s5473_s5 = smov [#allocation16]   ;;  %s5678_s12 = int_to_ptr.hbm [resolvable:$true] %s182_s12 }
  0x56   :  { %s160_s0 = sshll.u32 %s5473_s5, 4  ;;  %s5059_s18 = sshra.s32 %s5670_s10, 4  ;;  %s161_s0 = int_to_ptr.vmem [resolvable:$true] %s160_s0  ;;  %s5060_s18 = int_to_ptr.hbm [resolvable:$true] %s5059_s18 }
  0x57   :  { %s5061_s25 = scalar_lea.hbm %s5060_s18, 32  ;;  %s5063_s23 = scalar_lea.hbm %s5569_s24, 32 }
  0x58   :  { %p5062_p10 = scmp.ne.s32.totalorder %s5060_s18, %s5061_s25  ;;  %p5064_p11 = scmp.lt.s32.totalorder %s5060_s18, %s5569_s24 }
  0x59   :  { %p5065_p12 = scmp.lt.s32.totalorder %s5063_s23, %s5061_s25 }
  0x5b   :  { %p5066_p13 = por %p5065_p12, %p5064_p11 }
  0x5d   :  { %p5067_p0 = pnand %p5066_p13, %p5062_p10 }
  0x5f   :  { %5070 = shalt.err (!%p5067_p0)
}
  0x60   :  { %166 = dma.hbm_to_vmem [thread:$0]  %s5670_s10, 512, %s161_s0, [#allocation17], %s5470_s26, %s5470_s26, %s5471_s1  }
  0x61   :  { %s5474_s15 = smov [#allocation19]   ;;  %s208_s28 = sshll.u32 %s5594_s27, 4  ;;  %s5688_s28 = int_to_ptr.hbm [resolvable:$true] %s208_s28 }
  0x62   :  { %s184_s22 = sshll.u32 %s5474_s15, 4  ;;  %s5083_s24 = sshra.s32 %s5678_s12, 4  ;;  %s185_s22 = int_to_ptr.vmem [resolvable:$true] %s184_s22  ;;  %s5084_s24 = int_to_ptr.hbm [resolvable:$true] %s5083_s24 }
  0x63   :  { %s5085_s2 = scalar_lea.hbm %s5084_s24, 64  ;;  %s5087_s13 = scalar_lea.hbm %s5579_s6, 64 }
  0x64   :  { %p5086_p1 = scmp.ne.s32.totalorder %s5084_s24, %s5085_s2  ;;  %p5088_p2 = scmp.lt.s32.totalorder %s5084_s24, %s5579_s6 }
  0x65   :  { %p5089_p3 = scmp.lt.s32.totalorder %s5087_s13, %s5085_s2 }
  0x67   :  { %p5090_p4 = por %p5089_p3, %p5088_p2 }
  0x69   :  { %p5091_p5 = pnand %p5090_p4, %p5086_p1 }
  0x6b   :  { %5094 = shalt.err (!%p5091_p5)
}
  0x6c   :  { %190 = dma.hbm_to_vmem [thread:$0]  %s5678_s12, 1024, %s185_s22, [#allocation20], %s5470_s26, %s5470_s26, %s5471_s1  }
  0x6d   :  { %s236_s10 = sshll.u32 %s5609_s19, 4  ;;  %s5475_s11 = smov [#allocation22]   ;;  %s5698_s10 = int_to_ptr.hbm [resolvable:$true] %s236_s10 }
  0x6e   :  { %s210_s16 = sshll.u32 %s5475_s11, 4  ;;  %s5107_s6 = sshra.s32 %s5688_s28, 4  ;;  %s211_s16 = int_to_ptr.vmem [resolvable:$true] %s210_s16  ;;  %s5108_s6 = int_to_ptr.hbm [resolvable:$true] %s5107_s6 }
  0x6f   :  { %s5109_s5 = scalar_lea.hbm %s5108_s6, 64  ;;  %s5111_s0 = scalar_lea.hbm %s5594_s27, 64 }
  0x70   :  { %p5110_p6 = scmp.ne.s32.totalorder %s5108_s6, %s5109_s5  ;;  %p5112_p7 = scmp.lt.s32.totalorder %s5108_s6, %s5594_s27 }
  0x71   :  { %p5113_p8 = scmp.lt.s32.totalorder %s5111_s0, %s5109_s5 }
  0x73   :  { %p5114_p9 = por %p5113_p8, %p5112_p7 }
  0x75   :  { %p5115_p10 = pnand %p5114_p9, %p5110_p6 }
  0x77   :  { %5118 = shalt.err (!%p5115_p10)
}
  0x78   :  { %216 = dma.hbm_to_vmem [thread:$0]  %s5688_s28, 1024, %s211_s16, [#allocation23], %s5470_s26, %s5470_s26, %s5471_s1  }
  0x79   :  { %s5476_s12 = smov [#allocation25]   ;;  %s261_s25 = sshll.u32 %s5619_s3, 4  ;;  %s262_s25 = int_to_ptr.hbm [resolvable:$true] %s261_s25 }
  0x7a   :  { %s238_s18 = sshll.u32 %s5476_s12, 4  ;;  %s5131_s23 = sshra.s32 %s5698_s10, 4  ;;  %s239_s18 = int_to_ptr.vmem [resolvable:$true] %s238_s18  ;;  %s5132_s23 = int_to_ptr.hbm [resolvable:$true] %s5131_s23 }
  0x7b   :  { %s5133_s27 = scalar_lea.hbm %s5132_s23, 64  ;;  %s5135_s15 = scalar_lea.hbm %s5609_s19, 64 }
  0x7c   :  { %p5134_p11 = scmp.ne.s32.totalorder %s5132_s23, %s5133_s27  ;;  %p5136_p12 = scmp.lt.s32.totalorder %s5132_s23, %s5609_s19 }
  0x7d   :  { %p5137_p13 = scmp.lt.s32.totalorder %s5135_s15, %s5133_s27 }
  0x7f   :  { %p5138_p0 = por %p5137_p13, %p5136_p12 }
  0x81   :  { %p5139_p1 = pnand %p5138_p0, %p5134_p11 }
  0x83   :  { %5142 = shalt.err (!%p5139_p1)
}
  0x84   :  { %244 = dma.hbm_to_vmem [thread:$0]  %s5698_s10, 1024, %s239_s18, [#allocation26], %s5470_s26, %s5470_s26, %s5471_s1  }
  0x85   :  { %s88_s22 = sshll.u32 %s5519_s9, 4  ;;  %s5477_s28 = smov [#allocation28]   ;;  %s89_s22 = int_to_ptr.hbm [resolvable:$true] %s88_s22 }
  0x86   :  { %s263_s24 = sshll.u32 %s5477_s28, 4  ;;  %s5155_s2 = sshra.s32 %s262_s25, 4  ;;  %s264_s24 = int_to_ptr.vmem [resolvable:$true] %s263_s24  ;;  %s5156_s2 = int_to_ptr.hbm [resolvable:$true] %s5155_s2 }
  0x87   :  { %s5157_s19 = scalar_lea.hbm %s5156_s2, 1  ;;  %s5159_s13 = scalar_lea.hbm %s5619_s3, 1 }
  0x88   :  { %p5158_p2 = scmp.ne.s32.totalorder %s5156_s2, %s5157_s19  ;;  %p5160_p3 = scmp.lt.s32.totalorder %s5156_s2, %s5619_s3 }
  0x89   :  { %p5161_p4 = scmp.lt.s32.totalorder %s5159_s13, %s5157_s19 }
  0x8b   :  { %p5162_p5 = por %p5161_p4, %p5160_p3 }
  0x8d   :  { %p5163_p6 = pnand %p5162_p5, %p5158_p2 }
  0x8f   :  { %5166 = shalt.err (!%p5163_p6)
}
  0x90   :  { %266 = dma.hbm_to_vmem [thread:$0]  %s262_s25, 16, %s264_s24, [#allocation29]  }
  0x91   :  { %s5478_s10 = smov [#allocation7]   ;;  %s114_s16 = sshll.u32 %s5534_s21, 4  ;;  %s115_s16 = int_to_ptr.hbm [resolvable:$true] %s114_s16 }
  0x92   :  { %s90_s11 = sshll.u32 %s5478_s10, 4  ;;  %s5179_s6 = sshra.s32 %s89_s22, 4  ;;  %s91_s11 = int_to_ptr.vmem [resolvable:$true] %s90_s11  ;;  %s5180_s6 = int_to_ptr.hbm [resolvable:$true] %s5179_s6 }
  0x93   :  { %s5181_s5 = scalar_lea.hbm %s5180_s6, 4  ;;  %s5183_s0 = scalar_lea.hbm %s5519_s9, 4 }
  0x94   :  { %p5182_p7 = scmp.ne.s32.totalorder %s5180_s6, %s5181_s5  ;;  %p5184_p8 = scmp.lt.s32.totalorder %s5180_s6, %s5519_s9 }
  0x95   :  { %p5185_p9 = scmp.lt.s32.totalorder %s5183_s0, %s5181_s5 }
  0x97   :  { %p5186_p10 = por %p5185_p9, %p5184_p8 }
  0x99   :  { %p5187_p11 = pnand %p5186_p10, %p5182_p7 }
  0x9b   :  { %5190 = shalt.err (!%p5187_p11)
}
  0x9c   :  { %93 = dma.hbm_to_vmem [thread:$0]  %s89_s22, 64, %s91_s11, [#allocation8]  }
  0x9d   :  { %s141_s3 = sshll.u32 %s5554_s8, 4  ;;  %s5479_s12 = smov [#allocation12]   ;;  %s5722_s3 = int_to_ptr.hbm [resolvable:$true] %s141_s3 }
  0x9e   :  { %s116_s18 = sshll.u32 %s5479_s12, 4  ;;  %s5203_s25 = sshra.s32 %s115_s16, 4  ;;  %s117_s18 = int_to_ptr.vmem [resolvable:$true] %s116_s18  ;;  %s5204_s25 = int_to_ptr.hbm [resolvable:$true] %s5203_s25 }
  0x9f   :  { %s5205_s23 = scalar_lea.hbm %s5204_s25, 4  ;;  %s5207_s27 = scalar_lea.hbm %s5534_s21, 4 }
  0xa0   :  { %p5206_p12 = scmp.ne.s32.totalorder %s5204_s25, %s5205_s23  ;;  %p5208_p13 = scmp.lt.s32.totalorder %s5204_s25, %s5534_s21 }
  0xa1   :  { %p5209_p0 = scmp.lt.s32.totalorder %s5207_s27, %s5205_s23 }
  0xa3   :  { %p5210_p1 = por %p5209_p0, %p5208_p13 }
  0xa5   :  { %p5211_p2 = pnand %p5210_p1, %p5206_p12 }
  0xa7   :  { %5214 = shalt.err (!%p5211_p2)
}
  0xa8   :  { %119 = dma.hbm_to_vmem [thread:$0]  %s115_s16, 64, %s117_s18, [#allocation11]  }
  0xa9   :  { %s5480_s9 = smov [#allocation15]   ;;  %s172_s22 = sshll.u32 %s5574_s30, 4  ;;  %s173_s22 = int_to_ptr.hbm [resolvable:$true] %s172_s22 }
  0xaa   :  { %s143_s15 = sshll.u32 %s5480_s9, 4  ;;  %s5227_s28 = sshra.s32 %s5722_s3, 4  ;;  %s144_s15 = int_to_ptr.vmem [resolvable:$true] %s143_s15  ;;  %s5228_s28 = int_to_ptr.hbm [resolvable:$true] %s5227_s28 }
  0xab   :  { %s5229_s24 = scalar_lea.hbm %s5228_s28, 32  ;;  %s5231_s2 = scalar_lea.hbm %s5554_s8, 32 }
  0xac   :  { %p5230_p3 = scmp.ne.s32.totalorder %s5228_s28, %s5229_s24  ;;  %p5232_p4 = scmp.lt.s32.totalorder %s5228_s28, %s5554_s8 }
  0xad   :  { %p5233_p5 = scmp.lt.s32.totalorder %s5231_s2, %s5229_s24 }
  0xaf   :  { %p5234_p6 = por %p5233_p5, %p5232_p4 }
  0xb1   :  { %p5235_p7 = pnand %p5234_p6, %p5230_p3 }
  0xb3   :  { %5238 = shalt.err (!%p5235_p7)
}
  0xb4   :  { %149 = dma.hbm_to_vmem [thread:$0]  %s5722_s3, 512, %s144_s15, [#allocation14], %s5470_s26, %s5470_s26, %s5471_s1  }
  0xb5   :  { %s198_s21 = sshll.u32 %s5589_s20, 4  ;;  %s5481_s19 = smov [#allocation18]   ;;  %s199_s21 = int_to_ptr.hbm [resolvable:$true] %s198_s21 }
  0xb6   :  { %s174_s13 = sshll.u32 %s5481_s19, 4  ;;  %s5251_s10 = sshra.s32 %s173_s22, 4  ;;  %s175_s13 = int_to_ptr.vmem [resolvable:$true] %s174_s13  ;;  %s5252_s10 = int_to_ptr.hbm [resolvable:$true] %s5251_s10 }
  0xb7   :  { %s5253_s8 = scalar_lea.hbm %s5252_s10, 1  ;;  %s5255_s11 = scalar_lea.hbm %s5574_s30, 1 }
  0xb8   :  { %p5254_p8 = scmp.ne.s32.totalorder %s5252_s10, %s5253_s8  ;;  %p5256_p9 = scmp.lt.s32.totalorder %s5252_s10, %s5574_s30 }
  0xb9   :  { %p5257_p10 = scmp.lt.s32.totalorder %s5255_s11, %s5253_s8 }
  0xbb   :  { %p5258_p11 = por %p5257_p10, %p5256_p9 }
  0xbd   :  { %p5259_p12 = pnand %p5258_p11, %p5254_p8 }
  0xbf   :  { %5262 = shalt.err (!%p5259_p12)
}
  0xc0   :  { %177 = dma.hbm_to_vmem [thread:$0]  %s173_s22, 16, %s175_s13, [#allocation17]  }
  0xc1   :  { %s5482_s16 = smov [#allocation21]   ;;  %s221_s5 = sshll.u32 %s5599_s4, 4  ;;  %s5738_s5 = int_to_ptr.hbm [resolvable:$true] %s221_s5 }
  0xc2   :  { %s200_s6 = sshll.u32 %s5482_s16, 4  ;;  %s5275_s0 = sshra.s32 %s199_s21, 4  ;;  %s201_s6 = int_to_ptr.vmem [resolvable:$true] %s200_s6  ;;  %s5276_s0 = int_to_ptr.hbm [resolvable:$true] %s5275_s0 }
  0xc3   :  { %s5277_s3 = scalar_lea.hbm %s5276_s0, 1  ;;  %s5279_s12 = scalar_lea.hbm %s5589_s20, 1 }
  0xc4   :  { %p5278_p13 = scmp.ne.s32.totalorder %s5276_s0, %s5277_s3  ;;  %p5280_p0 = scmp.lt.s32.totalorder %s5276_s0, %s5589_s20 }
  0xc5   :  { %p5281_p1 = scmp.lt.s32.totalorder %s5279_s12, %s5277_s3 }
  0xc7   :  { %p5282_p2 = por %p5281_p1, %p5280_p0 }
  0xc9   :  { %p5283_p3 = pnand %p5282_p2, %p5278_p13 }
  0xcb   :  { %5286 = shalt.err (!%p5283_p3)
}
  0xcc   :  { %203 = dma.hbm_to_vmem [thread:$0]  %s199_s21, 16, %s201_s6, [#allocation20]  }
  0xcd   :  { %s6712_s30 = sld [smem:[#allocation52_spill]]  ;;  %s5483_s25 = smov [#allocation24]  }
  0xce   :  { %s223_s23 = sshll.u32 %s5483_s25, 4  ;;  %s5299_s27 = sshra.s32 %s5738_s5, 4  ;;  %s224_s23 = int_to_ptr.vmem [resolvable:$true] %s223_s23  ;;  %s5300_s27 = int_to_ptr.hbm [resolvable:$true] %s5299_s27 }
  0xcf   :  { %s5301_s9 = scalar_lea.hbm %s5300_s27, 32  ;;  %s5303_s15 = scalar_lea.hbm %s5599_s4, 32 }
  0xd0   :  { %p5302_p4 = scmp.ne.s32.totalorder %s5300_s27, %s5301_s9  ;;  %p5304_p5 = scmp.lt.s32.totalorder %s5300_s27, %s5599_s4 }
  0xd1   :  { %p5305_p6 = scmp.lt.s32.totalorder %s5303_s15, %s5301_s9 }
  0xd3   :  { %s250_s18 = sshll.u32 %s6712_s30, 4  ;;  %p5306_p7 = por %p5305_p6, %p5304_p5  ;;  %s251_s18 = int_to_ptr.hbm [resolvable:$true] %s250_s18 }
  0xd5   :  { %p5307_p8 = pnand %p5306_p7, %p5302_p4 }
  0xd7   :  { %5310 = shalt.err (!%p5307_p8)
}
  0xd8   :  { %s6713_s20 = sld [smem:[#allocation54_spill]]  ;;  %s5484_s22 = smov [#allocation27]  }
  0xd9   :  { %229 = dma.hbm_to_vmem [thread:$0]  %s5738_s5, 512, %s224_s23, [#allocation23], %s5470_s26, %s5470_s26, %s5471_s1  }
  0xda   :  { %s252_s28 = sshll.u32 %s5484_s22, 4  ;;  %s5323_s2 = sshra.s32 %s251_s18, 4  ;;  %s253_s28 = int_to_ptr.vmem [resolvable:$true] %s252_s28  ;;  %s5324_s2 = int_to_ptr.hbm [resolvable:$true] %s5323_s2 }
  0xdb   :  { %s5325_s4 = scalar_lea.hbm %s5324_s2, 1  ;;  %s5327_s21 = scalar_lea.hbm %s6712_s30, 1 }
  0xdc   :  { %p5326_p9 = scmp.ne.s32.totalorder %s5324_s2, %s5325_s4  ;;  %p5328_p10 = scmp.lt.s32.totalorder %s5324_s2, %s6712_s30 }
  0xdd   :  { %p5329_p11 = scmp.lt.s32.totalorder %s5327_s21, %s5325_s4 }
  0xde   :  { %s276_s24 = sshll.u32 %s6713_s20, 4  ;;  %s277_s24 = int_to_ptr.hbm [resolvable:$true] %s276_s24 }
  0xdf   :  { %p5330_p12 = por %p5329_p11, %p5328_p10 }
  0xe1   :  { %p5331_p13 = pnand %p5330_p12, %p5326_p9 }
  0xe3   :  { %5334 = shalt.err (!%p5331_p13)
}
  0xe4   :  { %255 = dma.hbm_to_vmem [thread:$0]  %s251_s18, 16, %s253_s28, [#allocation26]  }
  0xe5   :  { %s289_s26 = sshll.u32 %s5642_s14, 4  ;;  %s5485_s1 = smov [#allocation30]   ;;  %s290_s26 = int_to_ptr.hbm [resolvable:$true] %s289_s26 }
  0xe6   :  { %s278_s19 = sshll.u32 %s5485_s1, 4  ;;  %s5347_s13 = sshra.s32 %s277_s24, 4  ;;  %s279_s19 = int_to_ptr.vmem [resolvable:$true] %s278_s19  ;;  %s5348_s13 = int_to_ptr.hbm [resolvable:$true] %s5347_s13 }
  0xe7   :  { %s5349_s10 = scalar_lea.hbm %s5348_s13, 1  ;;  %s5351_s8 = scalar_lea.hbm %s6713_s20, 1 }
  0xe8   :  { %p5350_p0 = scmp.ne.s32.totalorder %s5348_s13, %s5349_s10  ;;  %p5352_p1 = scmp.lt.s32.totalorder %s5348_s13, %s6713_s20 }
  0xe9   :  { %p5353_p2 = scmp.lt.s32.totalorder %s5351_s8, %s5349_s10 }
  0xeb   :  { %p5354_p3 = por %p5353_p2, %p5352_p1 }
  0xed   :  { %p5355_p4 = pnand %p5354_p3, %p5350_p0 }
  0xef   :  { %5358 = shalt.err (!%p5355_p4)
}
  0xf0   :  { %281 = dma.hbm_to_vmem [thread:$0]  %s277_s24, 16, %s279_s19, [#allocation29]  }
  0xf1   :  { %s5486_s11 = smov [#allocation31]   ;;  %s5371_s6 = sshra.s32 %s290_s26, 4  ;;  %s5372_s6 = int_to_ptr.hbm [resolvable:$true] %s5371_s6 }
  0xf2   :  { %s291_s16 = sshll.u32 %s5486_s11, 4  ;;  %s5373_s5 = scalar_lea.hbm %s5372_s6, 1  ;;  %s292_s16 = int_to_ptr.vmem [resolvable:$true] %s291_s16 }
  0xf3   :  { %p5374_p5 = scmp.ne.s32.totalorder %s5372_s6, %s5373_s5  ;;  %s5375_s0 = scalar_lea.hbm %s5642_s14, 1 }
  0xf4   :  { %p5376_p6 = scmp.lt.s32.totalorder %s5372_s6, %s5642_s14  ;;  %p5377_p7 = scmp.lt.s32.totalorder %s5375_s0, %s5373_s5 }
  0xf6   :  { %p5378_p8 = por %p5377_p7, %p5376_p6 }
  0xf8   :  { %p5379_p9 = pnand %p5378_p8, %p5374_p5 }
  0xfa   :  { %5382 = shalt.err (!%p5379_p9)
}
  0xfb   :  { %294 = dma.hbm_to_vmem [thread:$0]  %s290_s26, 16, %s292_s16, [#allocation32]  }
  0xfc   :  { %5419 = dma.done.wait [#allocation8], 64  }
  0xfd   :  { %5420 = vsyncadd [#allocation8], 4294967232 }
  0xfe   :  { %5421 = dma.done.wait [#allocation11], 576  }
  0xff   :  { %5422 = vsyncadd [#allocation11], 4294966720 }
 0x100   :  { %5423 = dma.done.wait [#allocation14], 1024  }
 0x101   :  { %5424 = vsyncadd [#allocation14], 4294966272 }
 0x102   :  { %5425 = dma.done.wait [#allocation17], 528  }
 0x103   :  { %5426 = vsyncadd [#allocation17], 4294966768 }
 0x104   :  { %5427 = dma.done.wait [#allocation20], 1040  }
 0x105   :  { %5428 = vsyncadd [#allocation20], 4294966256 }
 0x106   :  { %5429 = dma.done.wait [#allocation23], 1536  }
 0x107   :  { %5430 = vsyncadd [#allocation23], 4294965760 }
 0x108   :  { %5431 = dma.done.wait [#allocation26], 1040  }
 0x109   :  { %5432 = vsyncadd [#allocation26], 4294966256 }
 0x10a   :  { %5433 = dma.done.wait [#allocation29], 32  }
 0x10b   :  { %5434 = vsyncadd [#allocation29], 4294967264 }
 0x10c   :  { %5435 = dma.done.wait [#allocation32], 16  }
 0x10d   :  { %5436 = vsyncadd [#allocation32], 4294967280  ;;  %s6714_s14 = sld [smem:[#allocation44_spill]]  ;;  %vm381_vm0 = vcmask 1043456   ;;  %vm374_vm1 = vcmask 31744   ;;  %v368_v2 = vld [vmem:[#allocation10 + $0x18] sm:$0xff] }
 0x10e   :  { %v367_v3 = vld [vmem:[#allocation10 + $0x10] sm:$0xff]  ;;  %v369_v4 = vld [vmem:[#allocation7] sm:$0xf]  ;;  %424 = vmatpush.msra.mxu1 %v368_v2  ;;  %v366_v5 = vld [vmem:[#allocation10 + $0x8] sm:$0xff]  ;;  %565 = vmatpush.msra.mxu3 %v368_v2  ;;  %v5487_v8 = vmov 0.0   ;;  %s6715_s3 = sld [smem:[#allocation45_spill]] }
 0x10f   :  { %4423 = vmatpush.msk.msra.mxu0 %vm381_vm0, %v369_v4  ;;  %v365_v7 = vld [vmem:[#allocation10] sm:$0xff]  ;;  %715 = vmatpush.msra.mxu2 %v368_v2  ;;  %s5488_s12 = smov 64   ;;  %s5489_s30 = smov 32   ;;  %vm6698_vm6 = vcmask 254976   ;;  %vm408_vm7 = vcmask 261120  }
 0x110   :  { %425 = vmatpush.msra.mxu1 %v367_v3  ;;  %566 = vmatpush.msra.mxu3 %v367_v3  ;;  %s6716_s18 = sld [smem:[#allocation46_spill]]  ;;  %s5490_s20 = smov 1  }
 0x111   :  { %490 = vmatpush.msrb.mxu0 %v368_v2  ;;  %716 = vmatpush.msra.mxu2 %v367_v3  ;;  %s6717_s25 = sld [smem:[#allocation47_spill]]  ;;  %s5491_s22 = smov 7  }
 0x112   :  { %426 = vmatpush.msra.mxu1 %v366_v5  ;;  %567 = vmatpush.msra.mxu3 %v366_v5  ;;  %s6718_s23 = sld [smem:[#allocation48_spill]]  ;;  %s5492_s28 = smov 2  }
 0x113   :  { %v5760_v6 = vld [vmem:[%s6714_s14] sm:$0xff]  ;;  %491 = vmatpush.msrb.mxu0 %v367_v3  ;;  %717 = vmatpush.msra.mxu2 %v366_v5  ;;  %v5776_v34 = vld [vmem:[%s6714_s14 + $0x8] sm:$0xff]  ;;  %s6719_s27 = sld [smem:[#allocation49_spill]]  ;;  %s5493_s24 = smov 3  }
 0x114   :  { %4424 = vmatmul.msk.f32.vlgmr.msra.gmra.mxu0 %vm374_vm1, %v5760_v6  ;;  %427 = vmatpush.msra.mxu1 %v365_v7  ;;  %v5766_v9 = vld [vmem:[%s6715_s3] ss:$0 sm:$0xff]  ;;  %s6720_s9 = sld [smem:[#allocation50_spill]]  ;;  %s5494_s2 = smov 4  }
 0x115   :  { %492 = vmatpush.msrb.mxu0 %v366_v5  ;;  %428 = vmatmul.f32.vlgmr.msra.gmra.mxu1 %v5487_v8  ;;  %s6723_s15 = sld [smem:[#allocation51_spill]]  ;;  %s5495_s4 = smov 5  }
 0x116   :  { %568 = vmatpush.msra.mxu3 %v365_v7  ;;  %640 = vmatpush.msrb.mxu1 %v368_v2  ;;  %s5496_s21 = smov 6   ;;  %s6732_s26 = sld [smem:[#allocation53_spill]] }
 0x117   :  { %493 = vmatpush.msrb.mxu0 %v365_v7  ;;  %718 = vmatpush.msra.mxu2 %v365_v7  ;;  %s6733_s1 = sld [smem:[#allocation55_spill]]  ;;  %s5505_s19 = smov [#allocation33]  }
 0x118   :  { %783 = vmatpush.msrb.mxu3 %v368_v2  ;;  %641 = vmatpush.msrb.mxu1 %v367_v3  ;;  %s4371_s13 = sshll.u32 %s5505_s19, 4  ;;  %s4373_s10 = sshll.u32 %s5657_s7, 4  ;;  %s4372_s13 = int_to_ptr.vmem [resolvable:$true] %s4371_s13  ;;  %s4374_s10 = int_to_ptr.hbm [resolvable:$true] %s4373_s10 }
 0x119   :  { %857 = vmatpush.msra.mxu0 %v368_v2  ;;  %s5407_s8 = sshra.s32 %s4374_s10, 4  ;;  %s5411_s16 = scalar_lea.hbm %s5657_s7, 2  ;;  %s5408_s8 = int_to_ptr.hbm [resolvable:$true] %s5407_s8 }
 0x11a   :  { %784 = vmatpush.msrb.mxu3 %v367_v3  ;;  %642 = vmatpush.msrb.mxu1 %v366_v5  ;;  %s5409_s11 = scalar_lea.hbm %s5408_s8, 2  ;;  %p5412_p11 = scmp.lt.s32.totalorder %s5408_s8, %s5657_s7 }
 0x11b   :  { %858 = vmatpush.msra.mxu0 %v367_v3  ;;  %p5410_p10 = scmp.ne.s32.totalorder %s5408_s8, %s5409_s11  ;;  %p5413_p12 = scmp.lt.s32.totalorder %s5411_s16, %s5409_s11 }
 0x11c   :  { %785 = vmatpush.msrb.mxu3 %v366_v5  ;;  %643 = vmatpush.msrb.mxu1 %v365_v7 }
 0x11d   :  { %859 = vmatpush.msra.mxu0 %v366_v5  ;;  %p5414_p13 = por %p5413_p12, %p5412_p11 }
 0x11e   :  { %786 = vmatpush.msrb.mxu3 %v365_v7  ;;  %931 = vmatpush.msra.mxu1 %v368_v2 }
 0x11f   :  { %860 = vmatpush.msra.mxu0 %v365_v7  ;;  %p5415_p0 = pnand %p5414_p13, %p5410_p10 }
 0x120   :  { %932 = vmatpush.msra.mxu1 %v367_v3  ;;  %4425 = vmatmul.msk.f32.gmra.mxu0 %vm374_vm1, %v5776_v34 }
 0x122   :  { %933 = vmatpush.msra.mxu1 %v366_v5 }
 0x124   :  { %934 = vmatpush.msra.mxu1 %v365_v7 }
 0x191   :  { %v402_v10 = vpop.f32.mrf.mxu0 }
 0x192   :  { %v5769_v11 = vadd.f32 %v5766_v9, %v402_v10  ;;  %v429_v12 = vpop.f32.mrf.mxu1 }
 0x194   :  { %v432_v13 = vadd.f32 %v429_v12, %v5769_v11 }
 0x196   :  { %4619 = vtanh.f32 %v432_v13  ;;  %v4426_v15 = vmul.f32 -1.442695, %v432_v13 }
 0x198   :  { %4621 = vpow2.f32 %v4426_v15 }
 0x19c   :  { %v4620_v14 = vpop.eup %4619 }
 0x19d   :  { %455 = vrot.lane.b32.xlu0 %v4620_v14, %s5488_s12  ;;  %v5783_v38 = vpop.f32.mrf.mxu0 }
 0x19e   :  { %v4622_v16 = vpop.eup %4621 }
 0x19f   :  { %v436_v17 = vadd.f32 1.0, %v4622_v16 }
 0x1a1   :  { %4623 = vrcp.f32 %v436_v17  ;;  %v448_v23 = vand.u32 2147483648, %v436_v17  ;;  %vm442_vm3 = vweird.f32 %v436_v17  ;;  %v446_v24 = vand.u32 2147483647, %v436_v17 }
 0x1a3   :  { %v449_v26 = vor.u32 1.1754944e-38, %v448_v23  ;;  %vm447_vm5 = vcmp.eq.f32.partialorder %v446_v24, 8.507059e+37 }
 0x1a7   :  { %v4624_v18 = vpop.eup %4623 }
 0x1a8   :  { %v438_v19 = vmul.f32 %v4624_v18, %v436_v17  ;;  %vm443_vm2 = vweird.f32 %v4624_v18 }
 0x1a9   :  { %vm444_vm4 = vmor %vm442_vm3, %vm443_vm2 }
 0x1aa   :  { %v439_v20 = vsub.f32 1.0, %v438_v19 }
 0x1ac   :  { %v440_v21 = vmul.f32 %v4624_v18, %v439_v20 }
 0x1ae   :  { %v441_v22 = vadd.f32 %v4624_v18, %v440_v21 }
 0x1b0   :  { %v445_v25 = vsel %vm444_vm4, %v4624_v18, %v441_v22 }
 0x1b1   :  { %v450_v28 = vsel %vm447_vm5, %v449_v26, %v445_v25 }
 0x1b2   :  { %v453_v30 = vmul.f32 0.0, %v450_v28 }
 0x20f   :  { %v456_v27 = vpop.permute.xlu0 %455 }
 0x210   :  { %v458_v29 = vmul.f32 %v456_v27, %v450_v28 }
 0x212   :  { %460 = vrot.lane.b32.xlu0 %v458_v29, %s5489_s30 }
 0x284   :  { %v461_v31 = vpop.permute.xlu0 %460 }
 0x285   :  { %v463_v32 = vadd.f32 %v461_v31, %v453_v30 }
 0x287   :  { %4625 = vtanh.f32 %v463_v32  ;;  %v523_v58 = vrot.slane %v463_v32, 6 }
 0x28d   :  { %v4626_v33 = vpop.eup %4625 }
 0x28e   :  { %466 = vrot.lane.b32.xlu1 %v4626_v33, %s5488_s12 }
 0x300   :  { %v467_v35 = vpop.permute.xlu1 %466 }
 0x301   :  { %v469_v36 = vmul.f32 %v467_v35, %v450_v28 }
 0x303   :  { %471 = vrot.lane.b32.xlu1 %v469_v36, %s5489_s30 }
 0x375   :  { %v472_v37 = vpop.permute.xlu1 %471 }
 0x376   :  { %475 = vst.msk [vmem:[#allocation2] sm:$0x3] %vm6698_vm6, %v472_v37  ;;  %4427 = vmatmul.msk.f32.vlgmr.msrb.gmra.mxu0 %vm408_vm7, %v472_v37 }
 0x3f3   :  { %v495_v39 = vpop.f32.mrf.mxu0 }
 0x3f4   :  { %v499_v40 = vrot.slane %v495_v39, 6 }
 0x3f6   :  { %v501_v41 = vadd.f32 %v499_v40, %v5769_v11 }
 0x3f8   :  { %4627 = vtanh.f32 %v501_v41  ;;  %v4428_v43 = vmul.f32 -1.442695, %v501_v41 }
 0x3fa   :  { %4629 = vpow2.f32 %v4428_v43 }
 0x3fe   :  { %v4628_v42 = vpop.eup %4627 }
 0x3ff   :  { %527 = vrot.lane.b32.xlu2 %v4628_v42, %s5488_s12 }
 0x400   :  { %v4630_v44 = vpop.eup %4629 }
 0x401   :  { %v505_v45 = vadd.f32 1.0, %v4630_v44 }
 0x403   :  { %4631 = vrcp.f32 %v505_v45  ;;  %v517_v51 = vand.u32 2147483648, %v505_v45  ;;  %vm511_vm9 = vweird.f32 %v505_v45  ;;  %v515_v52 = vand.u32 2147483647, %v505_v45 }
 0x405   :  { %v518_v54 = vor.u32 1.1754944e-38, %v517_v51  ;;  %vm516_vm11 = vcmp.eq.f32.partialorder %v515_v52, 8.507059e+37 }
 0x409   :  { %v4632_v46 = vpop.eup %4631 }
 0x40a   :  { %v507_v47 = vmul.f32 %v4632_v46, %v505_v45  ;;  %vm512_vm8 = vweird.f32 %v4632_v46 }
 0x40b   :  { %vm513_vm10 = vmor %vm511_vm9, %vm512_vm8 }
 0x40c   :  { %v508_v48 = vsub.f32 1.0, %v507_v47 }
 0x40e   :  { %v509_v49 = vmul.f32 %v4632_v46, %v508_v48 }
 0x410   :  { %v510_v50 = vadd.f32 %v4632_v46, %v509_v49 }
 0x412   :  { %v514_v53 = vsel %vm513_vm10, %v4632_v46, %v510_v50 }
 0x413   :  { %v519_v56 = vsel %vm516_vm11, %v518_v54, %v514_v53 }
 0x414   :  { %v525_v59 = vmul.f32 %v523_v58, %v519_v56 }
 0x459   :  { %v528_v55 = vpop.permute.xlu2 %527 }
 0x45a   :  { %v530_v57 = vmul.f32 %v528_v55, %v519_v56 }
 0x45c   :  { %532 = vrot.lane.b32.xlu2 %v530_v57, %s5489_s30 }
 0x4b6   :  { %v533_v60 = vpop.permute.xlu2 %532 }
 0x4b7   :  { %v535_v61 = vadd.f32 %v533_v60, %v525_v59 }
 0x4b9   :  { %4633 = vtanh.f32 %v535_v61  ;;  %v598_v26 = vrot.slane %v535_v61, 6 }
 0x4bf   :  { %v4634_v62 = vpop.eup %4633 }
 0x4c0   :  { %538 = vrot.lane.b32.xlu0 %v4634_v62, %s5488_s12 }
 0x532   :  { %v539_v63 = vpop.permute.xlu0 %538 }
 0x533   :  { %v5789_v0 = vmul.f32 %v539_v63, %v519_v56 }
 0x535   :  { %v548_v1 = vrot.slane %v5789_v0, 2 }
 0x537   :  { %549 = vrot.lane.b32.xlu1 %v548_v1, %s5489_s30  ;;  %v5814_v1 = vadd.f32 %v5766_v9, %v5783_v38 }
 0x5a9   :  { %v550_v2 = vpop.permute.xlu1 %549 }
 0x5aa   :  { %4429 = vmatmul.msk.f32.vlgmr.msra.gmra.mxu3 %vm408_vm7, %v550_v2 }
 0x62d   :  { %v570_v3 = vpop.f32.mrf.mxu3 }
 0x62e   :  { %v574_v4 = vrot.slane %v570_v3, 4 }
 0x630   :  { %v576_v5 = vadd.f32 %v574_v4, %v5769_v11 }
 0x632   :  { %4635 = vtanh.f32 %v576_v5  ;;  %v4430_v10 = vmul.f32 -1.442695, %v576_v5 }
 0x634   :  { %4637 = vpow2.f32 %v4430_v10 }
 0x638   :  { %v4636_v7 = vpop.eup %4635 }
 0x639   :  { %602 = vrot.lane.b32.xlu2 %v4636_v7, %s5488_s12 }
 0x63a   :  { %v4638_v12 = vpop.eup %4637 }
 0x63b   :  { %v580_v13 = vadd.f32 1.0, %v4638_v12 }
 0x63d   :  { %4639 = vrcp.f32 %v580_v13  ;;  %v592_v19 = vand.u32 2147483648, %v580_v13  ;;  %vm586_vm13 = vweird.f32 %v580_v13  ;;  %v590_v20 = vand.u32 2147483647, %v580_v13 }
 0x63f   :  { %v593_v22 = vor.u32 1.1754944e-38, %v592_v19  ;;  %vm591_vm15 = vcmp.eq.f32.partialorder %v590_v20, 8.507059e+37 }
 0x643   :  { %v4640_v14 = vpop.eup %4639 }
 0x644   :  { %v582_v15 = vmul.f32 %v4640_v14, %v580_v13  ;;  %vm587_vm12 = vweird.f32 %v4640_v14 }
 0x645   :  { %vm588_vm14 = vmor %vm586_vm13, %vm587_vm12 }
 0x646   :  { %v583_v16 = vsub.f32 1.0, %v582_v15 }
 0x648   :  { %v584_v17 = vmul.f32 %v4640_v14, %v583_v16 }
 0x64a   :  { %v585_v18 = vadd.f32 %v4640_v14, %v584_v17 }
 0x64c   :  { %v589_v21 = vsel %vm588_vm14, %v4640_v14, %v585_v18 }
 0x64d   :  { %v594_v24 = vsel %vm591_vm15, %v593_v22, %v589_v21 }
 0x64e   :  { %v600_v27 = vmul.f32 %v598_v26, %v594_v24 }
 0x693   :  { %v603_v23 = vpop.permute.xlu2 %602 }
 0x694   :  { %v605_v25 = vmul.f32 %v603_v23, %v594_v24 }
 0x696   :  { %607 = vrot.lane.b32.xlu0 %v605_v25, %s5489_s30 }
 0x708   :  { %v608_v28 = vpop.permute.xlu0 %607 }
 0x709   :  { %v610_v29 = vadd.f32 %v608_v28, %v600_v27  ;;  %v992_v27 = vld [vmem:[#allocation12] sm:$0xf] }
 0x70a   :  { %4441 = vmatpush.msk.msrb.mxu2 %vm381_vm0, %v992_v27 }
 0x70b   :  { %4641 = vtanh.f32 %v610_v29  ;;  %v673_v55 = vrot.slane %v610_v29, 6 }
 0x711   :  { %v4642_v30 = vpop.eup %4641 }
 0x712   :  { %613 = vrot.lane.b32.xlu1 %v4642_v30, %s5488_s12  ;;  %v5829_v30 = vld [vmem:[#allocation13 + $0x18] sm:$0xff] }
 0x713   :  { %1035 = vmatpush.msra.mxu3 %v5829_v30  ;;  %1107 = vmatpush.msrb.mxu0 %v5829_v30 }
 0x784   :  { %v614_v31 = vpop.permute.xlu1 %613 }
 0x785   :  { %v5798_v32 = vmul.f32 %v614_v31, %v594_v24  ;;  %v5831_v31 = vld [vmem:[#allocation13 + $0x10] sm:$0xff] }
 0x786   :  { %1036 = vmatpush.msra.mxu3 %v5831_v31  ;;  %1108 = vmatpush.msrb.mxu0 %v5831_v31 }
 0x787   :  { %v623_v33 = vrot.slane %v5798_v32, 4 }
 0x789   :  { %624 = vrot.lane.b32.xlu2 %v623_v33, %s5489_s30  ;;  %v5835_v33 = vld [vmem:[#allocation13 + $0x8] sm:$0xff] }
 0x78a   :  { %1037 = vmatpush.msra.mxu3 %v5835_v33  ;;  %1109 = vmatpush.msrb.mxu0 %v5835_v33 }
 0x7e3   :  { %v625_v35 = vpop.permute.xlu2 %624 }
 0x7e4   :  { %4431 = vmatmul.msk.f32.vlgmr.msrb.gmra.mxu1 %vm408_vm7, %v625_v35  ;;  %v4608_v35 = vld [vmem:[%s6716_s18] ss:$0 sm:$0xff] }
 0x7e5   :  { %1182 = vmatpush.msrb.mxu1 %v5829_v30 }
 0x7e7   :  { %1183 = vmatpush.msrb.mxu1 %v5831_v31 }
 0x7e9   :  { %1184 = vmatpush.msrb.mxu1 %v5835_v33 }
 0x861   :  { %v645_v36 = vpop.f32.mrf.mxu1 }
 0x862   :  { %v649_v37 = vrot.slane %v645_v36, 2 }
 0x864   :  { %v651_v39 = vadd.f32 %v649_v37, %v5769_v11 }
 0x866   :  { %4643 = vtanh.f32 %v651_v39  ;;  %v4432_v41 = vmul.f32 -1.442695, %v651_v39 }
 0x868   :  { %4645 = vpow2.f32 %v4432_v41 }
 0x86c   :  { %v4644_v40 = vpop.eup %4643 }
 0x86d   :  { %677 = vrot.lane.b32.xlu0 %v4644_v40, %s5488_s12 }
 0x86e   :  { %v4646_v42 = vpop.eup %4645 }
 0x86f   :  { %v655_v43 = vadd.f32 1.0, %v4646_v42 }
 0x871   :  { %4647 = vrcp.f32 %v655_v43  ;;  %v667_v49 = vand.u32 2147483648, %v655_v43  ;;  %vm661_vm3 = vweird.f32 %v655_v43  ;;  %v665_v50 = vand.u32 2147483647, %v655_v43 }
 0x873   :  { %v668_v51 = vor.u32 1.1754944e-38, %v667_v49  ;;  %vm666_vm5 = vcmp.eq.f32.partialorder %v665_v50, 8.507059e+37 }
 0x877   :  { %v4648_v44 = vpop.eup %4647 }
 0x878   :  { %v657_v45 = vmul.f32 %v4648_v44, %v655_v43  ;;  %vm662_vm2 = vweird.f32 %v4648_v44 }
 0x879   :  { %vm663_vm4 = vmor %vm661_vm3, %vm662_vm2 }
 0x87a   :  { %v658_v46 = vsub.f32 1.0, %v657_v45 }
 0x87c   :  { %v659_v47 = vmul.f32 %v4648_v44, %v658_v46 }
 0x87e   :  { %v660_v48 = vadd.f32 %v4648_v44, %v659_v47 }
 0x880   :  { %v664_v11 = vsel %vm663_vm4, %v4648_v44, %v660_v48 }
 0x881   :  { %v669_v53 = vsel %vm666_vm5, %v668_v51, %v664_v11 }
 0x882   :  { %v675_v56 = vmul.f32 %v673_v55, %v669_v53 }
 0x8df   :  { %v678_v52 = vpop.permute.xlu0 %677 }
 0x8e0   :  { %v680_v54 = vmul.f32 %v678_v52, %v669_v53 }
 0x8e2   :  { %682 = vrot.lane.b32.xlu1 %v680_v54, %s5489_s30 }
 0x954   :  { %v683_v57 = vpop.permute.xlu1 %682 }
 0x955   :  { %v685_v58 = vadd.f32 %v683_v57, %v675_v56 }
 0x957   :  { %4649 = vtanh.f32 %v685_v58  ;;  %v745_v22 = vrot.slane %v685_v58, 6 }
 0x95d   :  { %v4650_v59 = vpop.eup %4649 }
 0x95e   :  { %688 = vrot.lane.b32.xlu2 %v4650_v59, %s5488_s12 }
 0x9b8   :  { %v689_v60 = vpop.permute.xlu2 %688 }
 0x9b9   :  { %v5807_v61 = vmul.f32 %v689_v60, %v669_v53 }
 0x9bb   :  { %v698_v62 = vrot.slane %v5807_v61, 6 }
 0x9bd   :  { %699 = vrot.lane.b32.xlu0 %v698_v62, %s5489_s30 }
 0xa2f   :  { %v700_v63 = vpop.permute.xlu0 %699 }
 0xa30   :  { %4433 = vmatmul.msk.f32.vlgmr.msra.gmra.mxu2 %vm408_vm7, %v700_v63 }
 0xa31   :  { %1476 = vmatpush.msra.mxu2 %v5829_v30 }
 0xa33   :  { %1477 = vmatpush.msra.mxu2 %v5831_v31 }
 0xa35   :  { %1478 = vmatpush.msra.mxu2 %v5835_v33 }
 0xa38   :  { %4442 = vmatmul.msk.f32.vlgmr.msrb.gmra.mxu2 %vm374_vm1, %v5760_v6  ;;  %v5841_v6 = vld [vmem:[#allocation13] sm:$0xff] }
 0xa39   :  { %1038 = vmatpush.msra.mxu3 %v5841_v6  ;;  %1110 = vmatpush.msrb.mxu0 %v5841_v6 }
 0xa3a   :  { %1185 = vmatpush.msrb.mxu1 %v5841_v6  ;;  %1479 = vmatpush.msra.mxu2 %v5841_v6 }
 0xa40   :  { %4443 = vmatmul.msk.f32.gmra.mxu2 %vm374_vm1, %v5776_v34 }
 0xab3   :  { %v720_v2 = vpop.f32.mrf.mxu2 }
 0xab4   :  { %v723_v3 = vadd.f32 %v720_v2, %v5814_v1 }
 0xab6   :  { %4651 = vtanh.f32 %v723_v3  ;;  %v4434_v5 = vmul.f32 -1.442695, %v723_v3 }
 0xab8   :  { %4653 = vpow2.f32 %v4434_v5 }
 0xabb   :  { %v1017_v36 = vpop.f32.mrf.mxu2 }
 0xabc   :  { %v4652_v4 = vpop.eup %4651  ;;  %v5865_v37 = vadd.f32 %v4608_v35, %v1017_v36 }
 0xabd   :  { %749 = vrot.lane.b32.xlu1 %v4652_v4, %s5488_s12 }
 0xabe   :  { %v4654_v7 = vpop.eup %4653 }
 0xabf   :  { %v727_v10 = vadd.f32 1.0, %v4654_v7 }
 0xac1   :  { %4655 = vrcp.f32 %v727_v10  ;;  %v739_v9 = vand.u32 2147483648, %v727_v10  ;;  %vm733_vm9 = vweird.f32 %v727_v10  ;;  %v737_v38 = vand.u32 2147483647, %v727_v10 }
 0xac3   :  { %v740_v18 = vor.u32 1.1754944e-38, %v739_v9  ;;  %vm738_vm11 = vcmp.eq.f32.partialorder %v737_v38, 8.507059e+37  ;;  %v1020_v42 = vpop.f32.mrf.mxu2 }
 0xac4   :  { %v5868_v43 = vadd.f32 %v4608_v35, %v1020_v42 }
 0xac7   :  { %v4656_v12 = vpop.eup %4655 }
 0xac8   :  { %v729_v13 = vmul.f32 %v4656_v12, %v727_v10  ;;  %vm734_vm8 = vweird.f32 %v4656_v12 }
 0xac9   :  { %vm735_vm10 = vmor %vm733_vm9, %vm734_vm8 }
 0xaca   :  { %v730_v14 = vsub.f32 1.0, %v729_v13 }
 0xacc   :  { %v731_v15 = vmul.f32 %v4656_v12, %v730_v14 }
 0xace   :  { %v732_v16 = vadd.f32 %v4656_v12, %v731_v15 }
 0xad0   :  { %v736_v17 = vsel %vm735_vm10, %v4656_v12, %v732_v16 }
 0xad1   :  { %v741_v20 = vsel %vm738_vm11, %v740_v18, %v736_v17 }
 0xad2   :  { %v747_v23 = vmul.f32 %v745_v22, %v741_v20 }
 0xb2f   :  { %v750_v19 = vpop.permute.xlu1 %749 }
 0xb30   :  { %v752_v21 = vmul.f32 %v750_v19, %v741_v20 }
 0xb32   :  { %754 = vrot.lane.b32.xlu2 %v752_v21, %s5489_s30 }
 0xb8c   :  { %v755_v24 = vpop.permute.xlu2 %754 }
 0xb8d   :  { %v5819_v25 = vadd.f32 %v755_v24, %v747_v23 }
 0xb8f   :  { %4657 = vtanh.f32 %v5819_v25  ;;  %v816_v19 = vrot.slane %v5819_v25, 6 }
 0xb95   :  { %v4658_v26 = vpop.eup %4657 }
 0xb96   :  { %760 = vrot.lane.b32.xlu0 %v4658_v26, %s5488_s12 }
 0xc08   :  { %v761_v28 = vpop.permute.xlu0 %760 }
 0xc09   :  { %v763_v29 = vmul.f32 %v761_v28, %v741_v20 }
 0xc0b   :  { %765 = vrot.lane.b32.xlu1 %v763_v29, %s5489_s30 }
 0xc7d   :  { %v766_v34 = vpop.permute.xlu1 %765 }
 0xc7e   :  { %768 = vst.msk [vmem:[#allocation2 + $0x8] sm:$0x3] %vm6698_vm6, %v766_v34  ;;  %4435 = vmatmul.msk.f32.vlgmr.msrb.gmra.mxu3 %vm408_vm7, %v766_v34 }
 0xc7f   :  { %1257 = vmatpush.msrb.mxu3 %v5829_v30 }
 0xc81   :  { %1258 = vmatpush.msrb.mxu3 %v5831_v31 }
 0xc83   :  { %1259 = vmatpush.msrb.mxu3 %v5835_v33 }
 0xc85   :  { %1260 = vmatpush.msrb.mxu3 %v5841_v6 }
 0xc86   :  { %1039 = vmatmul.f32.vlgmr.msra.gmra.mxu3 %v5487_v8 }
 0xc87   :  { %1550 = vmatpush.msra.mxu3 %v5829_v30 }
 0xc89   :  { %1551 = vmatpush.msra.mxu3 %v5831_v31 }
 0xc8b   :  { %1552 = vmatpush.msra.mxu3 %v5835_v33 }
 0xc8d   :  { %1553 = vmatpush.msra.mxu3 %v5841_v6 }
 0xd01   :  { %v788_v39 = vpop.f32.mrf.mxu3 }
 0xd02   :  { %v792_v40 = vrot.slane %v788_v39, 6 }
 0xd04   :  { %v794_v41 = vadd.f32 %v792_v40, %v5814_v1 }
 0xd06   :  { %4659 = vtanh.f32 %v794_v41  ;;  %v4436_v49 = vmul.f32 -1.442695, %v794_v41 }
 0xd09   :  { %v1040_v44 = vpop.f32.mrf.mxu3 }
 0xd0a   :  { %v1044_v45 = vrot.slane %v1040_v44, 2 }
 0xd0c   :  { %v4660_v46 = vpop.eup %4659  ;;  %v1046_v47 = vadd.f32 %v1044_v45, %v5868_v43 }
 0xd0d   :  { %820 = vrot.lane.b32.xlu2 %v4660_v46, %s5488_s12 }
 0xd0e   :  { %4661 = vtanh.f32 %v1046_v47  ;;  %v4444_v54 = vmul.f32 -1.442695, %v1046_v47 }
 0xd0f   :  { %4663 = vpow2.f32 %v4436_v49 }
 0xd14   :  { %v4662_v48 = vpop.eup %4661 }
 0xd15   :  { %1069 = vrot.lane.b32.xlu0 %v4662_v48, %s5488_s12  ;;  %v4664_v50 = vpop.eup %4663 }
 0xd16   :  { %v798_v11 = vadd.f32 1.0, %v4664_v50 }
 0xd18   :  { %4665 = vrcp.f32 %v798_v11  ;;  %v810_v57 = vand.u32 2147483648, %v798_v11  ;;  %vm804_vm1 = vweird.f32 %v798_v11  ;;  %v808_v58 = vand.u32 2147483647, %v798_v11 }
 0xd19   :  { %4667 = vpow2.f32 %v4444_v54 }
 0xd1a   :  { %v811_v62 = vor.u32 1.1754944e-38, %v810_v57  ;;  %vm809_vm13 = vcmp.eq.f32.partialorder %v808_v58, 8.507059e+37 }
 0xd1e   :  { %v4666_v51 = vpop.eup %4665 }
 0xd1f   :  { %v800_v52 = vmul.f32 %v4666_v51, %v798_v11  ;;  %vm805_vm0 = vweird.f32 %v4666_v51  ;;  %v4668_v59 = vpop.eup %4667 }
 0xd20   :  { %vm806_vm12 = vmor %vm804_vm1, %vm805_vm0  ;;  %v1050_v63 = vadd.f32 1.0, %v4668_v59 }
 0xd21   :  { %v801_v53 = vsub.f32 1.0, %v800_v52 }
 0xd22   :  { %4669 = vrcp.f32 %v1050_v63  ;;  %v1062_v14 = vand.u32 2147483648, %v1050_v63  ;;  %vm1056_vm15 = vweird.f32 %v1050_v63  ;;  %v1060_v15 = vand.u32 2147483647, %v1050_v63 }
 0xd23   :  { %v802_v55 = vmul.f32 %v4666_v51, %v801_v53 }
 0xd24   :  { %v1063_v9 = vor.u32 1.1754944e-38, %v1062_v14  ;;  %vm1061_vm3 = vcmp.eq.f32.partialorder %v1060_v15, 8.507059e+37 }
 0xd25   :  { %v803_v56 = vadd.f32 %v4666_v51, %v802_v55 }
 0xd27   :  { %v807_v60 = vsel %vm806_vm12, %v4666_v51, %v803_v56 }
 0xd28   :  { %v812_v3 = vsel %vm809_vm13, %v811_v62, %v807_v60  ;;  %v4670_v5 = vpop.eup %4669 }
 0xd29   :  { %v1052_v7 = vmul.f32 %v4670_v5, %v1050_v63  ;;  %vm1057_vm14 = vweird.f32 %v4670_v5  ;;  %v818_v20 = vmul.f32 %v816_v19, %v812_v3 }
 0xd2a   :  { %vm1058_vm2 = vmor %vm1056_vm15, %vm1057_vm14 }
 0xd2b   :  { %v1053_v10 = vsub.f32 1.0, %v1052_v7 }
 0xd2d   :  { %v1054_v12 = vmul.f32 %v4670_v5, %v1053_v10 }
 0xd2f   :  { %v1055_v13 = vadd.f32 %v4670_v5, %v1054_v12 }
 0xd31   :  { %v1059_v16 = vsel %vm1058_vm2, %v4670_v5, %v1055_v13 }
 0xd32   :  { %v1064_v17 = vsel %vm1061_vm3, %v1063_v9, %v1059_v16 }
 0xd33   :  { %v1067_v23 = vmul.f32 0.0, %v1064_v17 }
 0xd67   :  { %v821_v2 = vpop.permute.xlu2 %820 }
 0xd68   :  { %v823_v4 = vmul.f32 %v821_v2, %v812_v3 }
 0xd6a   :  { %825 = vrot.lane.b32.xlu1 %v823_v4, %s5489_s30 }
 0xd87   :  { %v1070_v38 = vpop.permute.xlu0 %1069 }
 0xd88   :  { %v1072_v18 = vmul.f32 %v1070_v38, %v1064_v17 }
 0xd8a   :  { %1074 = vrot.lane.b32.xlu2 %v1072_v18, %s5489_s30 }
 0xddc   :  { %v826_v21 = vpop.permute.xlu1 %825 }
 0xddd   :  { %v5876_v22 = vadd.f32 %v826_v21, %v818_v20 }
 0xddf   :  { %4671 = vtanh.f32 %v5876_v22  ;;  %v890_v21 = vrot.slane %v5876_v22, 6 }
 0xde4   :  { %v1075_v24 = vpop.permute.xlu2 %1074 }
 0xde5   :  { %v4672_v26 = vpop.eup %4671  ;;  %v5879_v27 = vadd.f32 %v1075_v24, %v1067_v23 }
 0xde6   :  { %831 = vrot.lane.b32.xlu0 %v4672_v26, %s5488_s12 }
 0xde7   :  { %4673 = vtanh.f32 %v5879_v27 }
 0xded   :  { %v4674_v28 = vpop.eup %4673 }
 0xdee   :  { %1080 = vrot.lane.b32.xlu1 %v4674_v28, %s5488_s12  ;;  %v1140_v28 = vrot.slane %v5879_v27, 2 }
 0xe58   :  { %v832_v29 = vpop.permute.xlu0 %831 }
 0xe59   :  { %v5884_v25 = vmul.f32 %v832_v29, %v812_v3 }
 0xe5b   :  { %v840_v34 = vrot.slane %v5884_v25, 2 }
 0xe5d   :  { %841 = vrot.lane.b32.xlu2 %v840_v34, %s5489_s30 }
 0xe60   :  { %v1081_v35 = vpop.permute.xlu1 %1080 }
 0xe61   :  { %v5888_v36 = vmul.f32 %v1081_v35, %v1064_v17 }
 0xe63   :  { %v1090_v39 = vrot.slane %v5888_v36, 6 }
 0xe65   :  { %1091 = vrot.lane.b32.xlu0 %v1090_v39, %s5489_s30 }
 0xeb7   :  { %v842_v40 = vpop.permute.xlu2 %841 }
 0xeb8   :  { %4437 = vmatmul.msk.f32.vlgmr.msra.gmra.mxu0 %vm408_vm7, %v842_v40 }
 0xeb9   :  { %1328 = vmatpush.msra.mxu0 %v5829_v30 }
 0xebb   :  { %1329 = vmatpush.msra.mxu0 %v5831_v31 }
 0xebd   :  { %1330 = vmatpush.msra.mxu0 %v5835_v33 }
 0xebf   :  { %1331 = vmatpush.msra.mxu0 %v5841_v6 }
 0xed7   :  { %v1092_v41 = vpop.permute.xlu0 %1091 }
 0xed8   :  { %4445 = vmatmul.msk.f32.vlgmr.msrb.gmra.mxu0 %vm408_vm7, %v1092_v41 }
 0xf35   :  { %v862_v42 = vpop.f32.mrf.mxu0 }
 0xf36   :  { %v866_v44 = vrot.slane %v862_v42, 4 }
 0xf38   :  { %v868_v45 = vadd.f32 %v866_v44, %v5814_v1 }
 0xf3a   :  { %4675 = vtanh.f32 %v868_v45  ;;  %v4438_v11 = vmul.f32 -1.442695, %v868_v45 }
 0xf40   :  { %v4676_v46 = vpop.eup %4675 }
 0xf41   :  { %894 = vrot.lane.b32.xlu1 %v4676_v46, %s5488_s12 }
 0xf55   :  { %v1112_v47 = vpop.f32.mrf.mxu0 }
 0xf56   :  { %v1116_v48 = vrot.slane %v1112_v47, 4 }
 0xf58   :  { %v1118_v49 = vadd.f32 %v1116_v48, %v5868_v43 }
 0xf5a   :  { %4677 = vtanh.f32 %v1118_v49  ;;  %v4446_v51 = vmul.f32 -1.442695, %v1118_v49 }
 0xf5b   :  { %4679 = vpow2.f32 %v4438_v11 }
 0xf5c   :  { %4681 = vpow2.f32 %v4446_v51 }
 0xf60   :  { %v4678_v50 = vpop.eup %4677 }
 0xf61   :  { %1144 = vrot.lane.b32.xlu2 %v4678_v50, %s5488_s12  ;;  %v4680_v52 = vpop.eup %4679 }
 0xf62   :  { %v872_v53 = vadd.f32 1.0, %v4680_v52  ;;  %v4682_v54 = vpop.eup %4681 }
 0xf63   :  { %v1122_v55 = vadd.f32 1.0, %v4682_v54 }
 0xf64   :  { %4683 = vrcp.f32 %v872_v53  ;;  %v884_v3 = vand.u32 2147483648, %v872_v53  ;;  %vm878_vm5 = vweird.f32 %v872_v53  ;;  %v882_v4 = vand.u32 2147483647, %v872_v53 }
 0xf65   :  { %4685 = vrcp.f32 %v1122_v55  ;;  %v1134_v16 = vand.u32 2147483648, %v1122_v55  ;;  %vm1128_vm11 = vweird.f32 %v1122_v55  ;;  %v1132_v9 = vand.u32 2147483647, %v1122_v55 }
 0xf66   :  { %v885_v10 = vor.u32 1.1754944e-38, %v884_v3  ;;  %vm883_vm9 = vcmp.eq.f32.partialorder %v882_v4, 8.507059e+37 }
 0xf67   :  { %v1135_v17 = vor.u32 1.1754944e-38, %v1134_v16  ;;  %vm1133_vm1 = vcmp.eq.f32.partialorder %v1132_v9, 8.507059e+37 }
 0xf6a   :  { %v4684_v56 = vpop.eup %4683 }
 0xf6b   :  { %v874_v57 = vmul.f32 %v4684_v56, %v872_v53  ;;  %v4686_v59 = vpop.eup %4685  ;;  %vm879_vm4 = vweird.f32 %v4684_v56 }
 0xf6c   :  { %v1124_v62 = vmul.f32 %v4686_v59, %v1122_v55  ;;  %vm880_vm8 = vmor %vm878_vm5, %vm879_vm4  ;;  %vm1129_vm10 = vweird.f32 %v4686_v59 }
 0xf6d   :  { %v875_v58 = vsub.f32 1.0, %v874_v57  ;;  %vm1130_vm0 = vmor %vm1128_vm11, %vm1129_vm10 }
 0xf6e   :  { %v1125_v2 = vsub.f32 1.0, %v1124_v62 }
 0xf6f   :  { %v876_v60 = vmul.f32 %v4684_v56, %v875_v58 }
 0xf70   :  { %v1126_v7 = vmul.f32 %v4686_v59, %v1125_v2 }
 0xf71   :  { %v877_v63 = vadd.f32 %v4684_v56, %v876_v60 }
 0xf72   :  { %v1127_v15 = vadd.f32 %v4686_v59, %v1126_v7 }
 0xf73   :  { %v881_v5 = vsel %vm880_vm8, %v4684_v56, %v877_v63 }
 0xf74   :  { %v886_v13 = vsel %vm883_vm9, %v885_v10, %v881_v5  ;;  %v1131_v38 = vsel %vm1130_vm0, %v4686_v59, %v1127_v15 }
 0xf75   :  { %v1136_v19 = vsel %vm1133_vm1, %v1135_v17, %v1131_v38  ;;  %v892_v23 = vmul.f32 %v890_v21, %v886_v13 }
 0xf76   :  { %v1142_v29 = vmul.f32 %v1140_v28, %v1136_v19 }
 0xfb3   :  { %v895_v12 = vpop.permute.xlu1 %894 }
 0xfb4   :  { %v897_v14 = vmul.f32 %v895_v12, %v886_v13 }
 0xfb6   :  { %899 = vrot.lane.b32.xlu0 %v897_v14, %s5489_s30 }
 0xfbb   :  { %v1145_v18 = vpop.permute.xlu2 %1144 }
 0xfbc   :  { %v1147_v20 = vmul.f32 %v1145_v18, %v1136_v19 }
 0xfbe   :  { %1149 = vrot.lane.b32.xlu1 %v1147_v20, %s5489_s30 }
0x1028   :  { %v900_v24 = vpop.permute.xlu0 %899 }
0x1029   :  { %v5905_v26 = vadd.f32 %v900_v24, %v892_v23 }
0x102b   :  { %4687 = vtanh.f32 %v5905_v26 }
0x1030   :  { %v1150_v34 = vpop.permute.xlu1 %1149 }
0x1031   :  { %v4688_v35 = vpop.eup %4687  ;;  %v1152_v39 = vadd.f32 %v1150_v34, %v1142_v29 }
0x1032   :  { %905 = vrot.lane.b32.xlu2 %v4688_v35, %s5488_s12 }
0x1033   :  { %4689 = vtanh.f32 %v1152_v39  ;;  %v1215_v2 = vrot.slane %v1152_v39, 2 }
0x1039   :  { %v4690_v40 = vpop.eup %4689 }
0x103a   :  { %1155 = vrot.lane.b32.xlu0 %v4690_v40, %s5488_s12 }
0x108c   :  { %v906_v41 = vpop.permute.xlu2 %905 }
0x108d   :  { %v5911_v22 = vmul.f32 %v906_v41, %v886_v13 }
0x108f   :  { %v914_v42 = vrot.slane %v5911_v22, 4 }
0x1091   :  { %915 = vrot.lane.b32.xlu1 %v914_v42, %s5489_s30 }
0x10ac   :  { %v1156_v44 = vpop.permute.xlu0 %1155 }
0x10ad   :  { %v5915_v45 = vmul.f32 %v1156_v44, %v1136_v19 }
0x10af   :  { %v1165_v27 = vrot.slane %v5915_v45, 4 }
0x10b1   :  { %1166 = vrot.lane.b32.xlu2 %v1165_v27, %s5489_s30 }
0x1103   :  { %v916_v46 = vpop.permute.xlu1 %915 }
0x1104   :  { %4439 = vmatmul.msk.f32.vlgmr.msra.gmra.mxu1 %vm408_vm7, %v916_v46 }
0x1105   :  { %1402 = vmatpush.msra.mxu1 %v5829_v30 }
0x1107   :  { %1403 = vmatpush.msra.mxu1 %v5831_v31 }
0x1109   :  { %1404 = vmatpush.msra.mxu1 %v5835_v33 }
0x110b   :  { %v1167_v47 = vpop.permute.xlu2 %1166  ;;  %1405 = vmatpush.msra.mxu1 %v5841_v6 }
0x110c   :  { %4447 = vmatmul.msk.f32.vlgmr.msrb.gmra.mxu1 %vm408_vm7, %v1167_v47 }
0x1181   :  { %v5925_v48 = vpop.f32.mrf.mxu1 }
0x1189   :  { %v1187_v49 = vpop.f32.mrf.mxu1 }
0x118a   :  { %v1191_v50 = vrot.slane %v1187_v49, 6 }
0x118c   :  { %v1193_v11 = vadd.f32 %v1191_v50, %v5868_v43 }
0x118e   :  { %4691 = vtanh.f32 %v1193_v11  ;;  %v4448_v30 = vmul.f32 -1.442695, %v1193_v11 }
0x1190   :  { %4693 = vpow2.f32 %v4448_v30 }
0x1194   :  { %v4692_v51 = vpop.eup %4691 }
0x1195   :  { %1219 = vrot.lane.b32.xlu0 %v4692_v51, %s5488_s12 }
0x1196   :  { %v4694_v31 = vpop.eup %4693 }
0x1197   :  { %v1197_v52 = vadd.f32 1.0, %v4694_v31 }
0x1199   :  { %4695 = vrcp.f32 %v1197_v52  ;;  %v1209_v56 = vand.u32 2147483648, %v1197_v52  ;;  %vm1203_vm13 = vweird.f32 %v1197_v52  ;;  %v1207_v57 = vand.u32 2147483647, %v1197_v52 }
0x119b   :  { %v1210_v59 = vor.u32 1.1754944e-38, %v1209_v56  ;;  %vm1208_vm15 = vcmp.eq.f32.partialorder %v1207_v57, 8.507059e+37 }
0x119f   :  { %v4696_v33 = vpop.eup %4695 }
0x11a0   :  { %v1199_v53 = vmul.f32 %v4696_v33, %v1197_v52  ;;  %vm1204_vm12 = vweird.f32 %v4696_v33 }
0x11a1   :  { %vm1205_vm14 = vmor %vm1203_vm13, %vm1204_vm12 }
0x11a2   :  { %v1200_v6 = vsub.f32 1.0, %v1199_v53 }
0x11a4   :  { %v1201_v54 = vmul.f32 %v4696_v33, %v1200_v6 }
0x11a6   :  { %v1202_v55 = vadd.f32 %v4696_v33, %v1201_v54 }
0x11a8   :  { %v1206_v58 = vsel %vm1205_vm14, %v4696_v33, %v1202_v55 }
0x11a9   :  { %v1211_v62 = vsel %vm1208_vm15, %v1210_v59, %v1206_v58 }
0x11aa   :  { %v1217_v3 = vmul.f32 %v1215_v2, %v1211_v62 }
0x1207   :  { %v1220_v60 = vpop.permute.xlu0 %1219 }
0x1208   :  { %v1222_v63 = vmul.f32 %v1220_v60, %v1211_v62 }
0x120a   :  { %1224 = vrot.lane.b32.xlu1 %v1222_v63, %s5489_s30 }
0x127c   :  { %v1225_v4 = vpop.permute.xlu1 %1224 }
0x127d   :  { %v1227_v5 = vadd.f32 %v1225_v4, %v1217_v3 }
0x127f   :  { %4697 = vtanh.f32 %v1227_v5  ;;  %v1287_v41 = vrot.slane %v1227_v5, 2 }
0x1285   :  { %v4698_v7 = vpop.eup %4697 }
0x1286   :  { %1230 = vrot.lane.b32.xlu2 %v4698_v7, %s5488_s12 }
0x12e0   :  { %v1231_v10 = vpop.permute.xlu2 %1230 }
0x12e1   :  { %v5931_v12 = vmul.f32 %v1231_v10, %v1211_v62 }
0x12e3   :  { %v1240_v13 = vrot.slane %v5931_v12, 2 }
0x12e5   :  { %1241 = vrot.lane.b32.xlu0 %v1240_v13, %s5489_s30 }
0x1357   :  { %v1242_v14 = vpop.permute.xlu0 %1241 }
0x1358   :  { %4449 = vmatmul.msk.f32.vlgmr.msrb.gmra.mxu3 %vm408_vm7, %v1242_v14 }
0x13db   :  { %v1262_v15 = vpop.f32.mrf.mxu3 }
0x13dc   :  { %v1265_v16 = vadd.f32 %v1262_v15, %v5868_v43 }
0x13de   :  { %4699 = vtanh.f32 %v1265_v16  ;;  %v4450_v38 = vmul.f32 -1.442695, %v1265_v16 }
0x13e0   :  { %4701 = vpow2.f32 %v4450_v38 }
0x13e4   :  { %v4700_v9 = vpop.eup %4699 }
0x13e5   :  { %1291 = vrot.lane.b32.xlu1 %v4700_v9, %s5488_s12 }
0x13e6   :  { %v4702_v17 = vpop.eup %4701 }
0x13e7   :  { %v1269_v18 = vadd.f32 1.0, %v4702_v17 }
0x13e9   :  { %4703 = vrcp.f32 %v1269_v18  ;;  %v1281_v28 = vand.u32 2147483648, %v1269_v18  ;;  %vm1275_vm3 = vweird.f32 %v1269_v18  ;;  %v1279_v29 = vand.u32 2147483647, %v1269_v18 }
0x13eb   :  { %v1282_v34 = vor.u32 1.1754944e-38, %v1281_v28  ;;  %vm1280_vm5 = vcmp.eq.f32.partialorder %v1279_v29, 8.507059e+37 }
0x13ef   :  { %v4704_v19 = vpop.eup %4703 }
0x13f0   :  { %v1271_v20 = vmul.f32 %v4704_v19, %v1269_v18  ;;  %vm1276_vm2 = vweird.f32 %v4704_v19 }
0x13f1   :  { %vm1277_vm4 = vmor %vm1275_vm3, %vm1276_vm2 }
0x13f2   :  { %v1272_v21 = vsub.f32 1.0, %v1271_v20 }
0x13f4   :  { %v1273_v23 = vmul.f32 %v4704_v19, %v1272_v21 }
0x13f6   :  { %v1274_v24 = vadd.f32 %v4704_v19, %v1273_v23 }
0x13f8   :  { %v1278_v43 = vsel %vm1277_vm4, %v4704_v19, %v1274_v24 }
0x13f9   :  { %v1283_v39 = vsel %vm1280_vm5, %v1282_v34, %v1278_v43 }
0x13fa   :  { %v1289_v42 = vmul.f32 %v1287_v41, %v1283_v39 }
0x1457   :  { %v1292_v35 = vpop.permute.xlu1 %1291 }
0x1458   :  { %v1294_v40 = vmul.f32 %v1292_v35, %v1283_v39 }
0x145a   :  { %1296 = vrot.lane.b32.xlu2 %v1294_v40, %s5489_s30 }
0x14b4   :  { %v1297_v44 = vpop.permute.xlu2 %1296 }
0x14b5   :  { %v1299_v27 = vadd.f32 %v1297_v44, %v1289_v42 }
0x14b7   :  { %4705 = vtanh.f32 %v1299_v27  ;;  %v1361_v4 = vrot.slane %v1299_v27, 2 }
0x14bd   :  { %v4706_v46 = vpop.eup %4705 }
0x14be   :  { %1302 = vrot.lane.b32.xlu0 %v4706_v46, %s5488_s12 }
0x1530   :  { %v1303_v47 = vpop.permute.xlu0 %1302 }
0x1531   :  { %v5940_v49 = vmul.f32 %v1303_v47, %v1283_v39 }
0x1533   :  { %1312 = vrot.lane.b32.xlu1 %v5940_v49, %s5489_s30 }
0x15a5   :  { %v1313_v50 = vpop.permute.xlu1 %1312 }
0x15a6   :  { %4451 = vmatmul.msk.f32.vlgmr.msra.gmra.mxu0 %vm408_vm7, %v1313_v50 }
0x1623   :  { %v1333_v11 = vpop.f32.mrf.mxu0 }
0x1624   :  { %v1337_v51 = vrot.slane %v1333_v11, 2 }
0x1626   :  { %v1339_v30 = vadd.f32 %v1337_v51, %v5865_v37 }
0x1628   :  { %4707 = vtanh.f32 %v1339_v30  ;;  %v4452_v52 = vmul.f32 -1.442695, %v1339_v30 }
0x162a   :  { %4709 = vpow2.f32 %v4452_v52 }
0x162e   :  { %v4708_v31 = vpop.eup %4707 }
0x162f   :  { %1365 = vrot.lane.b32.xlu2 %v4708_v31, %s5488_s12 }
0x1630   :  { %v4710_v33 = vpop.eup %4709 }
0x1631   :  { %v1343_v53 = vadd.f32 1.0, %v4710_v33 }
0x1633   :  { %4711 = vrcp.f32 %v1343_v53  ;;  %v1355_v58 = vand.u32 2147483648, %v1343_v53  ;;  %vm1349_vm9 = vweird.f32 %v1343_v53  ;;  %v1353_v59 = vand.u32 2147483647, %v1343_v53 }
0x1635   :  { %v1356_v62 = vor.u32 1.1754944e-38, %v1355_v58  ;;  %vm1354_vm11 = vcmp.eq.f32.partialorder %v1353_v59, 8.507059e+37 }
0x1639   :  { %v4712_v6 = vpop.eup %4711 }
0x163a   :  { %v1345_v54 = vmul.f32 %v4712_v6, %v1343_v53  ;;  %vm1350_vm8 = vweird.f32 %v4712_v6 }
0x163b   :  { %vm1351_vm10 = vmor %vm1349_vm9, %vm1350_vm8 }
0x163c   :  { %v1346_v55 = vsub.f32 1.0, %v1345_v54 }
0x163e   :  { %v1347_v56 = vmul.f32 %v4712_v6, %v1346_v55 }
0x1640   :  { %v1348_v57 = vadd.f32 %v4712_v6, %v1347_v56 }
0x1642   :  { %v1352_v60 = vsel %vm1351_vm10, %v4712_v6, %v1348_v57  ;;  %vm546_vm10 = vcmask 257026  }
0x1643   :  { %v1357_v2 = vsel %vm1354_vm11, %v1356_v62, %v1352_v60  ;;  %vm621_vm11 = vcmask 259076  }
0x1644   :  { %v1363_v5 = vmul.f32 %v1361_v4, %v1357_v2 }
0x1689   :  { %v1366_v63 = vpop.permute.xlu2 %1365 }
0x168a   :  { %v1368_v3 = vmul.f32 %v1366_v63, %v1357_v2 }
0x168c   :  { %1370 = vrot.lane.b32.xlu0 %v1368_v3, %s5489_s30 }
0x16fe   :  { %v1371_v7 = vpop.permute.xlu0 %1370 }
0x16ff   :  { %v1373_v10 = vadd.f32 %v1371_v7, %v1363_v5 }
0x1701   :  { %4713 = vtanh.f32 %v1373_v10  ;;  %v1435_v46 = vrot.slane %v1373_v10, 2 }
0x1707   :  { %v4714_v13 = vpop.eup %4713 }
0x1708   :  { %1376 = vrot.lane.b32.xlu1 %v4714_v13, %s5488_s12 }
0x177a   :  { %v1377_v14 = vpop.permute.xlu1 %1376 }
0x177b   :  { %v5949_v15 = vmul.f32 %v1377_v14, %v1357_v2 }
0x177d   :  { %v1385_v16 = vrot.slane %v5949_v15, 6 }
0x177f   :  { %1386 = vrot.lane.b32.xlu2 %v1385_v16, %s5489_s30 }
0x17d9   :  { %v1387_v9 = vpop.permute.xlu2 %1386 }
0x17da   :  { %4453 = vmatmul.msk.f32.vlgmr.msra.gmra.mxu1 %vm408_vm7, %v1387_v9 }
0x1857   :  { %v1407_v38 = vpop.f32.mrf.mxu1 }
0x1858   :  { %v1411_v17 = vrot.slane %v1407_v38, 4 }
0x185a   :  { %v1413_v18 = vadd.f32 %v1411_v17, %v5865_v37 }
0x185c   :  { %4715 = vtanh.f32 %v1413_v18  ;;  %v4454_v20 = vmul.f32 -1.442695, %v1413_v18 }
0x185e   :  { %4717 = vpow2.f32 %v4454_v20 }
0x1862   :  { %v4716_v19 = vpop.eup %4715 }
0x1863   :  { %1439 = vrot.lane.b32.xlu0 %v4716_v19, %s5488_s12 }
0x1864   :  { %v4718_v21 = vpop.eup %4717 }
0x1865   :  { %v1417_v23 = vadd.f32 1.0, %v4718_v21 }
0x1867   :  { %4719 = vrcp.f32 %v1417_v23  ;;  %v1429_v35 = vand.u32 2147483648, %v1417_v23  ;;  %vm1423_vm1 = vweird.f32 %v1417_v23  ;;  %v1427_v39 = vand.u32 2147483647, %v1417_v23 }
0x1869   :  { %v1430_v41 = vor.u32 1.1754944e-38, %v1429_v35  ;;  %vm1428_vm13 = vcmp.eq.f32.partialorder %v1427_v39, 8.507059e+37 }
0x186d   :  { %v4720_v24 = vpop.eup %4719 }
0x186e   :  { %v1419_v28 = vmul.f32 %v4720_v24, %v1417_v23  ;;  %vm1424_vm0 = vweird.f32 %v4720_v24 }
0x186f   :  { %vm1425_vm12 = vmor %vm1423_vm1, %vm1424_vm0  ;;  %vm1163_vm0 = vcmask 521476   ;;  %vm696_vm1 = vcmask 261126  }
0x1870   :  { %v1420_v29 = vsub.f32 1.0, %v1419_v28 }
0x1872   :  { %v1421_v43 = vmul.f32 %v4720_v24, %v1420_v29 }
0x1874   :  { %v1422_v34 = vadd.f32 %v4720_v24, %v1421_v43 }
0x1876   :  { %v1426_v40 = vsel %vm1425_vm12, %v4720_v24, %v1422_v34  ;;  %vm1088_vm12 = vcmask 523526  }
0x1877   :  { %v1431_v44 = vsel %vm1428_vm13, %v1430_v41, %v1426_v40  ;;  %vm1238_vm13 = vcmask 519426  }
0x1878   :  { %v1437_v47 = vmul.f32 %v1435_v46, %v1431_v44 }
0x18d5   :  { %v1440_v42 = vpop.permute.xlu0 %1439 }
0x18d6   :  { %v1442_v27 = vmul.f32 %v1440_v42, %v1431_v44 }
0x18d8   :  { %1444 = vrot.lane.b32.xlu1 %v1442_v27, %s5489_s30 }
0x194a   :  { %v1445_v50 = vpop.permute.xlu1 %1444 }
0x194b   :  { %v1447_v11 = vadd.f32 %v1445_v50, %v1437_v47 }
0x194d   :  { %4721 = vtanh.f32 %v1447_v11  ;;  %v1509_v16 = vrot.slane %v1447_v11, 2 }
0x1953   :  { %v4722_v51 = vpop.eup %4721 }
0x1954   :  { %1450 = vrot.lane.b32.xlu2 %v4722_v51, %s5488_s12 }
0x19ae   :  { %v1451_v30 = vpop.permute.xlu2 %1450 }
0x19af   :  { %v5958_v31 = vmul.f32 %v1451_v30, %v1431_v44 }
0x19b1   :  { %v1459_v52 = vrot.slane %v5958_v31, 4 }
0x19b3   :  { %1460 = vrot.lane.b32.xlu0 %v1459_v52, %s5489_s30 }
0x1a25   :  { %v1461_v33 = vpop.permute.xlu0 %1460 }
0x1a26   :  { %4455 = vmatmul.msk.f32.vlgmr.msra.gmra.mxu2 %vm408_vm7, %v1461_v33 }
0x1aa9   :  { %v1481_v53 = vpop.f32.mrf.mxu2 }
0x1aaa   :  { %v1485_v6 = vrot.slane %v1481_v53, 6 }
0x1aac   :  { %v1487_v54 = vadd.f32 %v1485_v6, %v5865_v37 }
0x1aae   :  { %4723 = vtanh.f32 %v1487_v54  ;;  %v4456_v56 = vmul.f32 -1.442695, %v1487_v54  ;;  %v1616_v54 = vld [vmem:[%s6717_s25 + $0x30] sm:$0xff] }
0x1ab0   :  { %4725 = vpow2.f32 %v4456_v56  ;;  %v1614_v56 = vld [vmem:[%s6717_s25 + $0x20] sm:$0xff] }
0x1ab4   :  { %v4724_v55 = vpop.eup %4723 }
0x1ab5   :  { %1513 = vrot.lane.b32.xlu1 %v4724_v55, %s5488_s12  ;;  %v1615_v55 = vld [vmem:[%s6717_s25 + $0x28] sm:$0xff] }
0x1ab6   :  { %v4726_v57 = vpop.eup %4725 }
0x1ab7   :  { %v1491_v58 = vadd.f32 1.0, %v4726_v57 }
0x1ab9   :  { %4727 = vrcp.f32 %v1491_v58  ;;  %v1503_v3 = vand.u32 2147483648, %v1491_v58  ;;  %vm1497_vm15 = vweird.f32 %v1491_v58  ;;  %v1501_v4 = vand.u32 2147483647, %v1491_v58 }
0x1abb   :  { %v1504_v7 = vor.u32 1.1754944e-38, %v1503_v3  ;;  %vm1502_vm3 = vcmp.eq.f32.partialorder %v1501_v4, 8.507059e+37  ;;  %v6000_v3 = vld [vmem:[#allocation15 + $0x10] sm:$0xff] }
0x1abc   :  { %v1611_v4 = vld [vmem:[%s6717_s25 + $0x8] sm:$0xff] }
0x1abf   :  { %v4728_v59 = vpop.eup %4727 }
0x1ac0   :  { %v1493_v60 = vmul.f32 %v4728_v59, %v1491_v58  ;;  %vm1498_vm14 = vweird.f32 %v4728_v59 }
0x1ac1   :  { %vm1499_vm2 = vmor %vm1497_vm15, %vm1498_vm14  ;;  %vm1310_vm14 = vcmask 517376   ;;  %vm6699_vm15 = vcmask 523264  }
0x1ac2   :  { %v1494_v62 = vsub.f32 1.0, %v1493_v60 }
0x1ac4   :  { %v1495_v63 = vmul.f32 %v4728_v59, %v1494_v62  ;;  %v1613_v62 = vld [vmem:[%s6717_s25 + $0x18] sm:$0xff] }
0x1ac6   :  { %v1496_v2 = vadd.f32 %v4728_v59, %v1495_v63  ;;  %v5996_v63 = vld [vmem:[#allocation15 + $0x18] sm:$0xff] }
0x1ac7   :  { %1664 = vmatpush.msrb.mxu1 %v5996_v63  ;;  %1729 = vmatpush.msrb.mxu2 %v5996_v63 }
0x1ac8   :  { %v1500_v5 = vsel %vm1499_vm2, %v4728_v59, %v1496_v2  ;;  %v1612_v2 = vld [vmem:[%s6717_s25 + $0x10] sm:$0xff]  ;;  %1803 = vmatpush.msrb.mxu3 %v5996_v63 }
0x1ac9   :  { %v1505_v13 = vsel %vm1502_vm3, %v1504_v7, %v1500_v5  ;;  %v6003_v5 = vld [vmem:[#allocation15 + $0x8] sm:$0xff]  ;;  %1665 = vmatpush.msrb.mxu1 %v6000_v3  ;;  %1730 = vmatpush.msrb.mxu2 %v6000_v3 }
0x1aca   :  { %v1511_v9 = vmul.f32 %v1509_v16, %v1505_v13  ;;  %v1610_v7 = vld [vmem:[%s6717_s25] sm:$0xff]  ;;  %1804 = vmatpush.msrb.mxu3 %v6000_v3 }
0x1acb   :  { %1666 = vmatpush.msrb.mxu1 %v6003_v5  ;;  %1731 = vmatpush.msrb.mxu2 %v6003_v5  ;;  %v6042_v16 = vld [vmem:[%s6718_s23] ss:$0 sm:$0xff] }
0x1acc   :  { %1805 = vmatpush.msrb.mxu3 %v6003_v5 }
0x1b27   :  { %v1514_v10 = vpop.permute.xlu1 %1513 }
0x1b28   :  { %v1516_v14 = vmul.f32 %v1514_v10, %v1505_v13  ;;  %v6014_v10 = vld [vmem:[#allocation15] sm:$0xff] }
0x1b29   :  { %1667 = vmatpush.msrb.mxu1 %v6014_v10  ;;  %1732 = vmatpush.msrb.mxu2 %v6014_v10 }
0x1b2a   :  { %1518 = vrot.lane.b32.xlu2 %v1516_v14, %s5489_s30  ;;  %1668 = vmatmul.f32.vlgmr.msrb.gmra.mxu1 %v5487_v8 }
0x1b2b   :  { %1806 = vmatpush.msrb.mxu3 %v6014_v10  ;;  %1877 = vmatpush.msra.mxu1 %v5996_v63 }
0x1b2c   :  { %1951 = vmatpush.msra.mxu2 %v5996_v63 }
0x1b2d   :  { %1878 = vmatpush.msra.mxu1 %v6000_v3 }
0x1b2e   :  { %1952 = vmatpush.msra.mxu2 %v6000_v3 }
0x1b2f   :  { %1879 = vmatpush.msra.mxu1 %v6003_v5 }
0x1b30   :  { %1953 = vmatpush.msra.mxu2 %v6003_v5 }
0x1b31   :  { %1880 = vmatpush.msra.mxu1 %v6014_v10 }
0x1b32   :  { %1954 = vmatpush.msra.mxu2 %v6014_v10 }
0x1b33   :  { %2093 = vmatpush.msrb.mxu1 %v5996_v63 }
0x1b35   :  { %2094 = vmatpush.msrb.mxu1 %v6000_v3 }
0x1b37   :  { %2095 = vmatpush.msrb.mxu1 %v6003_v5 }
0x1b39   :  { %2096 = vmatpush.msrb.mxu1 %v6014_v10 }
0x1b84   :  { %v1519_v38 = vpop.permute.xlu2 %1518 }
0x1b85   :  { %v1521_v17 = vadd.f32 %v1519_v38, %v1511_v9 }
0x1b87   :  { %4729 = vtanh.f32 %v1521_v17  ;;  %v1580_v51 = vrot.slane %v1521_v17, 2 }
0x1b8d   :  { %v4730_v18 = vpop.eup %4729 }
0x1b8e   :  { %1524 = vrot.lane.b32.xlu0 %v4730_v18, %s5488_s12 }
0x1ba7   :  { %v1669_v38 = vpop.f32.mrf.mxu1 }
0x1c00   :  { %v1525_v19 = vpop.permute.xlu0 %1524 }
0x1c01   :  { %v1527_v20 = vmul.f32 %v1525_v19, %v1505_v13 }
0x1c03   :  { %v1533_v21 = vrot.slane %v1527_v20, 2 }
0x1c05   :  { %1534 = vrot.lane.b32.xlu1 %v1533_v21, %s5489_s30 }
0x1c77   :  { %v1535_v23 = vpop.permute.xlu1 %1534 }
0x1c78   :  { %4457 = vmatmul.msk.f32.vlgmr.msra.gmra.mxu3 %vm408_vm7, %v1535_v23 }
0x1c79   :  { %2019 = vmatpush.msra.mxu3 %v5996_v63 }
0x1c7b   :  { %2020 = vmatpush.msra.mxu3 %v6000_v3 }
0x1c7d   :  { %2021 = vmatpush.msra.mxu3 %v6003_v5 }
0x1c7f   :  { %2022 = vmatpush.msra.mxu3 %v6014_v10 }
0x1cfb   :  { %v1555_v24 = vpop.f32.mrf.mxu3 }
0x1cfc   :  { %v1558_v28 = vadd.f32 %v1555_v24, %v5865_v37 }
0x1cfe   :  { %4731 = vtanh.f32 %v1558_v28  ;;  %v4458_v43 = vmul.f32 -1.442695, %v1558_v28 }
0x1d00   :  { %4733 = vpow2.f32 %v4458_v43 }
0x1d04   :  { %v4732_v29 = vpop.eup %4731 }
0x1d05   :  { %1584 = vrot.lane.b32.xlu2 %v4732_v29, %s5488_s12 }
0x1d06   :  { %v4734_v34 = vpop.eup %4733 }
0x1d07   :  { %v1562_v35 = vadd.f32 1.0, %v4734_v34 }
0x1d09   :  { %4735 = vrcp.f32 %v1562_v35  ;;  %v1574_v44 = vand.u32 2147483648, %v1562_v35  ;;  %vm1568_vm5 = vweird.f32 %v1562_v35  ;;  %v1572_v27 = vand.u32 2147483647, %v1562_v35 }
0x1d0b   :  { %vm1573_vm9 = vcmp.eq.f32.partialorder %v1572_v27, 8.507059e+37 }
0x1d0d   :  { %543 = vrot.lane.b32.xlu2 %v5789_v0, %s5489_s30  ;;  %v1575_v0 = vor.u32 1.1754944e-38, %v1574_v44 }
0x1d0f   :  { %v4736_v39 = vpop.eup %4735 }
0x1d10   :  { %v1564_v40 = vmul.f32 %v4736_v39, %v1562_v35  ;;  %vm1569_vm4 = vweird.f32 %v4736_v39 }
0x1d11   :  { %vm1570_vm8 = vmor %vm1568_vm5, %vm1569_vm4 }
0x1d12   :  { %v1565_v41 = vsub.f32 1.0, %v1564_v40 }
0x1d14   :  { %v1566_v42 = vmul.f32 %v4736_v39, %v1565_v41 }
0x1d15   :  { %1381 = vrot.lane.b32.xlu2 %v5949_v15, %s5488_s12 }
0x1d16   :  { %v1567_v37 = vadd.f32 %v4736_v39, %v1566_v42 }
0x1d18   :  { %v1571_v46 = vsel %vm1570_vm8, %v4736_v39, %v1567_v37 }
0x1d19   :  { %v1576_v15 = vsel %vm1573_vm9, %v1575_v0, %v1571_v46 }
0x1d1a   :  { %v1582_v30 = vmul.f32 %v1580_v51, %v1576_v15 }
0x1d5f   :  { %v1585_v47 = vpop.permute.xlu2 %1584 }
0x1d60   :  { %v1587_v50 = vmul.f32 %v1585_v47, %v1576_v15 }
0x1d62   :  { %1589 = vrot.lane.b32.xlu0 %v1587_v50, %s5489_s30 }
0x1d67   :  { %v544_v11 = vpop.permute.xlu2 %543 }
0x1d68   :  { %547 = vst.msk [vmem:[#allocation2] sm:$0xc] %vm546_vm10, %v544_v11 }
0x1d6a   :  { %618 = vrot.lane.b32.xlu0 %v5798_v32, %s5489_s30 }
0x1d6f   :  { %v1382_v59 = vpop.permute.xlu2 %1381 }
0x1d72   :  { %1455 = vrot.lane.b32.xlu0 %v5958_v31, %s5488_s12  ;;  %v1617_v31 = vld [vmem:[%s6717_s25 + $0x38] sm:$0xff] }
0x1d73   :  { %1637 = vmatpush.msrb.mxu0 %v1617_v31 }
0x1d75   :  { %1638 = vmatpush.msrb.mxu0 %v1616_v54 }
0x1d77   :  { %1639 = vmatpush.msrb.mxu0 %v1615_v55 }
0x1d79   :  { %1640 = vmatpush.msrb.mxu0 %v1614_v56 }
0x1d7b   :  { %1641 = vmatpush.msrb.mxu0 %v1613_v62 }
0x1d7d   :  { %1642 = vmatpush.msrb.mxu0 %v1612_v2 }
0x1d7f   :  { %1643 = vmatpush.msrb.mxu0 %v1611_v4 }
0x1d81   :  { %1644 = vmatpush.msrb.mxu0 %v1610_v7 }
0x1dd4   :  { %v1590_v52 = vpop.permute.xlu0 %1589 }
0x1dd5   :  { %v1592_v33 = vadd.f32 %v1590_v52, %v1582_v30 }
0x1dd7   :  { %4737 = vtanh.f32 %v1592_v33 }
0x1ddc   :  { %v619_v53 = vpop.permute.xlu0 %618 }
0x1ddd   :  { %v4738_v6 = vpop.eup %4737  ;;  %622 = vst.msk [vmem:[#allocation2] sm:$0x30] %vm621_vm11, %v619_v53 }
0x1dde   :  { %1595 = vrot.lane.b32.xlu1 %v4738_v6, %s5488_s12 }
0x1de4   :  { %v1456_v32 = vpop.permute.xlu0 %1455 }
0x1de5   :  { %1458 = vst.msk [vmem:[#allocation2] sm:$0x30] %vm1163_vm0, %v1456_v32 }
0x1de6   :  { %693 = vrot.lane.b32.xlu1 %v5807_v61, %s5489_s30 }
0x1dee   :  { %1529 = vrot.lane.b32.xlu1 %v1527_v20, %s5488_s12 }
0x1e50   :  { %v1596_v57 = vpop.permute.xlu1 %1595 }
0x1e51   :  { %v1598_v58 = vmul.f32 %v1596_v57, %v1576_v15 }
0x1e53   :  { %1600 = vrot.lane.b32.xlu2 %v1598_v58, %s5488_s12 }
0x1e58   :  { %v694_v61 = vpop.permute.xlu1 %693 }
0x1e59   :  { %697 = vst.msk [vmem:[#allocation2] sm:$0xc0] %vm696_vm1, %v694_v61 }
0x1e5a   :  { %1384 = vst.msk [vmem:[#allocation2] sm:$0xc0] %vm1088_vm12, %v1382_v59 }
0x1e60   :  { %v1530_v60 = vpop.permute.xlu1 %1529 }
0x1e61   :  { %1532 = vst.msk [vmem:[#allocation2] sm:$0xc] %vm1238_vm13, %v1530_v60 }
0x1ead   :  { %v1601_v13 = vpop.permute.xlu2 %1600 }
0x1eae   :  { %1603 = vst.msk [vmem:[#allocation2] sm:$0x3] %vm1310_vm14, %v1601_v13 }
0x1eb5   :  { %v6037_v14 = vld [vmem:[#allocation2] sm:$0xff] }
0x1eb6   :  { %4459 = vmatmul.msk.f32.vlgmr.msrb.gmra.mxu0 %vm6699_vm15, %v6037_v14 }
0x1f33   :  { %v1646_v9 = vpop.f32.mrf.mxu0 }
0x1f34   :  { %v6045_v17 = vadd.f32 %v6042_v16, %v1646_v9 }
0x1f36   :  { %v1672_v18 = vadd.f32 %v1669_v38, %v6045_v17 }
0x1f38   :  { %4739 = vtanh.f32 %v1672_v18  ;;  %v4461_v20 = vmul.f32 -1.442695, %v1672_v18 }
0x1f3a   :  { %4741 = vpow2.f32 %v4461_v20 }
0x1f3e   :  { %v4740_v19 = vpop.eup %4739 }
0x1f3f   :  { %1695 = vrot.lane.b32.xlu0 %v4740_v19, %s5488_s12 }
0x1f40   :  { %v4742_v21 = vpop.eup %4741 }
0x1f41   :  { %v1676_v23 = vadd.f32 1.0, %v4742_v21 }
0x1f43   :  { %4743 = vrcp.f32 %v1676_v23  ;;  %v1688_v35 = vand.u32 2147483648, %v1676_v23  ;;  %vm1682_vm3 = vweird.f32 %v1676_v23  ;;  %v1686_v39 = vand.u32 2147483647, %v1676_v23 }
0x1f45   :  { %v1689_v41 = vor.u32 1.1754944e-38, %v1688_v35  ;;  %vm1687_vm5 = vcmp.eq.f32.partialorder %v1686_v39, 8.507059e+37 }
0x1f49   :  { %v4744_v24 = vpop.eup %4743 }
0x1f4a   :  { %v1678_v28 = vmul.f32 %v4744_v24, %v1676_v23  ;;  %vm1683_vm2 = vweird.f32 %v4744_v24 }
0x1f4b   :  { %vm1684_vm4 = vmor %vm1682_vm3, %vm1683_vm2 }
0x1f4c   :  { %v1679_v29 = vsub.f32 1.0, %v1678_v28 }
0x1f4e   :  { %v1680_v43 = vmul.f32 %v4744_v24, %v1679_v29 }
0x1f50   :  { %v1681_v34 = vadd.f32 %v4744_v24, %v1680_v43 }
0x1f52   :  { %v1685_v40 = vsel %vm1684_vm4, %v4744_v24, %v1681_v34 }
0x1f53   :  { %v1690_v37 = vsel %vm1687_vm5, %v1689_v41, %v1685_v40 }
0x1f54   :  { %v1693_v27 = vmul.f32 0.0, %v1690_v37 }
0x1fb1   :  { %v1696_v42 = vpop.permute.xlu0 %1695 }
0x1fb2   :  { %v1698_v44 = vmul.f32 %v1696_v42, %v1690_v37 }
0x1fb4   :  { %1700 = vrot.lane.b32.xlu1 %v1698_v44, %s5489_s30 }
0x2026   :  { %v1701_v46 = vpop.permute.xlu1 %1700 }
0x2027   :  { %v1703_v0 = vadd.f32 %v1701_v46, %v1693_v27 }
0x2029   :  { %4745 = vtanh.f32 %v1703_v0 }
0x202f   :  { %v4746_v47 = vpop.eup %4745 }
0x2030   :  { %1706 = vrot.lane.b32.xlu2 %v4746_v47, %s5488_s12 }
0x208a   :  { %v1707_v15 = vpop.permute.xlu2 %1706 }
0x208b   :  { %v1709_v50 = vmul.f32 %v1707_v15, %v1690_v37  ;;  %v940_v37 = vrot.slane %v5925_v48, 2 }
0x208d   :  { %1711 = vrot.lane.b32.xlu0 %v1709_v50, %s5489_s30  ;;  %v942_v46 = vadd.f32 %v940_v37, %v5814_v1 }
0x208f   :  { %v4440_v1 = vmul.f32 -1.442695, %v942_v46 }
0x20ff   :  { %v1712_v11 = vpop.permute.xlu0 %1711 }
0x2100   :  { %1714 = vst.msk [vmem:[#allocation3] sm:$0x3] %vm6698_vm6, %v1712_v11  ;;  %4462 = vmatmul.msk.f32.vlgmr.msrb.gmra.mxu2 %vm408_vm7, %v1712_v11 }
0x2101   :  { %2167 = vmatpush.msrb.mxu2 %v5996_v63 }
0x2103   :  { %2168 = vmatpush.msrb.mxu2 %v6000_v3  ;;  %v1762_v3 = vrot.slane %v1703_v0, 6 }
0x2105   :  { %2169 = vmatpush.msrb.mxu2 %v6003_v5 }
0x2107   :  { %2170 = vmatpush.msrb.mxu2 %v6014_v10 }
0x2183   :  { %v1734_v51 = vpop.f32.mrf.mxu2 }
0x2184   :  { %v1738_v30 = vrot.slane %v1734_v51, 6 }
0x2186   :  { %v1740_v52 = vadd.f32 %v1738_v30, %v6045_v17 }
0x2188   :  { %4747 = vtanh.f32 %v1740_v52  ;;  %v4463_v53 = vmul.f32 -1.442695, %v1740_v52 }
0x218a   :  { %4749 = vpow2.f32 %v4463_v53 }
0x218e   :  { %v4748_v33 = vpop.eup %4747 }
0x218f   :  { %1766 = vrot.lane.b32.xlu1 %v4748_v33, %s5488_s12 }
0x2190   :  { %v4750_v6 = vpop.eup %4749 }
0x2191   :  { %v1744_v32 = vadd.f32 1.0, %v4750_v6 }
0x2193   :  { %4751 = vrcp.f32 %v1744_v32  ;;  %v1756_v58 = vand.u32 2147483648, %v1744_v32  ;;  %vm1750_vm9 = vweird.f32 %v1744_v32  ;;  %v1754_v61 = vand.u32 2147483647, %v1744_v32 }
0x2195   :  { %v1757_v60 = vor.u32 1.1754944e-38, %v1756_v58  ;;  %vm1755_vm3 = vcmp.eq.f32.partialorder %v1754_v61, 8.507059e+37 }
0x2199   :  { %v4752_v31 = vpop.eup %4751 }
0x219a   :  { %v1746_v54 = vmul.f32 %v4752_v31, %v1744_v32  ;;  %vm1751_vm8 = vweird.f32 %v4752_v31 }
0x219b   :  { %vm1752_vm2 = vmor %vm1750_vm9, %vm1751_vm8 }
0x219c   :  { %v1747_v55 = vsub.f32 1.0, %v1746_v54 }
0x219e   :  { %v1748_v56 = vmul.f32 %v4752_v31, %v1747_v55 }
0x21a0   :  { %v1749_v57 = vadd.f32 %v4752_v31, %v1748_v56 }
0x21a2   :  { %v1753_v59 = vsel %vm1752_vm2, %v4752_v31, %v1749_v57 }
0x21a3   :  { %v1758_v63 = vsel %vm1755_vm3, %v1757_v60, %v1753_v59 }
0x21a4   :  { %v1764_v4 = vmul.f32 %v1762_v3, %v1758_v63 }
0x2201   :  { %v1767_v62 = vpop.permute.xlu1 %1766 }
0x2202   :  { %v1769_v2 = vmul.f32 %v1767_v62, %v1758_v63 }
0x2204   :  { %1771 = vrot.lane.b32.xlu2 %v1769_v2, %s5489_s30 }
0x225e   :  { %v1772_v5 = vpop.permute.xlu2 %1771 }
0x225f   :  { %v1774_v7 = vadd.f32 %v1772_v5, %v1764_v4 }
0x2261   :  { %4753 = vtanh.f32 %v1774_v7  ;;  %v1836_v11 = vrot.slane %v1774_v7, 6 }
0x2267   :  { %v4754_v10 = vpop.eup %4753 }
0x2268   :  { %1777 = vrot.lane.b32.xlu0 %v4754_v10, %s5488_s12 }
0x22da   :  { %v1778_v13 = vpop.permute.xlu0 %1777 }
0x22db   :  { %v6062_v9 = vmul.f32 %v1778_v13, %v1758_v63  ;;  %v964_v13 = vrot.slane %v5905_v26, 6 }
0x22dd   :  { %v1786_v38 = vrot.slane %v6062_v9, 2 }
0x22df   :  { %1787 = vrot.lane.b32.xlu1 %v1786_v38, %s5489_s30 }
0x2351   :  { %v1788_v18 = vpop.permute.xlu1 %1787 }
0x2352   :  { %4464 = vmatmul.msk.f32.vlgmr.msrb.gmra.mxu3 %vm408_vm7, %v1788_v18 }
0x23d5   :  { %v1808_v19 = vpop.f32.mrf.mxu3 }
0x23d6   :  { %v1812_v20 = vrot.slane %v1808_v19, 4 }
0x23d8   :  { %v1814_v21 = vadd.f32 %v1812_v20, %v6045_v17 }
0x23da   :  { %4755 = vtanh.f32 %v1814_v21  ;;  %v4465_v24 = vmul.f32 -1.442695, %v1814_v21 }
0x23dc   :  { %4757 = vpow2.f32 %v4465_v24 }
0x23e0   :  { %v4756_v23 = vpop.eup %4755 }
0x23e1   :  { %1840 = vrot.lane.b32.xlu2 %v4756_v23, %s5488_s12 }
0x23e2   :  { %v4758_v28 = vpop.eup %4757 }
0x23e3   :  { %v1818_v29 = vadd.f32 1.0, %v4758_v28 }
0x23e5   :  { %4759 = vrcp.f32 %v1818_v29  ;;  %v1830_v41 = vand.u32 2147483648, %v1818_v29  ;;  %vm1824_vm5 = vweird.f32 %v1818_v29  ;;  %v1828_v42 = vand.u32 2147483647, %v1818_v29 }
0x23e6   :  { %4761 = vtanh.f32 %v942_v46 }
0x23e7   :  { %v1831_v27 = vor.u32 1.1754944e-38, %v1830_v41  ;;  %vm1829_vm9 = vcmp.eq.f32.partialorder %v1828_v42, 8.507059e+37 }
0x23eb   :  { %v4760_v43 = vpop.eup %4759 }
0x23ec   :  { %v1820_v34 = vmul.f32 %v4760_v43, %v1818_v29  ;;  %vm1825_vm4 = vweird.f32 %v4760_v43  ;;  %v4762_v50 = vpop.eup %4761 }
0x23ed   :  { %vm1826_vm8 = vmor %vm1824_vm5, %vm1825_vm4 }
0x23ee   :  { %v1821_v35 = vsub.f32 1.0, %v1820_v34 }
0x23f0   :  { %v1822_v39 = vmul.f32 %v4760_v43, %v1821_v35 }
0x23f2   :  { %v1823_v40 = vadd.f32 %v4760_v43, %v1822_v39 }
0x23f4   :  { %v1827_v44 = vsel %vm1826_vm8, %v4760_v43, %v1823_v40 }
0x23f5   :  { %v1832_v47 = vsel %vm1829_vm9, %v1831_v27, %v1827_v44 }
0x23f6   :  { %v1838_v51 = vmul.f32 %v1836_v11, %v1832_v47 }
0x243b   :  { %v1841_v0 = vpop.permute.xlu2 %1840 }
0x243c   :  { %v1843_v15 = vmul.f32 %v1841_v0, %v1832_v47 }
0x243e   :  { %1845 = vrot.lane.b32.xlu0 %v1843_v15, %s5489_s30 }
0x2446   :  { %968 = vrot.lane.b32.xlu0 %v4762_v50, %s5488_s12 }
0x24b0   :  { %v1846_v30 = vpop.permute.xlu0 %1845 }
0x24b1   :  { %v6073_v52 = vadd.f32 %v1846_v30, %v1838_v51  ;;  %v2235_v51 = vld [vmem:[%s6719_s27 + $0x38] sm:$0xff]  ;;  %v2234_v30 = vld [vmem:[%s6719_s27 + $0x30] sm:$0xff] }
0x24b2   :  { %2248 = vmatpush.msra.mxu0 %v2235_v51 }
0x24b3   :  { %4763 = vtanh.f32 %v6073_v52  ;;  %v1910_v46 = vrot.slane %v6073_v52, 6  ;;  %v2233_v52 = vld [vmem:[%s6719_s27 + $0x28] sm:$0xff] }
0x24b4   :  { %4765 = vpow2.f32 %v4440_v1  ;;  %2249 = vmatpush.msra.mxu0 %v2234_v30  ;;  %v2231_v1 = vld [vmem:[%s6719_s27 + $0x18] sm:$0xff] }
0x24b6   :  { %2250 = vmatpush.msra.mxu0 %v2233_v52 }
0x24b8   :  { %v969_v63 = vpop.permute.xlu0 %968 }
0x24b9   :  { %v4764_v48 = vpop.eup %4763 }
0x24ba   :  { %1851 = vrot.lane.b32.xlu1 %v4764_v48, %s5488_s12  ;;  %v4766_v33 = vpop.eup %4765  ;;  %v2232_v48 = vld [vmem:[%s6719_s27 + $0x20] sm:$0xff] }
0x24bb   :  { %v946_v53 = vadd.f32 1.0, %v4766_v33  ;;  %2251 = vmatpush.msra.mxu0 %v2232_v48  ;;  %v2230_v33 = vld [vmem:[%s6719_s27 + $0x10] sm:$0xff] }
0x24bd   :  { %4767 = vrcp.f32 %v946_v53  ;;  %v958_v61 = vand.u32 2147483648, %v946_v53  ;;  %vm952_vm3 = vweird.f32 %v946_v53  ;;  %v956_v59 = vand.u32 2147483647, %v946_v53  ;;  %2252 = vmatpush.msra.mxu0 %v2231_v1 }
0x24bf   :  { %v959_v62 = vor.u32 1.1754944e-38, %v958_v61  ;;  %vm957_vm5 = vcmp.eq.f32.partialorder %v956_v59, 8.507059e+37  ;;  %2253 = vmatpush.msra.mxu0 %v2230_v33  ;;  %v6130_v59 = vld [vmem:[#allocation18] ss:$0 sm:$0xff] }
0x24c3   :  { %v4768_v6 = vpop.eup %4767 }
0x24c4   :  { %v948_v32 = vmul.f32 %v4768_v6, %v946_v53  ;;  %vm953_vm2 = vweird.f32 %v4768_v6  ;;  %v2229_v53 = vld [vmem:[%s6719_s27 + $0x8] sm:$0xff] }
0x24c5   :  { %vm954_vm4 = vmor %vm952_vm3, %vm953_vm2  ;;  %2254 = vmatpush.msra.mxu0 %v2229_v53 }
0x24c6   :  { %v949_v31 = vsub.f32 1.0, %v948_v32 }
0x24c8   :  { %v950_v54 = vmul.f32 %v4768_v6, %v949_v31 }
0x24ca   :  { %v951_v57 = vadd.f32 %v4768_v6, %v950_v54 }
0x24cc   :  { %v955_v60 = vsel %vm954_vm4, %v4768_v6, %v951_v57  ;;  %v2228_v6 = vld [vmem:[%s6719_s27] sm:$0xff] }
0x24cd   :  { %v960_v2 = vsel %vm957_vm5, %v959_v62, %v955_v60  ;;  %2255 = vmatpush.msra.mxu0 %v2228_v6 }
0x24ce   :  { %v971_v3 = vmul.f32 %v969_v63, %v960_v2  ;;  %v966_v18 = vmul.f32 %v964_v13, %v960_v2 }
0x252c   :  { %v1852_v55 = vpop.permute.xlu1 %1851 }
0x252d   :  { %v6077_v56 = vmul.f32 %v1852_v55, %v1832_v47 }
0x252f   :  { %v1860_v58 = vrot.slane %v6077_v56, 4 }
0x2531   :  { %1861 = vrot.lane.b32.xlu2 %v1860_v58, %s5489_s30 }
0x2539   :  { %973 = vrot.lane.b32.xlu2 %v971_v3, %s5489_s30 }
0x258b   :  { %v1862_v4 = vpop.permute.xlu2 %1861 }
0x258c   :  { %4466 = vmatmul.msk.f32.vlgmr.msra.gmra.mxu1 %vm408_vm7, %v1862_v4 }
0x2593   :  { %v974_v38 = vpop.permute.xlu2 %973 }
0x2594   :  { %v976_v19 = vadd.f32 %v974_v38, %v966_v18 }
0x2609   :  { %v1882_v5 = vpop.f32.mrf.mxu1 }
0x260a   :  { %v1886_v7 = vrot.slane %v1882_v5, 2 }
0x260c   :  { %v1888_v10 = vadd.f32 %v1886_v7, %v6045_v17 }
0x260e   :  { %4769 = vtanh.f32 %v1888_v10  ;;  %v4467_v17 = vmul.f32 -1.442695, %v1888_v10 }
0x260f   :  { %4771 = vtanh.f32 %v976_v19 }
0x2610   :  { %4773 = vpow2.f32 %v4467_v17 }
0x2614   :  { %v4770_v20 = vpop.eup %4769 }
0x2615   :  { %1914 = vrot.lane.b32.xlu1 %v4770_v20, %s5488_s12  ;;  %v4772_v21 = vpop.eup %4771 }
0x2616   :  { %v4774_v26 = vpop.eup %4773 }
0x2617   :  { %v1892_v23 = vadd.f32 1.0, %v4774_v26 }
0x2619   :  { %4775 = vrcp.f32 %v1892_v23  ;;  %v1904_v35 = vand.u32 2147483648, %v1892_v23  ;;  %vm1898_vm9 = vweird.f32 %v1892_v23  ;;  %v1902_v39 = vand.u32 2147483647, %v1892_v23 }
0x261b   :  { %vm1903_vm3 = vcmp.eq.f32.partialorder %v1902_v39, 8.507059e+37 }
0x261d   :  { %979 = vrot.lane.b32.xlu1 %v4772_v21, %s5488_s12 }
0x261f   :  { %v4776_v24 = vpop.eup %4775 }
0x2620   :  { %v1894_v28 = vmul.f32 %v4776_v24, %v1892_v23  ;;  %vm1899_vm8 = vweird.f32 %v4776_v24 }
0x2621   :  { %vm1900_vm2 = vmor %vm1898_vm9, %vm1899_vm8 }
0x2622   :  { %v1895_v29 = vsub.f32 1.0, %v1894_v28 }
0x2624   :  { %v1896_v43 = vmul.f32 %v4776_v24, %v1895_v29 }
0x2625   :  { %910 = vrot.lane.b32.xlu1 %v5911_v22, %s5489_s30  ;;  %v1905_v22 = vor.u32 1.1754944e-38, %v1904_v35 }
0x2626   :  { %v1897_v34 = vadd.f32 %v4776_v24, %v1896_v43 }
0x2628   :  { %v1901_v40 = vsel %vm1900_vm2, %v4776_v24, %v1897_v34 }
0x262d   :  { %1160 = vrot.lane.b32.xlu1 %v5915_v45, %s5488_s12  ;;  %v1906_v45 = vsel %vm1903_vm3, %v1905_v22, %v1901_v40  ;;  %v6147_v22 = vld [vmem:[#allocation16 + $0x18] sm:$0xff] }
0x262e   :  { %v1912_v0 = vmul.f32 %v1910_v46, %v1906_v45  ;;  %2275 = vmatpush.msrb.mxu3 %v6147_v22  ;;  %2346 = vmatpush.msra.mxu1 %v6147_v22 }
0x262f   :  { %2786 = vmatpush.msrb.mxu0 %v6147_v22 }
0x2687   :  { %v1915_v41 = vpop.permute.xlu1 %1914 }
0x2688   :  { %v1917_v42 = vmul.f32 %v1915_v41, %v1906_v45  ;;  %v6149_v41 = vld [vmem:[#allocation16 + $0x10] sm:$0xff] }
0x2689   :  { %2276 = vmatpush.msrb.mxu3 %v6149_v41  ;;  %2347 = vmatpush.msra.mxu1 %v6149_v41 }
0x268a   :  { %1919 = vrot.lane.b32.xlu0 %v1917_v42, %s5489_s30  ;;  %v6159_v42 = vld [vmem:[#allocation16] sm:$0xff]  ;;  %2787 = vmatpush.msrb.mxu0 %v6149_v41 }
0x268f   :  { %v980_v37 = vpop.permute.xlu1 %979 }
0x2692   :  { %836 = vrot.lane.b32.xlu0 %v5884_v25, %s5489_s30 }
0x2697   :  { %v911_v44 = vpop.permute.xlu1 %910 }
0x2698   :  { %913 = vst.msk [vmem:[#allocation2 + $0x8] sm:$0x30] %vm621_vm11, %v911_v44 }
0x269a   :  { %1085 = vrot.lane.b32.xlu0 %v5888_v36, %s5488_s12 }
0x269f   :  { %v1161_v27 = vpop.permute.xlu1 %1160 }
0x26a0   :  { %1164 = vst.msk [vmem:[#allocation2 + $0x8] sm:$0x30] %vm1163_vm0, %v1161_v27 }
0x26a2   :  { %1307 = vrot.lane.b32.xlu0 %v5940_v49, %s5488_s12  ;;  %v982_v49 = vmul.f32 %v980_v37, %v960_v2 }
0x26fc   :  { %v1920_v47 = vpop.permute.xlu0 %1919 }
0x26fd   :  { %v6101_v25 = vadd.f32 %v1920_v47, %v1912_v0 }
0x26ff   :  { %4777 = vtanh.f32 %v6101_v25  ;;  %v1981_v28 = vrot.slane %v6101_v25, 6 }
0x2704   :  { %v837_v15 = vpop.permute.xlu0 %836 }
0x2705   :  { %v4778_v36 = vpop.eup %4777  ;;  %839 = vst.msk [vmem:[#allocation2 + $0x8] sm:$0xc] %vm546_vm10, %v837_v15 }
0x2706   :  { %1925 = vrot.lane.b32.xlu2 %v4778_v36, %s5488_s12 }
0x270c   :  { %v1086_v50 = vpop.permute.xlu0 %1085 }
0x270e   :  { %984 = vrot.lane.b32.xlu2 %v982_v49, %s5489_s30 }
0x2714   :  { %v1308_v11 = vpop.permute.xlu0 %1307 }
0x2715   :  { %1311 = vst.msk [vmem:[#allocation2 + $0x8] sm:$0x3] %vm1310_vm14, %v1308_v11 }
0x2716   :  { %1235 = vrot.lane.b32.xlu2 %v5931_v12, %s5488_s12 }
0x2760   :  { %v1926_v32 = vpop.permute.xlu2 %1925 }
0x2761   :  { %v6118_v31 = vmul.f32 %v1926_v32, %v1906_v45  ;;  %v6153_v45 = vld [vmem:[#allocation16 + $0x8] sm:$0xff] }
0x2762   :  { %2277 = vmatpush.msrb.mxu3 %v6153_v45  ;;  %2348 = vmatpush.msra.mxu1 %v6153_v45 }
0x2763   :  { %v1934_v12 = vrot.slane %v6118_v31, 6  ;;  %2788 = vmatpush.msrb.mxu0 %v6153_v45 }
0x2764   :  { %2278 = vmatpush.msrb.mxu3 %v6159_v42  ;;  %2349 = vmatpush.msra.mxu1 %v6159_v42 }
0x2765   :  { %1935 = vrot.lane.b32.xlu1 %v1934_v12, %s5489_s30  ;;  %2789 = vmatpush.msrb.mxu0 %v6159_v42 }
0x2768   :  { %v985_v54 = vpop.permute.xlu2 %984 }
0x2769   :  { %987 = vst.msk [vmem:[#allocation2 + $0x8] sm:$0xc0] %vm696_vm1, %v985_v54 }
0x276a   :  { %1089 = vst.msk [vmem:[#allocation2 + $0x8] sm:$0xc0] %vm1088_vm12, %v1086_v50 }
0x2770   :  { %v1236_v55 = vpop.permute.xlu2 %1235 }
0x2771   :  { %1239 = vst.msk [vmem:[#allocation2 + $0x8] sm:$0xc] %vm1238_vm13, %v1236_v55 }
0x2778   :  { %v1605_v57 = vld [vmem:[#allocation2 + $0x8] sm:$0xff] }
0x2779   :  { %4460 = vmatmul.msk.f32.gmra.mxu0 %vm6699_vm15, %v1605_v57 }
0x2781   :  { %4476 = vmatmul.msk.f32.vlgmr.msra.gmra.mxu0 %vm6699_vm15, %v6037_v14 }
0x2789   :  { %4477 = vmatmul.msk.f32.gmra.mxu0 %vm6699_vm15, %v1605_v57 }
0x27d7   :  { %v1936_v58 = vpop.permute.xlu1 %1935 }
0x27d8   :  { %4468 = vmatmul.msk.f32.vlgmr.msra.gmra.mxu2 %vm408_vm7, %v1936_v58 }
0x27d9   :  { %2420 = vmatpush.msra.mxu2 %v6147_v22 }
0x27db   :  { %2421 = vmatpush.msra.mxu2 %v6149_v41 }
0x27dd   :  { %2422 = vmatpush.msra.mxu2 %v6153_v45 }
0x27df   :  { %2423 = vmatpush.msra.mxu2 %v6159_v42 }
0x27f6   :  { %v1649_v61 = vpop.f32.mrf.mxu0 }
0x27f7   :  { %v6136_v63 = vadd.f32 %v6042_v16, %v1649_v61 }
0x27fe   :  { %v2257_v60 = vpop.f32.mrf.mxu0 }
0x27ff   :  { %v6133_v62 = vadd.f32 %v6130_v59, %v2257_v60 }
0x2806   :  { %v2260_v0 = vpop.f32.mrf.mxu0 }
0x2807   :  { %v6184_v25 = vadd.f32 %v6130_v59, %v2260_v0 }
0x285b   :  { %v1956_v2 = vpop.f32.mrf.mxu2 }
0x285c   :  { %v1959_v3 = vadd.f32 %v1956_v2, %v6136_v63 }
0x285e   :  { %4779 = vtanh.f32 %v1959_v3  ;;  %v4469_v4 = vmul.f32 -1.442695, %v1959_v3 }
0x2860   :  { %4781 = vpow2.f32 %v4469_v4 }
0x2864   :  { %v4780_v14 = vpop.eup %4779 }
0x2865   :  { %1985 = vrot.lane.b32.xlu2 %v4780_v14, %s5488_s12 }
0x2866   :  { %v4782_v5 = vpop.eup %4781 }
0x2867   :  { %v1963_v7 = vadd.f32 1.0, %v4782_v5 }
0x2869   :  { %4783 = vrcp.f32 %v1963_v7  ;;  %v1975_v16 = vand.u32 2147483648, %v1963_v7  ;;  %vm1969_vm5 = vweird.f32 %v1963_v7  ;;  %v1973_v20 = vand.u32 2147483647, %v1963_v7 }
0x286b   :  { %v1976_v17 = vor.u32 1.1754944e-38, %v1975_v16  ;;  %vm1974_vm9 = vcmp.eq.f32.partialorder %v1973_v20, 8.507059e+37 }
0x286f   :  { %v4784_v10 = vpop.eup %4783 }
0x2870   :  { %v1965_v13 = vmul.f32 %v4784_v10, %v1963_v7  ;;  %vm1970_vm4 = vweird.f32 %v4784_v10 }
0x2871   :  { %vm1971_vm8 = vmor %vm1969_vm5, %vm1970_vm4 }
0x2872   :  { %v1966_v38 = vsub.f32 1.0, %v1965_v13 }
0x2874   :  { %v1967_v18 = vmul.f32 %v4784_v10, %v1966_v38 }
0x2876   :  { %v1968_v19 = vadd.f32 %v4784_v10, %v1967_v18 }
0x2878   :  { %v1972_v21 = vsel %vm1971_vm8, %v4784_v10, %v1968_v19 }
0x2879   :  { %v1977_v23 = vsel %vm1974_vm9, %v1976_v17, %v1972_v21 }
0x287a   :  { %v1983_v29 = vmul.f32 %v1981_v28, %v1977_v23 }
0x28bf   :  { %v1986_v26 = vpop.permute.xlu2 %1985 }
0x28c0   :  { %v1988_v24 = vmul.f32 %v1986_v26, %v1977_v23 }
0x28c2   :  { %1990 = vrot.lane.b32.xlu0 %v1988_v24, %s5489_s30 }
0x2934   :  { %v1991_v43 = vpop.permute.xlu0 %1990 }
0x2935   :  { %v6142_v34 = vadd.f32 %v1991_v43, %v1983_v29 }
0x2937   :  { %4785 = vtanh.f32 %v6142_v34  ;;  %v2052_v20 = vrot.slane %v6142_v34, 6 }
0x293d   :  { %v4786_v35 = vpop.eup %4785 }
0x293e   :  { %1996 = vrot.lane.b32.xlu1 %v4786_v35, %s5488_s12 }
0x29b0   :  { %v1997_v39 = vpop.permute.xlu1 %1996 }
0x29b1   :  { %v1999_v40 = vmul.f32 %v1997_v39, %v1977_v23 }
0x29b3   :  { %2001 = vrot.lane.b32.xlu2 %v1999_v40, %s5489_s30 }
0x2a0d   :  { %v2002_v37 = vpop.permute.xlu2 %2001 }
0x2a0e   :  { %2004 = vst.msk [vmem:[#allocation3 + $0x8] sm:$0x3] %vm6698_vm6, %v2002_v37  ;;  %4470 = vmatmul.msk.f32.vlgmr.msra.gmra.mxu3 %vm408_vm7, %v2002_v37 }
0x2a0f   :  { %2494 = vmatpush.msra.mxu3 %v6147_v22 }
0x2a11   :  { %2495 = vmatpush.msra.mxu3 %v6149_v41 }
0x2a13   :  { %2496 = vmatpush.msra.mxu3 %v6153_v45 }
0x2a15   :  { %2497 = vmatpush.msra.mxu3 %v6159_v42 }
0x2a16   :  { %2279 = vmatmul.f32.vlgmr.msrb.gmra.mxu3 %v5487_v8 }
0x2a17   :  { %2712 = vmatpush.msrb.mxu3 %v6147_v22 }
0x2a19   :  { %2713 = vmatpush.msrb.mxu3 %v6149_v41 }
0x2a1b   :  { %2714 = vmatpush.msrb.mxu3 %v6153_v45 }
0x2a1d   :  { %2715 = vmatpush.msrb.mxu3 %v6159_v42 }
0x2a91   :  { %v2024_v44 = vpop.f32.mrf.mxu3 }
0x2a92   :  { %v2028_v27 = vrot.slane %v2024_v44, 6 }
0x2a94   :  { %v2030_v46 = vadd.f32 %v2028_v27, %v6136_v63 }
0x2a96   :  { %4787 = vtanh.f32 %v2030_v46  ;;  %v4471_v11 = vmul.f32 -1.442695, %v2030_v46 }
0x2a99   :  { %v2280_v47 = vpop.f32.mrf.mxu3 }
0x2a9a   :  { %v2284_v15 = vrot.slane %v2280_v47, 2 }
0x2a9c   :  { %v4788_v36 = vpop.eup %4787  ;;  %v2286_v49 = vadd.f32 %v2284_v15, %v6184_v25 }
0x2a9d   :  { %2056 = vrot.lane.b32.xlu0 %v4788_v36, %s5488_s12 }
0x2a9e   :  { %4789 = vtanh.f32 %v2286_v49  ;;  %v4478_v51 = vmul.f32 -1.442695, %v2286_v49 }
0x2a9f   :  { %4791 = vpow2.f32 %v4471_v11 }
0x2aa0   :  { %4793 = vpow2.f32 %v4478_v51 }
0x2aa4   :  { %v4790_v50 = vpop.eup %4789 }
0x2aa5   :  { %2309 = vrot.lane.b32.xlu1 %v4790_v50, %s5488_s12  ;;  %v4792_v30 = vpop.eup %4791 }
0x2aa6   :  { %v2034_v52 = vadd.f32 1.0, %v4792_v30  ;;  %v4794_v48 = vpop.eup %4793 }
0x2aa7   :  { %v2290_v1 = vadd.f32 1.0, %v4794_v48 }
0x2aa8   :  { %4795 = vrcp.f32 %v2034_v52  ;;  %v2046_v58 = vand.u32 2147483648, %v2034_v52  ;;  %vm2040_vm3 = vweird.f32 %v2034_v52  ;;  %v2044_v61 = vand.u32 2147483647, %v2034_v52 }
0x2aa9   :  { %4797 = vrcp.f32 %v2290_v1  ;;  %v2302_v7 = vand.u32 2147483648, %v2290_v1  ;;  %vm2296_vm9 = vweird.f32 %v2290_v1  ;;  %v2300_v10 = vand.u32 2147483647, %v2290_v1 }
0x2aaa   :  { %v2047_v2 = vor.u32 1.1754944e-38, %v2046_v58  ;;  %vm2045_vm5 = vcmp.eq.f32.partialorder %v2044_v61, 8.507059e+37 }
0x2aab   :  { %v2303_v38 = vor.u32 1.1754944e-38, %v2302_v7  ;;  %vm2301_vm15 = vcmp.eq.f32.partialorder %v2300_v10, 8.507059e+37 }
0x2aae   :  { %v4796_v33 = vpop.eup %4795 }
0x2aaf   :  { %v2036_v53 = vmul.f32 %v4796_v33, %v2034_v52  ;;  %v4798_v32 = vpop.eup %4797  ;;  %vm2041_vm2 = vweird.f32 %v4796_v33 }
0x2ab0   :  { %v2292_v54 = vmul.f32 %v4798_v32, %v2290_v1  ;;  %vm2042_vm4 = vmor %vm2040_vm3, %vm2041_vm2  ;;  %vm2297_vm8 = vweird.f32 %v4798_v32 }
0x2ab1   :  { %v2037_v6 = vsub.f32 1.0, %v2036_v53  ;;  %vm2298_vm6 = vmor %vm2296_vm9, %vm2297_vm8 }
0x2ab2   :  { %v2293_v57 = vsub.f32 1.0, %v2292_v54 }
0x2ab3   :  { %v2038_v12 = vmul.f32 %v4796_v33, %v2037_v6 }
0x2ab4   :  { %v2294_v60 = vmul.f32 %v4798_v32, %v2293_v57 }
0x2ab5   :  { %v2039_v55 = vadd.f32 %v4796_v33, %v2038_v12 }
0x2ab6   :  { %v2295_v5 = vadd.f32 %v4798_v32, %v2294_v60 }
0x2ab7   :  { %v2043_v59 = vsel %vm2042_vm4, %v4796_v33, %v2039_v55 }
0x2ab8   :  { %v2048_v14 = vsel %vm2045_vm5, %v2047_v2, %v2043_v59  ;;  %v2299_v13 = vsel %vm2298_vm6, %v4798_v32, %v2295_v5 }
0x2ab9   :  { %v2304_v19 = vsel %vm2301_vm15, %v2303_v38, %v2299_v13  ;;  %v2054_v21 = vmul.f32 %v2052_v20, %v2048_v14 }
0x2aba   :  { %v2307_v24 = vmul.f32 0.0, %v2304_v19 }
0x2b0f   :  { %v2057_v3 = vpop.permute.xlu0 %2056 }
0x2b10   :  { %v2059_v4 = vmul.f32 %v2057_v3, %v2048_v14 }
0x2b12   :  { %2061 = vrot.lane.b32.xlu2 %v2059_v4, %s5489_s30 }
0x2b17   :  { %v2310_v18 = vpop.permute.xlu1 %2309 }
0x2b18   :  { %v2312_v16 = vmul.f32 %v2310_v18, %v2304_v19 }
0x2b1a   :  { %2314 = vrot.lane.b32.xlu0 %v2312_v16, %s5489_s30 }
0x2b6c   :  { %v2062_v17 = vpop.permute.xlu2 %2061 }
0x2b6d   :  { %v6192_v26 = vadd.f32 %v2062_v17, %v2054_v21 }
0x2b6f   :  { %4799 = vtanh.f32 %v6192_v26  ;;  %v2126_v17 = vrot.slane %v6192_v26, 6 }
0x2b75   :  { %v4800_v23 = vpop.eup %4799 }
0x2b76   :  { %2067 = vrot.lane.b32.xlu1 %v4800_v23, %s5488_s12 }
0x2b8c   :  { %v2315_v28 = vpop.permute.xlu0 %2314 }
0x2b8d   :  { %v6196_v29 = vadd.f32 %v2315_v28, %v2307_v24 }
0x2b8f   :  { %4801 = vtanh.f32 %v6196_v29 }
0x2b95   :  { %v4802_v43 = vpop.eup %4801 }
0x2b96   :  { %2320 = vrot.lane.b32.xlu2 %v4802_v43, %s5488_s12  ;;  %v2379_v43 = vrot.slane %v6196_v29, 2 }
0x2be8   :  { %v2068_v35 = vpop.permute.xlu1 %2067 }
0x2be9   :  { %v6200_v34 = vmul.f32 %v2068_v35, %v2048_v14 }
0x2beb   :  { %v2076_v39 = vrot.slane %v6200_v34, 2 }
0x2bed   :  { %2077 = vrot.lane.b32.xlu0 %v2076_v39, %s5489_s30 }
0x2bf0   :  { %v2321_v40 = vpop.permute.xlu2 %2320 }
0x2bf1   :  { %v6204_v37 = vmul.f32 %v2321_v40, %v2304_v19 }
0x2bf3   :  { %v2329_v44 = vrot.slane %v6204_v37, 6 }
0x2bf5   :  { %2330 = vrot.lane.b32.xlu1 %v2329_v44, %s5489_s30 }
0x2c5f   :  { %v2078_v27 = vpop.permute.xlu0 %2077 }
0x2c60   :  { %4472 = vmatmul.msk.f32.vlgmr.msrb.gmra.mxu1 %vm408_vm7, %v2078_v27 }
0x2c61   :  { %2564 = vmatpush.msrb.mxu1 %v6147_v22 }
0x2c63   :  { %2565 = vmatpush.msrb.mxu1 %v6149_v41 }
0x2c65   :  { %2566 = vmatpush.msrb.mxu1 %v6153_v45 }
0x2c67   :  { %v2331_v46 = vpop.permute.xlu1 %2330  ;;  %2567 = vmatpush.msrb.mxu1 %v6159_v42 }
0x2c68   :  { %4479 = vmatmul.msk.f32.vlgmr.msra.gmra.mxu1 %vm408_vm7, %v2331_v46 }
0x2cdd   :  { %v2098_v0 = vpop.f32.mrf.mxu1 }
0x2cde   :  { %v2102_v47 = vrot.slane %v2098_v0, 4 }
0x2ce0   :  { %v2104_v15 = vadd.f32 %v2102_v47, %v6136_v63 }
0x2ce2   :  { %4803 = vtanh.f32 %v2104_v15  ;;  %v4473_v30 = vmul.f32 -1.442695, %v2104_v15 }
0x2ce5   :  { %v2351_v36 = vpop.f32.mrf.mxu1 }
0x2ce6   :  { %v2355_v49 = vrot.slane %v2351_v36, 4 }
0x2ce8   :  { %v4804_v50 = vpop.eup %4803  ;;  %v2357_v11 = vadd.f32 %v2355_v49, %v6184_v25 }
0x2ce9   :  { %2130 = vrot.lane.b32.xlu2 %v4804_v50, %s5488_s12 }
0x2cea   :  { %4805 = vtanh.f32 %v2357_v11  ;;  %v4480_v6 = vmul.f32 -1.442695, %v2357_v11 }
0x2ceb   :  { %4807 = vpow2.f32 %v4473_v30 }
0x2cf0   :  { %v4806_v51 = vpop.eup %4805 }
0x2cf1   :  { %2383 = vrot.lane.b32.xlu0 %v4806_v51, %s5488_s12  ;;  %v4808_v52 = vpop.eup %4807 }
0x2cf2   :  { %v2108_v48 = vadd.f32 1.0, %v4808_v52 }
0x2cf4   :  { %4809 = vrcp.f32 %v2108_v48  ;;  %v2120_v54 = vand.u32 2147483648, %v2108_v48  ;;  %vm2114_vm15 = vweird.f32 %v2108_v48  ;;  %v2118_v55 = vand.u32 2147483647, %v2108_v48 }
0x2cf5   :  { %4811 = vpow2.f32 %v4480_v6 }
0x2cf6   :  { %v2121_v61 = vor.u32 1.1754944e-38, %v2120_v54  ;;  %vm2119_vm3 = vcmp.eq.f32.partialorder %v2118_v55, 8.507059e+37 }
0x2cfa   :  { %v4810_v1 = vpop.eup %4809 }
0x2cfb   :  { %v2110_v33 = vmul.f32 %v4810_v1, %v2108_v48  ;;  %vm2115_vm6 = vweird.f32 %v4810_v1  ;;  %v4812_v57 = vpop.eup %4811 }
0x2cfc   :  { %vm2116_vm2 = vmor %vm2114_vm15, %vm2115_vm6  ;;  %v2361_v59 = vadd.f32 1.0, %v4812_v57 }
0x2cfd   :  { %v2111_v53 = vsub.f32 1.0, %v2110_v33 }
0x2cfe   :  { %4813 = vrcp.f32 %v2361_v59  ;;  %v2373_v13 = vand.u32 2147483648, %v2361_v59  ;;  %vm2367_vm5 = vweird.f32 %v2361_v59  ;;  %v2371_v38 = vand.u32 2147483647, %v2361_v59 }
0x2cff   :  { %v2112_v32 = vmul.f32 %v4810_v1, %v2111_v53 }
0x2d00   :  { %v2374_v19 = vor.u32 1.1754944e-38, %v2373_v13  ;;  %vm2372_vm9 = vcmp.eq.f32.partialorder %v2371_v38, 8.507059e+37 }
0x2d01   :  { %v2113_v12 = vadd.f32 %v4810_v1, %v2112_v32 }
0x2d03   :  { %v2117_v58 = vsel %vm2116_vm2, %v4810_v1, %v2113_v12 }
0x2d04   :  { %v2122_v2 = vsel %vm2119_vm3, %v2121_v61, %v2117_v58  ;;  %v4814_v14 = vpop.eup %4813 }
0x2d05   :  { %v2363_v4 = vmul.f32 %v4814_v14, %v2361_v59  ;;  %vm2368_vm4 = vweird.f32 %v4814_v14  ;;  %v2128_v23 = vmul.f32 %v2126_v17, %v2122_v2 }
0x2d06   :  { %vm2369_vm8 = vmor %vm2367_vm5, %vm2368_vm4 }
0x2d07   :  { %v2364_v5 = vsub.f32 1.0, %v2363_v4 }
0x2d09   :  { %v2365_v7 = vmul.f32 %v4814_v14, %v2364_v5 }
0x2d0b   :  { %v2366_v10 = vadd.f32 %v4814_v14, %v2365_v7 }
0x2d0d   :  { %v2370_v18 = vsel %vm2369_vm8, %v4814_v14, %v2366_v10 }
0x2d0e   :  { %v2375_v20 = vsel %vm2372_vm9, %v2374_v19, %v2370_v18 }
0x2d0f   :  { %v2381_v35 = vmul.f32 %v2379_v43, %v2375_v20 }
0x2d43   :  { %v2131_v60 = vpop.permute.xlu2 %2130 }
0x2d44   :  { %v2133_v3 = vmul.f32 %v2131_v60, %v2122_v2 }
0x2d46   :  { %2135 = vrot.lane.b32.xlu1 %v2133_v3, %s5489_s30 }
0x2d63   :  { %v2384_v16 = vpop.permute.xlu0 %2383 }
0x2d64   :  { %v2386_v21 = vmul.f32 %v2384_v16, %v2375_v20 }
0x2d66   :  { %2388 = vrot.lane.b32.xlu2 %v2386_v21, %s5489_s30 }
0x2db8   :  { %v2136_v24 = vpop.permute.xlu1 %2135 }
0x2db9   :  { %v6221_v28 = vadd.f32 %v2136_v24, %v2128_v23 }
0x2dbb   :  { %4815 = vtanh.f32 %v6221_v28 }
0x2dc0   :  { %v2389_v39 = vpop.permute.xlu2 %2388 }
0x2dc1   :  { %v4816_v40 = vpop.eup %4815  ;;  %v2391_v44 = vadd.f32 %v2389_v39, %v2381_v35 }
0x2dc2   :  { %2141 = vrot.lane.b32.xlu0 %v4816_v40, %s5488_s12 }
0x2dc3   :  { %4817 = vtanh.f32 %v2391_v44  ;;  %v2453_v61 = vrot.slane %v2391_v44, 2 }
0x2dc9   :  { %v4818_v27 = vpop.eup %4817 }
0x2dca   :  { %2394 = vrot.lane.b32.xlu1 %v4818_v27, %s5488_s12 }
0x2e34   :  { %v2142_v46 = vpop.permute.xlu0 %2141 }
0x2e35   :  { %v6227_v26 = vmul.f32 %v2142_v46, %v2122_v2 }
0x2e37   :  { %v2150_v0 = vrot.slane %v6227_v26, 4 }
0x2e39   :  { %2151 = vrot.lane.b32.xlu2 %v2150_v0, %s5489_s30 }
0x2e3c   :  { %v2395_v47 = vpop.permute.xlu1 %2394 }
0x2e3d   :  { %v6231_v15 = vmul.f32 %v2395_v47, %v2375_v20 }
0x2e3f   :  { %v2403_v29 = vrot.slane %v6231_v15, 4 }
0x2e41   :  { %2404 = vrot.lane.b32.xlu0 %v2403_v29, %s5489_s30 }
0x2e93   :  { %v2152_v36 = vpop.permute.xlu2 %2151 }
0x2e94   :  { %4474 = vmatmul.msk.f32.vlgmr.msrb.gmra.mxu2 %vm408_vm7, %v2152_v36 }
0x2e95   :  { %2638 = vmatpush.msrb.mxu2 %v6147_v22 }
0x2e97   :  { %2639 = vmatpush.msrb.mxu2 %v6149_v41 }
0x2e99   :  { %2640 = vmatpush.msrb.mxu2 %v6153_v45 }
0x2e9b   :  { %2641 = vmatpush.msrb.mxu2 %v6159_v42 }
0x2eb3   :  { %v2405_v49 = vpop.permute.xlu0 %2404 }
0x2eb4   :  { %4481 = vmatmul.msk.f32.vlgmr.msra.gmra.mxu2 %vm408_vm7, %v2405_v49 }
0x2f17   :  { %v6241_v50 = vpop.f32.mrf.mxu2 }
0x2f37   :  { %v2425_v11 = vpop.f32.mrf.mxu2 }
0x2f38   :  { %v2429_v51 = vrot.slane %v2425_v11, 6 }
0x2f3a   :  { %v2431_v30 = vadd.f32 %v2429_v51, %v6184_v25 }
0x2f3c   :  { %4819 = vtanh.f32 %v2431_v30  ;;  %v4482_v22 = vmul.f32 -1.442695, %v2431_v30 }
0x2f3e   :  { %4821 = vpow2.f32 %v4482_v22 }
0x2f42   :  { %v4820_v52 = vpop.eup %4819 }
0x2f43   :  { %2457 = vrot.lane.b32.xlu1 %v4820_v52, %s5488_s12 }
0x2f44   :  { %v4822_v41 = vpop.eup %4821 }
0x2f45   :  { %v2435_v48 = vadd.f32 1.0, %v4822_v41 }
0x2f47   :  { %4823 = vrcp.f32 %v2435_v48  ;;  %v2447_v6 = vand.u32 2147483648, %v2435_v48  ;;  %vm2441_vm15 = vweird.f32 %v2435_v48  ;;  %v2445_v32 = vand.u32 2147483647, %v2435_v48 }
0x2f49   :  { %v2448_v54 = vor.u32 1.1754944e-38, %v2447_v6  ;;  %vm2446_vm3 = vcmp.eq.f32.partialorder %v2445_v32, 8.507059e+37 }
0x2f4d   :  { %v4824_v45 = vpop.eup %4823 }
0x2f4e   :  { %v2437_v42 = vmul.f32 %v4824_v45, %v2435_v48  ;;  %vm2442_vm6 = vweird.f32 %v4824_v45 }
0x2f4f   :  { %vm2443_vm2 = vmor %vm2441_vm15, %vm2442_vm6 }
0x2f50   :  { %v2438_v1 = vsub.f32 1.0, %v2437_v42 }
0x2f52   :  { %v2439_v33 = vmul.f32 %v4824_v45, %v2438_v1 }
0x2f54   :  { %v2440_v53 = vadd.f32 %v4824_v45, %v2439_v33 }
0x2f56   :  { %v2444_v12 = vsel %vm2443_vm2, %v4824_v45, %v2440_v53 }
0x2f57   :  { %v2449_v57 = vsel %vm2446_vm3, %v2448_v54, %v2444_v12 }
0x2f58   :  { %v2455_v59 = vmul.f32 %v2453_v61, %v2449_v57 }
0x2fb5   :  { %v2458_v55 = vpop.permute.xlu1 %2457 }
0x2fb6   :  { %v2460_v58 = vmul.f32 %v2458_v55, %v2449_v57 }
0x2fb8   :  { %2462 = vrot.lane.b32.xlu2 %v2460_v58, %s5489_s30 }
0x3012   :  { %v2463_v60 = vpop.permute.xlu2 %2462 }
0x3013   :  { %v2465_v2 = vadd.f32 %v2463_v60, %v2455_v59 }
0x3015   :  { %4825 = vtanh.f32 %v2465_v2  ;;  %v2524_v46 = vrot.slane %v2465_v2, 2 }
0x301b   :  { %v4826_v3 = vpop.eup %4825 }
0x301c   :  { %2468 = vrot.lane.b32.xlu0 %v4826_v3, %s5488_s12 }
0x308e   :  { %v2469_v14 = vpop.permute.xlu0 %2468 }
0x308f   :  { %v6247_v4 = vmul.f32 %v2469_v14, %v2449_v57 }
0x3091   :  { %v2477_v5 = vrot.slane %v6247_v4, 2 }
0x3093   :  { %2478 = vrot.lane.b32.xlu1 %v2477_v5, %s5489_s30 }
0x3105   :  { %v2479_v7 = vpop.permute.xlu1 %2478 }
0x3106   :  { %4483 = vmatmul.msk.f32.vlgmr.msra.gmra.mxu3 %vm408_vm7, %v2479_v7 }
0x3189   :  { %v2499_v10 = vpop.f32.mrf.mxu3 }
0x318a   :  { %v2502_v13 = vadd.f32 %v2499_v10, %v6184_v25 }
0x318c   :  { %4827 = vtanh.f32 %v2502_v13  ;;  %v4484_v18 = vmul.f32 -1.442695, %v2502_v13 }
0x318e   :  { %4829 = vpow2.f32 %v4484_v18 }
0x3192   :  { %v4828_v38 = vpop.eup %4827 }
0x3193   :  { %2528 = vrot.lane.b32.xlu2 %v4828_v38, %s5488_s12 }
0x3194   :  { %v4830_v19 = vpop.eup %4829 }
0x3195   :  { %v2506_v16 = vadd.f32 1.0, %v4830_v19 }
0x3197   :  { %4831 = vrcp.f32 %v2506_v16  ;;  %v2518_v43 = vand.u32 2147483648, %v2506_v16  ;;  %vm2512_vm5 = vweird.f32 %v2506_v16  ;;  %v2516_v35 = vand.u32 2147483647, %v2506_v16 }
0x3199   :  { %v2519_v39 = vor.u32 1.1754944e-38, %v2518_v43  ;;  %vm2517_vm9 = vcmp.eq.f32.partialorder %v2516_v35, 8.507059e+37 }
0x319d   :  { %v4832_v20 = vpop.eup %4831 }
0x319e   :  { %v2508_v21 = vmul.f32 %v4832_v20, %v2506_v16  ;;  %vm2513_vm4 = vweird.f32 %v4832_v20 }
0x319f   :  { %vm2514_vm8 = vmor %vm2512_vm5, %vm2513_vm4 }
0x31a0   :  { %v2509_v17 = vsub.f32 1.0, %v2508_v21 }
0x31a2   :  { %v2510_v23 = vmul.f32 %v4832_v20, %v2509_v17 }
0x31a4   :  { %v2511_v24 = vadd.f32 %v4832_v20, %v2510_v23 }
0x31a6   :  { %v2515_v25 = vsel %vm2514_vm8, %v4832_v20, %v2511_v24 }
0x31a7   :  { %v2520_v44 = vsel %vm2517_vm9, %v2519_v39, %v2515_v25 }
0x31a8   :  { %v2526_v0 = vmul.f32 %v2524_v46, %v2520_v44 }
0x31ed   :  { %v2529_v40 = vpop.permute.xlu2 %2528 }
0x31ee   :  { %v2531_v27 = vmul.f32 %v2529_v40, %v2520_v44 }
0x31f0   :  { %2533 = vrot.lane.b32.xlu0 %v2531_v27, %s5489_s30 }
0x3262   :  { %v2534_v47 = vpop.permute.xlu0 %2533 }
0x3263   :  { %v2536_v29 = vadd.f32 %v2534_v47, %v2526_v0 }
0x3265   :  { %4833 = vtanh.f32 %v2536_v29  ;;  %v2597_v60 = vrot.slane %v2536_v29, 2 }
0x326b   :  { %v4834_v36 = vpop.eup %4833 }
0x326c   :  { %2539 = vrot.lane.b32.xlu1 %v4834_v36, %s5488_s12 }
0x32de   :  { %v2540_v49 = vpop.permute.xlu1 %2539 }
0x32df   :  { %v6256_v11 = vmul.f32 %v2540_v49, %v2520_v44 }
0x32e1   :  { %2548 = vrot.lane.b32.xlu2 %v6256_v11, %s5489_s30 }
0x333b   :  { %v2549_v51 = vpop.permute.xlu2 %2548 }
0x333c   :  { %4485 = vmatmul.msk.f32.vlgmr.msrb.gmra.mxu1 %vm408_vm7, %v2549_v51 }
0x33b9   :  { %v2569_v30 = vpop.f32.mrf.mxu1 }
0x33ba   :  { %v2573_v52 = vrot.slane %v2569_v30, 2 }
0x33bc   :  { %v2575_v22 = vadd.f32 %v2573_v52, %v6133_v62 }
0x33be   :  { %4835 = vtanh.f32 %v2575_v22  ;;  %v4486_v48 = vmul.f32 -1.442695, %v2575_v22 }
0x33c0   :  { %4837 = vpow2.f32 %v4486_v48 }
0x33c4   :  { %v4836_v41 = vpop.eup %4835 }
0x33c5   :  { %2601 = vrot.lane.b32.xlu0 %v4836_v41, %s5488_s12 }
0x33c6   :  { %v4838_v45 = vpop.eup %4837 }
0x33c7   :  { %v2579_v42 = vadd.f32 1.0, %v4838_v45 }
0x33c9   :  { %4839 = vrcp.f32 %v2579_v42  ;;  %v2591_v12 = vand.u32 2147483648, %v2579_v42  ;;  %vm2585_vm15 = vweird.f32 %v2579_v42  ;;  %v2589_v54 = vand.u32 2147483647, %v2579_v42 }
0x33cb   :  { %v2592_v57 = vor.u32 1.1754944e-38, %v2591_v12  ;;  %vm2590_vm3 = vcmp.eq.f32.partialorder %v2589_v54, 8.507059e+37 }
0x33cf   :  { %v4840_v1 = vpop.eup %4839 }
0x33d0   :  { %v2581_v33 = vmul.f32 %v4840_v1, %v2579_v42  ;;  %vm2586_vm6 = vweird.f32 %v4840_v1 }
0x33d1   :  { %vm2587_vm2 = vmor %vm2585_vm15, %vm2586_vm6 }
0x33d2   :  { %v2582_v53 = vsub.f32 1.0, %v2581_v33 }
0x33d4   :  { %v2583_v6 = vmul.f32 %v4840_v1, %v2582_v53 }
0x33d6   :  { %v2584_v32 = vadd.f32 %v4840_v1, %v2583_v6 }
0x33d8   :  { %v2588_v55 = vsel %vm2587_vm2, %v4840_v1, %v2584_v32 }
0x33d9   :  { %v2593_v61 = vsel %vm2590_vm3, %v2592_v57, %v2588_v55 }
0x33da   :  { %v2599_v2 = vmul.f32 %v2597_v60, %v2593_v61 }
0x3437   :  { %v2602_v58 = vpop.permute.xlu0 %2601 }
0x3438   :  { %v2604_v59 = vmul.f32 %v2602_v58, %v2593_v61 }
0x343a   :  { %2606 = vrot.lane.b32.xlu1 %v2604_v59, %s5489_s30 }
0x34ac   :  { %v2607_v3 = vpop.permute.xlu1 %2606 }
0x34ad   :  { %v2609_v14 = vadd.f32 %v2607_v3, %v2599_v2 }
0x34af   :  { %4841 = vtanh.f32 %v2609_v14  ;;  %v2671_v36 = vrot.slane %v2609_v14, 2 }
0x34b5   :  { %v4842_v5 = vpop.eup %4841 }
0x34b6   :  { %2612 = vrot.lane.b32.xlu2 %v4842_v5, %s5488_s12 }
0x3510   :  { %v2613_v7 = vpop.permute.xlu2 %2612 }
0x3511   :  { %v6265_v10 = vmul.f32 %v2613_v7, %v2593_v61 }
0x3513   :  { %v2621_v13 = vrot.slane %v6265_v10, 6 }
0x3515   :  { %2622 = vrot.lane.b32.xlu0 %v2621_v13, %s5489_s30 }
0x3587   :  { %v2623_v38 = vpop.permute.xlu0 %2622 }
0x3588   :  { %4487 = vmatmul.msk.f32.vlgmr.msrb.gmra.mxu2 %vm408_vm7, %v2623_v38 }
0x360b   :  { %v2643_v18 = vpop.f32.mrf.mxu2 }
0x360c   :  { %v2647_v19 = vrot.slane %v2643_v18, 4 }
0x360e   :  { %v2649_v16 = vadd.f32 %v2647_v19, %v6133_v62 }
0x3610   :  { %4843 = vtanh.f32 %v2649_v16  ;;  %v4488_v21 = vmul.f32 -1.442695, %v2649_v16 }
0x3612   :  { %4845 = vpow2.f32 %v4488_v21 }
0x3616   :  { %v4844_v20 = vpop.eup %4843 }
0x3617   :  { %2675 = vrot.lane.b32.xlu1 %v4844_v20, %s5488_s12 }
0x3618   :  { %v4846_v17 = vpop.eup %4845 }
0x3619   :  { %v2653_v23 = vadd.f32 1.0, %v4846_v17 }
0x361b   :  { %4847 = vrcp.f32 %v2653_v23  ;;  %v2665_v40 = vand.u32 2147483648, %v2653_v23  ;;  %vm2659_vm5 = vweird.f32 %v2653_v23  ;;  %v2663_v44 = vand.u32 2147483647, %v2653_v23 }
0x361d   :  { %v2666_v46 = vor.u32 1.1754944e-38, %v2665_v40  ;;  %vm2664_vm9 = vcmp.eq.f32.partialorder %v2663_v44, 8.507059e+37 }
0x3621   :  { %v4848_v24 = vpop.eup %4847 }
0x3622   :  { %v2655_v43 = vmul.f32 %v4848_v24, %v2653_v23  ;;  %vm2660_vm4 = vweird.f32 %v4848_v24 }
0x3623   :  { %vm2661_vm8 = vmor %vm2659_vm5, %vm2660_vm4 }
0x3624   :  { %v2656_v35 = vsub.f32 1.0, %v2655_v43 }
0x3626   :  { %v2657_v25 = vmul.f32 %v4848_v24, %v2656_v35 }
0x3628   :  { %v2658_v39 = vadd.f32 %v4848_v24, %v2657_v25 }
0x362a   :  { %v2662_v27 = vsel %vm2661_vm8, %v4848_v24, %v2658_v39 }
0x362b   :  { %v2667_v47 = vsel %vm2664_vm9, %v2666_v46, %v2662_v27 }
0x362c   :  { %v2673_v49 = vmul.f32 %v2671_v36, %v2667_v47 }
0x3689   :  { %v2676_v0 = vpop.permute.xlu1 %2675 }
0x368a   :  { %v2678_v29 = vmul.f32 %v2676_v0, %v2667_v47 }
0x368c   :  { %2680 = vrot.lane.b32.xlu2 %v2678_v29, %s5489_s30 }
0x36e6   :  { %v2681_v51 = vpop.permute.xlu2 %2680 }
0x36e7   :  { %v2683_v30 = vadd.f32 %v2681_v51, %v2673_v49 }
0x36e9   :  { %4849 = vtanh.f32 %v2683_v30  ;;  %v2745_v13 = vrot.slane %v2683_v30, 2 }
0x36ef   :  { %v4850_v52 = vpop.eup %4849 }
0x36f0   :  { %2686 = vrot.lane.b32.xlu0 %v4850_v52, %s5488_s12 }
0x3762   :  { %v2687_v22 = vpop.permute.xlu0 %2686 }
0x3763   :  { %v6274_v41 = vmul.f32 %v2687_v22, %v2667_v47 }
0x3765   :  { %v2695_v48 = vrot.slane %v6274_v41, 4 }
0x3767   :  { %2696 = vrot.lane.b32.xlu1 %v2695_v48, %s5489_s30 }
0x37d9   :  { %v2697_v45 = vpop.permute.xlu1 %2696 }
0x37da   :  { %4489 = vmatmul.msk.f32.vlgmr.msrb.gmra.mxu3 %vm408_vm7, %v2697_v45 }
0x385d   :  { %v2717_v42 = vpop.f32.mrf.mxu3 }
0x385e   :  { %v2721_v1 = vrot.slane %v2717_v42, 6 }
0x3860   :  { %v2723_v33 = vadd.f32 %v2721_v1, %v6133_v62 }
0x3862   :  { %4851 = vtanh.f32 %v2723_v33  ;;  %v4490_v6 = vmul.f32 -1.442695, %v2723_v33 }
0x3864   :  { %4853 = vpow2.f32 %v4490_v6  ;;  %v6308_v6 = vld [vmem:[%s6720_s9 + $0x10] sm:$0xff] }
0x3868   :  { %v4852_v53 = vpop.eup %4851 }
0x3869   :  { %2749 = vrot.lane.b32.xlu2 %v4852_v53, %s5488_s12  ;;  %v6304_v53 = vld [vmem:[%s6720_s9 + $0x18] sm:$0xff] }
0x386a   :  { %v4854_v32 = vpop.eup %4853  ;;  %2899 = vmatpush.msra.mxu2 %v6304_v53  ;;  %2964 = vmatpush.msra.mxu3 %v6304_v53 }
0x386b   :  { %v2727_v12 = vadd.f32 1.0, %v4854_v32  ;;  %v2851_v32 = vld [vmem:[#allocation19 + $0x28] sm:$0xff]  ;;  %3038 = vmatpush.msra.mxu0 %v6304_v53 }
0x386c   :  { %2900 = vmatpush.msra.mxu2 %v6308_v6  ;;  %2965 = vmatpush.msra.mxu3 %v6308_v6 }
0x386d   :  { %4855 = vrcp.f32 %v2727_v12  ;;  %v2739_v59 = vand.u32 2147483648, %v2727_v12  ;;  %vm2733_vm15 = vweird.f32 %v2727_v12  ;;  %v2737_v60 = vand.u32 2147483647, %v2727_v12  ;;  %3039 = vmatpush.msra.mxu0 %v6308_v6 }
0x386f   :  { %v2740_v3 = vor.u32 1.1754944e-38, %v2739_v59  ;;  %vm2738_vm3 = vcmp.eq.f32.partialorder %v2737_v60, 8.507059e+37  ;;  %v2849_v59 = vld [vmem:[#allocation19 + $0x18] sm:$0xff]  ;;  %v6323_v60 = vld [vmem:[%s6720_s9] sm:$0xff] }
0x3873   :  { %v4856_v54 = vpop.eup %4855 }
0x3874   :  { %v2729_v55 = vmul.f32 %v4856_v54, %v2727_v12  ;;  %vm2734_vm6 = vweird.f32 %v4856_v54 }
0x3875   :  { %vm2735_vm2 = vmor %vm2733_vm15, %vm2734_vm6  ;;  %vm6721_vm6 = vcmask 523264  }
0x3876   :  { %v2730_v57 = vsub.f32 1.0, %v2729_v55 }
0x3878   :  { %v2731_v58 = vmul.f32 %v4856_v54, %v2730_v57 }
0x387a   :  { %v2732_v61 = vadd.f32 %v4856_v54, %v2731_v58 }
0x387c   :  { %v2736_v2 = vsel %vm2735_vm2, %v4856_v54, %v2732_v61  ;;  %v6320_v61 = vld [vmem:[%s6720_s9 + $0x8] sm:$0xff] }
0x387d   :  { %v2741_v5 = vsel %vm2738_vm3, %v2740_v3, %v2736_v2  ;;  %2901 = vmatpush.msra.mxu2 %v6320_v61  ;;  %v2848_v2 = vld [vmem:[#allocation19 + $0x10] sm:$0xff]  ;;  %v2847_v3 = vld [vmem:[#allocation19 + $0x8] sm:$0xff]  ;;  %2966 = vmatpush.msra.mxu3 %v6320_v61 }
0x387e   :  { %v2747_v38 = vmul.f32 %v2745_v13, %v2741_v5  ;;  %3040 = vmatpush.msra.mxu0 %v6320_v61  ;;  %v6353_v13 = vld [vmem:[#allocation21] ss:$0 sm:$0xff] }
0x387f   :  { %2902 = vmatpush.msra.mxu2 %v6323_v60  ;;  %2967 = vmatpush.msra.mxu3 %v6323_v60 }
0x3880   :  { %2903 = vmatmul.f32.vlgmr.msra.gmra.mxu2 %v5487_v8  ;;  %3041 = vmatpush.msra.mxu0 %v6323_v60 }
0x3881   :  { %3112 = vmatpush.msrb.mxu2 %v6304_v53  ;;  %3186 = vmatpush.msrb.mxu3 %v6304_v53 }
0x3883   :  { %3113 = vmatpush.msrb.mxu2 %v6308_v6  ;;  %3187 = vmatpush.msrb.mxu3 %v6308_v6 }
0x3885   :  { %3114 = vmatpush.msrb.mxu2 %v6320_v61  ;;  %3188 = vmatpush.msrb.mxu3 %v6320_v61 }
0x3887   :  { %3115 = vmatpush.msrb.mxu2 %v6323_v60  ;;  %3189 = vmatpush.msrb.mxu3 %v6323_v60 }
0x3889   :  { %3328 = vmatpush.msra.mxu2 %v6304_v53 }
0x388b   :  { %3329 = vmatpush.msra.mxu2 %v6308_v6 }
0x388d   :  { %3330 = vmatpush.msra.mxu2 %v6320_v61 }
0x388f   :  { %3331 = vmatpush.msra.mxu2 %v6323_v60 }
0x38c3   :  { %v2750_v14 = vpop.permute.xlu2 %2749 }
0x38c4   :  { %v2752_v7 = vmul.f32 %v2750_v14, %v2741_v5  ;;  %v2846_v14 = vld [vmem:[#allocation19] sm:$0xff] }
0x38c6   :  { %2754 = vrot.lane.b32.xlu0 %v2752_v7, %s5489_s30 }
0x3938   :  { %v2755_v18 = vpop.permute.xlu0 %2754 }
0x3939   :  { %v2757_v19 = vadd.f32 %v2755_v18, %v2747_v38  ;;  %v2904_v18 = vpop.f32.mrf.mxu2 }
0x393b   :  { %4857 = vtanh.f32 %v2757_v19  ;;  %v2816_v52 = vrot.slane %v2757_v19, 2 }
0x3941   :  { %v4858_v16 = vpop.eup %4857 }
0x3942   :  { %2760 = vrot.lane.b32.xlu1 %v4858_v16, %s5488_s12 }
0x39b4   :  { %v2761_v20 = vpop.permute.xlu1 %2760 }
0x39b5   :  { %v2763_v21 = vmul.f32 %v2761_v20, %v2741_v5 }
0x39b7   :  { %v2769_v17 = vrot.slane %v2763_v21, 2 }
0x39b9   :  { %2770 = vrot.lane.b32.xlu2 %v2769_v17, %s5489_s30 }
0x3a13   :  { %v2771_v23 = vpop.permute.xlu2 %2770 }
0x3a14   :  { %4491 = vmatmul.msk.f32.vlgmr.msrb.gmra.mxu0 %vm408_vm7, %v2771_v23 }
0x3a15   :  { %3254 = vmatpush.msrb.mxu0 %v6304_v53 }
0x3a17   :  { %3255 = vmatpush.msrb.mxu0 %v6308_v6 }
0x3a19   :  { %3256 = vmatpush.msrb.mxu0 %v6320_v61 }
0x3a1b   :  { %3257 = vmatpush.msrb.mxu0 %v6323_v60 }
0x3a91   :  { %v2791_v24 = vpop.f32.mrf.mxu0 }
0x3a92   :  { %v2794_v43 = vadd.f32 %v2791_v24, %v6133_v62 }
0x3a94   :  { %4859 = vtanh.f32 %v2794_v43  ;;  %v4492_v25 = vmul.f32 -1.442695, %v2794_v43 }
0x3a96   :  { %4861 = vpow2.f32 %v4492_v25 }
0x3a9a   :  { %v4860_v35 = vpop.eup %4859 }
0x3a9b   :  { %2820 = vrot.lane.b32.xlu0 %v4860_v35, %s5488_s12 }
0x3a9c   :  { %v4862_v39 = vpop.eup %4861 }
0x3a9d   :  { %v2798_v40 = vadd.f32 1.0, %v4862_v39 }
0x3a9f   :  { %4863 = vrcp.f32 %v2798_v40  ;;  %v2810_v47 = vand.u32 2147483648, %v2798_v40  ;;  %vm2804_vm5 = vweird.f32 %v2798_v40  ;;  %v2808_v29 = vand.u32 2147483647, %v2798_v40 }
0x3aa1   :  { %vm2809_vm9 = vcmp.eq.f32.partialorder %v2808_v29, 8.507059e+37 }
0x3aa3   :  { %1782 = vrot.lane.b32.xlu0 %v6062_v9, %s5489_s30  ;;  %v2811_v9 = vor.u32 1.1754944e-38, %v2810_v47 }
0x3aa5   :  { %v4864_v44 = vpop.eup %4863 }
0x3aa6   :  { %v2800_v27 = vmul.f32 %v4864_v44, %v2798_v40  ;;  %vm2805_vm4 = vweird.f32 %v4864_v44 }
0x3aa7   :  { %vm2806_vm8 = vmor %vm2804_vm5, %vm2805_vm4  ;;  %vm6722_vm5 = vcmask 254976  }
0x3aa8   :  { %v2801_v46 = vsub.f32 1.0, %v2800_v27 }
0x3aaa   :  { %v2802_v0 = vmul.f32 %v4864_v44, %v2801_v46 }
0x3aab   :  { %2617 = vrot.lane.b32.xlu0 %v6265_v10, %s5488_s12 }
0x3aac   :  { %v2803_v62 = vadd.f32 %v4864_v44, %v2802_v0 }
0x3aae   :  { %v2807_v36 = vsel %vm2806_vm8, %v4864_v44, %v2803_v62 }
0x3aaf   :  { %v2812_v10 = vsel %vm2809_vm9, %v2811_v9, %v2807_v36 }
0x3ab0   :  { %v2818_v22 = vmul.f32 %v2816_v52, %v2812_v10 }
0x3b0d   :  { %v2821_v49 = vpop.permute.xlu0 %2820 }
0x3b0e   :  { %v2823_v51 = vmul.f32 %v2821_v49, %v2812_v10 }
0x3b10   :  { %2825 = vrot.lane.b32.xlu1 %v2823_v51, %s5489_s30 }
0x3b15   :  { %v1783_v30 = vpop.permute.xlu0 %1782 }
0x3b16   :  { %1785 = vst.msk [vmem:[#allocation3] sm:$0xc] %vm546_vm10, %v1783_v30 }
0x3b18   :  { %1856 = vrot.lane.b32.xlu1 %v6077_v56, %s5489_s30  ;;  %v2853_v56 = vld [vmem:[#allocation19 + $0x38] sm:$0xff] }
0x3b19   :  { %2872 = vmatpush.msra.mxu1 %v2853_v56 }
0x3b1d   :  { %v2618_v57 = vpop.permute.xlu0 %2617 }
0x3b20   :  { %2691 = vrot.lane.b32.xlu1 %v6274_v41, %s5488_s12  ;;  %v2852_v41 = vld [vmem:[#allocation19 + $0x30] sm:$0xff] }
0x3b21   :  { %2873 = vmatpush.msra.mxu1 %v2852_v41 }
0x3b23   :  { %2874 = vmatpush.msra.mxu1 %v2851_v32 }
0x3b82   :  { %v2826_v48 = vpop.permute.xlu1 %2825 }
0x3b83   :  { %v2828_v45 = vadd.f32 %v2826_v48, %v2818_v22 }
0x3b85   :  { %4865 = vtanh.f32 %v2828_v45 }
0x3b8a   :  { %v1857_v42 = vpop.permute.xlu1 %1856 }
0x3b8b   :  { %v4866_v1 = vpop.eup %4865  ;;  %1859 = vst.msk [vmem:[#allocation3] sm:$0x30] %vm621_vm11, %v1857_v42 }
0x3b8c   :  { %2831 = vrot.lane.b32.xlu2 %v4866_v1, %s5488_s12 }
0x3b92   :  { %v2692_v33 = vpop.permute.xlu1 %2691 }
0x3b93   :  { %2694 = vst.msk [vmem:[#allocation3] sm:$0x30] %vm1163_vm0, %v2692_v33 }
0x3b94   :  { %1930 = vrot.lane.b32.xlu2 %v6118_v31, %s5489_s30  ;;  %v2850_v31 = vld [vmem:[#allocation19 + $0x20] sm:$0xff] }
0x3b95   :  { %2875 = vmatpush.msra.mxu1 %v2850_v31 }
0x3b97   :  { %2876 = vmatpush.msra.mxu1 %v2849_v59 }
0x3b99   :  { %2877 = vmatpush.msra.mxu1 %v2848_v2 }
0x3b9b   :  { %2878 = vmatpush.msra.mxu1 %v2847_v3 }
0x3b9c   :  { %2765 = vrot.lane.b32.xlu2 %v2763_v21, %s5488_s12 }
0x3b9d   :  { %2879 = vmatpush.msra.mxu1 %v2846_v14 }
0x3be6   :  { %v2832_v12 = vpop.permute.xlu2 %2831 }
0x3be7   :  { %v2834_v54 = vmul.f32 %v2832_v12, %v2812_v10 }
0x3be9   :  { %2836 = vrot.lane.b32.xlu0 %v2834_v54, %s5488_s12 }
0x3bee   :  { %v1931_v55 = vpop.permute.xlu2 %1930 }
0x3bef   :  { %1933 = vst.msk [vmem:[#allocation3] sm:$0xc0] %vm696_vm1, %v1931_v55 }
0x3bf0   :  { %2620 = vst.msk [vmem:[#allocation3] sm:$0xc0] %vm1088_vm12, %v2618_v57 }
0x3bf6   :  { %v2766_v58 = vpop.permute.xlu2 %2765 }
0x3bf7   :  { %2768 = vst.msk [vmem:[#allocation3] sm:$0xc] %vm1238_vm13, %v2766_v58 }
0x3c5b   :  { %v2837_v5 = vpop.permute.xlu0 %2836 }
0x3c5c   :  { %2839 = vst.msk [vmem:[#allocation3] sm:$0x3] %vm1310_vm14, %v2837_v5 }
0x3c63   :  { %v6349_v7 = vld [vmem:[#allocation3] sm:$0xff] }
0x3c64   :  { %4493 = vmatmul.msk.f32.vlgmr.msra.gmra.mxu1 %vm6721_vm6, %v6349_v7 }
0x3ce1   :  { %v2881_v38 = vpop.f32.mrf.mxu1 }
0x3ce2   :  { %v6356_v19 = vadd.f32 %v6353_v13, %v2881_v38 }
0x3ce4   :  { %v2907_v16 = vadd.f32 %v2904_v18, %v6356_v19 }
0x3ce6   :  { %4867 = vtanh.f32 %v2907_v16  ;;  %v4495_v21 = vmul.f32 -1.442695, %v2907_v16 }
0x3ce8   :  { %4869 = vpow2.f32 %v4495_v21 }
0x3cec   :  { %v4868_v20 = vpop.eup %4867 }
0x3ced   :  { %2930 = vrot.lane.b32.xlu1 %v4868_v20, %s5488_s12 }
0x3cee   :  { %v4870_v17 = vpop.eup %4869 }
0x3cef   :  { %v2911_v23 = vadd.f32 1.0, %v4870_v17 }
0x3cf1   :  { %4871 = vrcp.f32 %v2911_v23  ;;  %v2923_v40 = vand.u32 2147483648, %v2911_v23  ;;  %vm2917_vm2 = vweird.f32 %v2911_v23  ;;  %v2921_v44 = vand.u32 2147483647, %v2911_v23 }
0x3cf3   :  { %v2924_v46 = vor.u32 1.1754944e-38, %v2923_v40  ;;  %vm2922_vm4 = vcmp.eq.f32.partialorder %v2921_v44, 8.507059e+37 }
0x3cf7   :  { %v4872_v24 = vpop.eup %4871 }
0x3cf8   :  { %v2913_v43 = vmul.f32 %v4872_v24, %v2911_v23  ;;  %vm2918_vm15 = vweird.f32 %v4872_v24 }
0x3cf9   :  { %vm2919_vm3 = vmor %vm2917_vm2, %vm2918_vm15 }
0x3cfa   :  { %v2914_v35 = vsub.f32 1.0, %v2913_v43 }
0x3cfc   :  { %v2915_v25 = vmul.f32 %v4872_v24, %v2914_v35 }
0x3cfe   :  { %v2916_v39 = vadd.f32 %v4872_v24, %v2915_v25 }
0x3d00   :  { %v2920_v27 = vsel %vm2919_vm3, %v4872_v24, %v2916_v39 }
0x3d01   :  { %v2925_v62 = vsel %vm2922_vm4, %v2924_v46, %v2920_v27 }
0x3d02   :  { %v2928_v29 = vmul.f32 0.0, %v2925_v62 }
0x3d5f   :  { %v2931_v0 = vpop.permute.xlu1 %2930 }
0x3d60   :  { %v2933_v47 = vmul.f32 %v2931_v0, %v2925_v62 }
0x3d62   :  { %2935 = vrot.lane.b32.xlu2 %v2933_v47, %s5489_s30 }
0x3dbc   :  { %v2936_v36 = vpop.permute.xlu2 %2935 }
0x3dbd   :  { %v2938_v9 = vadd.f32 %v2936_v36, %v2928_v29 }
0x3dbf   :  { %4873 = vtanh.f32 %v2938_v9  ;;  %v2997_v59 = vrot.slane %v2938_v9, 6 }
0x3dc5   :  { %v4874_v49 = vpop.eup %4873 }
0x3dc6   :  { %2941 = vrot.lane.b32.xlu0 %v4874_v49, %s5488_s12 }
0x3e38   :  { %v2942_v10 = vpop.permute.xlu0 %2941 }
0x3e39   :  { %v2944_v51 = vmul.f32 %v2942_v10, %v2925_v62  ;;  %v2176_v62 = vrot.slane %v6241_v50, 2 }
0x3e3b   :  { %2946 = vrot.lane.b32.xlu1 %v2944_v51, %s5489_s30  ;;  %v2178_v36 = vadd.f32 %v2176_v62, %v6136_v63 }
0x3e3d   :  { %v4475_v63 = vmul.f32 -1.442695, %v2178_v36 }
0x3ead   :  { %v2947_v30 = vpop.permute.xlu1 %2946 }
0x3eae   :  { %2949 = vst.msk [vmem:[#allocation4] sm:$0x3] %vm6722_vm5, %v2947_v30  ;;  %4496 = vmatmul.msk.f32.vlgmr.msra.gmra.mxu3 %vm408_vm7, %v2947_v30 }
0x3eaf   :  { %3402 = vmatpush.msra.mxu3 %v6304_v53 }
0x3eb1   :  { %3403 = vmatpush.msra.mxu3 %v6308_v6 }
0x3eb3   :  { %3404 = vmatpush.msra.mxu3 %v6320_v61 }
0x3eb5   :  { %3405 = vmatpush.msra.mxu3 %v6323_v60 }
0x3f31   :  { %v2969_v52 = vpop.f32.mrf.mxu3 }
0x3f32   :  { %v2973_v22 = vrot.slane %v2969_v52, 6 }
0x3f34   :  { %v2975_v48 = vadd.f32 %v2973_v22, %v6356_v19 }
0x3f36   :  { %4875 = vtanh.f32 %v2975_v48  ;;  %v4497_v42 = vmul.f32 -1.442695, %v2975_v48 }
0x3f38   :  { %4877 = vpow2.f32 %v4497_v42 }
0x3f3c   :  { %v4876_v45 = vpop.eup %4875 }
0x3f3d   :  { %3001 = vrot.lane.b32.xlu2 %v4876_v45, %s5488_s12 }
0x3f3e   :  { %v4878_v1 = vpop.eup %4877 }
0x3f3f   :  { %v2979_v33 = vadd.f32 1.0, %v4878_v1 }
0x3f41   :  { %4879 = vrcp.f32 %v2979_v33  ;;  %v2991_v31 = vand.u32 2147483648, %v2979_v33  ;;  %vm2985_vm9 = vweird.f32 %v2979_v33  ;;  %v2989_v12 = vand.u32 2147483647, %v2979_v33 }
0x3f43   :  { %v2992_v55 = vor.u32 1.1754944e-38, %v2991_v31  ;;  %vm2990_vm15 = vcmp.eq.f32.partialorder %v2989_v12, 8.507059e+37 }
0x3f47   :  { %v4880_v56 = vpop.eup %4879 }
0x3f48   :  { %v2981_v41 = vmul.f32 %v4880_v56, %v2979_v33  ;;  %vm2986_vm8 = vweird.f32 %v4880_v56 }
0x3f49   :  { %vm2987_vm6 = vmor %vm2985_vm9, %vm2986_vm8 }
0x3f4a   :  { %v2982_v53 = vsub.f32 1.0, %v2981_v41 }
0x3f4c   :  { %v2983_v6 = vmul.f32 %v4880_v56, %v2982_v53 }
0x3f4e   :  { %v2984_v32 = vadd.f32 %v4880_v56, %v2983_v6 }
0x3f50   :  { %v2988_v54 = vsel %vm2987_vm6, %v4880_v56, %v2984_v32 }
0x3f51   :  { %v2993_v58 = vsel %vm2990_vm15, %v2992_v55, %v2988_v54 }
0x3f52   :  { %v2999_v60 = vmul.f32 %v2997_v59, %v2993_v58 }
0x3f97   :  { %v3002_v57 = vpop.permute.xlu2 %3001 }
0x3f98   :  { %v3004_v61 = vmul.f32 %v3002_v57, %v2993_v58 }
0x3f9a   :  { %3006 = vrot.lane.b32.xlu0 %v3004_v61, %s5489_s30 }
0x400c   :  { %v3007_v2 = vpop.permute.xlu0 %3006 }
0x400d   :  { %v3009_v3 = vadd.f32 %v3007_v2, %v2999_v60 }
0x400f   :  { %4881 = vtanh.f32 %v3009_v3  ;;  %v3071_v30 = vrot.slane %v3009_v3, 6 }
0x4015   :  { %v4882_v14 = vpop.eup %4881 }
0x4016   :  { %3012 = vrot.lane.b32.xlu1 %v4882_v14, %s5488_s12 }
0x4088   :  { %v3013_v5 = vpop.permute.xlu1 %3012 }
0x4089   :  { %v6373_v38 = vmul.f32 %v3013_v5, %v2993_v58  ;;  %v2200_v5 = vrot.slane %v6221_v28, 6 }
0x408b   :  { %v3021_v18 = vrot.slane %v6373_v38, 2 }
0x408d   :  { %3022 = vrot.lane.b32.xlu2 %v3021_v18, %s5489_s30 }
0x40e7   :  { %v3023_v16 = vpop.permute.xlu2 %3022 }
0x40e8   :  { %4498 = vmatmul.msk.f32.vlgmr.msra.gmra.mxu0 %vm408_vm7, %v3023_v16 }
0x4165   :  { %v3043_v20 = vpop.f32.mrf.mxu0 }
0x4166   :  { %v3047_v21 = vrot.slane %v3043_v20, 4 }
0x4168   :  { %v3049_v17 = vadd.f32 %v3047_v21, %v6356_v19 }
0x416a   :  { %4883 = vtanh.f32 %v3049_v17  ;;  %v4499_v24 = vmul.f32 -1.442695, %v3049_v17 }
0x416c   :  { %4885 = vpow2.f32 %v4499_v24 }
0x4170   :  { %v4884_v23 = vpop.eup %4883 }
0x4171   :  { %3075 = vrot.lane.b32.xlu0 %v4884_v23, %s5488_s12 }
0x4172   :  { %v4886_v43 = vpop.eup %4885 }
0x4173   :  { %v3053_v35 = vadd.f32 1.0, %v4886_v43 }
0x4175   :  { %4887 = vrcp.f32 %v3053_v35  ;;  %v3065_v46 = vand.u32 2147483648, %v3053_v35  ;;  %vm3059_vm3 = vweird.f32 %v3053_v35  ;;  %v3063_v0 = vand.u32 2147483647, %v3053_v35 }
0x4176   :  { %4889 = vtanh.f32 %v2178_v36 }
0x4177   :  { %v3066_v29 = vor.u32 1.1754944e-38, %v3065_v46  ;;  %vm3064_vm5 = vcmp.eq.f32.partialorder %v3063_v0, 8.507059e+37 }
0x417b   :  { %v4888_v25 = vpop.eup %4887 }
0x417c   :  { %v3055_v39 = vmul.f32 %v4888_v25, %v3053_v35  ;;  %vm3060_vm2 = vweird.f32 %v4888_v25  ;;  %v4890_v51 = vpop.eup %4889 }
0x417d   :  { %vm3061_vm4 = vmor %vm3059_vm3, %vm3060_vm2 }
0x417e   :  { %v3056_v40 = vsub.f32 1.0, %v3055_v39 }
0x4180   :  { %v3057_v44 = vmul.f32 %v4888_v25, %v3056_v40 }
0x4182   :  { %v3058_v27 = vadd.f32 %v4888_v25, %v3057_v44 }
0x4184   :  { %v3062_v47 = vsel %vm3061_vm4, %v4888_v25, %v3058_v27 }
0x4185   :  { %v3067_v49 = vsel %vm3064_vm5, %v3066_v29, %v3062_v47 }
0x4186   :  { %v3073_v52 = vmul.f32 %v3071_v30, %v3067_v49 }
0x41e3   :  { %v3076_v9 = vpop.permute.xlu0 %3075 }
0x41e4   :  { %v3078_v10 = vmul.f32 %v3076_v9, %v3067_v49 }
0x41e6   :  { %3080 = vrot.lane.b32.xlu1 %v3078_v10, %s5489_s30 }
0x41ee   :  { %2204 = vrot.lane.b32.xlu1 %v4890_v51, %s5488_s12 }
0x4258   :  { %v3081_v22 = vpop.permute.xlu1 %3080 }
0x4259   :  { %v6384_v48 = vadd.f32 %v3081_v22, %v3073_v52  ;;  %v3469_v22 = vld [vmem:[#allocation22 + $0x30] sm:$0xff] }
0x425b   :  { %4891 = vtanh.f32 %v6384_v48  ;;  %v3145_v36 = vrot.slane %v6384_v48, 6  ;;  %v3468_v48 = vld [vmem:[#allocation22 + $0x28] sm:$0xff] }
0x425c   :  { %4893 = vpow2.f32 %v4475_v63  ;;  %v3466_v63 = vld [vmem:[#allocation22 + $0x18] sm:$0xff] }
0x4260   :  { %v2205_v58 = vpop.permute.xlu1 %2204 }
0x4261   :  { %v4892_v50 = vpop.eup %4891 }
0x4262   :  { %3086 = vrot.lane.b32.xlu2 %v4892_v50, %s5488_s12  ;;  %v4894_v45 = vpop.eup %4893  ;;  %v3467_v50 = vld [vmem:[#allocation22 + $0x20] sm:$0xff] }
0x4263   :  { %v2182_v42 = vadd.f32 1.0, %v4894_v45  ;;  %v3465_v45 = vld [vmem:[#allocation22 + $0x10] sm:$0xff] }
0x4265   :  { %4895 = vrcp.f32 %v2182_v42  ;;  %v2194_v12 = vand.u32 2147483648, %v2182_v42  ;;  %vm2188_vm9 = vweird.f32 %v2182_v42  ;;  %v2192_v54 = vand.u32 2147483647, %v2182_v42 }
0x4267   :  { %v2195_v57 = vor.u32 1.1754944e-38, %v2194_v12  ;;  %vm2193_vm15 = vcmp.eq.f32.partialorder %v2192_v54, 8.507059e+37  ;;  %v6434_v54 = vld [vmem:[%s6723_s15] ss:$0 sm:$0xff] }
0x426b   :  { %v4896_v1 = vpop.eup %4895 }
0x426c   :  { %v2184_v33 = vmul.f32 %v4896_v1, %v2182_v42  ;;  %vm2189_vm8 = vweird.f32 %v4896_v1  ;;  %v3464_v42 = vld [vmem:[#allocation22 + $0x8] sm:$0xff] }
0x426d   :  { %vm2190_vm6 = vmor %vm2188_vm9, %vm2189_vm8  ;;  %vm6724_vm8 = vcmask 523264  }
0x426e   :  { %v2185_v56 = vsub.f32 1.0, %v2184_v33  ;;  %vm6725_vm9 = vmmov %vm6724_vm8 }
0x4270   :  { %v2186_v41 = vmul.f32 %v4896_v1, %v2185_v56 }
0x4272   :  { %v2187_v32 = vadd.f32 %v4896_v1, %v2186_v41 }
0x4274   :  { %v2191_v55 = vsel %vm2190_vm6, %v4896_v1, %v2187_v32  ;;  %v3463_v1 = vld [vmem:[#allocation22] sm:$0xff]  ;;  %vm6726_vm6 = vmmov %vm6724_vm8 }
0x4275   :  { %v2196_v61 = vsel %vm2193_vm15, %v2195_v57, %v2191_v55 }
0x4276   :  { %v2207_v59 = vmul.f32 %v2205_v58, %v2196_v61  ;;  %v2202_v16 = vmul.f32 %v2200_v5, %v2196_v61 }
0x42bc   :  { %v3087_v53 = vpop.permute.xlu2 %3086 }
0x42bd   :  { %v6388_v6 = vmul.f32 %v3087_v53, %v3067_v49 }
0x42bf   :  { %v3095_v31 = vrot.slane %v6388_v6, 4 }
0x42c1   :  { %3096 = vrot.lane.b32.xlu0 %v3095_v31, %s5489_s30 }
0x42c9   :  { %2209 = vrot.lane.b32.xlu0 %v2207_v59, %s5489_s30 }
0x4333   :  { %v3097_v60 = vpop.permute.xlu0 %3096 }
0x4334   :  { %4500 = vmatmul.msk.f32.vlgmr.msrb.gmra.mxu2 %vm408_vm7, %v3097_v60 }
0x433b   :  { %v2210_v18 = vpop.permute.xlu0 %2209 }
0x433c   :  { %v2212_v20 = vadd.f32 %v2210_v18, %v2202_v16 }
0x43b7   :  { %v3117_v2 = vpop.f32.mrf.mxu2 }
0x43b8   :  { %v3121_v3 = vrot.slane %v3117_v2, 2 }
0x43ba   :  { %v3123_v14 = vadd.f32 %v3121_v3, %v6356_v19 }
0x43bc   :  { %4897 = vtanh.f32 %v3123_v14  ;;  %v4501_v19 = vmul.f32 -1.442695, %v3123_v14 }
0x43bd   :  { %4899 = vtanh.f32 %v2212_v20 }
0x43be   :  { %4901 = vpow2.f32 %v4501_v19 }
0x43c2   :  { %v4898_v21 = vpop.eup %4897 }
0x43c3   :  { %3149 = vrot.lane.b32.xlu2 %v4898_v21, %s5488_s12  ;;  %v4900_v17 = vpop.eup %4899 }
0x43c4   :  { %v4902_v28 = vpop.eup %4901 }
0x43c5   :  { %v3127_v23 = vadd.f32 1.0, %v4902_v28 }
0x43c7   :  { %4903 = vrcp.f32 %v3127_v23  ;;  %v3139_v40 = vand.u32 2147483648, %v3127_v23  ;;  %vm3133_vm3 = vweird.f32 %v3127_v23  ;;  %v3137_v44 = vand.u32 2147483647, %v3127_v23 }
0x43c9   :  { %vm3138_vm5 = vcmp.eq.f32.partialorder %v3137_v44, 8.507059e+37 }
0x43cb   :  { %2215 = vrot.lane.b32.xlu2 %v4900_v17, %s5488_s12 }
0x43cd   :  { %v4904_v24 = vpop.eup %4903 }
0x43ce   :  { %v3129_v43 = vmul.f32 %v4904_v24, %v3127_v23  ;;  %vm3134_vm2 = vweird.f32 %v4904_v24 }
0x43cf   :  { %vm3135_vm4 = vmor %vm3133_vm3, %vm3134_vm2 }
0x43d0   :  { %v3130_v35 = vsub.f32 1.0, %v3129_v43 }
0x43d2   :  { %v3131_v25 = vmul.f32 %v4904_v24, %v3130_v35 }
0x43d3   :  { %2146 = vrot.lane.b32.xlu2 %v6227_v26, %s5489_s30  ;;  %v3140_v26 = vor.u32 1.1754944e-38, %v3139_v40 }
0x43d4   :  { %v3132_v39 = vadd.f32 %v4904_v24, %v3131_v25 }
0x43d6   :  { %v3136_v27 = vsel %vm3135_vm4, %v4904_v24, %v3132_v39 }
0x43db   :  { %2399 = vrot.lane.b32.xlu2 %v6231_v15, %s5488_s12  ;;  %v3141_v15 = vsel %vm3138_vm5, %v3140_v26, %v3136_v27  ;;  %v6451_v26 = vld [vmem:[#allocation24 + $0x18] sm:$0xff]  ;;  %vm6727_vm5 = vcmask 254976  }
0x43dc   :  { %v3147_v9 = vmul.f32 %v3145_v36, %v3141_v15  ;;  %3510 = vmatpush.msra.mxu0 %v6451_v26  ;;  %3581 = vmatpush.msrb.mxu2 %v6451_v26 }
0x441d   :  { %v3150_v46 = vpop.permute.xlu2 %3149 }
0x441e   :  { %v3152_v0 = vmul.f32 %v3150_v46, %v3141_v15  ;;  %v6453_v46 = vld [vmem:[#allocation24 + $0x10] sm:$0xff] }
0x441f   :  { %3511 = vmatpush.msra.mxu0 %v6453_v46  ;;  %3582 = vmatpush.msrb.mxu2 %v6453_v46 }
0x4420   :  { %3154 = vrot.lane.b32.xlu1 %v3152_v0, %s5489_s30  ;;  %v6463_v0 = vld [vmem:[#allocation24] sm:$0xff] }
0x4425   :  { %v2216_v62 = vpop.permute.xlu2 %2215 }
0x4428   :  { %2072 = vrot.lane.b32.xlu1 %v6200_v34, %s5489_s30 }
0x442d   :  { %v2147_v47 = vpop.permute.xlu2 %2146 }
0x442e   :  { %2149 = vst.msk [vmem:[#allocation3 + $0x8] sm:$0x30] %vm621_vm11, %v2147_v47 }
0x4430   :  { %2325 = vrot.lane.b32.xlu1 %v6204_v37, %s5488_s12  ;;  %v2218_v37 = vmul.f32 %v2216_v62, %v2196_v61 }
0x4435   :  { %v2400_v29 = vpop.permute.xlu2 %2399 }
0x4436   :  { %2402 = vst.msk [vmem:[#allocation3 + $0x8] sm:$0x30] %vm1163_vm0, %v2400_v29 }
0x4438   :  { %2544 = vrot.lane.b32.xlu1 %v6256_v11, %s5488_s12  ;;  %v3470_v11 = vld [vmem:[#allocation22 + $0x38] sm:$0xff] }
0x4439   :  { %3483 = vmatpush.msrb.mxu1 %v3470_v11 }
0x443b   :  { %3484 = vmatpush.msrb.mxu1 %v3469_v22 }
0x443d   :  { %3485 = vmatpush.msrb.mxu1 %v3468_v48 }
0x443f   :  { %3486 = vmatpush.msrb.mxu1 %v3467_v50 }
0x4441   :  { %3487 = vmatpush.msrb.mxu1 %v3466_v63 }
0x4443   :  { %3488 = vmatpush.msrb.mxu1 %v3465_v45 }
0x4445   :  { %3489 = vmatpush.msrb.mxu1 %v3464_v42 }
0x4447   :  { %3490 = vmatpush.msrb.mxu1 %v3463_v1 }
0x4449   :  { %4021 = vmatpush.msra.mxu1 %v6451_v26 }
0x444b   :  { %4022 = vmatpush.msra.mxu1 %v6453_v46 }
0x4492   :  { %v3155_v49 = vpop.permute.xlu1 %3154 }
0x4493   :  { %v6412_v10 = vadd.f32 %v3155_v49, %v3147_v9 }
0x4495   :  { %4905 = vtanh.f32 %v6412_v10  ;;  %v3216_v43 = vrot.slane %v6412_v10, 6 }
0x449a   :  { %v2073_v34 = vpop.permute.xlu1 %2072 }
0x449b   :  { %v4906_v51 = vpop.eup %4905  ;;  %2075 = vst.msk [vmem:[#allocation3 + $0x8] sm:$0xc] %vm546_vm10, %v2073_v34 }
0x449c   :  { %3160 = vrot.lane.b32.xlu0 %v4906_v51, %s5488_s12 }
0x44a2   :  { %v2326_v30 = vpop.permute.xlu1 %2325 }
0x44a4   :  { %2220 = vrot.lane.b32.xlu0 %v2218_v37, %s5489_s30 }
0x44aa   :  { %v2545_v52 = vpop.permute.xlu1 %2544 }
0x44ab   :  { %2547 = vst.msk [vmem:[#allocation3 + $0x8] sm:$0x3] %vm1310_vm14, %v2545_v52 }
0x44ac   :  { %2473 = vrot.lane.b32.xlu0 %v6247_v4, %s5488_s12 }
0x450e   :  { %v3161_v33 = vpop.permute.xlu0 %3160 }
0x450f   :  { %v6421_v56 = vmul.f32 %v3161_v33, %v3141_v15  ;;  %v6457_v15 = vld [vmem:[#allocation24 + $0x8] sm:$0xff] }
0x4510   :  { %3512 = vmatpush.msra.mxu0 %v6457_v15  ;;  %3583 = vmatpush.msrb.mxu2 %v6457_v15 }
0x4511   :  { %v3169_v4 = vrot.slane %v6421_v56, 6  ;;  %4023 = vmatpush.msra.mxu1 %v6457_v15 }
0x4512   :  { %3513 = vmatpush.msra.mxu0 %v6463_v0  ;;  %3584 = vmatpush.msrb.mxu2 %v6463_v0 }
0x4513   :  { %3170 = vrot.lane.b32.xlu2 %v3169_v4, %s5489_s30  ;;  %4024 = vmatpush.msra.mxu1 %v6463_v0 }
0x4516   :  { %v2221_v41 = vpop.permute.xlu0 %2220 }
0x4517   :  { %2223 = vst.msk [vmem:[#allocation3 + $0x8] sm:$0xc0] %vm696_vm1, %v2221_v41 }
0x4518   :  { %2328 = vst.msk [vmem:[#allocation3 + $0x8] sm:$0xc0] %vm1088_vm12, %v2326_v30 }
0x451e   :  { %v2474_v53 = vpop.permute.xlu0 %2473 }
0x451f   :  { %2476 = vst.msk [vmem:[#allocation3 + $0x8] sm:$0xc] %vm1238_vm13, %v2474_v53 }
0x4526   :  { %v2841_v32 = vld [vmem:[#allocation3 + $0x8] sm:$0xff] }
0x4527   :  { %4494 = vmatmul.msk.f32.gmra.mxu1 %vm6724_vm8, %v2841_v32 }
0x452f   :  { %4510 = vmatmul.msk.f32.vlgmr.msrb.gmra.mxu1 %vm6725_vm9, %v6349_v7 }
0x4537   :  { %4511 = vmatmul.msk.f32.gmra.mxu1 %vm6726_vm6, %v2841_v32 }
0x456d   :  { %v3171_v31 = vpop.permute.xlu2 %3170 }
0x456e   :  { %4502 = vmatmul.msk.f32.vlgmr.msrb.gmra.mxu3 %vm408_vm7, %v3171_v31 }
0x456f   :  { %3655 = vmatpush.msrb.mxu3 %v6451_v26 }
0x4571   :  { %3656 = vmatpush.msrb.mxu3 %v6453_v46 }
0x4573   :  { %3657 = vmatpush.msrb.mxu3 %v6457_v15 }
0x4575   :  { %3658 = vmatpush.msrb.mxu3 %v6463_v0 }
0x45a4   :  { %v2884_v12 = vpop.f32.mrf.mxu1 }
0x45a5   :  { %v6440_v58 = vadd.f32 %v6353_v13, %v2884_v12 }
0x45ac   :  { %v3492_v55 = vpop.f32.mrf.mxu1 }
0x45ad   :  { %v6437_v57 = vadd.f32 %v6434_v54, %v3492_v55 }
0x45b4   :  { %v3495_v9 = vpop.f32.mrf.mxu1 }
0x45b5   :  { %v6488_v10 = vadd.f32 %v6434_v54, %v3495_v9 }
0x45f1   :  { %v3191_v61 = vpop.f32.mrf.mxu3 }
0x45f2   :  { %v3194_v59 = vadd.f32 %v3191_v61, %v6440_v58 }
0x45f4   :  { %4907 = vtanh.f32 %v3194_v59  ;;  %v4503_v60 = vmul.f32 -1.442695, %v3194_v59 }
0x45f6   :  { %4909 = vpow2.f32 %v4503_v60 }
0x45fa   :  { %v4908_v7 = vpop.eup %4907 }
0x45fb   :  { %3220 = vrot.lane.b32.xlu0 %v4908_v7, %s5488_s12 }
0x45fc   :  { %v4910_v2 = vpop.eup %4909 }
0x45fd   :  { %v3198_v3 = vadd.f32 1.0, %v4910_v2 }
0x45ff   :  { %4911 = vrcp.f32 %v3198_v3  ;;  %v3210_v13 = vand.u32 2147483648, %v3198_v3  ;;  %vm3204_vm2 = vweird.f32 %v3198_v3  ;;  %v3208_v21 = vand.u32 2147483647, %v3198_v3 }
0x4601   :  { %v3211_v19 = vor.u32 1.1754944e-38, %v3210_v13  ;;  %vm3209_vm4 = vcmp.eq.f32.partialorder %v3208_v21, 8.507059e+37 }
0x4605   :  { %v4912_v14 = vpop.eup %4911 }
0x4606   :  { %v3200_v5 = vmul.f32 %v4912_v14, %v3198_v3  ;;  %vm3205_vm15 = vweird.f32 %v4912_v14 }
0x4607   :  { %vm3206_vm3 = vmor %vm3204_vm2, %vm3205_vm15 }
0x4608   :  { %v3201_v18 = vsub.f32 1.0, %v3200_v5 }
0x460a   :  { %v3202_v16 = vmul.f32 %v4912_v14, %v3201_v18 }
0x460c   :  { %v3203_v20 = vadd.f32 %v4912_v14, %v3202_v16 }
0x460e   :  { %v3207_v17 = vsel %vm3206_vm3, %v4912_v14, %v3203_v20 }
0x460f   :  { %v3212_v23 = vsel %vm3209_vm4, %v3211_v19, %v3207_v17 }
0x4610   :  { %v3218_v35 = vmul.f32 %v3216_v43, %v3212_v23 }
0x466d   :  { %v3221_v28 = vpop.permute.xlu0 %3220 }
0x466e   :  { %v3223_v24 = vmul.f32 %v3221_v28, %v3212_v23 }
0x4670   :  { %3225 = vrot.lane.b32.xlu1 %v3223_v24, %s5489_s30 }
0x46e2   :  { %v3226_v25 = vpop.permute.xlu1 %3225 }
0x46e3   :  { %v6446_v39 = vadd.f32 %v3226_v25, %v3218_v35 }
0x46e5   :  { %4913 = vtanh.f32 %v6446_v39  ;;  %v3287_v28 = vrot.slane %v6446_v39, 6 }
0x46eb   :  { %v4914_v40 = vpop.eup %4913 }
0x46ec   :  { %3231 = vrot.lane.b32.xlu2 %v4914_v40, %s5488_s12 }
0x4746   :  { %v3232_v44 = vpop.permute.xlu2 %3231 }
0x4747   :  { %v3234_v27 = vmul.f32 %v3232_v44, %v3212_v23 }
0x4749   :  { %3236 = vrot.lane.b32.xlu0 %v3234_v27, %s5489_s30 }
0x47bb   :  { %v3237_v62 = vpop.permute.xlu0 %3236 }
0x47bc   :  { %3239 = vst.msk [vmem:[#allocation4 + $0x8] sm:$0x3] %vm6727_vm5, %v3237_v62  ;;  %4504 = vmatmul.msk.f32.vlgmr.msrb.gmra.mxu0 %vm408_vm7, %v3237_v62 }
0x47bd   :  { %3729 = vmatpush.msrb.mxu0 %v6451_v26 }
0x47bf   :  { %3730 = vmatpush.msrb.mxu0 %v6453_v46 }
0x47c1   :  { %3731 = vmatpush.msrb.mxu0 %v6457_v15 }
0x47c3   :  { %3732 = vmatpush.msrb.mxu0 %v6463_v0 }
0x47c4   :  { %3514 = vmatmul.f32.vlgmr.msra.gmra.mxu0 %v5487_v8 }
0x47c5   :  { %3947 = vmatpush.msra.mxu0 %v6451_v26 }
0x47c7   :  { %3948 = vmatpush.msra.mxu0 %v6453_v46 }
0x47c9   :  { %3949 = vmatpush.msra.mxu0 %v6457_v15 }
0x47cb   :  { %3950 = vmatpush.msra.mxu0 %v6463_v0 }
0x4839   :  { %v3259_v47 = vpop.f32.mrf.mxu0 }
0x483a   :  { %v3263_v29 = vrot.slane %v3259_v47, 6 }
0x483c   :  { %v3265_v36 = vadd.f32 %v3263_v29, %v6440_v58 }
0x483e   :  { %4915 = vtanh.f32 %v3265_v36  ;;  %v4505_v22 = vmul.f32 -1.442695, %v3265_v36 }
0x4841   :  { %v3515_v49 = vpop.f32.mrf.mxu0 }
0x4842   :  { %v3519_v34 = vrot.slane %v3515_v49, 2 }
0x4844   :  { %v4916_v8 = vpop.eup %4915  ;;  %v3521_v51 = vadd.f32 %v3519_v34, %v6488_v10 }
0x4845   :  { %3291 = vrot.lane.b32.xlu1 %v4916_v8, %s5488_s12 }
0x4846   :  { %4917 = vtanh.f32 %v3521_v51  ;;  %v4512_v30 = vmul.f32 -1.442695, %v3521_v51 }
0x4848   :  { %4919 = vpow2.f32 %v4512_v30 }
0x484c   :  { %v4918_v37 = vpop.eup %4917 }
0x484d   :  { %3544 = vrot.lane.b32.xlu2 %v4918_v37, %s5488_s12 }
0x484e   :  { %v4920_v52 = vpop.eup %4919 }
0x484f   :  { %v3525_v11 = vadd.f32 1.0, %v4920_v52 }
0x4851   :  { %4921 = vrcp.f32 %v3525_v11  ;;  %v3537_v41 = vand.u32 2147483648, %v3525_v11  ;;  %vm3531_vm9 = vweird.f32 %v3525_v11  ;;  %v3535_v53 = vand.u32 2147483647, %v3525_v11 }
0x4852   :  { %4923 = vpow2.f32 %v4505_v22 }
0x4853   :  { %v3538_v12 = vor.u32 1.1754944e-38, %v3537_v41  ;;  %vm3536_vm15 = vcmp.eq.f32.partialorder %v3535_v53, 8.507059e+37 }
0x4857   :  { %v4922_v48 = vpop.eup %4921 }
0x4858   :  { %v4924_v50 = vpop.eup %4923  ;;  %v3527_v63 = vmul.f32 %v4922_v48, %v3525_v11  ;;  %vm3532_vm8 = vweird.f32 %v4922_v48 }
0x4859   :  { %v3269_v45 = vadd.f32 1.0, %v4924_v50  ;;  %vm3533_vm6 = vmor %vm3531_vm9, %vm3532_vm8 }
0x485a   :  { %v3528_v42 = vsub.f32 1.0, %v3527_v63 }
0x485b   :  { %4925 = vrcp.f32 %v3269_v45  ;;  %v3281_v2 = vand.u32 2147483648, %v3269_v45  ;;  %vm3275_vm3 = vweird.f32 %v3269_v45  ;;  %v3279_v3 = vand.u32 2147483647, %v3269_v45 }
0x485c   :  { %v3529_v1 = vmul.f32 %v4922_v48, %v3528_v42 }
0x485d   :  { %v3282_v5 = vor.u32 1.1754944e-38, %v3281_v2  ;;  %vm3280_vm5 = vcmp.eq.f32.partialorder %v3279_v3, 8.507059e+37 }
0x485e   :  { %v3530_v33 = vadd.f32 %v4922_v48, %v3529_v1 }
0x4860   :  { %v3534_v32 = vsel %vm3533_vm6, %v4922_v48, %v3530_v33 }
0x4861   :  { %v4926_v4 = vpop.eup %4925  ;;  %v3539_v55 = vsel %vm3536_vm15, %v3538_v12, %v3534_v32 }
0x4862   :  { %v3271_v31 = vmul.f32 %v4926_v4, %v3269_v45  ;;  %vm3276_vm2 = vweird.f32 %v4926_v4  ;;  %v3542_v13 = vmul.f32 0.0, %v3539_v55 }
0x4863   :  { %vm3277_vm4 = vmor %vm3275_vm3, %vm3276_vm2 }
0x4864   :  { %v3272_v59 = vsub.f32 1.0, %v3271_v31 }
0x4866   :  { %v3273_v7 = vmul.f32 %v4926_v4, %v3272_v59 }
0x4868   :  { %v3274_v60 = vadd.f32 %v4926_v4, %v3273_v7 }
0x486a   :  { %v3278_v14 = vsel %vm3277_vm4, %v4926_v4, %v3274_v60 }
0x486b   :  { %v3283_v16 = vsel %vm3280_vm5, %v3282_v5, %v3278_v14 }
0x486c   :  { %v3289_v23 = vmul.f32 %v3287_v28, %v3283_v16 }
0x48a7   :  { %v3545_v54 = vpop.permute.xlu2 %3544 }
0x48a8   :  { %v3547_v61 = vmul.f32 %v3545_v54, %v3539_v55 }
0x48aa   :  { %3549 = vrot.lane.b32.xlu1 %v3547_v61, %s5489_s30 }
0x48b7   :  { %v3292_v18 = vpop.permute.xlu1 %3291 }
0x48b8   :  { %v3294_v20 = vmul.f32 %v3292_v18, %v3283_v16 }
0x48ba   :  { %3296 = vrot.lane.b32.xlu0 %v3294_v20, %s5489_s30 }
0x491c   :  { %v3550_v21 = vpop.permute.xlu1 %3549 }
0x491d   :  { %v6495_v17 = vadd.f32 %v3550_v21, %v3542_v13 }
0x491f   :  { %4927 = vtanh.f32 %v6495_v17 }
0x4925   :  { %v4928_v19 = vpop.eup %4927 }
0x4926   :  { %3555 = vrot.lane.b32.xlu0 %v4928_v19, %s5488_s12 }
0x492c   :  { %v3297_v24 = vpop.permute.xlu0 %3296 }
0x492d   :  { %v6500_v43 = vadd.f32 %v3297_v24, %v3289_v23 }
0x492f   :  { %4929 = vtanh.f32 %v6500_v43  ;;  %v3361_v21 = vrot.slane %v6500_v43, 6 }
0x4935   :  { %v4930_v35 = vpop.eup %4929 }
0x4936   :  { %3302 = vrot.lane.b32.xlu2 %v4930_v35, %s5488_s12  ;;  %v3614_v35 = vrot.slane %v6495_v17, 2 }
0x4990   :  { %v3303_v25 = vpop.permute.xlu2 %3302 }
0x4991   :  { %v6504_v40 = vmul.f32 %v3303_v25, %v3283_v16 }
0x4993   :  { %v3311_v44 = vrot.slane %v6504_v40, 2 }
0x4995   :  { %3312 = vrot.lane.b32.xlu1 %v3311_v44, %s5489_s30 }
0x4998   :  { %v3556_v27 = vpop.permute.xlu0 %3555 }
0x4999   :  { %v6508_v62 = vmul.f32 %v3556_v27, %v3539_v55 }
0x499b   :  { %v3564_v39 = vrot.slane %v6508_v62, 6 }
0x499d   :  { %3565 = vrot.lane.b32.xlu2 %v3564_v39, %s5489_s30 }
0x49f7   :  { %v3566_v29 = vpop.permute.xlu2 %3565 }
0x4a07   :  { %v3313_v47 = vpop.permute.xlu1 %3312 }
0x4a08   :  { %4506 = vmatmul.msk.f32.vlgmr.msra.gmra.mxu2 %vm408_vm7, %v3313_v47 }
0x4a09   :  { %3799 = vmatpush.msra.mxu2 %v6451_v26 }
0x4a0b   :  { %3800 = vmatpush.msra.mxu2 %v6453_v46 }
0x4a0d   :  { %3801 = vmatpush.msra.mxu2 %v6457_v15 }
0x4a0f   :  { %3802 = vmatpush.msra.mxu2 %v6463_v0 }
0x4a10   :  { %4513 = vmatmul.msk.f32.vlgmr.msrb.gmra.mxu2 %vm408_vm7, %v3566_v29 }
0x4a8b   :  { %v3333_v36 = vpop.f32.mrf.mxu2 }
0x4a8c   :  { %v3337_v9 = vrot.slane %v3333_v36, 4 }
0x4a8e   :  { %v3339_v49 = vadd.f32 %v3337_v9, %v6440_v58 }
0x4a90   :  { %4931 = vtanh.f32 %v3339_v49  ;;  %v4507_v52 = vmul.f32 -1.442695, %v3339_v49 }
0x4a93   :  { %v3586_v34 = vpop.f32.mrf.mxu2 }
0x4a94   :  { %v3590_v8 = vrot.slane %v3586_v34, 4 }
0x4a96   :  { %v4932_v51 = vpop.eup %4931  ;;  %v3592_v37 = vadd.f32 %v3590_v8, %v6488_v10 }
0x4a97   :  { %3365 = vrot.lane.b32.xlu0 %v4932_v51, %s5488_s12 }
0x4a98   :  { %4933 = vtanh.f32 %v3592_v37  ;;  %v4514_v11 = vmul.f32 -1.442695, %v3592_v37 }
0x4a99   :  { %4935 = vpow2.f32 %v4507_v52 }
0x4a9a   :  { %4937 = vpow2.f32 %v4514_v11 }
0x4a9e   :  { %v4934_v30 = vpop.eup %4933 }
0x4a9f   :  { %3618 = vrot.lane.b32.xlu1 %v4934_v30, %s5488_s12  ;;  %v4936_v22 = vpop.eup %4935 }
0x4aa0   :  { %v3343_v48 = vadd.f32 1.0, %v4936_v22  ;;  %v4938_v50 = vpop.eup %4937 }
0x4aa1   :  { %v3596_v63 = vadd.f32 1.0, %v4938_v50 }
0x4aa2   :  { %4939 = vrcp.f32 %v3343_v48  ;;  %v3355_v31 = vand.u32 2147483648, %v3343_v48  ;;  %vm3349_vm9 = vweird.f32 %v3343_v48  ;;  %v3353_v12 = vand.u32 2147483647, %v3343_v48 }
0x4aa3   :  { %4941 = vrcp.f32 %v3596_v63  ;;  %v3608_v3 = vand.u32 2147483648, %v3596_v63  ;;  %vm3602_vm3 = vweird.f32 %v3596_v63  ;;  %v3606_v14 = vand.u32 2147483647, %v3596_v63 }
0x4aa4   :  { %v3356_v61 = vor.u32 1.1754944e-38, %v3355_v31  ;;  %vm3354_vm15 = vcmp.eq.f32.partialorder %v3353_v12, 8.507059e+37 }
0x4aa5   :  { %v3609_v18 = vor.u32 1.1754944e-38, %v3608_v3  ;;  %vm3607_vm5 = vcmp.eq.f32.partialorder %v3606_v14, 8.507059e+37 }
0x4aa8   :  { %v4940_v45 = vpop.eup %4939 }
0x4aa9   :  { %v3345_v42 = vmul.f32 %v4940_v45, %v3343_v48  ;;  %v4942_v33 = vpop.eup %4941  ;;  %vm3350_vm8 = vweird.f32 %v4940_v45 }
0x4aaa   :  { %v3598_v41 = vmul.f32 %v4942_v33, %v3596_v63  ;;  %vm3351_vm6 = vmor %vm3349_vm9, %vm3350_vm8  ;;  %vm3603_vm2 = vweird.f32 %v4942_v33 }
0x4aab   :  { %v3346_v1 = vsub.f32 1.0, %v3345_v42  ;;  %vm3604_vm4 = vmor %vm3602_vm3, %vm3603_vm2 }
0x4aac   :  { %v3599_v32 = vsub.f32 1.0, %v3598_v41 }
0x4aad   :  { %v3347_v4 = vmul.f32 %v4940_v45, %v3346_v1 }
0x4aae   :  { %v3600_v55 = vmul.f32 %v4942_v33, %v3599_v32 }
0x4aaf   :  { %v3348_v53 = vadd.f32 %v4940_v45, %v3347_v4 }
0x4ab0   :  { %v3601_v2 = vadd.f32 %v4942_v33, %v3600_v55 }
0x4ab1   :  { %v3352_v54 = vsel %vm3351_vm6, %v4940_v45, %v3348_v53 }
0x4ab2   :  { %v3357_v7 = vsel %vm3354_vm15, %v3356_v61, %v3352_v54  ;;  %v3605_v5 = vsel %vm3604_vm4, %v4942_v33, %v3601_v2 }
0x4ab3   :  { %v3610_v20 = vsel %vm3607_vm5, %v3609_v18, %v3605_v5  ;;  %v3363_v19 = vmul.f32 %v3361_v21, %v3357_v7 }
0x4ab4   :  { %v3616_v25 = vmul.f32 %v3614_v35, %v3610_v20 }
0x4b09   :  { %v3366_v59 = vpop.permute.xlu0 %3365 }
0x4b0a   :  { %v3368_v60 = vmul.f32 %v3366_v59, %v3357_v7 }
0x4b0c   :  { %3370 = vrot.lane.b32.xlu2 %v3368_v60, %s5489_s30 }
0x4b11   :  { %v3619_v16 = vpop.permute.xlu1 %3618 }
0x4b12   :  { %v3621_v13 = vmul.f32 %v3619_v16, %v3610_v20 }
0x4b14   :  { %3623 = vrot.lane.b32.xlu0 %v3621_v13, %s5489_s30 }
0x4b66   :  { %v3371_v28 = vpop.permute.xlu2 %3370 }
0x4b67   :  { %v6525_v23 = vadd.f32 %v3371_v28, %v3363_v19 }
0x4b69   :  { %4943 = vtanh.f32 %v6525_v23 }
0x4b6f   :  { %v4944_v24 = vpop.eup %4943 }
0x4b70   :  { %3376 = vrot.lane.b32.xlu1 %v4944_v24, %s5488_s12 }
0x4b86   :  { %v3624_v44 = vpop.permute.xlu0 %3623 }
0x4b87   :  { %v3626_v27 = vadd.f32 %v3624_v44, %v3616_v25 }
0x4b89   :  { %4945 = vtanh.f32 %v3626_v27  ;;  %v3688_v53 = vrot.slane %v3626_v27, 2 }
0x4b8f   :  { %v4946_v39 = vpop.eup %4945 }
0x4b90   :  { %3629 = vrot.lane.b32.xlu2 %v4946_v39, %s5488_s12 }
0x4be2   :  { %v3377_v47 = vpop.permute.xlu1 %3376 }
0x4be3   :  { %v6531_v43 = vmul.f32 %v3377_v47, %v3357_v7 }
0x4be5   :  { %v3385_v29 = vrot.slane %v6531_v43, 4 }
0x4be7   :  { %3386 = vrot.lane.b32.xlu0 %v3385_v29, %s5489_s30 }
0x4bea   :  { %v3630_v36 = vpop.permute.xlu2 %3629 }
0x4beb   :  { %v6535_v9 = vmul.f32 %v3630_v36, %v3610_v20 }
0x4bed   :  { %v3638_v49 = vrot.slane %v6535_v9, 4 }
0x4bef   :  { %3639 = vrot.lane.b32.xlu1 %v3638_v49, %s5489_s30 }
0x4c59   :  { %v3387_v17 = vpop.permute.xlu0 %3386 }
0x4c5a   :  { %4508 = vmatmul.msk.f32.vlgmr.msra.gmra.mxu3 %vm408_vm7, %v3387_v17 }
0x4c5b   :  { %3873 = vmatpush.msra.mxu3 %v6451_v26 }
0x4c5d   :  { %3874 = vmatpush.msra.mxu3 %v6453_v46 }
0x4c5f   :  { %3875 = vmatpush.msra.mxu3 %v6457_v15 }
0x4c61   :  { %v3640_v34 = vpop.permute.xlu1 %3639  ;;  %3876 = vmatpush.msra.mxu3 %v6463_v0 }
0x4c62   :  { %4515 = vmatmul.msk.f32.vlgmr.msrb.gmra.mxu3 %vm408_vm7, %v3640_v34 }
0x4cdd   :  { %v6545_v8 = vpop.f32.mrf.mxu3 }
0x4ce5   :  { %v3660_v51 = vpop.f32.mrf.mxu3 }
0x4ce6   :  { %v3664_v37 = vrot.slane %v3660_v51, 6 }
0x4ce8   :  { %v3666_v30 = vadd.f32 %v3664_v37, %v6488_v10 }
0x4cea   :  { %4947 = vtanh.f32 %v3666_v30  ;;  %v4516_v26 = vmul.f32 -1.442695, %v3666_v30 }
0x4cec   :  { %4949 = vpow2.f32 %v4516_v26 }
0x4cf0   :  { %v4948_v52 = vpop.eup %4947 }
0x4cf1   :  { %3692 = vrot.lane.b32.xlu2 %v4948_v52, %s5488_s12 }
0x4cf2   :  { %v4950_v46 = vpop.eup %4949 }
0x4cf3   :  { %v3670_v11 = vadd.f32 1.0, %v4950_v46 }
0x4cf5   :  { %4951 = vrcp.f32 %v3670_v11  ;;  %v3682_v63 = vand.u32 2147483648, %v3670_v11  ;;  %vm3676_vm9 = vweird.f32 %v3670_v11  ;;  %v3680_v45 = vand.u32 2147483647, %v3670_v11 }
0x4cf7   :  { %v3683_v1 = vor.u32 1.1754944e-38, %v3682_v63  ;;  %vm3681_vm15 = vcmp.eq.f32.partialorder %v3680_v45, 8.507059e+37 }
0x4cfb   :  { %v4952_v15 = vpop.eup %4951 }
0x4cfc   :  { %v3672_v22 = vmul.f32 %v4952_v15, %v3670_v11  ;;  %vm3677_vm8 = vweird.f32 %v4952_v15 }
0x4cfd   :  { %vm3678_vm6 = vmor %vm3676_vm9, %vm3677_vm8 }
0x4cfe   :  { %v3673_v0 = vsub.f32 1.0, %v3672_v22 }
0x4d00   :  { %v3674_v48 = vmul.f32 %v4952_v15, %v3673_v0 }
0x4d02   :  { %v3675_v50 = vadd.f32 %v4952_v15, %v3674_v48 }
0x4d04   :  { %v3679_v42 = vsel %vm3678_vm6, %v4952_v15, %v3675_v50 }
0x4d05   :  { %v3684_v4 = vsel %vm3681_vm15, %v3683_v1, %v3679_v42 }
0x4d06   :  { %v3690_v32 = vmul.f32 %v3688_v53, %v3684_v4 }
0x4d4b   :  { %v3693_v33 = vpop.permute.xlu2 %3692 }
0x4d4c   :  { %v3695_v41 = vmul.f32 %v3693_v33, %v3684_v4 }
0x4d4e   :  { %3697 = vrot.lane.b32.xlu0 %v3695_v41, %s5489_s30 }
0x4dc0   :  { %v3698_v31 = vpop.permute.xlu0 %3697 }
0x4dc1   :  { %v3700_v12 = vadd.f32 %v3698_v31, %v3690_v32 }
0x4dc3   :  { %4953 = vtanh.f32 %v3700_v12  ;;  %v3759_v39 = vrot.slane %v3700_v12, 2 }
0x4dc9   :  { %v4954_v54 = vpop.eup %4953 }
0x4dca   :  { %3703 = vrot.lane.b32.xlu1 %v4954_v54, %s5488_s12 }
0x4e3c   :  { %v3704_v55 = vpop.permute.xlu1 %3703 }
0x4e3d   :  { %v6551_v61 = vmul.f32 %v3704_v55, %v3684_v4 }
0x4e3f   :  { %v3712_v59 = vrot.slane %v6551_v61, 2 }
0x4e41   :  { %3713 = vrot.lane.b32.xlu2 %v3712_v59, %s5489_s30 }
0x4e9b   :  { %v3714_v7 = vpop.permute.xlu2 %3713 }
0x4e9c   :  { %4517 = vmatmul.msk.f32.vlgmr.msrb.gmra.mxu0 %vm408_vm7, %v3714_v7 }
0x4f19   :  { %v3734_v60 = vpop.f32.mrf.mxu0 }
0x4f1a   :  { %v3737_v2 = vadd.f32 %v3734_v60, %v6488_v10 }
0x4f1c   :  { %4955 = vtanh.f32 %v3737_v2  ;;  %v4518_v14 = vmul.f32 -1.442695, %v3737_v2 }
0x4f1e   :  { %4957 = vpow2.f32 %v4518_v14 }
0x4f22   :  { %v4956_v3 = vpop.eup %4955 }
0x4f23   :  { %3763 = vrot.lane.b32.xlu0 %v4956_v3, %s5488_s12 }
0x4f24   :  { %v4958_v5 = vpop.eup %4957 }
0x4f25   :  { %v3741_v18 = vadd.f32 1.0, %v4958_v5 }
0x4f27   :  { %4959 = vrcp.f32 %v3741_v18  ;;  %v3753_v28 = vand.u32 2147483648, %v3741_v18  ;;  %vm3747_vm3 = vweird.f32 %v3741_v18  ;;  %v3751_v24 = vand.u32 2147483647, %v3741_v18 }
0x4f29   :  { %v3754_v35 = vor.u32 1.1754944e-38, %v3753_v28  ;;  %vm3752_vm5 = vcmp.eq.f32.partialorder %v3751_v24, 8.507059e+37 }
0x4f2d   :  { %v4960_v16 = vpop.eup %4959 }
0x4f2e   :  { %v3743_v20 = vmul.f32 %v4960_v16, %v3741_v18  ;;  %vm3748_vm2 = vweird.f32 %v4960_v16 }
0x4f2f   :  { %vm3749_vm4 = vmor %vm3747_vm3, %vm3748_vm2 }
0x4f30   :  { %v3744_v13 = vsub.f32 1.0, %v3743_v20 }
0x4f32   :  { %v3745_v21 = vmul.f32 %v4960_v16, %v3744_v13 }
0x4f34   :  { %v3746_v19 = vadd.f32 %v4960_v16, %v3745_v21 }
0x4f36   :  { %v3750_v10 = vsel %vm3749_vm4, %v4960_v16, %v3746_v19 }
0x4f37   :  { %v3755_v44 = vsel %vm3752_vm5, %v3754_v35, %v3750_v10 }
0x4f38   :  { %v3761_v47 = vmul.f32 %v3759_v39, %v3755_v44 }
0x4f95   :  { %v3764_v25 = vpop.permute.xlu0 %3763 }
0x4f96   :  { %v3766_v27 = vmul.f32 %v3764_v25, %v3755_v44 }
0x4f98   :  { %3768 = vrot.lane.b32.xlu1 %v3766_v27, %s5489_s30 }
0x500a   :  { %v3769_v29 = vpop.permute.xlu1 %3768 }
0x500b   :  { %v3771_v36 = vadd.f32 %v3769_v29, %v3761_v47 }
0x500d   :  { %4961 = vtanh.f32 %v3771_v36  ;;  %v3832_v32 = vrot.slane %v3771_v36, 2 }
0x5013   :  { %v4962_v49 = vpop.eup %4961 }
0x5014   :  { %3774 = vrot.lane.b32.xlu2 %v4962_v49, %s5488_s12 }
0x506e   :  { %v3775_v17 = vpop.permute.xlu2 %3774 }
0x506f   :  { %v6560_v34 = vmul.f32 %v3775_v17, %v3755_v44 }
0x5071   :  { %3783 = vrot.lane.b32.xlu0 %v6560_v34, %s5489_s30 }
0x50e3   :  { %v3784_v51 = vpop.permute.xlu0 %3783 }
0x50e4   :  { %4519 = vmatmul.msk.f32.vlgmr.msra.gmra.mxu2 %vm408_vm7, %v3784_v51 }
0x5167   :  { %v3804_v37 = vpop.f32.mrf.mxu2 }
0x5168   :  { %v3808_v30 = vrot.slane %v3804_v37, 2 }
0x516a   :  { %v3810_v52 = vadd.f32 %v3808_v30, %v6437_v57 }
0x516c   :  { %4963 = vtanh.f32 %v3810_v52  ;;  %v4520_v46 = vmul.f32 -1.442695, %v3810_v52 }
0x516e   :  { %4965 = vpow2.f32 %v4520_v46 }
0x5172   :  { %v4964_v26 = vpop.eup %4963 }
0x5173   :  { %3836 = vrot.lane.b32.xlu1 %v4964_v26, %s5488_s12 }
0x5174   :  { %v4966_v11 = vpop.eup %4965 }
0x5175   :  { %v3814_v15 = vadd.f32 1.0, %v4966_v11 }
0x5177   :  { %4967 = vrcp.f32 %v3814_v15  ;;  %v3826_v45 = vand.u32 2147483648, %v3814_v15  ;;  %vm3820_vm9 = vweird.f32 %v3814_v15  ;;  %v3824_v42 = vand.u32 2147483647, %v3814_v15 }
0x5179   :  { %v3827_v33 = vor.u32 1.1754944e-38, %v3826_v45  ;;  %vm3825_vm15 = vcmp.eq.f32.partialorder %v3824_v42, 8.507059e+37 }
0x517d   :  { %v4968_v22 = vpop.eup %4967 }
0x517e   :  { %v3816_v0 = vmul.f32 %v4968_v22, %v3814_v15  ;;  %vm3821_vm8 = vweird.f32 %v4968_v22 }
0x517f   :  { %vm3822_vm6 = vmor %vm3820_vm9, %vm3821_vm8 }
0x5180   :  { %v3817_v48 = vsub.f32 1.0, %v3816_v0 }
0x5182   :  { %v3818_v50 = vmul.f32 %v4968_v22, %v3817_v48 }
0x5184   :  { %v3819_v63 = vadd.f32 %v4968_v22, %v3818_v50 }
0x5186   :  { %v3823_v1 = vsel %vm3822_vm6, %v4968_v22, %v3819_v63 }
0x5187   :  { %v3828_v41 = vsel %vm3825_vm15, %v3827_v33, %v3823_v1 }
0x5188   :  { %v3834_v31 = vmul.f32 %v3832_v32, %v3828_v41 }
0x51e5   :  { %v3837_v4 = vpop.permute.xlu1 %3836 }
0x51e6   :  { %v3839_v53 = vmul.f32 %v3837_v4, %v3828_v41 }
0x51e8   :  { %3841 = vrot.lane.b32.xlu2 %v3839_v53, %s5489_s30 }
0x5242   :  { %v3842_v12 = vpop.permute.xlu2 %3841 }
0x5243   :  { %v3844_v54 = vadd.f32 %v3842_v12, %v3834_v31 }
0x5245   :  { %4969 = vtanh.f32 %v3844_v54  ;;  %v3906_v36 = vrot.slane %v3844_v54, 2 }
0x524b   :  { %v4970_v55 = vpop.eup %4969 }
0x524c   :  { %3847 = vrot.lane.b32.xlu0 %v4970_v55, %s5488_s12 }
0x52be   :  { %v3848_v59 = vpop.permute.xlu0 %3847 }
0x52bf   :  { %v6569_v7 = vmul.f32 %v3848_v59, %v3828_v41 }
0x52c1   :  { %v3856_v60 = vrot.slane %v6569_v7, 6 }
0x52c3   :  { %3857 = vrot.lane.b32.xlu1 %v3856_v60, %s5489_s30 }
0x5335   :  { %v3858_v2 = vpop.permute.xlu1 %3857 }
0x5336   :  { %4521 = vmatmul.msk.f32.vlgmr.msra.gmra.mxu3 %vm408_vm7, %v3858_v2 }
0x53b9   :  { %v3878_v3 = vpop.f32.mrf.mxu3 }
0x53ba   :  { %v3882_v14 = vrot.slane %v3878_v3, 4 }
0x53bc   :  { %v3884_v5 = vadd.f32 %v3882_v14, %v6437_v57  ;;  %v3411_v14 = vrot.slane %v6545_v8, 2 }
0x53be   :  { %4971 = vtanh.f32 %v3884_v5  ;;  %v4522_v16 = vmul.f32 -1.442695, %v3884_v5  ;;  %v3413_v5 = vadd.f32 %v3411_v14, %v6440_v58 }
0x53c0   :  { %4973 = vpow2.f32 %v4522_v16  ;;  %v4509_v8 = vmul.f32 -1.442695, %v3413_v5 }
0x53c4   :  { %v4972_v18 = vpop.eup %4971 }
0x53c5   :  { %3910 = vrot.lane.b32.xlu2 %v4972_v18, %s5488_s12 }
0x53c6   :  { %v4974_v20 = vpop.eup %4973 }
0x53c7   :  { %v3888_v13 = vadd.f32 1.0, %v4974_v20 }
0x53c9   :  { %4975 = vrcp.f32 %v3888_v13  ;;  %v3900_v35 = vand.u32 2147483648, %v3888_v13  ;;  %vm3894_vm3 = vweird.f32 %v3888_v13  ;;  %v3898_v25 = vand.u32 2147483647, %v3888_v13 }
0x53cb   :  { %v3901_v27 = vor.u32 1.1754944e-38, %v3900_v35  ;;  %vm3899_vm5 = vcmp.eq.f32.partialorder %v3898_v25, 8.507059e+37 }
0x53cf   :  { %v4976_v21 = vpop.eup %4975 }
0x53d0   :  { %v3890_v19 = vmul.f32 %v4976_v21, %v3888_v13  ;;  %vm3895_vm2 = vweird.f32 %v4976_v21 }
0x53d1   :  { %vm3896_vm4 = vmor %vm3894_vm3, %vm3895_vm2 }
0x53d2   :  { %v3891_v28 = vsub.f32 1.0, %v3890_v19 }
0x53d4   :  { %v3892_v24 = vmul.f32 %v4976_v21, %v3891_v28 }
0x53d6   :  { %v3893_v10 = vadd.f32 %v4976_v21, %v3892_v24 }
0x53d8   :  { %v3897_v44 = vsel %vm3896_vm4, %v4976_v21, %v3893_v10 }
0x53d9   :  { %v3902_v47 = vsel %vm3899_vm5, %v3901_v27, %v3897_v44 }
0x53da   :  { %v3908_v49 = vmul.f32 %v3906_v36, %v3902_v47 }
0x541f   :  { %v3911_v39 = vpop.permute.xlu2 %3910 }
0x5420   :  { %v3913_v29 = vmul.f32 %v3911_v39, %v3902_v47 }
0x5422   :  { %3915 = vrot.lane.b32.xlu0 %v3913_v29, %s5489_s30 }
0x5494   :  { %v3916_v17 = vpop.permute.xlu0 %3915 }
0x5495   :  { %v3918_v51 = vadd.f32 %v3916_v17, %v3908_v49 }
0x5497   :  { %4977 = vtanh.f32 %v3918_v51  ;;  %v3980_v59 = vrot.slane %v3918_v51, 2 }
0x549d   :  { %v4978_v37 = vpop.eup %4977 }
0x549e   :  { %3921 = vrot.lane.b32.xlu1 %v4978_v37, %s5488_s12 }
0x5510   :  { %v3922_v30 = vpop.permute.xlu1 %3921 }
0x5511   :  { %v6578_v52 = vmul.f32 %v3922_v30, %v3902_v47 }
0x5513   :  { %v3930_v26 = vrot.slane %v6578_v52, 4 }
0x5515   :  { %3931 = vrot.lane.b32.xlu2 %v3930_v26, %s5489_s30 }
0x556f   :  { %v3932_v46 = vpop.permute.xlu2 %3931 }
0x5570   :  { %4523 = vmatmul.msk.f32.vlgmr.msra.gmra.mxu0 %vm408_vm7, %v3932_v46 }
0x55ed   :  { %v3952_v11 = vpop.f32.mrf.mxu0 }
0x55ee   :  { %v3956_v15 = vrot.slane %v3952_v11, 6 }
0x55f0   :  { %v3958_v22 = vadd.f32 %v3956_v15, %v6437_v57 }
0x55f2   :  { %4979 = vtanh.f32 %v3958_v22  ;;  %v4524_v48 = vmul.f32 -1.442695, %v3958_v22 }
0x55f4   :  { %4981 = vpow2.f32 %v4524_v48 }
0x55f8   :  { %v4980_v0 = vpop.eup %4979 }
0x55f9   :  { %3984 = vrot.lane.b32.xlu0 %v4980_v0, %s5488_s12 }
0x55fa   :  { %v4982_v50 = vpop.eup %4981 }
0x55fb   :  { %v3962_v63 = vadd.f32 1.0, %v4982_v50 }
0x55fd   :  { %4983 = vrcp.f32 %v3962_v63  ;;  %v3974_v41 = vand.u32 2147483648, %v3962_v63  ;;  %vm3968_vm9 = vweird.f32 %v3962_v63  ;;  %v3972_v53 = vand.u32 2147483647, %v3962_v63 }
0x55ff   :  { %v3975_v31 = vor.u32 1.1754944e-38, %v3974_v41  ;;  %vm3973_vm15 = vcmp.eq.f32.partialorder %v3972_v53, 8.507059e+37 }
0x5603   :  { %v4984_v45 = vpop.eup %4983 }
0x5604   :  { %v3964_v42 = vmul.f32 %v4984_v45, %v3962_v63  ;;  %vm3969_vm8 = vweird.f32 %v4984_v45 }
0x5605   :  { %vm3970_vm6 = vmor %vm3968_vm9, %vm3969_vm8 }
0x5606   :  { %v3965_v1 = vsub.f32 1.0, %v3964_v42 }
0x5608   :  { %v3966_v33 = vmul.f32 %v4984_v45, %v3965_v1 }
0x560a   :  { %v3967_v4 = vadd.f32 %v4984_v45, %v3966_v33  ;;  %v3435_v33 = vrot.slane %v6525_v23, 6 }
0x560c   :  { %v3971_v32 = vsel %vm3970_vm6, %v4984_v45, %v3967_v4 }
0x560d   :  { %v3976_v54 = vsel %vm3973_vm15, %v3975_v31, %v3971_v32 }
0x560e   :  { %v3982_v60 = vmul.f32 %v3980_v59, %v3976_v54 }
0x566b   :  { %v3985_v12 = vpop.permute.xlu0 %3984 }
0x566c   :  { %v3987_v55 = vmul.f32 %v3985_v12, %v3976_v54 }
0x566e   :  { %3989 = vrot.lane.b32.xlu1 %v3987_v55, %s5489_s30 }
0x56e0   :  { %v3990_v2 = vpop.permute.xlu1 %3989 }
0x56e1   :  { %v6586_v3 = vadd.f32 %v3990_v2, %v3982_v60 }
0x56e3   :  { %4985 = vtanh.f32 %v6586_v3  ;;  %v4051_v23 = vrot.slane %v6586_v3, 2 }
0x56e4   :  { %4987 = vtanh.f32 %v3413_v5 }
0x56e5   :  { %4989 = vpow2.f32 %v4509_v8  ;;  %v4079_v8 = vld [vmem:[#allocation25 + $0x10] sm:$0xff] }
0x56e9   :  { %v4986_v18 = vpop.eup %4985 }
0x56ea   :  { %3995 = vrot.lane.b32.xlu2 %v4986_v18, %s5488_s12  ;;  %v4988_v16 = vpop.eup %4987  ;;  %v4083_v18 = vld [vmem:[#allocation25 + $0x30] sm:$0xff] }
0x56eb   :  { %v4990_v58 = vpop.eup %4989 }
0x56ec   :  { %v3417_v28 = vadd.f32 1.0, %v4990_v58  ;;  %v4078_v58 = vld [vmem:[#allocation25 + $0x8] sm:$0xff] }
0x56ee   :  { %4991 = vrcp.f32 %v3417_v28  ;;  %v3429_v29 = vand.u32 2147483648, %v3417_v28  ;;  %vm3423_vm3 = vweird.f32 %v3417_v28  ;;  %v3427_v36 = vand.u32 2147483647, %v3417_v28 }
0x56f0   :  { %v3430_v17 = vor.u32 1.1754944e-38, %v3429_v29  ;;  %vm3428_vm5 = vcmp.eq.f32.partialorder %v3427_v36, 8.507059e+37 }
0x56f2   :  { %3439 = vrot.lane.b32.xlu2 %v4988_v16, %s5488_s12  ;;  %v4081_v16 = vld [vmem:[#allocation25 + $0x20] sm:$0xff] }
0x56f4   :  { %v4992_v24 = vpop.eup %4991 }
0x56f5   :  { %v3419_v10 = vmul.f32 %v4992_v24, %v3417_v28  ;;  %vm3424_vm2 = vweird.f32 %v4992_v24  ;;  %v4077_v28 = vld [vmem:[#allocation25] sm:$0xff] }
0x56f6   :  { %vm3425_vm4 = vmor %vm3423_vm3, %vm3424_vm2  ;;  %vm4154_vm2 = vcmask 31774   ;;  %vm4160_vm3 = vcmask 33824  }
0x56f7   :  { %v3420_v35 = vsub.f32 1.0, %v3419_v10 }
0x56f9   :  { %v3421_v27 = vmul.f32 %v4992_v24, %v3420_v35 }
0x56fb   :  { %v3422_v39 = vadd.f32 %v4992_v24, %v3421_v27 }
0x56fd   :  { %v3426_v49 = vsel %vm3425_vm4, %v4992_v24, %v3422_v39  ;;  %vm4165_vm4 = vcmask 44074  }
0x56fe   :  { %v3431_v37 = vsel %vm3428_vm5, %v3430_v17, %v3426_v49  ;;  %vm4170_vm5 = vcmask 54324  }
0x56ff   :  { %v3437_v4 = vmul.f32 %v3435_v33, %v3431_v37 }
0x5744   :  { %v3996_v20 = vpop.permute.xlu2 %3995 }
0x5745   :  { %v6593_v13 = vmul.f32 %v3996_v20, %v3976_v54 }
0x5747   :  { %v4004_v21 = vrot.slane %v6593_v13, 2 }
0x5749   :  { %4005 = vrot.lane.b32.xlu0 %v4004_v21, %s5489_s30 }
0x574c   :  { %v3440_v51 = vpop.permute.xlu2 %3439 }
0x574d   :  { %v3442_v30 = vmul.f32 %v3440_v51, %v3431_v37 }
0x57bb   :  { %v4006_v19 = vpop.permute.xlu0 %4005 }
0x57bc   :  { %4525 = vmatmul.msk.f32.vlgmr.msra.gmra.mxu1 %vm408_vm7, %v4006_v19 }
0x5839   :  { %v4026_v25 = vpop.f32.mrf.mxu1 }
0x583a   :  { %v4029_v44 = vadd.f32 %v4026_v25, %v6437_v57 }
0x583c   :  { %4993 = vtanh.f32 %v4029_v44  ;;  %v4526_v57 = vmul.f32 -1.442695, %v4029_v44  ;;  %v4613_v44 = vld [vmem:[#allocation27] ss:$0 sm:$0xff] }
0x583e   :  { %4995 = vpow2.f32 %v4526_v57 }
0x5842   :  { %v4994_v47 = vpop.eup %4993 }
0x5843   :  { %4055 = vrot.lane.b32.xlu1 %v4994_v47, %s5488_s12  ;;  %v4614_v47 = vld [vmem:[#allocation28] ss:$0 sm:$0xff] }
0x5844   :  { %v4996_v26 = vpop.eup %4995 }
0x5845   :  { %v4033_v46 = vadd.f32 1.0, %v4996_v26  ;;  %v4615_v26 = vld [vmem:[#allocation5] ss:$0 sm:$0xff] }
0x5847   :  { %4997 = vrcp.f32 %v4033_v46  ;;  %v4045_v50 = vand.u32 2147483648, %v4033_v46  ;;  %vm4039_vm9 = vweird.f32 %v4033_v46  ;;  %v4043_v63 = vand.u32 2147483647, %v4033_v46 }
0x5849   :  { %vm4044_vm15 = vcmp.eq.f32.partialorder %v4043_v63, 8.507059e+37 }
0x584b   :  { %3444 = vrot.lane.b32.xlu1 %v3442_v30, %s5489_s30 }
0x584d   :  { %v4998_v11 = vpop.eup %4997 }
0x584e   :  { %v4035_v15 = vmul.f32 %v4998_v11, %v4033_v46  ;;  %vm4040_vm8 = vweird.f32 %v4998_v11 }
0x584f   :  { %vm4041_vm6 = vmor %vm4039_vm9, %vm4040_vm8  ;;  %vm4175_vm8 = vcmask 64574   ;;  %vm4178_vm9 = vcmask 58368  }
0x5850   :  { %v4036_v22 = vsub.f32 1.0, %v4035_v15 }
0x5852   :  { %v4037_v0 = vmul.f32 %v4998_v11, %v4036_v22 }
0x5853   :  { %3017 = vrot.lane.b32.xlu1 %v6373_v38, %s5489_s30  ;;  %v4046_v38 = vor.u32 1.1754944e-38, %v4045_v50 }
0x5854   :  { %v4038_v48 = vadd.f32 %v4998_v11, %v4037_v0 }
0x5856   :  { %v4042_v45 = vsel %vm4041_vm6, %v4998_v11, %v4038_v48 }
0x585b   :  { %3852 = vrot.lane.b32.xlu1 %v6569_v7, %s5488_s12  ;;  %v4047_v7 = vsel %vm4044_vm15, %v4046_v38, %v4042_v45 }
0x585c   :  { %v4053_v12 = vmul.f32 %v4051_v23, %v4047_v7  ;;  %v5498_v23 = vmov 1  }
0x585d   :  { %4600 = vset.pattern.permute.xlu0 %v5498_v23 }
0x58b5   :  { %v4056_v42 = vpop.permute.xlu1 %4055 }
0x58b6   :  { %v4058_v1 = vmul.f32 %v4056_v42, %v4047_v7 }
0x58b8   :  { %4060 = vrot.lane.b32.xlu0 %v4058_v1, %s5489_s30 }
0x58bd   :  { %v3445_v41 = vpop.permute.xlu1 %3444 }
0x58be   :  { %v3447_v53 = vadd.f32 %v3445_v41, %v3437_v4 }
0x58c0   :  { %4999 = vtanh.f32 %v3447_v53 }
0x58c5   :  { %v3018_v32 = vpop.permute.xlu1 %3017 }
0x58c6   :  { %v5000_v31 = vpop.eup %4999  ;;  %3020 = vst.msk [vmem:[#allocation4] sm:$0xc] %vm546_vm10, %v3018_v32 }
0x58c7   :  { %3450 = vrot.lane.b32.xlu0 %v5000_v31, %s5488_s12  ;;  %v5497_v31 = vmov 5  }
0x58c8   :  { %4604 = vset.pattern.permute.xlu2 %v5497_v31 }
0x58cd   :  { %v3853_v2 = vpop.permute.xlu1 %3852 }
0x58cf   :  { %3165 = vrot.lane.b32.xlu0 %v6421_v56, %s5489_s30 }
0x58d7   :  { %4000 = vrot.lane.b32.xlu0 %v6593_v13, %s5488_s12 }
0x58df   :  { %3381 = vrot.lane.b32.xlu0 %v6531_v43, %s5489_s30 }
0x58e7   :  { %3634 = vrot.lane.b32.xlu0 %v6535_v9, %s5488_s12 }
0x592a   :  { %v4061_v54 = vpop.permute.xlu0 %4060 }
0x592b   :  { %v4063_v55 = vadd.f32 %v4061_v54, %v4053_v12  ;;  %v5499_v12 = vmov 0  }
0x592c   :  { %4599 = vset.pattern.permute.xlu1 %v5499_v12 }
0x592d   :  { %5001 = vtanh.f32 %v4063_v55 }
0x5933   :  { %v5002_v59 = vpop.eup %5001 }
0x5934   :  { %4066 = vrot.lane.b32.xlu2 %v5002_v59, %s5488_s12 }
0x5939   :  { %v3451_v60 = vpop.permute.xlu0 %3450 }
0x593a   :  { %v3453_v56 = vmul.f32 %v3451_v60, %v3431_v37 }
0x593c   :  { %3091 = vrot.lane.b32.xlu2 %v6388_v6, %s5489_s30  ;;  %3455 = vrot.lane.b32.xlu1 %v3453_v56, %s5489_s30 }
0x5941   :  { %v3166_v43 = vpop.permute.xlu0 %3165 }
0x5942   :  { %3168 = vst.msk [vmem:[#allocation4] sm:$0xc0] %vm696_vm1, %v3166_v43 }
0x5943   :  { %3855 = vst.msk [vmem:[#allocation4] sm:$0xc0] %vm1088_vm12, %v3853_v2 }
0x5944   :  { %3926 = vrot.lane.b32.xlu2 %v6578_v52, %s5488_s12 }
0x5949   :  { %v4001_v9 = vpop.permute.xlu0 %4000 }
0x594a   :  { %4003 = vst.msk [vmem:[#allocation4] sm:$0xc] %vm1238_vm13, %v4001_v9 }
0x594c   :  { %3307 = vrot.lane.b32.xlu2 %v6504_v40, %s5489_s30  ;;  %v4084_v40 = vld [vmem:[#allocation25 + $0x38] sm:$0xff] }
0x594d   :  { %4103 = vmatpush.msrb.mxu2 %v4084_v40  ;;  %v5501_v40 = vmov 2  }
0x594f   :  { %4104 = vmatpush.msrb.mxu2 %v4083_v18  ;;  %v5502_v18 = vmov 7  }
0x5951   :  { %v3382_v3 = vpop.permute.xlu0 %3381 }
0x5952   :  { %3384 = vst.msk [vmem:[#allocation4 + $0x8] sm:$0x30] %vm621_vm11, %v3382_v3 }
0x5954   :  { %3560 = vrot.lane.b32.xlu2 %v6508_v62, %s5488_s12  ;;  %v4082_v62 = vld [vmem:[#allocation25 + $0x28] sm:$0xff] }
0x5955   :  { %4105 = vmatpush.msrb.mxu2 %v4082_v62  ;;  %v5503_v62 = vmov 4  }
0x5957   :  { %4106 = vmatpush.msrb.mxu2 %v4081_v16  ;;  %v5504_v16 = vmov 6  }
0x5959   :  { %v3635_v6 = vpop.permute.xlu0 %3634 }
0x595a   :  { %3637 = vst.msk [vmem:[#allocation4 + $0x8] sm:$0x30] %vm1163_vm0, %v3635_v6 }
0x595c   :  { %3779 = vrot.lane.b32.xlu2 %v6560_v34, %s5488_s12 }
0x598e   :  { %v4067_v14 = vpop.permute.xlu2 %4066 }
0x598f   :  { %v4069_v52 = vmul.f32 %v4067_v14, %v4047_v7 }
0x5991   :  { %4071 = vrot.lane.b32.xlu1 %v4069_v52, %s5488_s12 }
0x5996   :  { %v3092_v5 = vpop.permute.xlu2 %3091 }
0x5997   :  { %3094 = vst.msk [vmem:[#allocation4] sm:$0x30] %vm621_vm11, %v3092_v5  ;;  %v5500_v5 = vmov 3  }
0x5999   :  { %3708 = vrot.lane.b32.xlu1 %v6551_v61, %s5488_s12  ;;  %v4080_v61 = vld [vmem:[#allocation25 + $0x18] sm:$0xff] }
0x599a   :  { %4107 = vmatpush.msrb.mxu2 %v4080_v61  ;;  %v4267_v61 = vld [vmem:[%s6732_s26 + $0x10] sm:$0xff] }
0x599c   :  { %4108 = vmatpush.msrb.mxu2 %v4079_v8  ;;  %v4266_v8 = vld [vmem:[%s6732_s26 + $0x8] sm:$0xff] }
0x599e   :  { %v3927_v20 = vpop.permute.xlu2 %3926  ;;  %4109 = vmatpush.msrb.mxu2 %v4078_v58 }
0x599f   :  { %3929 = vst.msk [vmem:[#allocation4] sm:$0x30] %vm1163_vm0, %v3927_v20  ;;  %v4272_v20 = vld [vmem:[%s6732_s26 + $0x38] sm:$0xff] }
0x59a0   :  { %4110 = vmatpush.msrb.mxu2 %v4077_v28  ;;  %4288 = vmatpush.msrb.mxu3 %v4272_v20  ;;  %v4265_v28 = vld [vmem:[%s6732_s26] sm:$0xff] }
0x59a6   :  { %v3308_v34 = vpop.permute.xlu2 %3307 }
0x59a7   :  { %3310 = vst.msk [vmem:[#allocation4 + $0x8] sm:$0xc] %vm546_vm10, %v3308_v34  ;;  %vm6728_vm10 = vcmask 523264   ;;  %v4271_v34 = vld [vmem:[%s6732_s26 + $0x30] sm:$0xff] }
0x59a8   :  { %vm6729_vm11 = vmmov %vm6728_vm10  ;;  %4289 = vmatpush.msrb.mxu3 %v4271_v34 }
0x59a9   :  { %vm6730_vm0 = vmmov %vm6728_vm10 }
0x59ae   :  { %v3456_v13 = vpop.permute.xlu1 %3455  ;;  %v3561_v21 = vpop.permute.xlu2 %3560 }
0x59af   :  { %3458 = vst.msk [vmem:[#allocation4 + $0x8] sm:$0xc0] %vm696_vm1, %v3456_v13  ;;  %vm6731_vm1 = vmmov %vm6730_vm0  ;;  %v4270_v13 = vld [vmem:[%s6732_s26 + $0x28] sm:$0xff] }
0x59b0   :  { %3563 = vst.msk [vmem:[#allocation4 + $0x8] sm:$0xc0] %vm1088_vm12, %v3561_v21  ;;  %vm4138_vm12 = vcmask 1024   ;;  %v4269_v21 = vld [vmem:[%s6732_s26 + $0x20] sm:$0xff]  ;;  %4290 = vmatpush.msrb.mxu3 %v4270_v13 }
0x59b2   :  { %4291 = vmatpush.msrb.mxu3 %v4269_v21 }
0x59b6   :  { %v3780_v19 = vpop.permute.xlu2 %3779 }
0x59b7   :  { %3782 = vst.msk [vmem:[#allocation4 + $0x8] sm:$0x3] %vm1310_vm14, %v3780_v19  ;;  %v4268_v19 = vld [vmem:[%s6732_s26 + $0x18] sm:$0xff] }
0x59b8   :  { %4292 = vmatpush.msrb.mxu3 %v4268_v19 }
0x59ba   :  { %4293 = vmatpush.msrb.mxu3 %v4267_v61 }
0x59bc   :  { %4294 = vmatpush.msrb.mxu3 %v4266_v8 }
0x59be   :  { %4295 = vmatpush.msrb.mxu3 %v4265_v28 }
0x5a03   :  { %v4072_v24 = vpop.permute.xlu1 %4071 }
0x5a04   :  { %4074 = vst.msk [vmem:[#allocation4] sm:$0x3] %vm1310_vm14, %v4072_v24  ;;  %vm4149_vm14 = vcmask 21524   ;;  %v4304_v24 = vld [vmem:[%s6733_s1 + $0x18] sm:$0xff] }
0x5a05   :  { %4324 = vmatpush.msrb.mxu0 %v4304_v24 }
0x5a0b   :  { %v3709_v10 = vpop.permute.xlu1 %3708  ;;  %v6645_v35 = vld [vmem:[#allocation4] sm:$0xff] }
0x5a0c   :  { %3711 = vst.msk [vmem:[#allocation4 + $0x8] sm:$0xc] %vm1238_vm13, %v3709_v10  ;;  %4527 = vmatmul.msk.f32.vlgmr.msrb.gmra.mxu2 %vm6728_vm10, %v6645_v35  ;;  %vm4144_vm13 = vcmask 11274   ;;  %v4303_v10 = vld [vmem:[%s6733_s1 + $0x10] sm:$0xff] }
0x5a0d   :  { %4325 = vmatpush.msrb.mxu0 %v4303_v10 }
0x5a13   :  { %v6650_v25 = vld [vmem:[#allocation4 + $0x8] sm:$0xff] }
0x5a14   :  { %4528 = vmatmul.msk.f32.gmra.mxu2 %vm6729_vm11, %v6650_v25 }
0x5a8f   :  { %v4112_v27 = vpop.f32.mrf.mxu2 }
0x5a90   :  { %v4113_v39 = vadd.f32 %v4613_v44, %v4112_v27 }
0x5a92   :  { %5003 = vtanh.f32 %v4113_v39  ;;  %v4215_v39 = vrot.slane %v6645_v35, 2 }
0x5a97   :  { %v4115_v29 = vpop.f32.mrf.mxu2 }
0x5a98   :  { %v5004_v36 = vpop.eup %5003  ;;  %v4116_v49 = vadd.f32 %v4613_v44, %v4115_v29 }
0x5a99   :  { %v4124_v17 = vmul.f32 %v5004_v36, %v4614_v47  ;;  %v4223_v36 = vrot.slane %v6645_v35, 4 }
0x5a9a   :  { %5005 = vtanh.f32 %v4116_v49 }
0x5a9b   :  { %v4126_v51 = vsel %vm6730_vm0, %v4124_v17, 0.0 }
0x5a9c   :  { %4127 = vadd.xlane.f32.xlu0 %v4126_v51 }
0x5aa0   :  { %v5006_v37 = vpop.eup %5005 }
0x5aa1   :  { %v4125_v30 = vmul.f32 %v5006_v37, %v4614_v47  ;;  %v4231_v37 = vrot.slane %v6645_v35, 6 }
0x5aa3   :  { %v4129_v57 = vsel %vm6731_vm1, %v4125_v30, 0.0  ;;  %vm4339_vm1 = vcmask 130048  }
0x5aa4   :  { %4130 = vadd.xlane.f32.xlu1 %v4129_v57 }
0x5b0f   :  { %v4128_v46 = vpop.xlane.xlu0 %4127 }
0x5b10   :  { %v4136_v11 = vadd.f32 %v4615_v26, %v4128_v46 }
0x5b12   :  { %4141 = vrot.lane.b32.xlu2 %v4136_v11, %s5490_s20  ;;  %4139 = vst.msk [vmem:[#allocation33] sm:$0x3] %vm4138_vm12, %v4136_v11 }
0x5b17   :  { %v4131_v15 = vpop.xlane.xlu1 %4130 }
0x5b18   :  { %v4137_v22 = vadd.f32 %v4615_v26, %v4131_v15 }
0x5b1a   :  { %4172 = vrot.lane.b32.xlu0 %v4137_v22, %s5491_s22  ;;  %4146 = vrot.lane.b32.xlu2 %v4136_v11, %s5492_s28 }
0x5b22   :  { %4151 = vrot.lane.b32.xlu2 %v4136_v11, %s5493_s24 }
0x5b2a   :  { %4157 = vrot.lane.b32.xlu2 %v4137_v22, %s5494_s2 }
0x5b32   :  { %4162 = vrot.lane.b32.xlu2 %v4137_v22, %s5495_s4 }
0x5b3a   :  { %4167 = vrot.lane.b32.xlu2 %v4137_v22, %s5496_s21  ;;  %v4245_v22 = vrot.slane %v6650_v25, 2 }
0x5b6c   :  { %v4142_v0 = vpop.permute.xlu2 %4141 }
0x5b6d   :  { %4145 = vst.msk [vmem:[#allocation33 - $0x2] sm:$0xc] %vm4144_vm13, %v4142_v0 }
0x5b74   :  { %v4147_v48 = vpop.permute.xlu2 %4146 }
0x5b75   :  { %4150 = vst.msk [vmem:[#allocation33 - $0x4] sm:$0x30] %vm4149_vm14, %v4147_v48 }
0x5b7c   :  { %v4152_v50 = vpop.permute.xlu2 %4151 }
0x5b7d   :  { %4155 = vst.msk [vmem:[#allocation33 - $0x6] sm:$0xc0] %vm4154_vm2, %v4152_v50  ;;  %v4253_v50 = vrot.slane %v6650_v25, 4 }
0x5b84   :  { %v4158_v63 = vpop.permute.xlu2 %4157 }
0x5b85   :  { %4161 = vst.msk [vmem:[#allocation33] sm:$0x3] %vm4160_vm3, %v4158_v63 }
0x5b8c   :  { %v4163_v45 = vpop.permute.xlu2 %4162  ;;  %v4173_v42 = vpop.permute.xlu0 %4172 }
0x5b8d   :  { %4166 = vst.msk [vmem:[#allocation33 - $0x2] sm:$0xc] %vm4165_vm4, %v4163_v45 }
0x5b94   :  { %v4168_v38 = vpop.permute.xlu2 %4167 }
0x5b95   :  { %4171 = vst.msk [vmem:[#allocation33 - $0x4] sm:$0x30] %vm4170_vm5, %v4168_v38 }
0x5b96   :  { %4176 = vst.msk [vmem:[#allocation33 - $0x6] sm:$0xc0] %vm4175_vm8, %v4173_v42 }
0x5b9d   :  { %v4177_v7 = vld [vmem:[#allocation33] sm:$0x3] }
0x5b9e   :  { %v4179_v1 = vsel %vm4178_vm9, %v4177_v7, -inf }
0x5b9f   :  { %4180 = vmax.xlane.f32.xlu1 %v4179_v1 }
0x5c12   :  { %v4181_v33 = vpop.xlane.xlu1 %4180 }
0x5c13   :  { %v4182_v4 = vsub.f32 %v4177_v7, %v4181_v33 }
0x5c15   :  { %v4183_v41 = vmul.f32 1.442695, %v4182_v4  ;;  %v4302_v4 = vld [vmem:[%s6733_s1 + $0x8] sm:$0xff] }
0x5c16   :  { %4326 = vmatpush.msrb.mxu0 %v4302_v4 }
0x5c17   :  { %5007 = vpow2.f32 %v4183_v41  ;;  %v4301_v41 = vld [vmem:[%s6733_s1] sm:$0xff] }
0x5c18   :  { %4327 = vmatpush.msrb.mxu0 %v4301_v41 }
0x5c1d   :  { %v5008_v53 = vpop.eup %5007 }
0x5c1e   :  { %v4185_v32 = vsel %vm4178_vm9, %v5008_v53, 0.0 }
0x5c1f   :  { %4186 = vadd.xlane.f32.xlu2 %v4185_v32  ;;  %v4616_v32 = vld [vmem:[#allocation30] ss:$0 sm:$0xff] }
0x5c92   :  { %v4187_v54 = vpop.xlane.xlu2 %4186 }
0x5c93   :  { %5009 = vrcp.f32 %v4187_v54  ;;  %v4199_v56 = vand.u32 2147483648, %v4187_v54  ;;  %v4197_v2 = vand.u32 2147483647, %v4187_v54  ;;  %vm4193_vm15 = vweird.f32 %v4187_v54 }
0x5c95   :  { %v4200_v3 = vor.u32 1.1754944e-38, %v4199_v56  ;;  %vm4198_vm11 = vcmp.eq.f32.partialorder %v4197_v2, 8.507059e+37 }
0x5c99   :  { %v5010_v55 = vpop.eup %5009 }
0x5c9a   :  { %v4189_v59 = vmul.f32 %v5010_v55, %v4187_v54  ;;  %vm4194_vm6 = vweird.f32 %v5010_v55  ;;  %v4617_v54 = vld [vmem:[#allocation31] ss:$0 sm:$0xff] }
0x5c9b   :  { %vm4195_vm10 = vmor %vm4193_vm15, %vm4194_vm6 }
0x5c9c   :  { %v4190_v60 = vsub.f32 1.0, %v4189_v59 }
0x5c9e   :  { %v4191_v43 = vmul.f32 %v5010_v55, %v4190_v60 }
0x5ca0   :  { %v4192_v9 = vadd.f32 %v5010_v55, %v4191_v43 }
0x5ca2   :  { %v4196_v6 = vsel %vm4195_vm10, %v5010_v55, %v4192_v9 }
0x5ca3   :  { %v4201_v14 = vsel %vm4198_vm11, %v4200_v3, %v4196_v6 }
0x5ca4   :  { %v4202_v52 = vmul.f32 %v5008_v53, %v4201_v14  ;;  %v4334_v53 = vld [vmem:[%s5647_s29 + $0x8] sm:$0xff] }
0x5ca5   :  { %4357 = vmatpush.msrb.mxu1 %v4334_v53 }
0x5ca6   :  { %4203 = vst.msk [vmem:[#allocation33] sm:$0x3] %vm4178_vm9, %v4202_v52  ;;  %4242 = vperm.xlu2 %4604, %v4202_v52   ;;  %4212 = vperm.xlu0 %4600, %v4202_v52  }
0x5ca7   :  { %4206 = vperm.xlu1 %4599, %v4202_v52  }
0x5cae   :  { %4602 = vset.pattern.permute.xlu0 %v5500_v5 }
0x5caf   :  { %4601 = vset.pattern.permute.xlu1 %v5501_v40  ;;  %4228 = vperm.xlu0 %4602, %v4202_v52  }
0x5cb0   :  { %4220 = vperm.xlu1 %4601, %v4202_v52  }
0x5cb7   :  { %4606 = vset.pattern.permute.xlu0 %v5502_v18 }
0x5cb8   :  { %4603 = vset.pattern.permute.xlu1 %v5503_v62  ;;  %4258 = vperm.xlu0 %4606, %v4202_v52  }
0x5cb9   :  { %4236 = vperm.xlu1 %4603, %v4202_v52  }
0x5cc1   :  { %4605 = vset.pattern.permute.xlu1 %v5504_v16 }
0x5cc2   :  { %4250 = vperm.xlu1 %4605, %v4202_v52  }
0x5d00   :  { %v4243_v15 = vpop.permute.xlu2 %4242 }
0x5d01   :  { %v4247_v48 = vmul.f32 %v4245_v22, %v4243_v15 }
0x5d18   :  { %v4213_v44 = vpop.permute.xlu0 %4212 }
0x5d19   :  { %v4207_v58 = vpop.permute.xlu1 %4206  ;;  %v4217_v47 = vmul.f32 %v4215_v39, %v4213_v44 }
0x5d1a   :  { %v4209_v29 = vmul.f32 %v4207_v58, %v6645_v35  ;;  %v4261_v35 = vrot.slane %v6650_v25, 6 }
0x5d1c   :  { %v4218_v17 = vadd.f32 %v4217_v47, %v4209_v29 }
0x5d21   :  { %v4229_v51 = vpop.permute.xlu0 %4228 }
0x5d22   :  { %v4221_v27 = vpop.permute.xlu1 %4220  ;;  %v4233_v26 = vmul.f32 %v4231_v37, %v4229_v51 }
0x5d23   :  { %v4225_v49 = vmul.f32 %v4223_v36, %v4221_v27 }
0x5d25   :  { %v4226_v30 = vadd.f32 %v4225_v49, %v4218_v17 }
0x5d27   :  { %v4234_v11 = vadd.f32 %v4233_v26, %v4226_v30 }
0x5d2a   :  { %v4259_v63 = vpop.permute.xlu0 %4258 }
0x5d2b   :  { %v4237_v57 = vpop.permute.xlu1 %4236  ;;  %v4263_v7 = vmul.f32 %v4261_v35, %v4259_v63 }
0x5d2c   :  { %v4239_v46 = vmul.f32 %v4237_v57, %v6650_v25  ;;  %v4333_v25 = vld [vmem:[%s5647_s29] sm:$0xff] }
0x5d2d   :  { %4358 = vmatpush.msrb.mxu1 %v4333_v25 }
0x5d2e   :  { %v4240_v0 = vadd.f32 %v4239_v46, %v4234_v11 }
0x5d30   :  { %v4248_v38 = vadd.f32 %v4247_v48, %v4240_v0 }
0x5d34   :  { %v4251_v45 = vpop.permute.xlu1 %4250 }
0x5d35   :  { %v4255_v42 = vmul.f32 %v4253_v50, %v4251_v45 }
0x5d37   :  { %v4256_v1 = vadd.f32 %v4255_v42, %v4248_v38 }
0x5d39   :  { %v4264_v33 = vadd.f32 %v4263_v7, %v4256_v1 }
0x5d3b   :  { %4529 = vmatmul.msk.f32.vlgmr.msrb.gmra.mxu3 %vm6730_vm0, %v4264_v33 }
0x5dbe   :  { %v4297_v31 = vpop.f32.mrf.mxu3 }
0x5dbf   :  { %v4298_v23 = vadd.f32 %v4616_v32, %v4297_v31 }
0x5dc1   :  { %v4300_v12 = vmax.f32 %v4298_v23, 0.0 }
0x5dc3   :  { %4530 = vmatmul.msk.f32.vlgmr.msrb.gmra.mxu0 %vm408_vm7, %v4300_v12 }
0x5e40   :  { %v4329_v55 = vpop.f32.mrf.mxu0 }
0x5e41   :  { %v4330_v59 = vadd.f32 %v4617_v54, %v4329_v55 }
0x5e43   :  { %v4332_v60 = vmax.f32 %v4330_v59, 0.0 }
0x5e45   :  { %4531 = vmatmul.msk.f32.vlgmr.msrb.gmra.mxu1 %vm4339_vm1, %v4332_v60 }
0x5e46   :  { %5418 = shalt.err (!%p5415_p0)
}
0x5e47   :  { %4376 = dma.vmem_to_hbm [thread:$0]  %s4372_s13, 32, %s4374_s10, [#allocation9]   ;;  %v4618_v56 = vld [vmem:[#allocation6] ss:$0 sm:$0xff] }
0x5ec2   :  { %v4360_v43 = vpop.f32.mrf.mxu1 }
0x5ec3   :  { %v4361_v2 = vadd.f32 %v4618_v56, %v4360_v43 }
0x5ec5   :  { %4363 = vst.msk [vmem:[%s5652_s17] sm:$0x3] %vm4138_vm12, %v4361_v2 }
0x5ec6   :  { %5437 = dma.done.wait [#allocation9], 32  }
0x5ec7   :  { %5438 = vsyncadd [#allocation9], 4294967264 }
0x5ec8   :  { %4383 = vsyncpa [#allocation8], 1 }
0x5ec9   :  { %4384 = vsyncpa [#allocation11], 1 }
0x5eca   :  { %4385 = vsyncpa [#allocation14], 1 }
0x5ecb   :  { %4386 = vsyncpa [#allocation17], 1 }
0x5ecc   :  { %4387 = vsyncpa [#allocation20], 1 }
0x5ecd   :  { %4388 = vsyncpa [#allocation23], 1 }
0x5ece   :  { %4389 = vsyncpa [#allocation26], 1 }
0x5ecf   :  { %4390 = vsyncpa [#allocation29], 1 }
0x5ed0   :  { %4391 = vsyncpa [#allocation32], 1 }
0x5ed1   :  { %4392 = vsyncpa [#allocation9], 1 }

</bundles_post_ra>
